<compile_context>
chip_gen: v7x
topology: tpu7x:2x2x1
jax: 0.10.0
libtpu: 0.0.40
codegen_flags: <defaults>
</compile_context>

<pallas_src>
import functools

import jax
import jax.numpy as jnp
from jax import lax
from jax.experimental import pallas as pl
from jax.experimental.pallas import tpu as pltpu

# ----------------------------- model hyper-params -----------------------------
POINT_LEN = 200                      # stand-in for args.point_len
FC_LEN = POINT_LEN // 128 + 1        # = 2, the module's fc_len formula
INPUT_C = 10
CHANNEL = 16
NUM_CLASSES = 5
FC_HIDDEN = 1024
KSIZE = 5
STRIDE = 2
PAD = 2
BN_EPS = 1e-5
NEG_SLOPE = 0.1
LANE = 128

CHANS = [INPUT_C, CHANNEL, CHANNEL * 2, CHANNEL * 2, CHANNEL * 4,
         CHANNEL * 4, CHANNEL * 8, CHANNEL * 8]
N_CONV = 7


def _round_up(x, m):
    return (x + m - 1) // m * m


def _out_len(l):
    return (l + 2 * PAD - KSIZE) // STRIDE + 1


def _conv_chain_len(l):
    for _ in range(N_CONV):
        l = _out_len(l)
    return l


def _scr_rows(seq_len):
    # per sample: PAD leading guard rows + seq_len data rows + 4 trailing guard rows
    return _round_up(seq_len + PAD + 4, 8)


# guard the hard-coded fc_len formula against the actual stride-2 chain
assert _conv_chain_len(POINT_LEN) == FC_LEN, "fc_len formula mismatch with conv chain"


# ----------------------------- fused Pallas kernel -----------------------------
def _fused_net_kernel(x_ref, tgt_ref,
                      w1, w2, w3, w4, w5, w6, w7,
                      cvec_ref, fc1w_ref, fcvec_ref, fc2w_ref,
                      h_ref, loss_ref,
                      scr_ref, fcin_ref, *, n_batch, seq_len):
    conv_w_refs = (w1, w2, w3, w4, w5, w6, w7)
    l_scr = _scr_rows(seq_len)

    # ---- stage the (channels-last) input into the zero-guarded activation scratch ----
    scr_ref[...] = jnp.zeros_like(scr_ref)       # leading/trailing guards & unused lanes = 0
    for b in range(n_batch):
        base = b * l_scr
        scr_ref[pl.ds(base + PAD, seq_len), 0:INPUT_C] = x_ref[pl.ds(b * seq_len, seq_len), :]

    # -------- conv1..conv7: 5 strided tap reads + matmul + bias + LeakyReLU + BN --------
    l_in = seq_len
    for i in range(N_CONV):
        c_in, c_out = CHANS[i], CHANS[i + 1]
        c_in_p = _round_up(c_in, 8)              # sublane-aligned tap row-block in the weight
        l_out = _out_len(l_in)
        w_ref = conv_w_refs[i]
        w_taps = [w_ref[kk * c_in_p:(kk + 1) * c_in_p, :] for kk in range(KSIZE)]
        b_row = cvec_ref[3 * i + 0:3 * i + 1, 0:c_out]
        g_row = cvec_ref[3 * i + 1:3 * i + 2, 0:c_out]
        beta_row = cvec_ref[3 * i + 2:3 * i + 3, 0:c_out]

        ys = []
        tot = None
        for b in range(n_batch):
            base = b * l_scr
            acc = None
            for kk in range(KSIZE):
                # output o needs input position 2*o + kk - PAD  ->  scratch row base + kk + 2*o
                g_full = scr_ref[pl.ds(base + kk, l_out, stride=STRIDE), :]
                g = g_full[:, 0:c_in_p]
                term = jnp.dot(g.astype(jnp.bfloat16), w_taps[kk],
                               preferred_element_type=jnp.float32)
                acc = term if acc is None else acc + term
            y = acc + b_row
            y = jnp.maximum(y, NEG_SLOPE * y)                         # LeakyReLU(0.1)
            ys.append(y)
            part = jnp.sum(y, axis=0, keepdims=True)
            tot = part if tot is None else tot + part

        # train-mode BatchNorm (biased batch variance, two-pass form) folded to y*s + t
        inv_n = 1.0 / float(n_batch * l_out)
        mean = tot * inv_n
        vtot = None
        for y in ys:
            d = y - mean
            part = jnp.sum(d * d, axis=0, keepdims=True)
            vtot = part if vtot is None else vtot + part
        var = vtot * inv_n
        scale = g_row * lax.rsqrt(var + BN_EPS)
        shift = beta_row - mean * scale

        for b in range(n_batch):
            base = b * l_scr
            scr_ref[pl.ds(base + PAD, l_out), 0:c_out] = ys[b] * scale + shift
            # re-zero trailing guard rows that may still hold the previous (longer) layer's data
            scr_ref[pl.ds(base + PAD + l_out, 4), 0:c_out] = jnp.zeros((4, c_out), jnp.float32)
        l_in = l_out
        # TODO(synk): BatchNorm running_mean/var are not persisted (pure forward pass).

    # -------- fc1 (PyTorch NCL flatten folded into the packed weight layout) --------
    l_fin = l_in                                  # == FC_LEN
    c_last = CHANS[-1]
    for b in range(n_batch):
        base = b * l_scr + PAD
        for l in range(l_fin):
            fcin_ref[b:b + 1, l * c_last:(l + 1) * c_last] = scr_ref[pl.ds(base + l, 1), :]
    xfc = fcin_ref[...]                                            # (n_batch, fc_len*128)
    yfc = jnp.dot(xfc.astype(jnp.bfloat16), fc1w_ref[...],
                  preferred_element_type=jnp.float32)              # (n_batch, 1024)
    yfc = yfc + fcvec_ref[0:1, :]
    yfc = jnp.maximum(yfc, NEG_SLOPE * yfc)
    mean = jnp.mean(yfc, axis=0, keepdims=True)
    d = yfc - mean
    var = jnp.mean(d * d, axis=0, keepdims=True)
    scale = fcvec_ref[1:2, :] * lax.rsqrt(var + BN_EPS)
    shift = fcvec_ref[2:3, :] - mean * scale
    yfc = yfc * scale + shift

    # -------- fc2 + exact softmax --------
    logits = jnp.dot(yfc.astype(jnp.bfloat16), fc2w_ref[...],
                     preferred_element_type=jnp.float32)           # (n_batch, 5)
    logits = logits + fcvec_ref[3:4, 0:NUM_CLASSES]
    mx = jnp.max(logits, axis=1, keepdims=True)
    shifted = logits - mx
    ex = jnp.exp(shifted)
    denom = jnp.sum(ex, axis=1, keepdims=True)
    probs = ex / denom                       # exact reciprocal: rows sum to 1 in f32
    h_ref[...] = probs

    # -------- loss: log-softmax NLL stand-in --------
    # TODO(synk): the loss fn is injected via the module ctor in the original; NLL over the
    # softmax output is used as a deterministic stand-in (computed via log-softmax).
    log_probs = shifted - jnp.log(denom)
    tgt = tgt_ref[...]                                             # (n_batch, 1) int32
    cls_idx = lax.broadcasted_iota(jnp.int32, (n_batch, NUM_CLASSES), 1)
    picked = jnp.sum(jnp.where(cls_idx == tgt, log_probs, 0.0), axis=1, keepdims=True)
    loss_ref[...] = -jnp.sum(picked, axis=0, keepdims=True) * (1.0 / n_batch)


def _pallas_forward(packed, x_flat, tgt2d, n_batch, seq_len):
    kernel = functools.partial(_fused_net_kernel, n_batch=n_batch, seq_len=seq_len)
    n_inputs = 2 + N_CONV + 4
    vmem = pltpu.MemorySpace.VMEM
    l_scr = _scr_rows(seq_len)
    # TODO(synk): fc1_w (bf16, 512 KiB) could be streamed behind the conv stage with a manual
    # make_async_copy; at this size the DMA is <1 us so it is left synchronous.
    h, loss = pl.pallas_call(
        kernel,
        out_shape=(jax.ShapeDtypeStruct((n_batch, NUM_CLASSES), jnp.float32),
                   jax.ShapeDtypeStruct((1, 1), jnp.float32)),
        in_specs=[pl.BlockSpec(memory_space=vmem) for _ in range(n_inputs)],
        out_specs=[pl.BlockSpec(memory_space=vmem),
                   pl.BlockSpec(memory_space=vmem)],
        scratch_shapes=[pltpu.VMEM((n_batch * l_scr, LANE), jnp.float32),
                        pltpu.VMEM((n_batch, FC_LEN * CHANS[-1]), jnp.float32)],
        compiler_params=pltpu.CompilerParams(vmem_limit_bytes=16 * 1024 * 1024),
    )(x_flat, tgt2d, *packed["conv_w"], packed["conv_vecs"],
      packed["fc1_w"], packed["fc_vecs"], packed["fc2_w"])
    return h, loss


# ----------------------------- parameters -------------------------------------
def init_params(key):
    """PyTorch-layout parameters (same init distributions as nn.Conv1d / nn.Linear)."""
    params = {}
    for i in range(N_CONV):
        c_in, c_out = CHANS[i], CHANS[i + 1]
        key, kw, kb = jax.random.split(key, 3)
        bound = 1.0 / float(c_in * KSIZE) ** 0.5
        params[f"conv{i+1}_w"] = jax.random.uniform(kw, (c_out, c_in, KSIZE), jnp.float32, -bound, bound)
        params[f"conv{i+1}_b"] = jax.random.uniform(kb, (c_out,), jnp.float32, -bound, bound)
        params[f"bn{i+1}_g"] = jnp.ones((c_out,), jnp.float32)
        params[f"bn{i+1}_b"] = jnp.zeros((c_out,), jnp.float32)
    fc1_in = CHANNEL * 8 * FC_LEN
    key, kw, kb = jax.random.split(key, 3)
    bound = 1.0 / float(fc1_in) ** 0.5
    params["fc1_w"] = jax.random.uniform(kw, (FC_HIDDEN, fc1_in), jnp.float32, -bound, bound)
    params["fc1_b"] = jax.random.uniform(kb, (FC_HIDDEN,), jnp.float32, -bound, bound)
    params["bn_fc1_g"] = jnp.ones((FC_HIDDEN,), jnp.float32)
    params["bn_fc1_b"] = jnp.zeros((FC_HIDDEN,), jnp.float32)
    key, kw, kb = jax.random.split(key, 3)
    bound = 1.0 / float(FC_HIDDEN) ** 0.5
    params["fc2_w"] = jax.random.uniform(kw, (NUM_CLASSES, FC_HIDDEN), jnp.float32, -bound, bound)
    params["fc2_b"] = jax.random.uniform(kb, (NUM_CLASSES,), jnp.float32, -bound, bound)
    return params


def pack_params(p):
    """Host-side (one-time) re-layout into matmul-ready bf16 kernel operands."""
    packed = {"conv_w": []}
    vec_rows = []
    for i in range(N_CONV):
        w = p[f"conv{i+1}_w"]                                 # (c_out, c_in, K)
        c_out, c_in, k = w.shape
        c_in_p = _round_up(c_in, 8)
        w_t = jnp.transpose(w, (2, 1, 0))                     # (K, c_in, c_out)
        w_pad = jnp.zeros((k, c_in_p, c_out), jnp.float32).at[:, :c_in, :].set(w_t)
        # rows [kk*c_in_p + ci] = W[co, ci, kk]; taps packed densely (no 128-lane padding)
        packed["conv_w"].append(w_pad.reshape(k * c_in_p, c_out).astype(jnp.bfloat16))
        for name in (f"conv{i+1}_b", f"bn{i+1}_g", f"bn{i+1}_b"):
            v = p[name]
            vec_rows.append(jnp.pad(v, (0, LANE - v.shape[0])))
    packed["conv_vecs"] = jnp.stack(vec_rows, axis=0)         # (21, 128) f32

    # fc1 weight reordered so the PyTorch NCL flatten (idx = c*fc_len + l) becomes
    # fc_len contiguous 128-row blocks indexed by the final sequence position l.
    w1 = p["fc1_w"]                                           # (1024, c_last*fc_len)
    c_last = CHANS[-1]
    l_fin = w1.shape[1] // c_last
    bmat = jnp.transpose(w1).reshape(c_last, l_fin, FC_HIDDEN)
    packed["fc1_w"] = (jnp.transpose(bmat, (1, 0, 2))
                       .reshape(l_fin * c_last, FC_HIDDEN).astype(jnp.bfloat16))

    fc2_b = p["fc2_b"]
    packed["fc_vecs"] = jnp.stack(
        [p["fc1_b"], p["bn_fc1_g"], p["bn_fc1_b"],
         jnp.pad(fc2_b, (0, FC_HIDDEN - fc2_b.shape[0]))], axis=0)     # (4, 1024) f32
    packed["fc2_w"] = jnp.transpose(p["fc2_w"]).astype(jnp.bfloat16)   # (1024, 5)
    return packed


# ----------------------------- forward -----------------------------------------
@jax.jit
def forward(packed, data_ncl, target):
    n, c0, l0 = data_ncl.shape
    # channels-last, samples stacked along rows: A[b*L + m, c] = data[b, c, m]
    x_flat = jnp.transpose(data_ncl, (0, 2, 1)).reshape(n * l0, c0)
    tgt2d = target.reshape(n, 1).astype(jnp.int32)
    h, loss = _pallas_forward(packed, x_flat, tgt2d, n, l0)
    return loss[0, 0], h, target


# ----------------------------- main --------------------------------------------
if __name__ == "__main__":
    key = jax.random.PRNGKey(0)
    kp, kd, kt = jax.random.split(key, 3)
    params = init_params(kp)
    packed = pack_params(params)

    batch = 2
    data = jax.random.normal(kd, (batch, INPUT_C, POINT_LEN), jnp.float32)
    target = jax.random.randint(kt, (batch,), 0, NUM_CLASSES)

    loss, h, tgt = forward(packed, data, target)
    jax.block_until_ready((loss, h, tgt))

    assert h.shape == (batch, NUM_CLASSES)
    assert bool(jnp.all(jnp.isfinite(h))) and bool(jnp.isfinite(loss))
    assert jnp.allclose(jnp.sum(h, axis=1), 1.0, atol=1e-3)
    print("KERNEL_OK")
</pallas_src>

<mosaic_0001>
module attributes {stable_mosaic.version = 11 : i64} {
  func.func @_fused_net_kernel(%arg0: memref<400x10xf32, #tpu.memory_space<vmem>>, %arg1: memref<2x1xi32, #tpu.memory_space<vmem>>, %arg2: memref<80x16xbf16, #tpu.memory_space<vmem>>, %arg3: memref<80x32xbf16, #tpu.memory_space<vmem>>, %arg4: memref<160x32xbf16, #tpu.memory_space<vmem>>, %arg5: memref<160x64xbf16, #tpu.memory_space<vmem>>, %arg6: memref<320x64xbf16, #tpu.memory_space<vmem>>, %arg7: memref<320x128xbf16, #tpu.memory_space<vmem>>, %arg8: memref<640x128xbf16, #tpu.memory_space<vmem>>, %arg9: memref<21x128xf32, #tpu.memory_space<vmem>>, %arg10: memref<256x1024xbf16, #tpu.memory_space<vmem>>, %arg11: memref<4x1024xf32, #tpu.memory_space<vmem>>, %arg12: memref<1024x5xbf16, #tpu.memory_space<vmem>>, %arg13: memref<2x5xf32, #tpu.memory_space<vmem>>, %arg14: memref<1x1xf32, #tpu.memory_space<vmem>>, %arg15: memref<416x128xf32, #tpu.memory_space<vmem>>, %arg16: memref<2x256xf32, #tpu.memory_space<vmem>>) attributes {dimension_semantics = [], scalar_prefetch = 0 : i64, scratch_operands = 2 : i64, tpu.core_type = #tpu.core_type<tc>} {
    %cst = arith.constant 0.000000e+00 : f32
    %0 = vector.broadcast %cst : f32 to vector<416x128xf32>
    %c0 = arith.constant 0 : index
    %c0_0 = arith.constant 0 : index
    %1 = vector.load %arg15[%c0, %c0_0] : memref<416x128xf32, #tpu.memory_space<vmem>>, vector<416x128xf32>
    tpu.vector_store %arg15[%c0, %c0_0], %0 {strides = array<i32>} : memref<416x128xf32, #tpu.memory_space<vmem>>, vector<416x128xf32>,
    %c0_1 = arith.constant 0 : index
    %c0_2 = arith.constant 0 : index
    %2 = vector.load %arg0[%c0_1, %c0_2] : memref<400x10xf32, #tpu.memory_space<vmem>>, vector<200x10xf32>
    %c2 = arith.constant 2 : index
    %c0_3 = arith.constant 0 : index
    %3 = vector.load %arg15[%c2, %c0_3] : memref<416x128xf32, #tpu.memory_space<vmem>>, vector<200x10xf32>
    tpu.vector_store %arg15[%c2, %c0_3], %2 {strides = array<i32>} : memref<416x128xf32, #tpu.memory_space<vmem>>, vector<200x10xf32>,
    %c200 = arith.constant 200 : index
    %c0_4 = arith.constant 0 : index
    %4 = vector.load %arg0[%c200, %c0_4] : memref<400x10xf32, #tpu.memory_space<vmem>>, vector<200x10xf32>
    %c210 = arith.constant 210 : index
    %c0_5 = arith.constant 0 : index
    %5 = vector.load %arg15[%c210, %c0_5] : memref<416x128xf32, #tpu.memory_space<vmem>>, vector<200x10xf32>
    tpu.vector_store %arg15[%c210, %c0_5], %4 {strides = array<i32>} : memref<416x128xf32, #tpu.memory_space<vmem>>, vector<200x10xf32>,
    %c0_6 = arith.constant 0 : index
    %c0_7 = arith.constant 0 : index
    %6 = vector.load %arg2[%c0_6, %c0_7] : memref<80x16xbf16, #tpu.memory_space<vmem>>, vector<16x16xbf16>
    %c16 = arith.constant 16 : index
    %c0_8 = arith.constant 0 : index
    %7 = vector.load %arg2[%c16, %c0_8] : memref<80x16xbf16, #tpu.memory_space<vmem>>, vector<16x16xbf16>
    %c32 = arith.constant 32 : index
    %c0_9 = arith.constant 0 : index
    %8 = vector.load %arg2[%c32, %c0_9] : memref<80x16xbf16, #tpu.memory_space<vmem>>, vector<16x16xbf16>
    %c48 = arith.constant 48 : index
    %c0_10 = arith.constant 0 : index
    %9 = vector.load %arg2[%c48, %c0_10] : memref<80x16xbf16, #tpu.memory_space<vmem>>, vector<16x16xbf16>
    %c64 = arith.constant 64 : index
    %c0_11 = arith.constant 0 : index
    %10 = vector.load %arg2[%c64, %c0_11] : memref<80x16xbf16, #tpu.memory_space<vmem>>, vector<16x16xbf16>
    %c0_12 = arith.constant 0 : index
    %c0_13 = arith.constant 0 : index
    %11 = vector.load %arg9[%c0_12, %c0_13] : memref<21x128xf32, #tpu.memory_space<vmem>>, vector<1x16xf32>
    %c1 = arith.constant 1 : index
    %c0_14 = arith.constant 0 : index
    %12 = vector.load %arg9[%c1, %c0_14] : memref<21x128xf32, #tpu.memory_space<vmem>>, vector<1x16xf32>
    %c2_15 = arith.constant 2 : index
    %c0_16 = arith.constant 0 : index
    %13 = vector.load %arg9[%c2_15, %c0_16] : memref<21x128xf32, #tpu.memory_space<vmem>>, vector<1x16xf32>
    %c0_17 = arith.constant 0 : index
    %c0_18 = arith.constant 0 : index
    %14 = tpu.strided_load %arg15[%c0_17, %c0_18] {strides = array<i32: 2, 1>} : memref<416x128xf32, #tpu.memory_space<vmem>>, vector<100x128xf32>
    %15 = vector.extract_strided_slice %14 {offsets = [0, 0], sizes = [100, 16], strides = [1, 1]} : vector<100x128xf32> to vector<100x16xf32>
    %16 = arith.truncf %15 : vector<100x16xf32> to vector<100x16xbf16>
    %cst_19 = arith.constant dense<0.000000e+00> : vector<100x16xf32>
    %17 = tpu.matmul %16, %6, %cst_19 {dimension_numbers = #tpu.dot_dimension_numbers<[1], [0], [0], [1], [0, 0, 1, 1], [], []>} : vector<100x16xbf16>, vector<16x16xbf16>, vector<100x16xf32> -> vector<100x16xf32>
    %c1_20 = arith.constant 1 : index
    %c0_21 = arith.constant 0 : index
    %18 = tpu.strided_load %arg15[%c1_20, %c0_21] {strides = array<i32: 2, 1>} : memref<416x128xf32, #tpu.memory_space<vmem>>, vector<100x128xf32>
    %19 = vector.extract_strided_slice %18 {offsets = [0, 0], sizes = [100, 16], strides = [1, 1]} : vector<100x128xf32> to vector<100x16xf32>
    %20 = arith.truncf %19 : vector<100x16xf32> to vector<100x16xbf16>
    %cst_22 = arith.constant dense<0.000000e+00> : vector<100x16xf32>
    %21 = tpu.matmul %20, %7, %cst_22 {dimension_numbers = #tpu.dot_dimension_numbers<[1], [0], [0], [1], [0, 0, 1, 1], [], []>} : vector<100x16xbf16>, vector<16x16xbf16>, vector<100x16xf32> -> vector<100x16xf32>
    %22 = arith.addf %17, %21 : vector<100x16xf32>
    %c2_23 = arith.constant 2 : index
    %c0_24 = arith.constant 0 : index
    %23 = tpu.strided_load %arg15[%c2_23, %c0_24] {strides = array<i32: 2, 1>} : memref<416x128xf32, #tpu.memory_space<vmem>>, vector<100x128xf32>
    %24 = vector.extract_strided_slice %23 {offsets = [0, 0], sizes = [100, 16], strides = [1, 1]} : vector<100x128xf32> to vector<100x16xf32>
    %25 = arith.truncf %24 : vector<100x16xf32> to vector<100x16xbf16>
    %cst_25 = arith.constant dense<0.000000e+00> : vector<100x16xf32>
    %26 = tpu.matmul %25, %8, %cst_25 {dimension_numbers = #tpu.dot_dimension_numbers<[1], [0], [0], [1], [0, 0, 1, 1], [], []>} : vector<100x16xbf16>, vector<16x16xbf16>, vector<100x16xf32> -> vector<100x16xf32>
    %27 = arith.addf %22, %26 : vector<100x16xf32>
    %c3 = arith.constant 3 : index
    %c0_26 = arith.constant 0 : index
    %28 = tpu.strided_load %arg15[%c3, %c0_26] {strides = array<i32: 2, 1>} : memref<416x128xf32, #tpu.memory_space<vmem>>, vector<100x128xf32>
    %29 = vector.extract_strided_slice %28 {offsets = [0, 0], sizes = [100, 16], strides = [1, 1]} : vector<100x128xf32> to vector<100x16xf32>
    %30 = arith.truncf %29 : vector<100x16xf32> to vector<100x16xbf16>
    %cst_27 = arith.constant dense<0.000000e+00> : vector<100x16xf32>
    %31 = tpu.matmul %30, %9, %cst_27 {dimension_numbers = #tpu.dot_dimension_numbers<[1], [0], [0], [1], [0, 0, 1, 1], [], []>} : vector<100x16xbf16>, vector<16x16xbf16>, vector<100x16xf32> -> vector<100x16xf32>
    %32 = arith.addf %27, %31 : vector<100x16xf32>
    %c4 = arith.constant 4 : index
    %c0_28 = arith.constant 0 : index
    %33 = tpu.strided_load %arg15[%c4, %c0_28] {strides = array<i32: 2, 1>} : memref<416x128xf32, #tpu.memory_space<vmem>>, vector<100x128xf32>
    %34 = vector.extract_strided_slice %33 {offsets = [0, 0], sizes = [100, 16], strides = [1, 1]} : vector<100x128xf32> to vector<100x16xf32>
    %35 = arith.truncf %34 : vector<100x16xf32> to vector<100x16xbf16>
    %cst_29 = arith.constant dense<0.000000e+00> : vector<100x16xf32>
    %36 = tpu.matmul %35, %10, %cst_29 {dimension_numbers = #tpu.dot_dimension_numbers<[1], [0], [0], [1], [0, 0, 1, 1], [], []>} : vector<100x16xbf16>, vector<16x16xbf16>, vector<100x16xf32> -> vector<100x16xf32>
    %37 = arith.addf %32, %36 : vector<100x16xf32>
    %38 = vector.broadcast %11 : vector<1x16xf32> to vector<100x16xf32>
    %39 = arith.addf %37, %38 : vector<100x16xf32>
    %cst_30 = arith.constant 1.000000e-01 : f32
    %40 = vector.broadcast %cst_30 : f32 to vector<100x16xf32>
    %41 = arith.mulf %40, %39 : vector<100x16xf32>
    %42 = arith.maximumf %39, %41 : vector<100x16xf32>
    %cst_31 = arith.constant dense<0.000000e+00> : vector<16xf32>
    %43 = vector.multi_reduction <add>, %42, %cst_31 [0] : vector<100x16xf32> to vector<16xf32>
    %44 = vector.shape_cast %43 : vector<16xf32> to vector<1x16xf32>
    %c208 = arith.constant 208 : index
    %c0_32 = arith.constant 0 : index
    %45 = tpu.strided_load %arg15[%c208, %c0_32] {strides = array<i32: 2, 1>} : memref<416x128xf32, #tpu.memory_space<vmem>>, vector<100x128xf32>
    %46 = vector.extract_strided_slice %45 {offsets = [0, 0], sizes = [100, 16], strides = [1, 1]} : vector<100x128xf32> to vector<100x16xf32>
    %47 = arith.truncf %46 : vector<100x16xf32> to vector<100x16xbf16>
    %cst_33 = arith.constant dense<0.000000e+00> : vector<100x16xf32>
    %48 = tpu.matmul %47, %6, %cst_33 {dimension_numbers = #tpu.dot_dimension_numbers<[1], [0], [0], [1], [0, 0, 1, 1], [], []>} : vector<100x16xbf16>, vector<16x16xbf16>, vector<100x16xf32> -> vector<100x16xf32>
    %c209 = arith.constant 209 : index
    %c0_34 = arith.constant 0 : index
    %49 = tpu.strided_load %arg15[%c209, %c0_34] {strides = array<i32: 2, 1>} : memref<416x128xf32, #tpu.memory_space<vmem>>, vector<100x128xf32>
    %50 = vector.extract_strided_slice %49 {offsets = [0, 0], sizes = [100, 16], strides = [1, 1]} : vector<100x128xf32> to vector<100x16xf32>
    %51 = arith.truncf %50 : vector<100x16xf32> to vector<100x16xbf16>
    %cst_35 = arith.constant dense<0.000000e+00> : vector<100x16xf32>
    %52 = tpu.matmul %51, %7, %cst_35 {dimension_numbers = #tpu.dot_dimension_numbers<[1], [0], [0], [1], [0, 0, 1, 1], [], []>} : vector<100x16xbf16>, vector<16x16xbf16>, vector<100x16xf32> -> vector<100x16xf32>
    %53 = arith.addf %48, %52 : vector<100x16xf32>
    %c210_36 = arith.constant 210 : index
    %c0_37 = arith.constant 0 : index
    %54 = tpu.strided_load %arg15[%c210_36, %c0_37] {strides = array<i32: 2, 1>} : memref<416x128xf32, #tpu.memory_space<vmem>>, vector<100x128xf32>
    %55 = vector.extract_strided_slice %54 {offsets = [0, 0], sizes = [100, 16], strides = [1, 1]} : vector<100x128xf32> to vector<100x16xf32>
    %56 = arith.truncf %55 : vector<100x16xf32> to vector<100x16xbf16>
    %cst_38 = arith.constant dense<0.000000e+00> : vector<100x16xf32>
    %57 = tpu.matmul %56, %8, %cst_38 {dimension_numbers = #tpu.dot_dimension_numbers<[1], [0], [0], [1], [0, 0, 1, 1], [], []>} : vector<100x16xbf16>, vector<16x16xbf16>, vector<100x16xf32> -> vector<100x16xf32>
    %58 = arith.addf %53, %57 : vector<100x16xf32>
    %c211 = arith.constant 211 : index
    %c0_39 = arith.constant 0 : index
    %59 = tpu.strided_load %arg15[%c211, %c0_39] {strides = array<i32: 2, 1>} : memref<416x128xf32, #tpu.memory_space<vmem>>, vector<100x128xf32>
    %60 = vector.extract_strided_slice %59 {offsets = [0, 0], sizes = [100, 16], strides = [1, 1]} : vector<100x128xf32> to vector<100x16xf32>
    %61 = arith.truncf %60 : vector<100x16xf32> to vector<100x16xbf16>
    %cst_40 = arith.constant dense<0.000000e+00> : vector<100x16xf32>
    %62 = tpu.matmul %61, %9, %cst_40 {dimension_numbers = #tpu.dot_dimension_numbers<[1], [0], [0], [1], [0, 0, 1, 1], [], []>} : vector<100x16xbf16>, vector<16x16xbf16>, vector<100x16xf32> -> vector<100x16xf32>
    %63 = arith.addf %58, %62 : vector<100x16xf32>
    %c212 = arith.constant 212 : index
    %c0_41 = arith.constant 0 : index
    %64 = tpu.strided_load %arg15[%c212, %c0_41] {strides = array<i32: 2, 1>} : memref<416x128xf32, #tpu.memory_space<vmem>>, vector<100x128xf32>
    %65 = vector.extract_strided_slice %64 {offsets = [0, 0], sizes = [100, 16], strides = [1, 1]} : vector<100x128xf32> to vector<100x16xf32>
    %66 = arith.truncf %65 : vector<100x16xf32> to vector<100x16xbf16>
    %cst_42 = arith.constant dense<0.000000e+00> : vector<100x16xf32>
    %67 = tpu.matmul %66, %10, %cst_42 {dimension_numbers = #tpu.dot_dimension_numbers<[1], [0], [0], [1], [0, 0, 1, 1], [], []>} : vector<100x16xbf16>, vector<16x16xbf16>, vector<100x16xf32> -> vector<100x16xf32>
    %68 = arith.addf %63, %67 : vector<100x16xf32>
    %69 = vector.broadcast %11 : vector<1x16xf32> to vector<100x16xf32>
    %70 = arith.addf %68, %69 : vector<100x16xf32>
    %cst_43 = arith.constant 1.000000e-01 : f32
    %71 = vector.broadcast %cst_43 : f32 to vector<100x16xf32>
    %72 = arith.mulf %71, %70 : vector<100x16xf32>
    %73 = arith.maximumf %70, %72 : vector<100x16xf32>
    %cst_44 = arith.constant dense<0.000000e+00> : vector<16xf32>
    %74 = vector.multi_reduction <add>, %73, %cst_44 [0] : vector<100x16xf32> to vector<16xf32>
    %75 = vector.shape_cast %74 : vector<16xf32> to vector<1x16xf32>
    %76 = arith.addf %44, %75 : vector<1x16xf32>
    %cst_45 = arith.constant 5.000000e-03 : f32
    %77 = vector.broadcast %cst_45 : f32 to vector<1x16xf32>
    %78 = arith.mulf %76, %77 : vector<1x16xf32>
    %79 = vector.broadcast %78 : vector<1x16xf32> to vector<100x16xf32>
    %80 = arith.subf %42, %79 : vector<100x16xf32>
    %81 = arith.mulf %80, %80 : vector<100x16xf32>
    %cst_46 = arith.constant dense<0.000000e+00> : vector<16xf32>
    %82 = vector.multi_reduction <add>, %81, %cst_46 [0] : vector<100x16xf32> to vector<16xf32>
    %83 = vector.shape_cast %82 : vector<16xf32> to vector<1x16xf32>
    %84 = vector.broadcast %78 : vector<1x16xf32> to vector<100x16xf32>
    %85 = arith.subf %73, %84 : vector<100x16xf32>
    %86 = arith.mulf %85, %85 : vector<100x16xf32>
    %cst_47 = arith.constant dense<0.000000e+00> : vector<16xf32>
    %87 = vector.multi_reduction <add>, %86, %cst_47 [0] : vector<100x16xf32> to vector<16xf32>
    %88 = vector.shape_cast %87 : vector<16xf32> to vector<1x16xf32>
    %89 = arith.addf %83, %88 : vector<1x16xf32>
    %cst_48 = arith.constant 5.000000e-03 : f32
    %90 = vector.broadcast %cst_48 : f32 to vector<1x16xf32>
    %91 = arith.mulf %89, %90 : vector<1x16xf32>
    %cst_49 = arith.constant 9.99999974E-6 : f32
    %92 = vector.broadcast %cst_49 : f32 to vector<1x16xf32>
    %93 = arith.addf %91, %92 : vector<1x16xf32>
    %94 = math.rsqrt %93 : vector<1x16xf32>
    %95 = arith.mulf %12, %94 : vector<1x16xf32>
    %96 = arith.mulf %78, %95 : vector<1x16xf32>
    %97 = arith.subf %13, %96 : vector<1x16xf32>
    %98 = vector.broadcast %95 : vector<1x16xf32> to vector<100x16xf32>
    %99 = arith.mulf %42, %98 : vector<100x16xf32>
    %100 = vector.broadcast %97 : vector<1x16xf32> to vector<100x16xf32>
    %101 = arith.addf %99, %100 : vector<100x16xf32>
    %c2_50 = arith.constant 2 : index
    %c0_51 = arith.constant 0 : index
    %102 = vector.load %arg15[%c2_50, %c0_51] : memref<416x128xf32, #tpu.memory_space<vmem>>, vector<100x16xf32>
    tpu.vector_store %arg15[%c2_50, %c0_51], %101 {strides = array<i32>} : memref<416x128xf32, #tpu.memory_space<vmem>>, vector<100x16xf32>,
    %cst_52 = arith.constant 0.000000e+00 : f32
    %103 = vector.broadcast %cst_52 : f32 to vector<4x16xf32>
    %c102 = arith.constant 102 : index
    %c0_53 = arith.constant 0 : index
    %104 = vector.load %arg15[%c102, %c0_53] : memref<416x128xf32, #tpu.memory_space<vmem>>, vector<4x16xf32>
    tpu.vector_store %arg15[%c102, %c0_53], %103 {strides = array<i32>} : memref<416x128xf32, #tpu.memory_space<vmem>>, vector<4x16xf32>,
    %105 = vector.broadcast %95 : vector<1x16xf32> to vector<100x16xf32>
    %106 = arith.mulf %73, %105 : vector<100x16xf32>
    %107 = vector.broadcast %97 : vector<1x16xf32> to vector<100x16xf32>
    %108 = arith.addf %106, %107 : vector<100x16xf32>
    %c210_54 = arith.constant 210 : index
    %c0_55 = arith.constant 0 : index
    %109 = vector.load %arg15[%c210_54, %c0_55] : memref<416x128xf32, #tpu.memory_space<vmem>>, vector<100x16xf32>
    tpu.vector_store %arg15[%c210_54, %c0_55], %108 {strides = array<i32>} : memref<416x128xf32, #tpu.memory_space<vmem>>, vector<100x16xf32>,
    %cst_56 = arith.constant 0.000000e+00 : f32
    %110 = vector.broadcast %cst_56 : f32 to vector<4x16xf32>
    %c310 = arith.constant 310 : index
    %c0_57 = arith.constant 0 : index
    %111 = vector.load %arg15[%c310, %c0_57] : memref<416x128xf32, #tpu.memory_space<vmem>>, vector<4x16xf32>
    tpu.vector_store %arg15[%c310, %c0_57], %110 {strides = array<i32>} : memref<416x128xf32, #tpu.memory_space<vmem>>, vector<4x16xf32>,
    %c0_58 = arith.constant 0 : index
    %c0_59 = arith.constant 0 : index
    %112 = vector.load %arg3[%c0_58, %c0_59] : memref<80x32xbf16, #tpu.memory_space<vmem>>, vector<16x32xbf16>
    %c16_60 = arith.constant 16 : index
    %c0_61 = arith.constant 0 : index
    %113 = vector.load %arg3[%c16_60, %c0_61] : memref<80x32xbf16, #tpu.memory_space<vmem>>, vector<16x32xbf16>
    %c32_62 = arith.constant 32 : index
    %c0_63 = arith.constant 0 : index
    %114 = vector.load %arg3[%c32_62, %c0_63] : memref<80x32xbf16, #tpu.memory_space<vmem>>, vector<16x32xbf16>
    %c48_64 = arith.constant 48 : index
    %c0_65 = arith.constant 0 : index
    %115 = vector.load %arg3[%c48_64, %c0_65] : memref<80x32xbf16, #tpu.memory_space<vmem>>, vector<16x32xbf16>
    %c64_66 = arith.constant 64 : index
    %c0_67 = arith.constant 0 : index
    %116 = vector.load %arg3[%c64_66, %c0_67] : memref<80x32xbf16, #tpu.memory_space<vmem>>, vector<16x32xbf16>
    %c3_68 = arith.constant 3 : index
    %c0_69 = arith.constant 0 : index
    %117 = vector.load %arg9[%c3_68, %c0_69] : memref<21x128xf32, #tpu.memory_space<vmem>>, vector<1x32xf32>
    %c4_70 = arith.constant 4 : index
    %c0_71 = arith.constant 0 : index
    %118 = vector.load %arg9[%c4_70, %c0_71] : memref<21x128xf32, #tpu.memory_space<vmem>>, vector<1x32xf32>
    %c5 = arith.constant 5 : index
    %c0_72 = arith.constant 0 : index
    %119 = vector.load %arg9[%c5, %c0_72] : memref<21x128xf32, #tpu.memory_space<vmem>>, vector<1x32xf32>
    %c0_73 = arith.constant 0 : index
    %c0_74 = arith.constant 0 : index
    %120 = tpu.strided_load %arg15[%c0_73, %c0_74] {strides = array<i32: 2, 1>} : memref<416x128xf32, #tpu.memory_space<vmem>>, vector<50x128xf32>
    %121 = vector.extract_strided_slice %120 {offsets = [0, 0], sizes = [50, 16], strides = [1, 1]} : vector<50x128xf32> to vector<50x16xf32>
    %122 = arith.truncf %121 : vector<50x16xf32> to vector<50x16xbf16>
    %cst_75 = arith.constant dense<0.000000e+00> : vector<50x32xf32>
    %123 = tpu.matmul %122, %112, %cst_75 {dimension_numbers = #tpu.dot_dimension_numbers<[1], [0], [0], [1], [0, 0, 1, 1], [], []>} : vector<50x16xbf16>, vector<16x32xbf16>, vector<50x32xf32> -> vector<50x32xf32>
    %c1_76 = arith.constant 1 : index
    %c0_77 = arith.constant 0 : index
    %124 = tpu.strided_load %arg15[%c1_76, %c0_77] {strides = array<i32: 2, 1>} : memref<416x128xf32, #tpu.memory_space<vmem>>, vector<50x128xf32>
    %125 = vector.extract_strided_slice %124 {offsets = [0, 0], sizes = [50, 16], strides = [1, 1]} : vector<50x128xf32> to vector<50x16xf32>
    %126 = arith.truncf %125 : vector<50x16xf32> to vector<50x16xbf16>
    %cst_78 = arith.constant dense<0.000000e+00> : vector<50x32xf32>
    %127 = tpu.matmul %126, %113, %cst_78 {dimension_numbers = #tpu.dot_dimension_numbers<[1], [0], [0], [1], [0, 0, 1, 1], [], []>} : vector<50x16xbf16>, vector<16x32xbf16>, vector<50x32xf32> -> vector<50x32xf32>
    %128 = arith.addf %123, %127 : vector<50x32xf32>
    %c2_79 = arith.constant 2 : index
    %c0_80 = arith.constant 0 : index
    %129 = tpu.strided_load %arg15[%c2_79, %c0_80] {strides = array<i32: 2, 1>} : memref<416x128xf32, #tpu.memory_space<vmem>>, vector<50x128xf32>
    %130 = vector.extract_strided_slice %129 {offsets = [0, 0], sizes = [50, 16], strides = [1, 1]} : vector<50x128xf32> to vector<50x16xf32>
    %131 = arith.truncf %130 : vector<50x16xf32> to vector<50x16xbf16>
    %cst_81 = arith.constant dense<0.000000e+00> : vector<50x32xf32>
    %132 = tpu.matmul %131, %114, %cst_81 {dimension_numbers = #tpu.dot_dimension_numbers<[1], [0], [0], [1], [0, 0, 1, 1], [], []>} : vector<50x16xbf16>, vector<16x32xbf16>, vector<50x32xf32> -> vector<50x32xf32>
    %133 = arith.addf %128, %132 : vector<50x32xf32>
    %c3_82 = arith.constant 3 : index
    %c0_83 = arith.constant 0 : index
    %134 = tpu.strided_load %arg15[%c3_82, %c0_83] {strides = array<i32: 2, 1>} : memref<416x128xf32, #tpu.memory_space<vmem>>, vector<50x128xf32>
    %135 = vector.extract_strided_slice %134 {offsets = [0, 0], sizes = [50, 16], strides = [1, 1]} : vector<50x128xf32> to vector<50x16xf32>
    %136 = arith.truncf %135 : vector<50x16xf32> to vector<50x16xbf16>
    %cst_84 = arith.constant dense<0.000000e+00> : vector<50x32xf32>
    %137 = tpu.matmul %136, %115, %cst_84 {dimension_numbers = #tpu.dot_dimension_numbers<[1], [0], [0], [1], [0, 0, 1, 1], [], []>} : vector<50x16xbf16>, vector<16x32xbf16>, vector<50x32xf32> -> vector<50x32xf32>
    %138 = arith.addf %133, %137 : vector<50x32xf32>
    %c4_85 = arith.constant 4 : index
    %c0_86 = arith.constant 0 : index
    %139 = tpu.strided_load %arg15[%c4_85, %c0_86] {strides = array<i32: 2, 1>} : memref<416x128xf32, #tpu.memory_space<vmem>>, vector<50x128xf32>
    %140 = vector.extract_strided_slice %139 {offsets = [0, 0], sizes = [50, 16], strides = [1, 1]} : vector<50x128xf32> to vector<50x16xf32>
    %141 = arith.truncf %140 : vector<50x16xf32> to vector<50x16xbf16>
    %cst_87 = arith.constant dense<0.000000e+00> : vector<50x32xf32>
    %142 = tpu.matmul %141, %116, %cst_87 {dimension_numbers = #tpu.dot_dimension_numbers<[1], [0], [0], [1], [0, 0, 1, 1], [], []>} : vector<50x16xbf16>, vector<16x32xbf16>, vector<50x32xf32> -> vector<50x32xf32>
    %143 = arith.addf %138, %142 : vector<50x32xf32>
    %144 = vector.broadcast %117 : vector<1x32xf32> to vector<50x32xf32>
    %145 = arith.addf %143, %144 : vector<50x32xf32>
    %cst_88 = arith.constant 1.000000e-01 : f32
    %146 = vector.broadcast %cst_88 : f32 to vector<50x32xf32>
    %147 = arith.mulf %146, %145 : vector<50x32xf32>
    %148 = arith.maximumf %145, %147 : vector<50x32xf32>
    %cst_89 = arith.constant dense<0.000000e+00> : vector<32xf32>
    %149 = vector.multi_reduction <add>, %148, %cst_89 [0] : vector<50x32xf32> to vector<32xf32>
    %150 = vector.shape_cast %149 : vector<32xf32> to vector<1x32xf32>
    %c208_90 = arith.constant 208 : index
    %c0_91 = arith.constant 0 : index
    %151 = tpu.strided_load %arg15[%c208_90, %c0_91] {strides = array<i32: 2, 1>} : memref<416x128xf32, #tpu.memory_space<vmem>>, vector<50x128xf32>
    %152 = vector.extract_strided_slice %151 {offsets = [0, 0], sizes = [50, 16], strides = [1, 1]} : vector<50x128xf32> to vector<50x16xf32>
    %153 = arith.truncf %152 : vector<50x16xf32> to vector<50x16xbf16>
    %cst_92 = arith.constant dense<0.000000e+00> : vector<50x32xf32>
    %154 = tpu.matmul %153, %112, %cst_92 {dimension_numbers = #tpu.dot_dimension_numbers<[1], [0], [0], [1], [0, 0, 1, 1], [], []>} : vector<50x16xbf16>, vector<16x32xbf16>, vector<50x32xf32> -> vector<50x32xf32>
    %c209_93 = arith.constant 209 : index
    %c0_94 = arith.constant 0 : index
    %155 = tpu.strided_load %arg15[%c209_93, %c0_94] {strides = array<i32: 2, 1>} : memref<416x128xf32, #tpu.memory_space<vmem>>, vector<50x128xf32>
    %156 = vector.extract_strided_slice %155 {offsets = [0, 0], sizes = [50, 16], strides = [1, 1]} : vector<50x128xf32> to vector<50x16xf32>
    %157 = arith.truncf %156 : vector<50x16xf32> to vector<50x16xbf16>
    %cst_95 = arith.constant dense<0.000000e+00> : vector<50x32xf32>
    %158 = tpu.matmul %157, %113, %cst_95 {dimension_numbers = #tpu.dot_dimension_numbers<[1], [0], [0], [1], [0, 0, 1, 1], [], []>} : vector<50x16xbf16>, vector<16x32xbf16>, vector<50x32xf32> -> vector<50x32xf32>
    %159 = arith.addf %154, %158 : vector<50x32xf32>
    %c210_96 = arith.constant 210 : index
    %c0_97 = arith.constant 0 : index
    %160 = tpu.strided_load %arg15[%c210_96, %c0_97] {strides = array<i32: 2, 1>} : memref<416x128xf32, #tpu.memory_space<vmem>>, vector<50x128xf32>
    %161 = vector.extract_strided_slice %160 {offsets = [0, 0], sizes = [50, 16], strides = [1, 1]} : vector<50x128xf32> to vector<50x16xf32>
    %162 = arith.truncf %161 : vector<50x16xf32> to vector<50x16xbf16>
    %cst_98 = arith.constant dense<0.000000e+00> : vector<50x32xf32>
    %163 = tpu.matmul %162, %114, %cst_98 {dimension_numbers = #tpu.dot_dimension_numbers<[1], [0], [0], [1], [0, 0, 1, 1], [], []>} : vector<50x16xbf16>, vector<16x32xbf16>, vector<50x32xf32> -> vector<50x32xf32>
    %164 = arith.addf %159, %163 : vector<50x32xf32>
    %c211_99 = arith.constant 211 : index
    %c0_100 = arith.constant 0 : index
    %165 = tpu.strided_load %arg15[%c211_99, %c0_100] {strides = array<i32: 2, 1>} : memref<416x128xf32, #tpu.memory_space<vmem>>, vector<50x128xf32>
    %166 = vector.extract_strided_slice %165 {offsets = [0, 0], sizes = [50, 16], strides = [1, 1]} : vector<50x128xf32> to vector<50x16xf32>
    %167 = arith.truncf %166 : vector<50x16xf32> to vector<50x16xbf16>
    %cst_101 = arith.constant dense<0.000000e+00> : vector<50x32xf32>
    %168 = tpu.matmul %167, %115, %cst_101 {dimension_numbers = #tpu.dot_dimension_numbers<[1], [0], [0], [1], [0, 0, 1, 1], [], []>} : vector<50x16xbf16>, vector<16x32xbf16>, vector<50x32xf32> -> vector<50x32xf32>
    %169 = arith.addf %164, %168 : vector<50x32xf32>
    %c212_102 = arith.constant 212 : index
    %c0_103 = arith.constant 0 : index
    %170 = tpu.strided_load %arg15[%c212_102, %c0_103] {strides = array<i32: 2, 1>} : memref<416x128xf32, #tpu.memory_space<vmem>>, vector<50x128xf32>
    %171 = vector.extract_strided_slice %170 {offsets = [0, 0], sizes = [50, 16], strides = [1, 1]} : vector<50x128xf32> to vector<50x16xf32>
    %172 = arith.truncf %171 : vector<50x16xf32> to vector<50x16xbf16>
    %cst_104 = arith.constant dense<0.000000e+00> : vector<50x32xf32>
    %173 = tpu.matmul %172, %116, %cst_104 {dimension_numbers = #tpu.dot_dimension_numbers<[1], [0], [0], [1], [0, 0, 1, 1], [], []>} : vector<50x16xbf16>, vector<16x32xbf16>, vector<50x32xf32> -> vector<50x32xf32>
    %174 = arith.addf %169, %173 : vector<50x32xf32>
    %175 = vector.broadcast %117 : vector<1x32xf32> to vector<50x32xf32>
    %176 = arith.addf %174, %175 : vector<50x32xf32>
    %cst_105 = arith.constant 1.000000e-01 : f32
    %177 = vector.broadcast %cst_105 : f32 to vector<50x32xf32>
    %178 = arith.mulf %177, %176 : vector<50x32xf32>
    %179 = arith.maximumf %176, %178 : vector<50x32xf32>
    %cst_106 = arith.constant dense<0.000000e+00> : vector<32xf32>
    %180 = vector.multi_reduction <add>, %179, %cst_106 [0] : vector<50x32xf32> to vector<32xf32>
    %181 = vector.shape_cast %180 : vector<32xf32> to vector<1x32xf32>
    %182 = arith.addf %150, %181 : vector<1x32xf32>
    %cst_107 = arith.constant 0.00999999977 : f32
    %183 = vector.broadcast %cst_107 : f32 to vector<1x32xf32>
    %184 = arith.mulf %182, %183 : vector<1x32xf32>
    %185 = vector.broadcast %184 : vector<1x32xf32> to vector<50x32xf32>
    %186 = arith.subf %148, %185 : vector<50x32xf32>
    %187 = arith.mulf %186, %186 : vector<50x32xf32>
    %cst_108 = arith.constant dense<0.000000e+00> : vector<32xf32>
    %188 = vector.multi_reduction <add>, %187, %cst_108 [0] : vector<50x32xf32> to vector<32xf32>
    %189 = vector.shape_cast %188 : vector<32xf32> to vector<1x32xf32>
    %190 = vector.broadcast %184 : vector<1x32xf32> to vector<50x32xf32>
    %191 = arith.subf %179, %190 : vector<50x32xf32>
    %192 = arith.mulf %191, %191 : vector<50x32xf32>
    %cst_109 = arith.constant dense<0.000000e+00> : vector<32xf32>
    %193 = vector.multi_reduction <add>, %192, %cst_109 [0] : vector<50x32xf32> to vector<32xf32>
    %194 = vector.shape_cast %193 : vector<32xf32> to vector<1x32xf32>
    %195 = arith.addf %189, %194 : vector<1x32xf32>
    %cst_110 = arith.constant 0.00999999977 : f32
    %196 = vector.broadcast %cst_110 : f32 to vector<1x32xf32>
    %197 = arith.mulf %195, %196 : vector<1x32xf32>
    %cst_111 = arith.constant 9.99999974E-6 : f32
    %198 = vector.broadcast %cst_111 : f32 to vector<1x32xf32>
    %199 = arith.addf %197, %198 : vector<1x32xf32>
    %200 = math.rsqrt %199 : vector<1x32xf32>
    %201 = arith.mulf %118, %200 : vector<1x32xf32>
    %202 = arith.mulf %184, %201 : vector<1x32xf32>
    %203 = arith.subf %119, %202 : vector<1x32xf32>
    %204 = vector.broadcast %201 : vector<1x32xf32> to vector<50x32xf32>
    %205 = arith.mulf %148, %204 : vector<50x32xf32>
    %206 = vector.broadcast %203 : vector<1x32xf32> to vector<50x32xf32>
    %207 = arith.addf %205, %206 : vector<50x32xf32>
    %c2_112 = arith.constant 2 : index
    %c0_113 = arith.constant 0 : index
    %208 = vector.load %arg15[%c2_112, %c0_113] : memref<416x128xf32, #tpu.memory_space<vmem>>, vector<50x32xf32>
    tpu.vector_store %arg15[%c2_112, %c0_113], %207 {strides = array<i32>} : memref<416x128xf32, #tpu.memory_space<vmem>>, vector<50x32xf32>,
    %cst_114 = arith.constant 0.000000e+00 : f32
    %209 = vector.broadcast %cst_114 : f32 to vector<4x32xf32>
    %c52 = arith.constant 52 : index
    %c0_115 = arith.constant 0 : index
    %210 = vector.load %arg15[%c52, %c0_115] : memref<416x128xf32, #tpu.memory_space<vmem>>, vector<4x32xf32>
    tpu.vector_store %arg15[%c52, %c0_115], %209 {strides = array<i32>} : memref<416x128xf32, #tpu.memory_space<vmem>>, vector<4x32xf32>,
    %211 = vector.broadcast %201 : vector<1x32xf32> to vector<50x32xf32>
    %212 = arith.mulf %179, %211 : vector<50x32xf32>
    %213 = vector.broadcast %203 : vector<1x32xf32> to vector<50x32xf32>
    %214 = arith.addf %212, %213 : vector<50x32xf32>
    %c210_116 = arith.constant 210 : index
    %c0_117 = arith.constant 0 : index
    %215 = vector.load %arg15[%c210_116, %c0_117] : memref<416x128xf32, #tpu.memory_space<vmem>>, vector<50x32xf32>
    tpu.vector_store %arg15[%c210_116, %c0_117], %214 {strides = array<i32>} : memref<416x128xf32, #tpu.memory_space<vmem>>, vector<50x32xf32>,
    %cst_118 = arith.constant 0.000000e+00 : f32
    %216 = vector.broadcast %cst_118 : f32 to vector<4x32xf32>
    %c260 = arith.constant 260 : index
    %c0_119 = arith.constant 0 : index
    %217 = vector.load %arg15[%c260, %c0_119] : memref<416x128xf32, #tpu.memory_space<vmem>>, vector<4x32xf32>
    tpu.vector_store %arg15[%c260, %c0_119], %216 {strides = array<i32>} : memref<416x128xf32, #tpu.memory_space<vmem>>, vector<4x32xf32>,
    %c0_120 = arith.constant 0 : index
    %c0_121 = arith.constant 0 : index
    %218 = vector.load %arg4[%c0_120, %c0_121] : memref<160x32xbf16, #tpu.memory_space<vmem>>, vector<32x32xbf16>
    %c32_122 = arith.constant 32 : index
    %c0_123 = arith.constant 0 : index
    %219 = vector.load %arg4[%c32_122, %c0_123] : memref<160x32xbf16, #tpu.memory_space<vmem>>, vector<32x32xbf16>
    %c64_124 = arith.constant 64 : index
    %c0_125 = arith.constant 0 : index
    %220 = vector.load %arg4[%c64_124, %c0_125] : memref<160x32xbf16, #tpu.memory_space<vmem>>, vector<32x32xbf16>
    %c96 = arith.constant 96 : index
    %c0_126 = arith.constant 0 : index
    %221 = vector.load %arg4[%c96, %c0_126] : memref<160x32xbf16, #tpu.memory_space<vmem>>, vector<32x32xbf16>
    %c128 = arith.constant 128 : index
    %c0_127 = arith.constant 0 : index
    %222 = vector.load %arg4[%c128, %c0_127] : memref<160x32xbf16, #tpu.memory_space<vmem>>, vector<32x32xbf16>
    %c6 = arith.constant 6 : index
    %c0_128 = arith.constant 0 : index
    %223 = vector.load %arg9[%c6, %c0_128] : memref<21x128xf32, #tpu.memory_space<vmem>>, vector<1x32xf32>
    %c7 = arith.constant 7 : index
    %c0_129 = arith.constant 0 : index
    %224 = vector.load %arg9[%c7, %c0_129] : memref<21x128xf32, #tpu.memory_space<vmem>>, vector<1x32xf32>
    %c8 = arith.constant 8 : index
    %c0_130 = arith.constant 0 : index
    %225 = vector.load %arg9[%c8, %c0_130] : memref<21x128xf32, #tpu.memory_space<vmem>>, vector<1x32xf32>
    %c0_131 = arith.constant 0 : index
    %c0_132 = arith.constant 0 : index
    %226 = tpu.strided_load %arg15[%c0_131, %c0_132] {strides = array<i32: 2, 1>} : memref<416x128xf32, #tpu.memory_space<vmem>>, vector<25x128xf32>
    %227 = vector.extract_strided_slice %226 {offsets = [0, 0], sizes = [25, 32], strides = [1, 1]} : vector<25x128xf32> to vector<25x32xf32>
    %228 = arith.truncf %227 : vector<25x32xf32> to vector<25x32xbf16>
    %cst_133 = arith.constant dense<0.000000e+00> : vector<25x32xf32>
    %229 = tpu.matmul %228, %218, %cst_133 {dimension_numbers = #tpu.dot_dimension_numbers<[1], [0], [0], [1], [0, 0, 1, 1], [], []>} : vector<25x32xbf16>, vector<32x32xbf16>, vector<25x32xf32> -> vector<25x32xf32>
    %c1_134 = arith.constant 1 : index
    %c0_135 = arith.constant 0 : index
    %230 = tpu.strided_load %arg15[%c1_134, %c0_135] {strides = array<i32: 2, 1>} : memref<416x128xf32, #tpu.memory_space<vmem>>, vector<25x128xf32>
    %231 = vector.extract_strided_slice %230 {offsets = [0, 0], sizes = [25, 32], strides = [1, 1]} : vector<25x128xf32> to vector<25x32xf32>
    %232 = arith.truncf %231 : vector<25x32xf32> to vector<25x32xbf16>
    %cst_136 = arith.constant dense<0.000000e+00> : vector<25x32xf32>
    %233 = tpu.matmul %232, %219, %cst_136 {dimension_numbers = #tpu.dot_dimension_numbers<[1], [0], [0], [1], [0, 0, 1, 1], [], []>} : vector<25x32xbf16>, vector<32x32xbf16>, vector<25x32xf32> -> vector<25x32xf32>
    %234 = arith.addf %229, %233 : vector<25x32xf32>
    %c2_137 = arith.constant 2 : index
    %c0_138 = arith.constant 0 : index
    %235 = tpu.strided_load %arg15[%c2_137, %c0_138] {strides = array<i32: 2, 1>} : memref<416x128xf32, #tpu.memory_space<vmem>>, vector<25x128xf32>
    %236 = vector.extract_strided_slice %235 {offsets = [0, 0], sizes = [25, 32], strides = [1, 1]} : vector<25x128xf32> to vector<25x32xf32>
    %237 = arith.truncf %236 : vector<25x32xf32> to vector<25x32xbf16>
    %cst_139 = arith.constant dense<0.000000e+00> : vector<25x32xf32>
    %238 = tpu.matmul %237, %220, %cst_139 {dimension_numbers = #tpu.dot_dimension_numbers<[1], [0], [0], [1], [0, 0, 1, 1], [], []>} : vector<25x32xbf16>, vector<32x32xbf16>, vector<25x32xf32> -> vector<25x32xf32>
    %239 = arith.addf %234, %238 : vector<25x32xf32>
    %c3_140 = arith.constant 3 : index
    %c0_141 = arith.constant 0 : index
    %240 = tpu.strided_load %arg15[%c3_140, %c0_141] {strides = array<i32: 2, 1>} : memref<416x128xf32, #tpu.memory_space<vmem>>, vector<25x128xf32>
    %241 = vector.extract_strided_slice %240 {offsets = [0, 0], sizes = [25, 32], strides = [1, 1]} : vector<25x128xf32> to vector<25x32xf32>
    %242 = arith.truncf %241 : vector<25x32xf32> to vector<25x32xbf16>
    %cst_142 = arith.constant dense<0.000000e+00> : vector<25x32xf32>
    %243 = tpu.matmul %242, %221, %cst_142 {dimension_numbers = #tpu.dot_dimension_numbers<[1], [0], [0], [1], [0, 0, 1, 1], [], []>} : vector<25x32xbf16>, vector<32x32xbf16>, vector<25x32xf32> -> vector<25x32xf32>
    %244 = arith.addf %239, %243 : vector<25x32xf32>
    %c4_143 = arith.constant 4 : index
    %c0_144 = arith.constant 0 : index
    %245 = tpu.strided_load %arg15[%c4_143, %c0_144] {strides = array<i32: 2, 1>} : memref<416x128xf32, #tpu.memory_space<vmem>>, vector<25x128xf32>
    %246 = vector.extract_strided_slice %245 {offsets = [0, 0], sizes = [25, 32], strides = [1, 1]} : vector<25x128xf32> to vector<25x32xf32>
    %247 = arith.truncf %246 : vector<25x32xf32> to vector<25x32xbf16>
    %cst_145 = arith.constant dense<0.000000e+00> : vector<25x32xf32>
    %248 = tpu.matmul %247, %222, %cst_145 {dimension_numbers = #tpu.dot_dimension_numbers<[1], [0], [0], [1], [0, 0, 1, 1], [], []>} : vector<25x32xbf16>, vector<32x32xbf16>, vector<25x32xf32> -> vector<25x32xf32>
    %249 = arith.addf %244, %248 : vector<25x32xf32>
    %250 = vector.broadcast %223 : vector<1x32xf32> to vector<25x32xf32>
    %251 = arith.addf %249, %250 : vector<25x32xf32>
    %cst_146 = arith.constant 1.000000e-01 : f32
    %252 = vector.broadcast %cst_146 : f32 to vector<25x32xf32>
    %253 = arith.mulf %252, %251 : vector<25x32xf32>
    %254 = arith.maximumf %251, %253 : vector<25x32xf32>
    %cst_147 = arith.constant dense<0.000000e+00> : vector<32xf32>
    %255 = vector.multi_reduction <add>, %254, %cst_147 [0] : vector<25x32xf32> to vector<32xf32>
    %256 = vector.shape_cast %255 : vector<32xf32> to vector<1x32xf32>
    %c208_148 = arith.constant 208 : index
    %c0_149 = arith.constant 0 : index
    %257 = tpu.strided_load %arg15[%c208_148, %c0_149] {strides = array<i32: 2, 1>} : memref<416x128xf32, #tpu.memory_space<vmem>>, vector<25x128xf32>
    %258 = vector.extract_strided_slice %257 {offsets = [0, 0], sizes = [25, 32], strides = [1, 1]} : vector<25x128xf32> to vector<25x32xf32>
    %259 = arith.truncf %258 : vector<25x32xf32> to vector<25x32xbf16>
    %cst_150 = arith.constant dense<0.000000e+00> : vector<25x32xf32>
    %260 = tpu.matmul %259, %218, %cst_150 {dimension_numbers = #tpu.dot_dimension_numbers<[1], [0], [0], [1], [0, 0, 1, 1], [], []>} : vector<25x32xbf16>, vector<32x32xbf16>, vector<25x32xf32> -> vector<25x32xf32>
    %c209_151 = arith.constant 209 : index
    %c0_152 = arith.constant 0 : index
    %261 = tpu.strided_load %arg15[%c209_151, %c0_152] {strides = array<i32: 2, 1>} : memref<416x128xf32, #tpu.memory_space<vmem>>, vector<25x128xf32>
    %262 = vector.extract_strided_slice %261 {offsets = [0, 0], sizes = [25, 32], strides = [1, 1]} : vector<25x128xf32> to vector<25x32xf32>
    %263 = arith.truncf %262 : vector<25x32xf32> to vector<25x32xbf16>
    %cst_153 = arith.constant dense<0.000000e+00> : vector<25x32xf32>
    %264 = tpu.matmul %263, %219, %cst_153 {dimension_numbers = #tpu.dot_dimension_numbers<[1], [0], [0], [1], [0, 0, 1, 1], [], []>} : vector<25x32xbf16>, vector<32x32xbf16>, vector<25x32xf32> -> vector<25x32xf32>
    %265 = arith.addf %260, %264 : vector<25x32xf32>
    %c210_154 = arith.constant 210 : index
    %c0_155 = arith.constant 0 : index
    %266 = tpu.strided_load %arg15[%c210_154, %c0_155] {strides = array<i32: 2, 1>} : memref<416x128xf32, #tpu.memory_space<vmem>>, vector<25x128xf32>
    %267 = vector.extract_strided_slice %266 {offsets = [0, 0], sizes = [25, 32], strides = [1, 1]} : vector<25x128xf32> to vector<25x32xf32>
    %268 = arith.truncf %267 : vector<25x32xf32> to vector<25x32xbf16>
    %cst_156 = arith.constant dense<0.000000e+00> : vector<25x32xf32>
    %269 = tpu.matmul %268, %220, %cst_156 {dimension_numbers = #tpu.dot_dimension_numbers<[1], [0], [0], [1], [0, 0, 1, 1], [], []>} : vector<25x32xbf16>, vector<32x32xbf16>, vector<25x32xf32> -> vector<25x32xf32>
    %270 = arith.addf %265, %269 : vector<25x32xf32>
    %c211_157 = arith.constant 211 : index
    %c0_158 = arith.constant 0 : index
    %271 = tpu.strided_load %arg15[%c211_157, %c0_158] {strides = array<i32: 2, 1>} : memref<416x128xf32, #tpu.memory_space<vmem>>, vector<25x128xf32>
    %272 = vector.extract_strided_slice %271 {offsets = [0, 0], sizes = [25, 32], strides = [1, 1]} : vector<25x128xf32> to vector<25x32xf32>
    %273 = arith.truncf %272 : vector<25x32xf32> to vector<25x32xbf16>
    %cst_159 = arith.constant dense<0.000000e+00> : vector<25x32xf32>
    %274 = tpu.matmul %273, %221, %cst_159 {dimension_numbers = #tpu.dot_dimension_numbers<[1], [0], [0], [1], [0, 0, 1, 1], [], []>} : vector<25x32xbf16>, vector<32x32xbf16>, vector<25x32xf32> -> vector<25x32xf32>
    %275 = arith.addf %270, %274 : vector<25x32xf32>
    %c212_160 = arith.constant 212 : index
    %c0_161 = arith.constant 0 : index
    %276 = tpu.strided_load %arg15[%c212_160, %c0_161] {strides = array<i32: 2, 1>} : memref<416x128xf32, #tpu.memory_space<vmem>>, vector<25x128xf32>
    %277 = vector.extract_strided_slice %276 {offsets = [0, 0], sizes = [25, 32], strides = [1, 1]} : vector<25x128xf32> to vector<25x32xf32>
    %278 = arith.truncf %277 : vector<25x32xf32> to vector<25x32xbf16>
    %cst_162 = arith.constant dense<0.000000e+00> : vector<25x32xf32>
    %279 = tpu.matmul %278, %222, %cst_162 {dimension_numbers = #tpu.dot_dimension_numbers<[1], [0], [0], [1], [0, 0, 1, 1], [], []>} : vector<25x32xbf16>, vector<32x32xbf16>, vector<25x32xf32> -> vector<25x32xf32>
    %280 = arith.addf %275, %279 : vector<25x32xf32>
    %281 = vector.broadcast %223 : vector<1x32xf32> to vector<25x32xf32>
    %282 = arith.addf %280, %281 : vector<25x32xf32>
    %cst_163 = arith.constant 1.000000e-01 : f32
    %283 = vector.broadcast %cst_163 : f32 to vector<25x32xf32>
    %284 = arith.mulf %283, %282 : vector<25x32xf32>
    %285 = arith.maximumf %282, %284 : vector<25x32xf32>
    %cst_164 = arith.constant dense<0.000000e+00> : vector<32xf32>
    %286 = vector.multi_reduction <add>, %285, %cst_164 [0] : vector<25x32xf32> to vector<32xf32>
    %287 = vector.shape_cast %286 : vector<32xf32> to vector<1x32xf32>
    %288 = arith.addf %256, %287 : vector<1x32xf32>
    %cst_165 = arith.constant 2.000000e-02 : f32
    %289 = vector.broadcast %cst_165 : f32 to vector<1x32xf32>
    %290 = arith.mulf %288, %289 : vector<1x32xf32>
    %291 = vector.broadcast %290 : vector<1x32xf32> to vector<25x32xf32>
    %292 = arith.subf %254, %291 : vector<25x32xf32>
    %293 = arith.mulf %292, %292 : vector<25x32xf32>
    %cst_166 = arith.constant dense<0.000000e+00> : vector<32xf32>
    %294 = vector.multi_reduction <add>, %293, %cst_166 [0] : vector<25x32xf32> to vector<32xf32>
    %295 = vector.shape_cast %294 : vector<32xf32> to vector<1x32xf32>
    %296 = vector.broadcast %290 : vector<1x32xf32> to vector<25x32xf32>
    %297 = arith.subf %285, %296 : vector<25x32xf32>
    %298 = arith.mulf %297, %297 : vector<25x32xf32>
    %cst_167 = arith.constant dense<0.000000e+00> : vector<32xf32>
    %299 = vector.multi_reduction <add>, %298, %cst_167 [0] : vector<25x32xf32> to vector<32xf32>
    %300 = vector.shape_cast %299 : vector<32xf32> to vector<1x32xf32>
    %301 = arith.addf %295, %300 : vector<1x32xf32>
    %cst_168 = arith.constant 2.000000e-02 : f32
    %302 = vector.broadcast %cst_168 : f32 to vector<1x32xf32>
    %303 = arith.mulf %301, %302 : vector<1x32xf32>
    %cst_169 = arith.constant 9.99999974E-6 : f32
    %304 = vector.broadcast %cst_169 : f32 to vector<1x32xf32>
    %305 = arith.addf %303, %304 : vector<1x32xf32>
    %306 = math.rsqrt %305 : vector<1x32xf32>
    %307 = arith.mulf %224, %306 : vector<1x32xf32>
    %308 = arith.mulf %290, %307 : vector<1x32xf32>
    %309 = arith.subf %225, %308 : vector<1x32xf32>
    %310 = vector.broadcast %307 : vector<1x32xf32> to vector<25x32xf32>
    %311 = arith.mulf %254, %310 : vector<25x32xf32>
    %312 = vector.broadcast %309 : vector<1x32xf32> to vector<25x32xf32>
    %313 = arith.addf %311, %312 : vector<25x32xf32>
    %c2_170 = arith.constant 2 : index
    %c0_171 = arith.constant 0 : index
    %314 = vector.load %arg15[%c2_170, %c0_171] : memref<416x128xf32, #tpu.memory_space<vmem>>, vector<25x32xf32>
    tpu.vector_store %arg15[%c2_170, %c0_171], %313 {strides = array<i32>} : memref<416x128xf32, #tpu.memory_space<vmem>>, vector<25x32xf32>,
    %cst_172 = arith.constant 0.000000e+00 : f32
    %315 = vector.broadcast %cst_172 : f32 to vector<4x32xf32>
    %c27 = arith.constant 27 : index
    %c0_173 = arith.constant 0 : index
    %316 = vector.load %arg15[%c27, %c0_173] : memref<416x128xf32, #tpu.memory_space<vmem>>, vector<4x32xf32>
    tpu.vector_store %arg15[%c27, %c0_173], %315 {strides = array<i32>} : memref<416x128xf32, #tpu.memory_space<vmem>>, vector<4x32xf32>,
    %317 = vector.broadcast %307 : vector<1x32xf32> to vector<25x32xf32>
    %318 = arith.mulf %285, %317 : vector<25x32xf32>
    %319 = vector.broadcast %309 : vector<1x32xf32> to vector<25x32xf32>
    %320 = arith.addf %318, %319 : vector<25x32xf32>
    %c210_174 = arith.constant 210 : index
    %c0_175 = arith.constant 0 : index
    %321 = vector.load %arg15[%c210_174, %c0_175] : memref<416x128xf32, #tpu.memory_space<vmem>>, vector<25x32xf32>
    tpu.vector_store %arg15[%c210_174, %c0_175], %320 {strides = array<i32>} : memref<416x128xf32, #tpu.memory_space<vmem>>, vector<25x32xf32>,
    %cst_176 = arith.constant 0.000000e+00 : f32
    %322 = vector.broadcast %cst_176 : f32 to vector<4x32xf32>
    %c235 = arith.constant 235 : index
    %c0_177 = arith.constant 0 : index
    %323 = vector.load %arg15[%c235, %c0_177] : memref<416x128xf32, #tpu.memory_space<vmem>>, vector<4x32xf32>
    tpu.vector_store %arg15[%c235, %c0_177], %322 {strides = array<i32>} : memref<416x128xf32, #tpu.memory_space<vmem>>, vector<4x32xf32>,
    %c0_178 = arith.constant 0 : index
    %c0_179 = arith.constant 0 : index
    %324 = vector.load %arg5[%c0_178, %c0_179] : memref<160x64xbf16, #tpu.memory_space<vmem>>, vector<32x64xbf16>
    %c32_180 = arith.constant 32 : index
    %c0_181 = arith.constant 0 : index
    %325 = vector.load %arg5[%c32_180, %c0_181] : memref<160x64xbf16, #tpu.memory_space<vmem>>, vector<32x64xbf16>
    %c64_182 = arith.constant 64 : index
    %c0_183 = arith.constant 0 : index
    %326 = vector.load %arg5[%c64_182, %c0_183] : memref<160x64xbf16, #tpu.memory_space<vmem>>, vector<32x64xbf16>
    %c96_184 = arith.constant 96 : index
    %c0_185 = arith.constant 0 : index
    %327 = vector.load %arg5[%c96_184, %c0_185] : memref<160x64xbf16, #tpu.memory_space<vmem>>, vector<32x64xbf16>
    %c128_186 = arith.constant 128 : index
    %c0_187 = arith.constant 0 : index
    %328 = vector.load %arg5[%c128_186, %c0_187] : memref<160x64xbf16, #tpu.memory_space<vmem>>, vector<32x64xbf16>
    %c9 = arith.constant 9 : index
    %c0_188 = arith.constant 0 : index
    %329 = vector.load %arg9[%c9, %c0_188] : memref<21x128xf32, #tpu.memory_space<vmem>>, vector<1x64xf32>
    %c10 = arith.constant 10 : index
    %c0_189 = arith.constant 0 : index
    %330 = vector.load %arg9[%c10, %c0_189] : memref<21x128xf32, #tpu.memory_space<vmem>>, vector<1x64xf32>
    %c11 = arith.constant 11 : index
    %c0_190 = arith.constant 0 : index
    %331 = vector.load %arg9[%c11, %c0_190] : memref<21x128xf32, #tpu.memory_space<vmem>>, vector<1x64xf32>
    %c0_191 = arith.constant 0 : index
    %c0_192 = arith.constant 0 : index
    %332 = tpu.strided_load %arg15[%c0_191, %c0_192] {strides = array<i32: 2, 1>} : memref<416x128xf32, #tpu.memory_space<vmem>>, vector<13x128xf32>
    %333 = vector.extract_strided_slice %332 {offsets = [0, 0], sizes = [13, 32], strides = [1, 1]} : vector<13x128xf32> to vector<13x32xf32>
    %334 = arith.truncf %333 : vector<13x32xf32> to vector<13x32xbf16>
    %cst_193 = arith.constant dense<0.000000e+00> : vector<13x64xf32>
    %335 = tpu.matmul %334, %324, %cst_193 {dimension_numbers = #tpu.dot_dimension_numbers<[1], [0], [0], [1], [0, 0, 1, 1], [], []>} : vector<13x32xbf16>, vector<32x64xbf16>, vector<13x64xf32> -> vector<13x64xf32>
    %c1_194 = arith.constant 1 : index
    %c0_195 = arith.constant 0 : index
    %336 = tpu.strided_load %arg15[%c1_194, %c0_195] {strides = array<i32: 2, 1>} : memref<416x128xf32, #tpu.memory_space<vmem>>, vector<13x128xf32>
    %337 = vector.extract_strided_slice %336 {offsets = [0, 0], sizes = [13, 32], strides = [1, 1]} : vector<13x128xf32> to vector<13x32xf32>
    %338 = arith.truncf %337 : vector<13x32xf32> to vector<13x32xbf16>
    %cst_196 = arith.constant dense<0.000000e+00> : vector<13x64xf32>
    %339 = tpu.matmul %338, %325, %cst_196 {dimension_numbers = #tpu.dot_dimension_numbers<[1], [0], [0], [1], [0, 0, 1, 1], [], []>} : vector<13x32xbf16>, vector<32x64xbf16>, vector<13x64xf32> -> vector<13x64xf32>
    %340 = arith.addf %335, %339 : vector<13x64xf32>
    %c2_197 = arith.constant 2 : index
    %c0_198 = arith.constant 0 : index
    %341 = tpu.strided_load %arg15[%c2_197, %c0_198] {strides = array<i32: 2, 1>} : memref<416x128xf32, #tpu.memory_space<vmem>>, vector<13x128xf32>
    %342 = vector.extract_strided_slice %341 {offsets = [0, 0], sizes = [13, 32], strides = [1, 1]} : vector<13x128xf32> to vector<13x32xf32>
    %343 = arith.truncf %342 : vector<13x32xf32> to vector<13x32xbf16>
    %cst_199 = arith.constant dense<0.000000e+00> : vector<13x64xf32>
    %344 = tpu.matmul %343, %326, %cst_199 {dimension_numbers = #tpu.dot_dimension_numbers<[1], [0], [0], [1], [0, 0, 1, 1], [], []>} : vector<13x32xbf16>, vector<32x64xbf16>, vector<13x64xf32> -> vector<13x64xf32>
    %345 = arith.addf %340, %344 : vector<13x64xf32>
    %c3_200 = arith.constant 3 : index
    %c0_201 = arith.constant 0 : index
    %346 = tpu.strided_load %arg15[%c3_200, %c0_201] {strides = array<i32: 2, 1>} : memref<416x128xf32, #tpu.memory_space<vmem>>, vector<13x128xf32>
    %347 = vector.extract_strided_slice %346 {offsets = [0, 0], sizes = [13, 32], strides = [1, 1]} : vector<13x128xf32> to vector<13x32xf32>
    %348 = arith.truncf %347 : vector<13x32xf32> to vector<13x32xbf16>
    %cst_202 = arith.constant dense<0.000000e+00> : vector<13x64xf32>
    %349 = tpu.matmul %348, %327, %cst_202 {dimension_numbers = #tpu.dot_dimension_numbers<[1], [0], [0], [1], [0, 0, 1, 1], [], []>} : vector<13x32xbf16>, vector<32x64xbf16>, vector<13x64xf32> -> vector<13x64xf32>
    %350 = arith.addf %345, %349 : vector<13x64xf32>
    %c4_203 = arith.constant 4 : index
    %c0_204 = arith.constant 0 : index
    %351 = tpu.strided_load %arg15[%c4_203, %c0_204] {strides = array<i32: 2, 1>} : memref<416x128xf32, #tpu.memory_space<vmem>>, vector<13x128xf32>
    %352 = vector.extract_strided_slice %351 {offsets = [0, 0], sizes = [13, 32], strides = [1, 1]} : vector<13x128xf32> to vector<13x32xf32>
    %353 = arith.truncf %352 : vector<13x32xf32> to vector<13x32xbf16>
    %cst_205 = arith.constant dense<0.000000e+00> : vector<13x64xf32>
    %354 = tpu.matmul %353, %328, %cst_205 {dimension_numbers = #tpu.dot_dimension_numbers<[1], [0], [0], [1], [0, 0, 1, 1], [], []>} : vector<13x32xbf16>, vector<32x64xbf16>, vector<13x64xf32> -> vector<13x64xf32>
    %355 = arith.addf %350, %354 : vector<13x64xf32>
    %356 = vector.broadcast %329 : vector<1x64xf32> to vector<13x64xf32>
    %357 = arith.addf %355, %356 : vector<13x64xf32>
    %cst_206 = arith.constant 1.000000e-01 : f32
    %358 = vector.broadcast %cst_206 : f32 to vector<13x64xf32>
    %359 = arith.mulf %358, %357 : vector<13x64xf32>
    %360 = arith.maximumf %357, %359 : vector<13x64xf32>
    %cst_207 = arith.constant dense<0.000000e+00> : vector<64xf32>
    %361 = vector.multi_reduction <add>, %360, %cst_207 [0] : vector<13x64xf32> to vector<64xf32>
    %362 = vector.shape_cast %361 : vector<64xf32> to vector<1x64xf32>
    %c208_208 = arith.constant 208 : index
    %c0_209 = arith.constant 0 : index
    %363 = tpu.strided_load %arg15[%c208_208, %c0_209] {strides = array<i32: 2, 1>} : memref<416x128xf32, #tpu.memory_space<vmem>>, vector<13x128xf32>
    %364 = vector.extract_strided_slice %363 {offsets = [0, 0], sizes = [13, 32], strides = [1, 1]} : vector<13x128xf32> to vector<13x32xf32>
    %365 = arith.truncf %364 : vector<13x32xf32> to vector<13x32xbf16>
    %cst_210 = arith.constant dense<0.000000e+00> : vector<13x64xf32>
    %366 = tpu.matmul %365, %324, %cst_210 {dimension_numbers = #tpu.dot_dimension_numbers<[1], [0], [0], [1], [0, 0, 1, 1], [], []>} : vector<13x32xbf16>, vector<32x64xbf16>, vector<13x64xf32> -> vector<13x64xf32>
    %c209_211 = arith.constant 209 : index
    %c0_212 = arith.constant 0 : index
    %367 = tpu.strided_load %arg15[%c209_211, %c0_212] {strides = array<i32: 2, 1>} : memref<416x128xf32, #tpu.memory_space<vmem>>, vector<13x128xf32>
    %368 = vector.extract_strided_slice %367 {offsets = [0, 0], sizes = [13, 32], strides = [1, 1]} : vector<13x128xf32> to vector<13x32xf32>
    %369 = arith.truncf %368 : vector<13x32xf32> to vector<13x32xbf16>
    %cst_213 = arith.constant dense<0.000000e+00> : vector<13x64xf32>
    %370 = tpu.matmul %369, %325, %cst_213 {dimension_numbers = #tpu.dot_dimension_numbers<[1], [0], [0], [1], [0, 0, 1, 1], [], []>} : vector<13x32xbf16>, vector<32x64xbf16>, vector<13x64xf32> -> vector<13x64xf32>
    %371 = arith.addf %366, %370 : vector<13x64xf32>
    %c210_214 = arith.constant 210 : index
    %c0_215 = arith.constant 0 : index
    %372 = tpu.strided_load %arg15[%c210_214, %c0_215] {strides = array<i32: 2, 1>} : memref<416x128xf32, #tpu.memory_space<vmem>>, vector<13x128xf32>
    %373 = vector.extract_strided_slice %372 {offsets = [0, 0], sizes = [13, 32], strides = [1, 1]} : vector<13x128xf32> to vector<13x32xf32>
    %374 = arith.truncf %373 : vector<13x32xf32> to vector<13x32xbf16>
    %cst_216 = arith.constant dense<0.000000e+00> : vector<13x64xf32>
    %375 = tpu.matmul %374, %326, %cst_216 {dimension_numbers = #tpu.dot_dimension_numbers<[1], [0], [0], [1], [0, 0, 1, 1], [], []>} : vector<13x32xbf16>, vector<32x64xbf16>, vector<13x64xf32> -> vector<13x64xf32>
    %376 = arith.addf %371, %375 : vector<13x64xf32>
    %c211_217 = arith.constant 211 : index
    %c0_218 = arith.constant 0 : index
    %377 = tpu.strided_load %arg15[%c211_217, %c0_218] {strides = array<i32: 2, 1>} : memref<416x128xf32, #tpu.memory_space<vmem>>, vector<13x128xf32>
    %378 = vector.extract_strided_slice %377 {offsets = [0, 0], sizes = [13, 32], strides = [1, 1]} : vector<13x128xf32> to vector<13x32xf32>
    %379 = arith.truncf %378 : vector<13x32xf32> to vector<13x32xbf16>
    %cst_219 = arith.constant dense<0.000000e+00> : vector<13x64xf32>
    %380 = tpu.matmul %379, %327, %cst_219 {dimension_numbers = #tpu.dot_dimension_numbers<[1], [0], [0], [1], [0, 0, 1, 1], [], []>} : vector<13x32xbf16>, vector<32x64xbf16>, vector<13x64xf32> -> vector<13x64xf32>
    %381 = arith.addf %376, %380 : vector<13x64xf32>
    %c212_220 = arith.constant 212 : index
    %c0_221 = arith.constant 0 : index
    %382 = tpu.strided_load %arg15[%c212_220, %c0_221] {strides = array<i32: 2, 1>} : memref<416x128xf32, #tpu.memory_space<vmem>>, vector<13x128xf32>
    %383 = vector.extract_strided_slice %382 {offsets = [0, 0], sizes = [13, 32], strides = [1, 1]} : vector<13x128xf32> to vector<13x32xf32>
    %384 = arith.truncf %383 : vector<13x32xf32> to vector<13x32xbf16>
    %cst_222 = arith.constant dense<0.000000e+00> : vector<13x64xf32>
    %385 = tpu.matmul %384, %328, %cst_222 {dimension_numbers = #tpu.dot_dimension_numbers<[1], [0], [0], [1], [0, 0, 1, 1], [], []>} : vector<13x32xbf16>, vector<32x64xbf16>, vector<13x64xf32> -> vector<13x64xf32>
    %386 = arith.addf %381, %385 : vector<13x64xf32>
    %387 = vector.broadcast %329 : vector<1x64xf32> to vector<13x64xf32>
    %388 = arith.addf %386, %387 : vector<13x64xf32>
    %cst_223 = arith.constant 1.000000e-01 : f32
    %389 = vector.broadcast %cst_223 : f32 to vector<13x64xf32>
    %390 = arith.mulf %389, %388 : vector<13x64xf32>
    %391 = arith.maximumf %388, %390 : vector<13x64xf32>
    %cst_224 = arith.constant dense<0.000000e+00> : vector<64xf32>
    %392 = vector.multi_reduction <add>, %391, %cst_224 [0] : vector<13x64xf32> to vector<64xf32>
    %393 = vector.shape_cast %392 : vector<64xf32> to vector<1x64xf32>
    %394 = arith.addf %362, %393 : vector<1x64xf32>
    %cst_225 = arith.constant 0.0384615399 : f32
    %395 = vector.broadcast %cst_225 : f32 to vector<1x64xf32>
    %396 = arith.mulf %394, %395 : vector<1x64xf32>
    %397 = vector.broadcast %396 : vector<1x64xf32> to vector<13x64xf32>
    %398 = arith.subf %360, %397 : vector<13x64xf32>
    %399 = arith.mulf %398, %398 : vector<13x64xf32>
    %cst_226 = arith.constant dense<0.000000e+00> : vector<64xf32>
    %400 = vector.multi_reduction <add>, %399, %cst_226 [0] : vector<13x64xf32> to vector<64xf32>
    %401 = vector.shape_cast %400 : vector<64xf32> to vector<1x64xf32>
    %402 = vector.broadcast %396 : vector<1x64xf32> to vector<13x64xf32>
    %403 = arith.subf %391, %402 : vector<13x64xf32>
    %404 = arith.mulf %403, %403 : vector<13x64xf32>
    %cst_227 = arith.constant dense<0.000000e+00> : vector<64xf32>
    %405 = vector.multi_reduction <add>, %404, %cst_227 [0] : vector<13x64xf32> to vector<64xf32>
    %406 = vector.shape_cast %405 : vector<64xf32> to vector<1x64xf32>
    %407 = arith.addf %401, %406 : vector<1x64xf32>
    %cst_228 = arith.constant 0.0384615399 : f32
    %408 = vector.broadcast %cst_228 : f32 to vector<1x64xf32>
    %409 = arith.mulf %407, %408 : vector<1x64xf32>
    %cst_229 = arith.constant 9.99999974E-6 : f32
    %410 = vector.broadcast %cst_229 : f32 to vector<1x64xf32>
    %411 = arith.addf %409, %410 : vector<1x64xf32>
    %412 = math.rsqrt %411 : vector<1x64xf32>
    %413 = arith.mulf %330, %412 : vector<1x64xf32>
    %414 = arith.mulf %396, %413 : vector<1x64xf32>
    %415 = arith.subf %331, %414 : vector<1x64xf32>
    %416 = vector.broadcast %413 : vector<1x64xf32> to vector<13x64xf32>
    %417 = arith.mulf %360, %416 : vector<13x64xf32>
    %418 = vector.broadcast %415 : vector<1x64xf32> to vector<13x64xf32>
    %419 = arith.addf %417, %418 : vector<13x64xf32>
    %c2_230 = arith.constant 2 : index
    %c0_231 = arith.constant 0 : index
    %420 = vector.load %arg15[%c2_230, %c0_231] : memref<416x128xf32, #tpu.memory_space<vmem>>, vector<13x64xf32>
    tpu.vector_store %arg15[%c2_230, %c0_231], %419 {strides = array<i32>} : memref<416x128xf32, #tpu.memory_space<vmem>>, vector<13x64xf32>,
    %cst_232 = arith.constant 0.000000e+00 : f32
    %421 = vector.broadcast %cst_232 : f32 to vector<4x64xf32>
    %c15 = arith.constant 15 : index
    %c0_233 = arith.constant 0 : index
    %422 = vector.load %arg15[%c15, %c0_233] : memref<416x128xf32, #tpu.memory_space<vmem>>, vector<4x64xf32>
    tpu.vector_store %arg15[%c15, %c0_233], %421 {strides = array<i32>} : memref<416x128xf32, #tpu.memory_space<vmem>>, vector<4x64xf32>,
    %423 = vector.broadcast %413 : vector<1x64xf32> to vector<13x64xf32>
    %424 = arith.mulf %391, %423 : vector<13x64xf32>
    %425 = vector.broadcast %415 : vector<1x64xf32> to vector<13x64xf32>
    %426 = arith.addf %424, %425 : vector<13x64xf32>
    %c210_234 = arith.constant 210 : index
    %c0_235 = arith.constant 0 : index
    %427 = vector.load %arg15[%c210_234, %c0_235] : memref<416x128xf32, #tpu.memory_space<vmem>>, vector<13x64xf32>
    tpu.vector_store %arg15[%c210_234, %c0_235], %426 {strides = array<i32>} : memref<416x128xf32, #tpu.memory_space<vmem>>, vector<13x64xf32>,
    %cst_236 = arith.constant 0.000000e+00 : f32
    %428 = vector.broadcast %cst_236 : f32 to vector<4x64xf32>
    %c223 = arith.constant 223 : index
    %c0_237 = arith.constant 0 : index
    %429 = vector.load %arg15[%c223, %c0_237] : memref<416x128xf32, #tpu.memory_space<vmem>>, vector<4x64xf32>
    tpu.vector_store %arg15[%c223, %c0_237], %428 {strides = array<i32>} : memref<416x128xf32, #tpu.memory_space<vmem>>, vector<4x64xf32>,
    %c0_238 = arith.constant 0 : index
    %c0_239 = arith.constant 0 : index
    %430 = vector.load %arg6[%c0_238, %c0_239] : memref<320x64xbf16, #tpu.memory_space<vmem>>, vector<64x64xbf16>
    %c64_240 = arith.constant 64 : index
    %c0_241 = arith.constant 0 : index
    %431 = vector.load %arg6[%c64_240, %c0_241] : memref<320x64xbf16, #tpu.memory_space<vmem>>, vector<64x64xbf16>
    %c128_242 = arith.constant 128 : index
    %c0_243 = arith.constant 0 : index
    %432 = vector.load %arg6[%c128_242, %c0_243] : memref<320x64xbf16, #tpu.memory_space<vmem>>, vector<64x64xbf16>
    %c192 = arith.constant 192 : index
    %c0_244 = arith.constant 0 : index
    %433 = vector.load %arg6[%c192, %c0_244] : memref<320x64xbf16, #tpu.memory_space<vmem>>, vector<64x64xbf16>
    %c256 = arith.constant 256 : index
    %c0_245 = arith.constant 0 : index
    %434 = vector.load %arg6[%c256, %c0_245] : memref<320x64xbf16, #tpu.memory_space<vmem>>, vector<64x64xbf16>
    %c12 = arith.constant 12 : index
    %c0_246 = arith.constant 0 : index
    %435 = vector.load %arg9[%c12, %c0_246] : memref<21x128xf32, #tpu.memory_space<vmem>>, vector<1x64xf32>
    %c13 = arith.constant 13 : index
    %c0_247 = arith.constant 0 : index
    %436 = vector.load %arg9[%c13, %c0_247] : memref<21x128xf32, #tpu.memory_space<vmem>>, vector<1x64xf32>
    %c14 = arith.constant 14 : index
    %c0_248 = arith.constant 0 : index
    %437 = vector.load %arg9[%c14, %c0_248] : memref<21x128xf32, #tpu.memory_space<vmem>>, vector<1x64xf32>
    %c0_249 = arith.constant 0 : index
    %c0_250 = arith.constant 0 : index
    %438 = tpu.strided_load %arg15[%c0_249, %c0_250] {strides = array<i32: 2, 1>} : memref<416x128xf32, #tpu.memory_space<vmem>>, vector<7x128xf32>
    %439 = vector.extract_strided_slice %438 {offsets = [0, 0], sizes = [7, 64], strides = [1, 1]} : vector<7x128xf32> to vector<7x64xf32>
    %440 = arith.truncf %439 : vector<7x64xf32> to vector<7x64xbf16>
    %cst_251 = arith.constant dense<0.000000e+00> : vector<7x64xf32>
    %441 = tpu.matmul %440, %430, %cst_251 {dimension_numbers = #tpu.dot_dimension_numbers<[1], [0], [0], [1], [0, 0, 1, 1], [], []>} : vector<7x64xbf16>, vector<64x64xbf16>, vector<7x64xf32> -> vector<7x64xf32>
    %c1_252 = arith.constant 1 : index
    %c0_253 = arith.constant 0 : index
    %442 = tpu.strided_load %arg15[%c1_252, %c0_253] {strides = array<i32: 2, 1>} : memref<416x128xf32, #tpu.memory_space<vmem>>, vector<7x128xf32>
    %443 = vector.extract_strided_slice %442 {offsets = [0, 0], sizes = [7, 64], strides = [1, 1]} : vector<7x128xf32> to vector<7x64xf32>
    %444 = arith.truncf %443 : vector<7x64xf32> to vector<7x64xbf16>
    %cst_254 = arith.constant dense<0.000000e+00> : vector<7x64xf32>
    %445 = tpu.matmul %444, %431, %cst_254 {dimension_numbers = #tpu.dot_dimension_numbers<[1], [0], [0], [1], [0, 0, 1, 1], [], []>} : vector<7x64xbf16>, vector<64x64xbf16>, vector<7x64xf32> -> vector<7x64xf32>
    %446 = arith.addf %441, %445 : vector<7x64xf32>
    %c2_255 = arith.constant 2 : index
    %c0_256 = arith.constant 0 : index
    %447 = tpu.strided_load %arg15[%c2_255, %c0_256] {strides = array<i32: 2, 1>} : memref<416x128xf32, #tpu.memory_space<vmem>>, vector<7x128xf32>
    %448 = vector.extract_strided_slice %447 {offsets = [0, 0], sizes = [7, 64], strides = [1, 1]} : vector<7x128xf32> to vector<7x64xf32>
    %449 = arith.truncf %448 : vector<7x64xf32> to vector<7x64xbf16>
    %cst_257 = arith.constant dense<0.000000e+00> : vector<7x64xf32>
    %450 = tpu.matmul %449, %432, %cst_257 {dimension_numbers = #tpu.dot_dimension_numbers<[1], [0], [0], [1], [0, 0, 1, 1], [], []>} : vector<7x64xbf16>, vector<64x64xbf16>, vector<7x64xf32> -> vector<7x64xf32>
    %451 = arith.addf %446, %450 : vector<7x64xf32>
    %c3_258 = arith.constant 3 : index
    %c0_259 = arith.constant 0 : index
    %452 = tpu.strided_load %arg15[%c3_258, %c0_259] {strides = array<i32: 2, 1>} : memref<416x128xf32, #tpu.memory_space<vmem>>, vector<7x128xf32>
    %453 = vector.extract_strided_slice %452 {offsets = [0, 0], sizes = [7, 64], strides = [1, 1]} : vector<7x128xf32> to vector<7x64xf32>
    %454 = arith.truncf %453 : vector<7x64xf32> to vector<7x64xbf16>
    %cst_260 = arith.constant dense<0.000000e+00> : vector<7x64xf32>
    %455 = tpu.matmul %454, %433, %cst_260 {dimension_numbers = #tpu.dot_dimension_numbers<[1], [0], [0], [1], [0, 0, 1, 1], [], []>} : vector<7x64xbf16>, vector<64x64xbf16>, vector<7x64xf32> -> vector<7x64xf32>
    %456 = arith.addf %451, %455 : vector<7x64xf32>
    %c4_261 = arith.constant 4 : index
    %c0_262 = arith.constant 0 : index
    %457 = tpu.strided_load %arg15[%c4_261, %c0_262] {strides = array<i32: 2, 1>} : memref<416x128xf32, #tpu.memory_space<vmem>>, vector<7x128xf32>
    %458 = vector.extract_strided_slice %457 {offsets = [0, 0], sizes = [7, 64], strides = [1, 1]} : vector<7x128xf32> to vector<7x64xf32>
    %459 = arith.truncf %458 : vector<7x64xf32> to vector<7x64xbf16>
    %cst_263 = arith.constant dense<0.000000e+00> : vector<7x64xf32>
    %460 = tpu.matmul %459, %434, %cst_263 {dimension_numbers = #tpu.dot_dimension_numbers<[1], [0], [0], [1], [0, 0, 1, 1], [], []>} : vector<7x64xbf16>, vector<64x64xbf16>, vector<7x64xf32> -> vector<7x64xf32>
    %461 = arith.addf %456, %460 : vector<7x64xf32>
    %462 = vector.broadcast %435 : vector<1x64xf32> to vector<7x64xf32>
    %463 = arith.addf %461, %462 : vector<7x64xf32>
    %cst_264 = arith.constant 1.000000e-01 : f32
    %464 = vector.broadcast %cst_264 : f32 to vector<7x64xf32>
    %465 = arith.mulf %464, %463 : vector<7x64xf32>
    %466 = arith.maximumf %463, %465 : vector<7x64xf32>
    %cst_265 = arith.constant dense<0.000000e+00> : vector<64xf32>
    %467 = vector.multi_reduction <add>, %466, %cst_265 [0] : vector<7x64xf32> to vector<64xf32>
    %468 = vector.shape_cast %467 : vector<64xf32> to vector<1x64xf32>
    %c208_266 = arith.constant 208 : index
    %c0_267 = arith.constant 0 : index
    %469 = tpu.strided_load %arg15[%c208_266, %c0_267] {strides = array<i32: 2, 1>} : memref<416x128xf32, #tpu.memory_space<vmem>>, vector<7x128xf32>
    %470 = vector.extract_strided_slice %469 {offsets = [0, 0], sizes = [7, 64], strides = [1, 1]} : vector<7x128xf32> to vector<7x64xf32>
    %471 = arith.truncf %470 : vector<7x64xf32> to vector<7x64xbf16>
    %cst_268 = arith.constant dense<0.000000e+00> : vector<7x64xf32>
    %472 = tpu.matmul %471, %430, %cst_268 {dimension_numbers = #tpu.dot_dimension_numbers<[1], [0], [0], [1], [0, 0, 1, 1], [], []>} : vector<7x64xbf16>, vector<64x64xbf16>, vector<7x64xf32> -> vector<7x64xf32>
    %c209_269 = arith.constant 209 : index
    %c0_270 = arith.constant 0 : index
    %473 = tpu.strided_load %arg15[%c209_269, %c0_270] {strides = array<i32: 2, 1>} : memref<416x128xf32, #tpu.memory_space<vmem>>, vector<7x128xf32>
    %474 = vector.extract_strided_slice %473 {offsets = [0, 0], sizes = [7, 64], strides = [1, 1]} : vector<7x128xf32> to vector<7x64xf32>
    %475 = arith.truncf %474 : vector<7x64xf32> to vector<7x64xbf16>
    %cst_271 = arith.constant dense<0.000000e+00> : vector<7x64xf32>
    %476 = tpu.matmul %475, %431, %cst_271 {dimension_numbers = #tpu.dot_dimension_numbers<[1], [0], [0], [1], [0, 0, 1, 1], [], []>} : vector<7x64xbf16>, vector<64x64xbf16>, vector<7x64xf32> -> vector<7x64xf32>
    %477 = arith.addf %472, %476 : vector<7x64xf32>
    %c210_272 = arith.constant 210 : index
    %c0_273 = arith.constant 0 : index
    %478 = tpu.strided_load %arg15[%c210_272, %c0_273] {strides = array<i32: 2, 1>} : memref<416x128xf32, #tpu.memory_space<vmem>>, vector<7x128xf32>
    %479 = vector.extract_strided_slice %478 {offsets = [0, 0], sizes = [7, 64], strides = [1, 1]} : vector<7x128xf32> to vector<7x64xf32>
    %480 = arith.truncf %479 : vector<7x64xf32> to vector<7x64xbf16>
    %cst_274 = arith.constant dense<0.000000e+00> : vector<7x64xf32>
    %481 = tpu.matmul %480, %432, %cst_274 {dimension_numbers = #tpu.dot_dimension_numbers<[1], [0], [0], [1], [0, 0, 1, 1], [], []>} : vector<7x64xbf16>, vector<64x64xbf16>, vector<7x64xf32> -> vector<7x64xf32>
    %482 = arith.addf %477, %481 : vector<7x64xf32>
    %c211_275 = arith.constant 211 : index
    %c0_276 = arith.constant 0 : index
    %483 = tpu.strided_load %arg15[%c211_275, %c0_276] {strides = array<i32: 2, 1>} : memref<416x128xf32, #tpu.memory_space<vmem>>, vector<7x128xf32>
    %484 = vector.extract_strided_slice %483 {offsets = [0, 0], sizes = [7, 64], strides = [1, 1]} : vector<7x128xf32> to vector<7x64xf32>
    %485 = arith.truncf %484 : vector<7x64xf32> to vector<7x64xbf16>
    %cst_277 = arith.constant dense<0.000000e+00> : vector<7x64xf32>
    %486 = tpu.matmul %485, %433, %cst_277 {dimension_numbers = #tpu.dot_dimension_numbers<[1], [0], [0], [1], [0, 0, 1, 1], [], []>} : vector<7x64xbf16>, vector<64x64xbf16>, vector<7x64xf32> -> vector<7x64xf32>
    %487 = arith.addf %482, %486 : vector<7x64xf32>
    %c212_278 = arith.constant 212 : index
    %c0_279 = arith.constant 0 : index
    %488 = tpu.strided_load %arg15[%c212_278, %c0_279] {strides = array<i32: 2, 1>} : memref<416x128xf32, #tpu.memory_space<vmem>>, vector<7x128xf32>
    %489 = vector.extract_strided_slice %488 {offsets = [0, 0], sizes = [7, 64], strides = [1, 1]} : vector<7x128xf32> to vector<7x64xf32>
    %490 = arith.truncf %489 : vector<7x64xf32> to vector<7x64xbf16>
    %cst_280 = arith.constant dense<0.000000e+00> : vector<7x64xf32>
    %491 = tpu.matmul %490, %434, %cst_280 {dimension_numbers = #tpu.dot_dimension_numbers<[1], [0], [0], [1], [0, 0, 1, 1], [], []>} : vector<7x64xbf16>, vector<64x64xbf16>, vector<7x64xf32> -> vector<7x64xf32>
    %492 = arith.addf %487, %491 : vector<7x64xf32>
    %493 = vector.broadcast %435 : vector<1x64xf32> to vector<7x64xf32>
    %494 = arith.addf %492, %493 : vector<7x64xf32>
    %cst_281 = arith.constant 1.000000e-01 : f32
    %495 = vector.broadcast %cst_281 : f32 to vector<7x64xf32>
    %496 = arith.mulf %495, %494 : vector<7x64xf32>
    %497 = arith.maximumf %494, %496 : vector<7x64xf32>
    %cst_282 = arith.constant dense<0.000000e+00> : vector<64xf32>
    %498 = vector.multi_reduction <add>, %497, %cst_282 [0] : vector<7x64xf32> to vector<64xf32>
    %499 = vector.shape_cast %498 : vector<64xf32> to vector<1x64xf32>
    %500 = arith.addf %468, %499 : vector<1x64xf32>
    %cst_283 = arith.constant 0.0714285746 : f32
    %501 = vector.broadcast %cst_283 : f32 to vector<1x64xf32>
    %502 = arith.mulf %500, %501 : vector<1x64xf32>
    %503 = vector.broadcast %502 : vector<1x64xf32> to vector<7x64xf32>
    %504 = arith.subf %466, %503 : vector<7x64xf32>
    %505 = arith.mulf %504, %504 : vector<7x64xf32>
    %cst_284 = arith.constant dense<0.000000e+00> : vector<64xf32>
    %506 = vector.multi_reduction <add>, %505, %cst_284 [0] : vector<7x64xf32> to vector<64xf32>
    %507 = vector.shape_cast %506 : vector<64xf32> to vector<1x64xf32>
    %508 = vector.broadcast %502 : vector<1x64xf32> to vector<7x64xf32>
    %509 = arith.subf %497, %508 : vector<7x64xf32>
    %510 = arith.mulf %509, %509 : vector<7x64xf32>
    %cst_285 = arith.constant dense<0.000000e+00> : vector<64xf32>
    %511 = vector.multi_reduction <add>, %510, %cst_285 [0] : vector<7x64xf32> to vector<64xf32>
    %512 = vector.shape_cast %511 : vector<64xf32> to vector<1x64xf32>
    %513 = arith.addf %507, %512 : vector<1x64xf32>
    %cst_286 = arith.constant 0.0714285746 : f32
    %514 = vector.broadcast %cst_286 : f32 to vector<1x64xf32>
    %515 = arith.mulf %513, %514 : vector<1x64xf32>
    %cst_287 = arith.constant 9.99999974E-6 : f32
    %516 = vector.broadcast %cst_287 : f32 to vector<1x64xf32>
    %517 = arith.addf %515, %516 : vector<1x64xf32>
    %518 = math.rsqrt %517 : vector<1x64xf32>
    %519 = arith.mulf %436, %518 : vector<1x64xf32>
    %520 = arith.mulf %502, %519 : vector<1x64xf32>
    %521 = arith.subf %437, %520 : vector<1x64xf32>
    %522 = vector.broadcast %519 : vector<1x64xf32> to vector<7x64xf32>
    %523 = arith.mulf %466, %522 : vector<7x64xf32>
    %524 = vector.broadcast %521 : vector<1x64xf32> to vector<7x64xf32>
    %525 = arith.addf %523, %524 : vector<7x64xf32>
    %c2_288 = arith.constant 2 : index
    %c0_289 = arith.constant 0 : index
    %526 = vector.load %arg15[%c2_288, %c0_289] : memref<416x128xf32, #tpu.memory_space<vmem>>, vector<7x64xf32>
    tpu.vector_store %arg15[%c2_288, %c0_289], %525 {strides = array<i32>} : memref<416x128xf32, #tpu.memory_space<vmem>>, vector<7x64xf32>,
    %cst_290 = arith.constant 0.000000e+00 : f32
    %527 = vector.broadcast %cst_290 : f32 to vector<4x64xf32>
    %c9_291 = arith.constant 9 : index
    %c0_292 = arith.constant 0 : index
    %528 = vector.load %arg15[%c9_291, %c0_292] : memref<416x128xf32, #tpu.memory_space<vmem>>, vector<4x64xf32>
    tpu.vector_store %arg15[%c9_291, %c0_292], %527 {strides = array<i32>} : memref<416x128xf32, #tpu.memory_space<vmem>>, vector<4x64xf32>,
    %529 = vector.broadcast %519 : vector<1x64xf32> to vector<7x64xf32>
    %530 = arith.mulf %497, %529 : vector<7x64xf32>
    %531 = vector.broadcast %521 : vector<1x64xf32> to vector<7x64xf32>
    %532 = arith.addf %530, %531 : vector<7x64xf32>
    %c210_293 = arith.constant 210 : index
    %c0_294 = arith.constant 0 : index
    %533 = vector.load %arg15[%c210_293, %c0_294] : memref<416x128xf32, #tpu.memory_space<vmem>>, vector<7x64xf32>
    tpu.vector_store %arg15[%c210_293, %c0_294], %532 {strides = array<i32>} : memref<416x128xf32, #tpu.memory_space<vmem>>, vector<7x64xf32>,
    %cst_295 = arith.constant 0.000000e+00 : f32
    %534 = vector.broadcast %cst_295 : f32 to vector<4x64xf32>
    %c217 = arith.constant 217 : index
    %c0_296 = arith.constant 0 : index
    %535 = vector.load %arg15[%c217, %c0_296] : memref<416x128xf32, #tpu.memory_space<vmem>>, vector<4x64xf32>
    tpu.vector_store %arg15[%c217, %c0_296], %534 {strides = array<i32>} : memref<416x128xf32, #tpu.memory_space<vmem>>, vector<4x64xf32>,
    %c0_297 = arith.constant 0 : index
    %c0_298 = arith.constant 0 : index
    %536 = vector.load %arg7[%c0_297, %c0_298] : memref<320x128xbf16, #tpu.memory_space<vmem>>, vector<64x128xbf16>
    %c64_299 = arith.constant 64 : index
    %c0_300 = arith.constant 0 : index
    %537 = vector.load %arg7[%c64_299, %c0_300] : memref<320x128xbf16, #tpu.memory_space<vmem>>, vector<64x128xbf16>
    %c128_301 = arith.constant 128 : index
    %c0_302 = arith.constant 0 : index
    %538 = vector.load %arg7[%c128_301, %c0_302] : memref<320x128xbf16, #tpu.memory_space<vmem>>, vector<64x128xbf16>
    %c192_303 = arith.constant 192 : index
    %c0_304 = arith.constant 0 : index
    %539 = vector.load %arg7[%c192_303, %c0_304] : memref<320x128xbf16, #tpu.memory_space<vmem>>, vector<64x128xbf16>
    %c256_305 = arith.constant 256 : index
    %c0_306 = arith.constant 0 : index
    %540 = vector.load %arg7[%c256_305, %c0_306] : memref<320x128xbf16, #tpu.memory_space<vmem>>, vector<64x128xbf16>
    %c15_307 = arith.constant 15 : index
    %c0_308 = arith.constant 0 : index
    %541 = vector.load %arg9[%c15_307, %c0_308] : memref<21x128xf32, #tpu.memory_space<vmem>>, vector<1x128xf32>
    %c16_309 = arith.constant 16 : index
    %c0_310 = arith.constant 0 : index
    %542 = vector.load %arg9[%c16_309, %c0_310] : memref<21x128xf32, #tpu.memory_space<vmem>>, vector<1x128xf32>
    %c17 = arith.constant 17 : index
    %c0_311 = arith.constant 0 : index
    %543 = vector.load %arg9[%c17, %c0_311] : memref<21x128xf32, #tpu.memory_space<vmem>>, vector<1x128xf32>
    %c0_312 = arith.constant 0 : index
    %c0_313 = arith.constant 0 : index
    %544 = tpu.strided_load %arg15[%c0_312, %c0_313] {strides = array<i32: 2, 1>} : memref<416x128xf32, #tpu.memory_space<vmem>>, vector<4x128xf32>
    %545 = vector.extract_strided_slice %544 {offsets = [0, 0], sizes = [4, 64], strides = [1, 1]} : vector<4x128xf32> to vector<4x64xf32>
    %546 = arith.truncf %545 : vector<4x64xf32> to vector<4x64xbf16>
    %cst_314 = arith.constant dense<0.000000e+00> : vector<4x128xf32>
    %547 = tpu.matmul %546, %536, %cst_314 {dimension_numbers = #tpu.dot_dimension_numbers<[1], [0], [0], [1], [0, 0, 1, 1], [], []>} : vector<4x64xbf16>, vector<64x128xbf16>, vector<4x128xf32> -> vector<4x128xf32>
    %c1_315 = arith.constant 1 : index
    %c0_316 = arith.constant 0 : index
    %548 = tpu.strided_load %arg15[%c1_315, %c0_316] {strides = array<i32: 2, 1>} : memref<416x128xf32, #tpu.memory_space<vmem>>, vector<4x128xf32>
    %549 = vector.extract_strided_slice %548 {offsets = [0, 0], sizes = [4, 64], strides = [1, 1]} : vector<4x128xf32> to vector<4x64xf32>
    %550 = arith.truncf %549 : vector<4x64xf32> to vector<4x64xbf16>
    %cst_317 = arith.constant dense<0.000000e+00> : vector<4x128xf32>
    %551 = tpu.matmul %550, %537, %cst_317 {dimension_numbers = #tpu.dot_dimension_numbers<[1], [0], [0], [1], [0, 0, 1, 1], [], []>} : vector<4x64xbf16>, vector<64x128xbf16>, vector<4x128xf32> -> vector<4x128xf32>
    %552 = arith.addf %547, %551 : vector<4x128xf32>
    %c2_318 = arith.constant 2 : index
    %c0_319 = arith.constant 0 : index
    %553 = tpu.strided_load %arg15[%c2_318, %c0_319] {strides = array<i32: 2, 1>} : memref<416x128xf32, #tpu.memory_space<vmem>>, vector<4x128xf32>
    %554 = vector.extract_strided_slice %553 {offsets = [0, 0], sizes = [4, 64], strides = [1, 1]} : vector<4x128xf32> to vector<4x64xf32>
    %555 = arith.truncf %554 : vector<4x64xf32> to vector<4x64xbf16>
    %cst_320 = arith.constant dense<0.000000e+00> : vector<4x128xf32>
    %556 = tpu.matmul %555, %538, %cst_320 {dimension_numbers = #tpu.dot_dimension_numbers<[1], [0], [0], [1], [0, 0, 1, 1], [], []>} : vector<4x64xbf16>, vector<64x128xbf16>, vector<4x128xf32> -> vector<4x128xf32>
    %557 = arith.addf %552, %556 : vector<4x128xf32>
    %c3_321 = arith.constant 3 : index
    %c0_322 = arith.constant 0 : index
    %558 = tpu.strided_load %arg15[%c3_321, %c0_322] {strides = array<i32: 2, 1>} : memref<416x128xf32, #tpu.memory_space<vmem>>, vector<4x128xf32>
    %559 = vector.extract_strided_slice %558 {offsets = [0, 0], sizes = [4, 64], strides = [1, 1]} : vector<4x128xf32> to vector<4x64xf32>
    %560 = arith.truncf %559 : vector<4x64xf32> to vector<4x64xbf16>
    %cst_323 = arith.constant dense<0.000000e+00> : vector<4x128xf32>
    %561 = tpu.matmul %560, %539, %cst_323 {dimension_numbers = #tpu.dot_dimension_numbers<[1], [0], [0], [1], [0, 0, 1, 1], [], []>} : vector<4x64xbf16>, vector<64x128xbf16>, vector<4x128xf32> -> vector<4x128xf32>
    %562 = arith.addf %557, %561 : vector<4x128xf32>
    %c4_324 = arith.constant 4 : index
    %c0_325 = arith.constant 0 : index
    %563 = tpu.strided_load %arg15[%c4_324, %c0_325] {strides = array<i32: 2, 1>} : memref<416x128xf32, #tpu.memory_space<vmem>>, vector<4x128xf32>
    %564 = vector.extract_strided_slice %563 {offsets = [0, 0], sizes = [4, 64], strides = [1, 1]} : vector<4x128xf32> to vector<4x64xf32>
    %565 = arith.truncf %564 : vector<4x64xf32> to vector<4x64xbf16>
    %cst_326 = arith.constant dense<0.000000e+00> : vector<4x128xf32>
    %566 = tpu.matmul %565, %540, %cst_326 {dimension_numbers = #tpu.dot_dimension_numbers<[1], [0], [0], [1], [0, 0, 1, 1], [], []>} : vector<4x64xbf16>, vector<64x128xbf16>, vector<4x128xf32> -> vector<4x128xf32>
    %567 = arith.addf %562, %566 : vector<4x128xf32>
    %568 = vector.broadcast %541 : vector<1x128xf32> to vector<4x128xf32>
    %569 = arith.addf %567, %568 : vector<4x128xf32>
    %cst_327 = arith.constant 1.000000e-01 : f32
    %570 = vector.broadcast %cst_327 : f32 to vector<4x128xf32>
    %571 = arith.mulf %570, %569 : vector<4x128xf32>
    %572 = arith.maximumf %569, %571 : vector<4x128xf32>
    %cst_328 = arith.constant dense<0.000000e+00> : vector<128xf32>
    %573 = vector.multi_reduction <add>, %572, %cst_328 [0] : vector<4x128xf32> to vector<128xf32>
    %574 = vector.shape_cast %573 : vector<128xf32> to vector<1x128xf32>
    %c208_329 = arith.constant 208 : index
    %c0_330 = arith.constant 0 : index
    %575 = tpu.strided_load %arg15[%c208_329, %c0_330] {strides = array<i32: 2, 1>} : memref<416x128xf32, #tpu.memory_space<vmem>>, vector<4x128xf32>
    %576 = vector.extract_strided_slice %575 {offsets = [0, 0], sizes = [4, 64], strides = [1, 1]} : vector<4x128xf32> to vector<4x64xf32>
    %577 = arith.truncf %576 : vector<4x64xf32> to vector<4x64xbf16>
    %cst_331 = arith.constant dense<0.000000e+00> : vector<4x128xf32>
    %578 = tpu.matmul %577, %536, %cst_331 {dimension_numbers = #tpu.dot_dimension_numbers<[1], [0], [0], [1], [0, 0, 1, 1], [], []>} : vector<4x64xbf16>, vector<64x128xbf16>, vector<4x128xf32> -> vector<4x128xf32>
    %c209_332 = arith.constant 209 : index
    %c0_333 = arith.constant 0 : index
    %579 = tpu.strided_load %arg15[%c209_332, %c0_333] {strides = array<i32: 2, 1>} : memref<416x128xf32, #tpu.memory_space<vmem>>, vector<4x128xf32>
    %580 = vector.extract_strided_slice %579 {offsets = [0, 0], sizes = [4, 64], strides = [1, 1]} : vector<4x128xf32> to vector<4x64xf32>
    %581 = arith.truncf %580 : vector<4x64xf32> to vector<4x64xbf16>
    %cst_334 = arith.constant dense<0.000000e+00> : vector<4x128xf32>
    %582 = tpu.matmul %581, %537, %cst_334 {dimension_numbers = #tpu.dot_dimension_numbers<[1], [0], [0], [1], [0, 0, 1, 1], [], []>} : vector<4x64xbf16>, vector<64x128xbf16>, vector<4x128xf32> -> vector<4x128xf32>
    %583 = arith.addf %578, %582 : vector<4x128xf32>
    %c210_335 = arith.constant 210 : index
    %c0_336 = arith.constant 0 : index
    %584 = tpu.strided_load %arg15[%c210_335, %c0_336] {strides = array<i32: 2, 1>} : memref<416x128xf32, #tpu.memory_space<vmem>>, vector<4x128xf32>
    %585 = vector.extract_strided_slice %584 {offsets = [0, 0], sizes = [4, 64], strides = [1, 1]} : vector<4x128xf32> to vector<4x64xf32>
    %586 = arith.truncf %585 : vector<4x64xf32> to vector<4x64xbf16>
    %cst_337 = arith.constant dense<0.000000e+00> : vector<4x128xf32>
    %587 = tpu.matmul %586, %538, %cst_337 {dimension_numbers = #tpu.dot_dimension_numbers<[1], [0], [0], [1], [0, 0, 1, 1], [], []>} : vector<4x64xbf16>, vector<64x128xbf16>, vector<4x128xf32> -> vector<4x128xf32>
    %588 = arith.addf %583, %587 : vector<4x128xf32>
    %c211_338 = arith.constant 211 : index
    %c0_339 = arith.constant 0 : index
    %589 = tpu.strided_load %arg15[%c211_338, %c0_339] {strides = array<i32: 2, 1>} : memref<416x128xf32, #tpu.memory_space<vmem>>, vector<4x128xf32>
    %590 = vector.extract_strided_slice %589 {offsets = [0, 0], sizes = [4, 64], strides = [1, 1]} : vector<4x128xf32> to vector<4x64xf32>
    %591 = arith.truncf %590 : vector<4x64xf32> to vector<4x64xbf16>
    %cst_340 = arith.constant dense<0.000000e+00> : vector<4x128xf32>
    %592 = tpu.matmul %591, %539, %cst_340 {dimension_numbers = #tpu.dot_dimension_numbers<[1], [0], [0], [1], [0, 0, 1, 1], [], []>} : vector<4x64xbf16>, vector<64x128xbf16>, vector<4x128xf32> -> vector<4x128xf32>
    %593 = arith.addf %588, %592 : vector<4x128xf32>
    %c212_341 = arith.constant 212 : index
    %c0_342 = arith.constant 0 : index
    %594 = tpu.strided_load %arg15[%c212_341, %c0_342] {strides = array<i32: 2, 1>} : memref<416x128xf32, #tpu.memory_space<vmem>>, vector<4x128xf32>
    %595 = vector.extract_strided_slice %594 {offsets = [0, 0], sizes = [4, 64], strides = [1, 1]} : vector<4x128xf32> to vector<4x64xf32>
    %596 = arith.truncf %595 : vector<4x64xf32> to vector<4x64xbf16>
    %cst_343 = arith.constant dense<0.000000e+00> : vector<4x128xf32>
    %597 = tpu.matmul %596, %540, %cst_343 {dimension_numbers = #tpu.dot_dimension_numbers<[1], [0], [0], [1], [0, 0, 1, 1], [], []>} : vector<4x64xbf16>, vector<64x128xbf16>, vector<4x128xf32> -> vector<4x128xf32>
    %598 = arith.addf %593, %597 : vector<4x128xf32>
    %599 = vector.broadcast %541 : vector<1x128xf32> to vector<4x128xf32>
    %600 = arith.addf %598, %599 : vector<4x128xf32>
    %cst_344 = arith.constant 1.000000e-01 : f32
    %601 = vector.broadcast %cst_344 : f32 to vector<4x128xf32>
    %602 = arith.mulf %601, %600 : vector<4x128xf32>
    %603 = arith.maximumf %600, %602 : vector<4x128xf32>
    %cst_345 = arith.constant dense<0.000000e+00> : vector<128xf32>
    %604 = vector.multi_reduction <add>, %603, %cst_345 [0] : vector<4x128xf32> to vector<128xf32>
    %605 = vector.shape_cast %604 : vector<128xf32> to vector<1x128xf32>
    %606 = arith.addf %574, %605 : vector<1x128xf32>
    %cst_346 = arith.constant 1.250000e-01 : f32
    %607 = vector.broadcast %cst_346 : f32 to vector<1x128xf32>
    %608 = arith.mulf %606, %607 : vector<1x128xf32>
    %609 = vector.broadcast %608 : vector<1x128xf32> to vector<4x128xf32>
    %610 = arith.subf %572, %609 : vector<4x128xf32>
    %611 = arith.mulf %610, %610 : vector<4x128xf32>
    %cst_347 = arith.constant dense<0.000000e+00> : vector<128xf32>
    %612 = vector.multi_reduction <add>, %611, %cst_347 [0] : vector<4x128xf32> to vector<128xf32>
    %613 = vector.shape_cast %612 : vector<128xf32> to vector<1x128xf32>
    %614 = vector.broadcast %608 : vector<1x128xf32> to vector<4x128xf32>
    %615 = arith.subf %603, %614 : vector<4x128xf32>
    %616 = arith.mulf %615, %615 : vector<4x128xf32>
    %cst_348 = arith.constant dense<0.000000e+00> : vector<128xf32>
    %617 = vector.multi_reduction <add>, %616, %cst_348 [0] : vector<4x128xf32> to vector<128xf32>
    %618 = vector.shape_cast %617 : vector<128xf32> to vector<1x128xf32>
    %619 = arith.addf %613, %618 : vector<1x128xf32>
    %cst_349 = arith.constant 1.250000e-01 : f32
    %620 = vector.broadcast %cst_349 : f32 to vector<1x128xf32>
    %621 = arith.mulf %619, %620 : vector<1x128xf32>
    %cst_350 = arith.constant 9.99999974E-6 : f32
    %622 = vector.broadcast %cst_350 : f32 to vector<1x128xf32>
    %623 = arith.addf %621, %622 : vector<1x128xf32>
    %624 = math.rsqrt %623 : vector<1x128xf32>
    %625 = arith.mulf %542, %624 : vector<1x128xf32>
    %626 = arith.mulf %608, %625 : vector<1x128xf32>
    %627 = arith.subf %543, %626 : vector<1x128xf32>
    %628 = vector.broadcast %625 : vector<1x128xf32> to vector<4x128xf32>
    %629 = arith.mulf %572, %628 : vector<4x128xf32>
    %630 = vector.broadcast %627 : vector<1x128xf32> to vector<4x128xf32>
    %631 = arith.addf %629, %630 : vector<4x128xf32>
    %c2_351 = arith.constant 2 : index
    %c0_352 = arith.constant 0 : index
    %632 = vector.load %arg15[%c2_351, %c0_352] : memref<416x128xf32, #tpu.memory_space<vmem>>, vector<4x128xf32>
    tpu.vector_store %arg15[%c2_351, %c0_352], %631 {strides = array<i32>} : memref<416x128xf32, #tpu.memory_space<vmem>>, vector<4x128xf32>,
    %cst_353 = arith.constant 0.000000e+00 : f32
    %633 = vector.broadcast %cst_353 : f32 to vector<4x128xf32>
    %c6_354 = arith.constant 6 : index
    %c0_355 = arith.constant 0 : index
    %634 = vector.load %arg15[%c6_354, %c0_355] : memref<416x128xf32, #tpu.memory_space<vmem>>, vector<4x128xf32>
    tpu.vector_store %arg15[%c6_354, %c0_355], %633 {strides = array<i32>} : memref<416x128xf32, #tpu.memory_space<vmem>>, vector<4x128xf32>,
    %635 = vector.broadcast %625 : vector<1x128xf32> to vector<4x128xf32>
    %636 = arith.mulf %603, %635 : vector<4x128xf32>
    %637 = vector.broadcast %627 : vector<1x128xf32> to vector<4x128xf32>
    %638 = arith.addf %636, %637 : vector<4x128xf32>
    %c210_356 = arith.constant 210 : index
    %c0_357 = arith.constant 0 : index
    %639 = vector.load %arg15[%c210_356, %c0_357] : memref<416x128xf32, #tpu.memory_space<vmem>>, vector<4x128xf32>
    tpu.vector_store %arg15[%c210_356, %c0_357], %638 {strides = array<i32>} : memref<416x128xf32, #tpu.memory_space<vmem>>, vector<4x128xf32>,
    %cst_358 = arith.constant 0.000000e+00 : f32
    %640 = vector.broadcast %cst_358 : f32 to vector<4x128xf32>
    %c214 = arith.constant 214 : index
    %c0_359 = arith.constant 0 : index
    %641 = vector.load %arg15[%c214, %c0_359] : memref<416x128xf32, #tpu.memory_space<vmem>>, vector<4x128xf32>
    tpu.vector_store %arg15[%c214, %c0_359], %640 {strides = array<i32>} : memref<416x128xf32, #tpu.memory_space<vmem>>, vector<4x128xf32>,
    %c0_360 = arith.constant 0 : index
    %c0_361 = arith.constant 0 : index
    %642 = vector.load %arg8[%c0_360, %c0_361] : memref<640x128xbf16, #tpu.memory_space<vmem>>, vector<128x128xbf16>
    %c128_362 = arith.constant 128 : index
    %c0_363 = arith.constant 0 : index
    %643 = vector.load %arg8[%c128_362, %c0_363] : memref<640x128xbf16, #tpu.memory_space<vmem>>, vector<128x128xbf16>
    %c256_364 = arith.constant 256 : index
    %c0_365 = arith.constant 0 : index
    %644 = vector.load %arg8[%c256_364, %c0_365] : memref<640x128xbf16, #tpu.memory_space<vmem>>, vector<128x128xbf16>
    %c384 = arith.constant 384 : index
    %c0_366 = arith.constant 0 : index
    %645 = vector.load %arg8[%c384, %c0_366] : memref<640x128xbf16, #tpu.memory_space<vmem>>, vector<128x128xbf16>
    %c512 = arith.constant 512 : index
    %c0_367 = arith.constant 0 : index
    %646 = vector.load %arg8[%c512, %c0_367] : memref<640x128xbf16, #tpu.memory_space<vmem>>, vector<128x128xbf16>
    %c18 = arith.constant 18 : index
    %c0_368 = arith.constant 0 : index
    %647 = vector.load %arg9[%c18, %c0_368] : memref<21x128xf32, #tpu.memory_space<vmem>>, vector<1x128xf32>
    %c19 = arith.constant 19 : index
    %c0_369 = arith.constant 0 : index
    %648 = vector.load %arg9[%c19, %c0_369] : memref<21x128xf32, #tpu.memory_space<vmem>>, vector<1x128xf32>
    %c20 = arith.constant 20 : index
    %c0_370 = arith.constant 0 : index
    %649 = vector.load %arg9[%c20, %c0_370] : memref<21x128xf32, #tpu.memory_space<vmem>>, vector<1x128xf32>
    %c0_371 = arith.constant 0 : index
    %c0_372 = arith.constant 0 : index
    %650 = tpu.strided_load %arg15[%c0_371, %c0_372] {strides = array<i32: 2, 1>} : memref<416x128xf32, #tpu.memory_space<vmem>>, vector<2x128xf32>
    %651 = arith.truncf %650 : vector<2x128xf32> to vector<2x128xbf16>
    %cst_373 = arith.constant dense<0.000000e+00> : vector<2x128xf32>
    %652 = tpu.matmul %651, %642, %cst_373 {dimension_numbers = #tpu.dot_dimension_numbers<[1], [0], [0], [1], [0, 0, 1, 1], [], []>} : vector<2x128xbf16>, vector<128x128xbf16>, vector<2x128xf32> -> vector<2x128xf32>
    %c1_374 = arith.constant 1 : index
    %c0_375 = arith.constant 0 : index
    %653 = tpu.strided_load %arg15[%c1_374, %c0_375] {strides = array<i32: 2, 1>} : memref<416x128xf32, #tpu.memory_space<vmem>>, vector<2x128xf32>
    %654 = arith.truncf %653 : vector<2x128xf32> to vector<2x128xbf16>
    %cst_376 = arith.constant dense<0.000000e+00> : vector<2x128xf32>
    %655 = tpu.matmul %654, %643, %cst_376 {dimension_numbers = #tpu.dot_dimension_numbers<[1], [0], [0], [1], [0, 0, 1, 1], [], []>} : vector<2x128xbf16>, vector<128x128xbf16>, vector<2x128xf32> -> vector<2x128xf32>
    %656 = arith.addf %652, %655 : vector<2x128xf32>
    %c2_377 = arith.constant 2 : index
    %c0_378 = arith.constant 0 : index
    %657 = tpu.strided_load %arg15[%c2_377, %c0_378] {strides = array<i32: 2, 1>} : memref<416x128xf32, #tpu.memory_space<vmem>>, vector<2x128xf32>
    %658 = arith.truncf %657 : vector<2x128xf32> to vector<2x128xbf16>
    %cst_379 = arith.constant dense<0.000000e+00> : vector<2x128xf32>
    %659 = tpu.matmul %658, %644, %cst_379 {dimension_numbers = #tpu.dot_dimension_numbers<[1], [0], [0], [1], [0, 0, 1, 1], [], []>} : vector<2x128xbf16>, vector<128x128xbf16>, vector<2x128xf32> -> vector<2x128xf32>
    %660 = arith.addf %656, %659 : vector<2x128xf32>
    %c3_380 = arith.constant 3 : index
    %c0_381 = arith.constant 0 : index
    %661 = tpu.strided_load %arg15[%c3_380, %c0_381] {strides = array<i32: 2, 1>} : memref<416x128xf32, #tpu.memory_space<vmem>>, vector<2x128xf32>
    %662 = arith.truncf %661 : vector<2x128xf32> to vector<2x128xbf16>
    %cst_382 = arith.constant dense<0.000000e+00> : vector<2x128xf32>
    %663 = tpu.matmul %662, %645, %cst_382 {dimension_numbers = #tpu.dot_dimension_numbers<[1], [0], [0], [1], [0, 0, 1, 1], [], []>} : vector<2x128xbf16>, vector<128x128xbf16>, vector<2x128xf32> -> vector<2x128xf32>
    %664 = arith.addf %660, %663 : vector<2x128xf32>
    %c4_383 = arith.constant 4 : index
    %c0_384 = arith.constant 0 : index
    %665 = tpu.strided_load %arg15[%c4_383, %c0_384] {strides = array<i32: 2, 1>} : memref<416x128xf32, #tpu.memory_space<vmem>>, vector<2x128xf32>
    %666 = arith.truncf %665 : vector<2x128xf32> to vector<2x128xbf16>
    %cst_385 = arith.constant dense<0.000000e+00> : vector<2x128xf32>
    %667 = tpu.matmul %666, %646, %cst_385 {dimension_numbers = #tpu.dot_dimension_numbers<[1], [0], [0], [1], [0, 0, 1, 1], [], []>} : vector<2x128xbf16>, vector<128x128xbf16>, vector<2x128xf32> -> vector<2x128xf32>
    %668 = arith.addf %664, %667 : vector<2x128xf32>
    %669 = vector.broadcast %647 : vector<1x128xf32> to vector<2x128xf32>
    %670 = arith.addf %668, %669 : vector<2x128xf32>
    %cst_386 = arith.constant 1.000000e-01 : f32
    %671 = vector.broadcast %cst_386 : f32 to vector<2x128xf32>
    %672 = arith.mulf %671, %670 : vector<2x128xf32>
    %673 = arith.maximumf %670, %672 : vector<2x128xf32>
    %cst_387 = arith.constant dense<0.000000e+00> : vector<128xf32>
    %674 = vector.multi_reduction <add>, %673, %cst_387 [0] : vector<2x128xf32> to vector<128xf32>
    %675 = vector.shape_cast %674 : vector<128xf32> to vector<1x128xf32>
    %c208_388 = arith.constant 208 : index
    %c0_389 = arith.constant 0 : index
    %676 = tpu.strided_load %arg15[%c208_388, %c0_389] {strides = array<i32: 2, 1>} : memref<416x128xf32, #tpu.memory_space<vmem>>, vector<2x128xf32>
    %677 = arith.truncf %676 : vector<2x128xf32> to vector<2x128xbf16>
    %cst_390 = arith.constant dense<0.000000e+00> : vector<2x128xf32>
    %678 = tpu.matmul %677, %642, %cst_390 {dimension_numbers = #tpu.dot_dimension_numbers<[1], [0], [0], [1], [0, 0, 1, 1], [], []>} : vector<2x128xbf16>, vector<128x128xbf16>, vector<2x128xf32> -> vector<2x128xf32>
    %c209_391 = arith.constant 209 : index
    %c0_392 = arith.constant 0 : index
    %679 = tpu.strided_load %arg15[%c209_391, %c0_392] {strides = array<i32: 2, 1>} : memref<416x128xf32, #tpu.memory_space<vmem>>, vector<2x128xf32>
    %680 = arith.truncf %679 : vector<2x128xf32> to vector<2x128xbf16>
    %cst_393 = arith.constant dense<0.000000e+00> : vector<2x128xf32>
    %681 = tpu.matmul %680, %643, %cst_393 {dimension_numbers = #tpu.dot_dimension_numbers<[1], [0], [0], [1], [0, 0, 1, 1], [], []>} : vector<2x128xbf16>, vector<128x128xbf16>, vector<2x128xf32> -> vector<2x128xf32>
    %682 = arith.addf %678, %681 : vector<2x128xf32>
    %c210_394 = arith.constant 210 : index
    %c0_395 = arith.constant 0 : index
    %683 = tpu.strided_load %arg15[%c210_394, %c0_395] {strides = array<i32: 2, 1>} : memref<416x128xf32, #tpu.memory_space<vmem>>, vector<2x128xf32>
    %684 = arith.truncf %683 : vector<2x128xf32> to vector<2x128xbf16>
    %cst_396 = arith.constant dense<0.000000e+00> : vector<2x128xf32>
    %685 = tpu.matmul %684, %644, %cst_396 {dimension_numbers = #tpu.dot_dimension_numbers<[1], [0], [0], [1], [0, 0, 1, 1], [], []>} : vector<2x128xbf16>, vector<128x128xbf16>, vector<2x128xf32> -> vector<2x128xf32>
    %686 = arith.addf %682, %685 : vector<2x128xf32>
    %c211_397 = arith.constant 211 : index
    %c0_398 = arith.constant 0 : index
    %687 = tpu.strided_load %arg15[%c211_397, %c0_398] {strides = array<i32: 2, 1>} : memref<416x128xf32, #tpu.memory_space<vmem>>, vector<2x128xf32>
    %688 = arith.truncf %687 : vector<2x128xf32> to vector<2x128xbf16>
    %cst_399 = arith.constant dense<0.000000e+00> : vector<2x128xf32>
    %689 = tpu.matmul %688, %645, %cst_399 {dimension_numbers = #tpu.dot_dimension_numbers<[1], [0], [0], [1], [0, 0, 1, 1], [], []>} : vector<2x128xbf16>, vector<128x128xbf16>, vector<2x128xf32> -> vector<2x128xf32>
    %690 = arith.addf %686, %689 : vector<2x128xf32>
    %c212_400 = arith.constant 212 : index
    %c0_401 = arith.constant 0 : index
    %691 = tpu.strided_load %arg15[%c212_400, %c0_401] {strides = array<i32: 2, 1>} : memref<416x128xf32, #tpu.memory_space<vmem>>, vector<2x128xf32>
    %692 = arith.truncf %691 : vector<2x128xf32> to vector<2x128xbf16>
    %cst_402 = arith.constant dense<0.000000e+00> : vector<2x128xf32>
    %693 = tpu.matmul %692, %646, %cst_402 {dimension_numbers = #tpu.dot_dimension_numbers<[1], [0], [0], [1], [0, 0, 1, 1], [], []>} : vector<2x128xbf16>, vector<128x128xbf16>, vector<2x128xf32> -> vector<2x128xf32>
    %694 = arith.addf %690, %693 : vector<2x128xf32>
    %695 = vector.broadcast %647 : vector<1x128xf32> to vector<2x128xf32>
    %696 = arith.addf %694, %695 : vector<2x128xf32>
    %cst_403 = arith.constant 1.000000e-01 : f32
    %697 = vector.broadcast %cst_403 : f32 to vector<2x128xf32>
    %698 = arith.mulf %697, %696 : vector<2x128xf32>
    %699 = arith.maximumf %696, %698 : vector<2x128xf32>
    %cst_404 = arith.constant dense<0.000000e+00> : vector<128xf32>
    %700 = vector.multi_reduction <add>, %699, %cst_404 [0] : vector<2x128xf32> to vector<128xf32>
    %701 = vector.shape_cast %700 : vector<128xf32> to vector<1x128xf32>
    %702 = arith.addf %675, %701 : vector<1x128xf32>
    %cst_405 = arith.constant 2.500000e-01 : f32
    %703 = vector.broadcast %cst_405 : f32 to vector<1x128xf32>
    %704 = arith.mulf %702, %703 : vector<1x128xf32>
    %705 = vector.broadcast %704 : vector<1x128xf32> to vector<2x128xf32>
    %706 = arith.subf %673, %705 : vector<2x128xf32>
    %707 = arith.mulf %706, %706 : vector<2x128xf32>
    %cst_406 = arith.constant dense<0.000000e+00> : vector<128xf32>
    %708 = vector.multi_reduction <add>, %707, %cst_406 [0] : vector<2x128xf32> to vector<128xf32>
    %709 = vector.shape_cast %708 : vector<128xf32> to vector<1x128xf32>
    %710 = vector.broadcast %704 : vector<1x128xf32> to vector<2x128xf32>
    %711 = arith.subf %699, %710 : vector<2x128xf32>
    %712 = arith.mulf %711, %711 : vector<2x128xf32>
    %cst_407 = arith.constant dense<0.000000e+00> : vector<128xf32>
    %713 = vector.multi_reduction <add>, %712, %cst_407 [0] : vector<2x128xf32> to vector<128xf32>
    %714 = vector.shape_cast %713 : vector<128xf32> to vector<1x128xf32>
    %715 = arith.addf %709, %714 : vector<1x128xf32>
    %cst_408 = arith.constant 2.500000e-01 : f32
    %716 = vector.broadcast %cst_408 : f32 to vector<1x128xf32>
    %717 = arith.mulf %715, %716 : vector<1x128xf32>
    %cst_409 = arith.constant 9.99999974E-6 : f32
    %718 = vector.broadcast %cst_409 : f32 to vector<1x128xf32>
    %719 = arith.addf %717, %718 : vector<1x128xf32>
    %720 = math.rsqrt %719 : vector<1x128xf32>
    %721 = arith.mulf %648, %720 : vector<1x128xf32>
    %722 = arith.mulf %704, %721 : vector<1x128xf32>
    %723 = arith.subf %649, %722 : vector<1x128xf32>
    %724 = vector.broadcast %721 : vector<1x128xf32> to vector<2x128xf32>
    %725 = arith.mulf %673, %724 : vector<2x128xf32>
    %726 = vector.broadcast %723 : vector<1x128xf32> to vector<2x128xf32>
    %727 = arith.addf %725, %726 : vector<2x128xf32>
    %c2_410 = arith.constant 2 : index
    %c0_411 = arith.constant 0 : index
    %728 = vector.load %arg15[%c2_410, %c0_411] : memref<416x128xf32, #tpu.memory_space<vmem>>, vector<2x128xf32>
    tpu.vector_store %arg15[%c2_410, %c0_411], %727 {strides = array<i32>} : memref<416x128xf32, #tpu.memory_space<vmem>>, vector<2x128xf32>,
    %cst_412 = arith.constant 0.000000e+00 : f32
    %729 = vector.broadcast %cst_412 : f32 to vector<4x128xf32>
    %c4_413 = arith.constant 4 : index
    %c0_414 = arith.constant 0 : index
    %730 = vector.load %arg15[%c4_413, %c0_414] : memref<416x128xf32, #tpu.memory_space<vmem>>, vector<4x128xf32>
    tpu.vector_store %arg15[%c4_413, %c0_414], %729 {strides = array<i32>} : memref<416x128xf32, #tpu.memory_space<vmem>>, vector<4x128xf32>,
    %731 = vector.broadcast %721 : vector<1x128xf32> to vector<2x128xf32>
    %732 = arith.mulf %699, %731 : vector<2x128xf32>
    %733 = vector.broadcast %723 : vector<1x128xf32> to vector<2x128xf32>
    %734 = arith.addf %732, %733 : vector<2x128xf32>
    %c210_415 = arith.constant 210 : index
    %c0_416 = arith.constant 0 : index
    %735 = vector.load %arg15[%c210_415, %c0_416] : memref<416x128xf32, #tpu.memory_space<vmem>>, vector<2x128xf32>
    tpu.vector_store %arg15[%c210_415, %c0_416], %734 {strides = array<i32>} : memref<416x128xf32, #tpu.memory_space<vmem>>, vector<2x128xf32>,
    %cst_417 = arith.constant 0.000000e+00 : f32
    %736 = vector.broadcast %cst_417 : f32 to vector<4x128xf32>
    %c212_418 = arith.constant 212 : index
    %c0_419 = arith.constant 0 : index
    %737 = vector.load %arg15[%c212_418, %c0_419] : memref<416x128xf32, #tpu.memory_space<vmem>>, vector<4x128xf32>
    tpu.vector_store %arg15[%c212_418, %c0_419], %736 {strides = array<i32>} : memref<416x128xf32, #tpu.memory_space<vmem>>, vector<4x128xf32>,
    %c2_420 = arith.constant 2 : index
    %c0_421 = arith.constant 0 : index
    %738 = vector.load %arg15[%c2_420, %c0_421] : memref<416x128xf32, #tpu.memory_space<vmem>>, vector<1x128xf32>
    %c0_422 = arith.constant 0 : index
    %c0_423 = arith.constant 0 : index
    %739 = vector.load %arg16[%c0_422, %c0_423] : memref<2x256xf32, #tpu.memory_space<vmem>>, vector<1x128xf32>
    tpu.vector_store %arg16[%c0_422, %c0_423], %738 {strides = array<i32>} : memref<2x256xf32, #tpu.memory_space<vmem>>, vector<1x128xf32>,
    %c3_424 = arith.constant 3 : index
    %c0_425 = arith.constant 0 : index
    %740 = vector.load %arg15[%c3_424, %c0_425] : memref<416x128xf32, #tpu.memory_space<vmem>>, vector<1x128xf32>
    %c0_426 = arith.constant 0 : index
    %c128_427 = arith.constant 128 : index
    %741 = vector.load %arg16[%c0_426, %c128_427] : memref<2x256xf32, #tpu.memory_space<vmem>>, vector<1x128xf32>
    tpu.vector_store %arg16[%c0_426, %c128_427], %740 {strides = array<i32>} : memref<2x256xf32, #tpu.memory_space<vmem>>, vector<1x128xf32>,
    %c210_428 = arith.constant 210 : index
    %c0_429 = arith.constant 0 : index
    %742 = vector.load %arg15[%c210_428, %c0_429] : memref<416x128xf32, #tpu.memory_space<vmem>>, vector<1x128xf32>
    %c1_430 = arith.constant 1 : index
    %c0_431 = arith.constant 0 : index
    %743 = vector.load %arg16[%c1_430, %c0_431] : memref<2x256xf32, #tpu.memory_space<vmem>>, vector<1x128xf32>
    tpu.vector_store %arg16[%c1_430, %c0_431], %742 {strides = array<i32>} : memref<2x256xf32, #tpu.memory_space<vmem>>, vector<1x128xf32>,
    %c211_432 = arith.constant 211 : index
    %c0_433 = arith.constant 0 : index
    %744 = vector.load %arg15[%c211_432, %c0_433] : memref<416x128xf32, #tpu.memory_space<vmem>>, vector<1x128xf32>
    %c1_434 = arith.constant 1 : index
    %c128_435 = arith.constant 128 : index
    %745 = vector.load %arg16[%c1_434, %c128_435] : memref<2x256xf32, #tpu.memory_space<vmem>>, vector<1x128xf32>
    tpu.vector_store %arg16[%c1_434, %c128_435], %744 {strides = array<i32>} : memref<2x256xf32, #tpu.memory_space<vmem>>, vector<1x128xf32>,
    %c0_436 = arith.constant 0 : index
    %c0_437 = arith.constant 0 : index
    %746 = vector.load %arg16[%c0_436, %c0_437] : memref<2x256xf32, #tpu.memory_space<vmem>>, vector<2x256xf32>
    %747 = arith.truncf %746 : vector<2x256xf32> to vector<2x256xbf16>
    %c0_438 = arith.constant 0 : index
    %c0_439 = arith.constant 0 : index
    %748 = vector.load %arg10[%c0_438, %c0_439] : memref<256x1024xbf16, #tpu.memory_space<vmem>>, vector<256x1024xbf16>
    %cst_440 = arith.constant dense<0.000000e+00> : vector<2x1024xf32>
    %749 = tpu.matmul %747, %748, %cst_440 {dimension_numbers = #tpu.dot_dimension_numbers<[1], [0], [0], [1], [0, 0, 1, 1], [], []>} : vector<2x256xbf16>, vector<256x1024xbf16>, vector<2x1024xf32> -> vector<2x1024xf32>
    %c0_441 = arith.constant 0 : index
    %c0_442 = arith.constant 0 : index
    %750 = vector.load %arg11[%c0_441, %c0_442] : memref<4x1024xf32, #tpu.memory_space<vmem>>, vector<1x1024xf32>
    %751 = vector.broadcast %750 : vector<1x1024xf32> to vector<2x1024xf32>
    %752 = arith.addf %749, %751 : vector<2x1024xf32>
    %cst_443 = arith.constant 1.000000e-01 : f32
    %753 = vector.broadcast %cst_443 : f32 to vector<2x1024xf32>
    %754 = arith.mulf %753, %752 : vector<2x1024xf32>
    %755 = arith.maximumf %752, %754 : vector<2x1024xf32>
    %cst_444 = arith.constant dense<0.000000e+00> : vector<1024xf32>
    %756 = vector.multi_reduction <add>, %755, %cst_444 [0] : vector<2x1024xf32> to vector<1024xf32>
    %757 = vector.shape_cast %756 : vector<1024xf32> to vector<1x1024xf32>
    %cst_445 = arith.constant 2.000000e+00 : f32
    %758 = vector.broadcast %cst_445 : f32 to vector<1x1024xf32>
    %759 = arith.divf %757, %758 : vector<1x1024xf32>
    %760 = vector.broadcast %759 : vector<1x1024xf32> to vector<2x1024xf32>
    %761 = arith.subf %755, %760 : vector<2x1024xf32>
    %762 = arith.mulf %761, %761 : vector<2x1024xf32>
    %cst_446 = arith.constant dense<0.000000e+00> : vector<1024xf32>
    %763 = vector.multi_reduction <add>, %762, %cst_446 [0] : vector<2x1024xf32> to vector<1024xf32>
    %764 = vector.shape_cast %763 : vector<1024xf32> to vector<1x1024xf32>
    %cst_447 = arith.constant 2.000000e+00 : f32
    %765 = vector.broadcast %cst_447 : f32 to vector<1x1024xf32>
    %766 = arith.divf %764, %765 : vector<1x1024xf32>
    %c1_448 = arith.constant 1 : index
    %c0_449 = arith.constant 0 : index
    %767 = vector.load %arg11[%c1_448, %c0_449] : memref<4x1024xf32, #tpu.memory_space<vmem>>, vector<1x1024xf32>
    %cst_450 = arith.constant 9.99999974E-6 : f32
    %768 = vector.broadcast %cst_450 : f32 to vector<1x1024xf32>
    %769 = arith.addf %766, %768 : vector<1x1024xf32>
    %770 = math.rsqrt %769 : vector<1x1024xf32>
    %771 = arith.mulf %767, %770 : vector<1x1024xf32>
    %c2_451 = arith.constant 2 : index
    %c0_452 = arith.constant 0 : index
    %772 = vector.load %arg11[%c2_451, %c0_452] : memref<4x1024xf32, #tpu.memory_space<vmem>>, vector<1x1024xf32>
    %773 = arith.mulf %759, %771 : vector<1x1024xf32>
    %774 = arith.subf %772, %773 : vector<1x1024xf32>
    %775 = vector.broadcast %771 : vector<1x1024xf32> to vector<2x1024xf32>
    %776 = arith.mulf %755, %775 : vector<2x1024xf32>
    %777 = vector.broadcast %774 : vector<1x1024xf32> to vector<2x1024xf32>
    %778 = arith.addf %776, %777 : vector<2x1024xf32>
    %779 = arith.truncf %778 : vector<2x1024xf32> to vector<2x1024xbf16>
    %c0_453 = arith.constant 0 : index
    %c0_454 = arith.constant 0 : index
    %780 = vector.load %arg12[%c0_453, %c0_454] : memref<1024x5xbf16, #tpu.memory_space<vmem>>, vector<1024x5xbf16>
    %cst_455 = arith.constant dense<0.000000e+00> : vector<2x5xf32>
    %781 = tpu.matmul %779, %780, %cst_455 {dimension_numbers = #tpu.dot_dimension_numbers<[1], [0], [0], [1], [0, 0, 1, 1], [], []>} : vector<2x1024xbf16>, vector<1024x5xbf16>, vector<2x5xf32> -> vector<2x5xf32>
    %c3_456 = arith.constant 3 : index
    %c0_457 = arith.constant 0 : index
    %782 = vector.load %arg11[%c3_456, %c0_457] : memref<4x1024xf32, #tpu.memory_space<vmem>>, vector<1x5xf32>
    %783 = vector.broadcast %782 : vector<1x5xf32> to vector<2x5xf32>
    %784 = arith.addf %781, %783 : vector<2x5xf32>
    %cst_458 = arith.constant dense<0xFF800000> : vector<2xf32>
    %785 = vector.multi_reduction <maximumf>, %784, %cst_458 [1] : vector<2x5xf32> to vector<2xf32>
    %786 = vector.shape_cast %785 : vector<2xf32> to vector<2x1xf32>
    %787 = vector.broadcast %786 : vector<2x1xf32> to vector<2x5xf32>
    %788 = arith.subf %784, %787 : vector<2x5xf32>
    %789 = math.exp %788 : vector<2x5xf32>
    %cst_459 = arith.constant dense<0.000000e+00> : vector<2xf32>
    %790 = vector.multi_reduction <add>, %789, %cst_459 [1] : vector<2x5xf32> to vector<2xf32>
    %791 = vector.shape_cast %790 : vector<2xf32> to vector<2x1xf32>
    %792 = vector.broadcast %791 : vector<2x1xf32> to vector<2x5xf32>
    %793 = arith.divf %789, %792 : vector<2x5xf32>
    %c0_460 = arith.constant 0 : index
    %c0_461 = arith.constant 0 : index
    %794 = vector.load %arg13[%c0_460, %c0_461] : memref<2x5xf32, #tpu.memory_space<vmem>>, vector<2x5xf32>
    tpu.vector_store %arg13[%c0_460, %c0_461], %793 {strides = array<i32>} : memref<2x5xf32, #tpu.memory_space<vmem>>, vector<2x5xf32>,
    %795 = math.log %791 : vector<2x1xf32>
    %796 = vector.broadcast %795 : vector<2x1xf32> to vector<2x5xf32>
    %797 = arith.subf %788, %796 : vector<2x5xf32>
    %c0_462 = arith.constant 0 : index
    %c0_463 = arith.constant 0 : index
    %798 = vector.load %arg1[%c0_462, %c0_463] : memref<2x1xi32, #tpu.memory_space<vmem>>, vector<2x1xi32>
    %799 = tpu.iota {dimensions = array<i32: 1>} : vector<2x5xi32>
    %800 = vector.broadcast %798 : vector<2x1xi32> to vector<2x5xi32>
    %801 = arith.cmpi eq, %799, %800 : vector<2x5xi32>
    %cst_464 = arith.constant 0.000000e+00 : f32
    %802 = vector.broadcast %cst_464 : f32 to vector<2x5xf32>
    %803 = arith.select %801, %797, %802 : vector<2x5xi1>, vector<2x5xf32>
    %cst_465 = arith.constant dense<0.000000e+00> : vector<2xf32>
    %804 = vector.multi_reduction <add>, %803, %cst_465 [1] : vector<2x5xf32> to vector<2xf32>
    %805 = vector.shape_cast %804 : vector<2xf32> to vector<2x1xf32>
    %cst_466 = arith.constant dense<0.000000e+00> : vector<1xf32>
    %806 = vector.multi_reduction <add>, %805, %cst_466 [0] : vector<2x1xf32> to vector<1xf32>
    %807 = vector.shape_cast %806 : vector<1xf32> to vector<1x1xf32>
    %cst_467 = arith.constant 0.000000e+00 : f32
    %808 = vector.broadcast %cst_467 : f32 to vector<1x1xf32>
    %809 = arith.subf %808, %807 : vector<1x1xf32>
    %cst_468 = arith.constant 5.000000e-01 : f32
    %810 = vector.broadcast %cst_468 : f32 to vector<1x1xf32>
    %811 = arith.mulf %809, %810 : vector<1x1xf32>
    %c0_469 = arith.constant 0 : index
    %c0_470 = arith.constant 0 : index
    %812 = vector.load %arg14[%c0_469, %c0_470] : memref<1x1xf32, #tpu.memory_space<vmem>>, vector<1x1xf32>
    tpu.vector_store %arg14[%c0_469, %c0_470], %811 {strides = array<i32>} : memref<1x1xf32, #tpu.memory_space<vmem>>, vector<1x1xf32>,
    return
  }
}

</mosaic_0001>

<bundles_post_ra>
// kernel: forward.1
= control target key start
LH: loop header
LB: loop body
LE: loop exit
PB: predicated region body
PF: predicated region fallthrough
CT: control target
= control target key end

     0   :  { %20 = vsyncpa [#allocation5], 0  ;;  %s14741_s0 = inlined_call_operand.vmem [shape: f32[400,10], index: 0, kind: input, shape index: {}]   ;;  %s14742_s1 = inlined_call_operand.vmem [shape: s32[2,1], index: 1, kind: input, shape index: {}]   ;;  %s14743_s2 = inlined_call_operand.vmem [shape: bf16[80,16], index: 2, kind: input, shape index: {}]   ;;  %s14744_s3 = inlined_call_operand.vmem [shape: bf16[80,32], index: 3, kind: input, shape index: {}]   ;;  %s14745_s4 = inlined_call_operand.vmem [shape: bf16[160,32], index: 4, kind: input, shape index: {}]   ;;  %s14746_s5 = inlined_call_operand.vmem [shape: bf16[160,64], index: 5, kind: input, shape index: {}]   ;;  %s14747_s6 = inlined_call_operand.vmem [shape: bf16[320,64], index: 6, kind: input, shape index: {}]   ;;  %s14748_s7 = inlined_call_operand.vmem [shape: bf16[320,128], index: 7, kind: input, shape index: {}]   ;;  %s14749_s8 = inlined_call_operand.vmem [shape: bf16[640,128], index: 8, kind: input, shape index: {}]   ;;  %s14750_s9 = inlined_call_operand.hbm [shape: f32[21,128], index: 9, kind: input, shape index: {}]   ;;  %s14751_s10 = inlined_call_operand.vmem [shape: bf16[256,1024], index: 10, kind: input, shape index: {}]   ;;  %s14752_s11 = inlined_call_operand.hbm [shape: f32[4,1024], index: 11, kind: input, shape index: {}]   ;;  %s14753_s12 = inlined_call_operand.vmem [shape: bf16[1024,5], index: 12, kind: input, shape index: {}]   ;;  %s14754_s13 = inlined_call_operand.hbm [shape: f32[2,5], index: 13, kind: output, shape index: {0}]   ;;  %s14755_s14 = inlined_call_operand.hbm [shape: f32[1,1], index: 14, kind: output, shape index: {1}]  }
   0x1   :  { %21 = vsyncpa [#allocation8], 0 }
   0x2   :  { %22 = vsyncpa [#allocation6], 0 }
   0x3   :  { %23 = vsyncpa [#allocation11], 0  ;;  %s11487_s29 = smov [#allocation4]   ;;  %s11391_s17 = scalar_lea.hbm %s14750_s9, 384 }
   0x4   :  { %s47_s30 = sshll.u32 %s11487_s29, 4  ;;  %p11392_p0 = scmp.ne.s32.totalorder %s14750_s9, %s11391_s17  ;;  %s48_s30 = int_to_ptr.vmem [resolvable:$true] %s47_s30 }
   0x5   :  { %p11395_p1 = scmp.lt.u32.totalorder %s11391_s17, %s14750_s9 }
   0x7   :  { %p11397_p2 = pnand %p11395_p1, %p11392_p0 }
   0x9   :  { %11400 = shalt.err (!%p11397_p2)
}
   0xa   :  { %s11401_s22 = scalar_lea.vmem %s48_s30, 384  ;;  %p11406_p4 = scmp.lt.s32.totalorder %s48_s30, %s48_s30 }
   0xb   :  { %p11402_p3 = scmp.ne.s32.totalorder %s48_s30, %s11401_s22  ;;  %p11407_p5 = scmp.lt.s32.totalorder %s11401_s22, %s11401_s22 }
   0xd   :  { %p11408_p6 = por %p11407_p5, %p11406_p4 }
   0xf   :  { %p11409_p7 = pnand %p11408_p6, %p11402_p3 }
  0x11   :  { %11412 = shalt.err (!%p11409_p7)
}
  0x12   :  { %s11488_s23 = smov 128   ;;  %s11489_s24 = smov 8  }
  0x13   :  { %53 = dma.hbm_to_vmem [thread:$0]  %s14750_s9, 384, %s48_s30, [#allocation5], %s11488_s23, %s11488_s23, %s11489_s24  }
  0x14   :  { %s11490_s27 = smov [#allocation7]   ;;  %s11413_s16 = scalar_lea.hbm %s14752_s11, 512 }
  0x15   :  { %s62_s28 = sshll.u32 %s11490_s27, 4  ;;  %p11414_p8 = scmp.ne.s32.totalorder %s14752_s11, %s11413_s16  ;;  %s63_s28 = int_to_ptr.vmem [resolvable:$true] %s62_s28 }
  0x16   :  { %p11417_p9 = scmp.lt.u32.totalorder %s11413_s16, %s14752_s11 }
  0x18   :  { %p11419_p10 = pnand %p11417_p9, %p11414_p8 }
  0x1a   :  { %11422 = shalt.err (!%p11419_p10)
}
  0x1b   :  { %s11423_s21 = scalar_lea.vmem %s63_s28, 512  ;;  %p11428_p12 = scmp.lt.s32.totalorder %s63_s28, %s63_s28 }
  0x1c   :  { %p11424_p11 = scmp.ne.s32.totalorder %s63_s28, %s11423_s21  ;;  %p11429_p13 = scmp.lt.s32.totalorder %s11423_s21, %s11423_s21 }
  0x1e   :  { %p11430_p0 = por %p11429_p13, %p11428_p12 }
  0x20   :  { %p11431_p1 = pnand %p11430_p0, %p11424_p11 }
  0x22   :  { %11434 = shalt.err (!%p11431_p1)
}
  0x23   :  { %65 = dma.hbm_to_vmem [thread:$0]  %s14752_s11, 512, %s63_s28, [#allocation8]  }
  0x24   :  { %11479 = dma.done.wait [#allocation5], 384  }
  0x25   :  { %11480 = vsyncadd [#allocation5], 4294966912 }
  0x26   :  { %11481 = dma.done.wait [#allocation8], 512  }
  0x27   :  { %11482 = vsyncadd [#allocation8], 4294966784  ;;  %v11491_v0 = vmov 0.0   ;;  %vm11492_vm0 = vmmov 0   ;;  %v11657_v1 = vld [vmem:[%s14743_s2 + $0x8] sm:$0xff]   ;;  %vm152_vm1 = vcmask 80896  }
  0x28   :  { %10104 = vmatprep.subr.bf16.mxu0 %v11491_v0  ;;  %75 = vst [vmem:[#allocation2] sm:$0xff] %v11491_v0  ;;  %76 = vst [vmem:[#allocation2 + $0x8] sm:$0xff] %v11491_v0  ;;  %10134 = vmatprep.subr.bf16.mxu1 %v11491_v0  ;;  %v11662_v2 = vld [vmem:[%s14743_s2] sm:$0xff]   ;;  %v128_v4 = vld [vmem:[%s14741_s0 + $0x8] sm:$0xff]  ;;  %vm312_vm2 = vcmask 130048   ;;  %vm1086_vm3 = vcmask 125952  }
  0x29   :  { %77 = vst [vmem:[#allocation2 + $0x10] sm:$0xff] %v11491_v0  ;;  %78 = vst [vmem:[#allocation2 + $0x18] sm:$0xff] %v11491_v0  ;;  %10106 = vmatprep.mubr.msk.bf16.mxu0 %vm11492_vm0, %v11491_v0  ;;  %10136 = vmatprep.mubr.msk.bf16.mxu1 %vm11492_vm0, %v11491_v0  ;;  %v127_v3 = vld [vmem:[%s14741_s0] sm:$0xff]  ;;  %v129_v5 = vld [vmem:[%s14741_s0 + $0x10] sm:$0xff]  ;;  %vm3270_vm4 = vcmask 257024   ;;  %vm2649_vm5 = vcmask 261120  }
  0x2a   :  { %79 = vst [vmem:[#allocation2 + $0x20] sm:$0xff] %v11491_v0  ;;  %80 = vst [vmem:[#allocation2 + $0x28] sm:$0xff] %v11491_v0  ;;  %10105 = vmatpush3.bf16.msra.mxu0 %v11657_v1  ;;  %10135 = vmatpush3.bf16.msra.mxu1 %v11662_v2  ;;  %v130_v6 = vld [vmem:[%s14741_s0 + $0x18] sm:$0xff]  ;;  %v131_v7 = vld [vmem:[%s14741_s0 + $0x20] sm:$0xff]  ;;  %vm2661_vm6 = vcmask 254976   ;;  %vm3715_vm7 = vcmask 253952  }
  0x2b   :  { %81 = vst [vmem:[#allocation2 + $0x30] sm:$0xff] %v11491_v0  ;;  %82 = vst [vmem:[#allocation2 + $0x38] sm:$0xff] %v11491_v0  ;;  %10164 = vmatprep.subr.bf16.mxu0 %v11491_v0  ;;  %10194 = vmatprep.subr.bf16.mxu1 %v11491_v0  ;;  %v132_v8 = vld [vmem:[%s14741_s0 + $0x28] sm:$0xff]  ;;  %v133_v9 = vld [vmem:[%s14741_s0 + $0x30] sm:$0xff]  ;;  %vm4801_vm8 = vcmask 519168   ;;  %vm4485_vm9 = vcmask 523264  }
  0x2c   :  { %83 = vst [vmem:[#allocation2 + $0x40] sm:$0xff] %v11491_v0  ;;  %84 = vst [vmem:[#allocation2 + $0x48] sm:$0xff] %v11491_v0  ;;  %v134_v10 = vld [vmem:[%s14741_s0 + $0x38] sm:$0xff]  ;;  %v135_v11 = vld [vmem:[%s14741_s0 + $0x40] sm:$0xff]  ;;  %vm4487_vm10 = vcmask 520192   ;;  %vm5208_vm11 = vcmask 522240  }
  0x2d   :  { %85 = vst [vmem:[#allocation2 + $0x50] sm:$0xff] %v11491_v0  ;;  %86 = vst [vmem:[#allocation2 + $0x58] sm:$0xff] %v11491_v0  ;;  %v136_v12 = vld [vmem:[%s14741_s0 + $0x48] sm:$0xff]  ;;  %v137_v13 = vld [vmem:[%s14741_s0 + $0x50] sm:$0xff]  ;;  %vm5895_vm12 = vcmask 1043456   ;;  %vm6727_vm13 = vcmask 1041408  }
  0x2e   :  { %87 = vst [vmem:[#allocation2 + $0x60] sm:$0xff] %v11491_v0  ;;  %88 = vst [vmem:[#allocation2 + $0x68] sm:$0xff] %v11491_v0  ;;  %v138_v14 = vld [vmem:[%s14741_s0 + $0x58] sm:$0xff]  ;;  %v139_v15 = vld [vmem:[%s14741_s0 + $0x60] sm:$0xff]  ;;  %vm9087_vm14 = vcmask 33792  }
  0x2f   :  { %89 = vst [vmem:[#allocation2 + $0x70] sm:$0xff] %v11491_v0  ;;  %90 = vst [vmem:[#allocation2 + $0x78] sm:$0xff] %v11491_v0  ;;  %v140_v16 = vld [vmem:[%s14741_s0 + $0x68] sm:$0xff]  ;;  %v141_v17 = vld [vmem:[%s14741_s0 + $0x70] sm:$0xff] }
  0x30   :  { %91 = vst [vmem:[#allocation2 + $0x80] sm:$0xff] %v11491_v0  ;;  %92 = vst [vmem:[#allocation2 + $0x88] sm:$0xff] %v11491_v0  ;;  %v11728_v18 = vld [vmem:[%s14743_s2 + $0x10] sm:$0xff]   ;;  %v11183_v19 = vld [vmem:[%s14743_s2 + $0x18] sm:$0xff]  }
  0x31   :  { %93 = vst [vmem:[#allocation2 + $0x90] sm:$0xff] %v11491_v0  ;;  %94 = vst [vmem:[#allocation2 + $0x98] sm:$0xff] %v11491_v0  ;;  %v142_v20 = vld [vmem:[%s14741_s0 + $0x78] sm:$0xff]  ;;  %v143_v21 = vld [vmem:[%s14741_s0 + $0x80] sm:$0xff] }
  0x32   :  { %95 = vst [vmem:[#allocation2 + $0xa0] sm:$0xff] %v11491_v0  ;;  %96 = vst [vmem:[#allocation2 + $0xa8] sm:$0xff] %v11491_v0  ;;  %v144_v22 = vld [vmem:[%s14741_s0 + $0x88] sm:$0xff]  ;;  %v145_v25 = vld [vmem:[%s14741_s0 + $0x90] sm:$0xff] }
  0x33   :  { %97 = vst [vmem:[#allocation2 + $0xb0] sm:$0xff] %v11491_v0  ;;  %98 = vst [vmem:[#allocation2 + $0xb8] sm:$0xff] %v11491_v0  ;;  %v146_v28 = vld [vmem:[%s14741_s0 + $0x98] sm:$0xff]  ;;  %v147_v31 = vld [vmem:[%s14741_s0 + $0xa0] sm:$0xff] }
  0x34   :  { %99 = vst [vmem:[#allocation2 + $0xc0] sm:$0xff] %v11491_v0  ;;  %100 = vst [vmem:[#allocation2 + $0xc8] sm:$0xff] %v11491_v0  ;;  %v148_v32 = vld [vmem:[%s14741_s0 + $0xa8] sm:$0xff]  ;;  %v149_v33 = vld [vmem:[%s14741_s0 + $0xb0] sm:$0xff] }
  0x35   :  { %101 = vst [vmem:[#allocation2 + $0xd0] sm:$0xff] %v11491_v0  ;;  %102 = vst [vmem:[#allocation2 + $0xd8] sm:$0xff] %v11491_v0  ;;  %v150_v34 = vld [vmem:[%s14741_s0 + $0xb8] sm:$0xff]  ;;  %v151_v36 = vld [vmem:[%s14741_s0 + $0xc0] sm:$0xff] }
  0x36   :  { %103 = vst [vmem:[#allocation2 + $0xe0] sm:$0xff] %v11491_v0  ;;  %104 = vst [vmem:[#allocation2 + $0xe8] sm:$0xff] %v11491_v0  ;;  %v178_v50 = vld [vmem:[%s14741_s0 + $0xc8] sm:$0xff]  ;;  %v179_v53 = vld [vmem:[%s14741_s0 + $0xd0] sm:$0xff] }
  0x37   :  { %105 = vst [vmem:[#allocation2 + $0xf0] sm:$0xff] %v11491_v0  ;;  %106 = vst [vmem:[#allocation2 + $0xf8] sm:$0xff] %v11491_v0  ;;  %v180_v54 = vld [vmem:[%s14741_s0 + $0xd8] sm:$0xff]  ;;  %v181_v55 = vld [vmem:[%s14741_s0 + $0xe0] sm:$0xff] }
  0x38   :  { %107 = vst [vmem:[#allocation2 + $0x100] sm:$0xff] %v11491_v0  ;;  %108 = vst [vmem:[#allocation2 + $0x108] sm:$0xff] %v11491_v0  ;;  %v182_v56 = vld [vmem:[%s14741_s0 + $0xe8] sm:$0xff]  ;;  %v183_v59 = vld [vmem:[%s14741_s0 + $0xf0] sm:$0xff] }
  0x39   :  { %109 = vst [vmem:[#allocation2 + $0x110] sm:$0xff] %v11491_v0  ;;  %110 = vst [vmem:[#allocation2 + $0x118] sm:$0xff] %v11491_v0  ;;  %v184_v60 = vld [vmem:[%s14741_s0 + $0xf8] sm:$0xff]  ;;  %v185_v61 = vld [vmem:[%s14741_s0 + $0x100] sm:$0xff] }
  0x3a   :  { %111 = vst [vmem:[#allocation2 + $0x120] sm:$0xff] %v11491_v0  ;;  %112 = vst [vmem:[#allocation2 + $0x128] sm:$0xff] %v11491_v0  ;;  %v186_v62 = vld [vmem:[%s14741_s0 + $0x108] sm:$0xff]  ;;  %v187_v63 = vld [vmem:[%s14741_s0 + $0x110] sm:$0xff] }
  0x3b   :  { %113 = vst [vmem:[#allocation2 + $0x130] sm:$0xff] %v11491_v0  ;;  %114 = vst [vmem:[#allocation2 + $0x138] sm:$0xff] %v11491_v0 }
  0x3c   :  { %115 = vst [vmem:[#allocation2 + $0x140] sm:$0xff] %v11491_v0  ;;  %116 = vst [vmem:[#allocation2 + $0x148] sm:$0xff] %v11491_v0 }
  0x3d   :  { %117 = vst [vmem:[#allocation2 + $0x150] sm:$0xff] %v11491_v0  ;;  %118 = vst [vmem:[#allocation2 + $0x158] sm:$0xff] %v11491_v0 }
  0x3e   :  { %119 = vst [vmem:[#allocation2 + $0x160] sm:$0xff] %v11491_v0  ;;  %120 = vst [vmem:[#allocation2 + $0x168] sm:$0xff] %v11491_v0 }
  0x3f   :  { %121 = vst [vmem:[#allocation2 + $0x170] sm:$0xff] %v11491_v0  ;;  %122 = vst [vmem:[#allocation2 + $0x178] sm:$0xff] %v11491_v0 }
  0x40   :  { %123 = vst [vmem:[#allocation2 + $0x180] sm:$0xff] %v11491_v0  ;;  %124 = vst [vmem:[#allocation2 + $0x188] sm:$0xff] %v11491_v0 }
  0x41   :  { %125 = vst [vmem:[#allocation2 + $0x190] sm:$0xff] %v11491_v0  ;;  %126 = vst [vmem:[#allocation2 + $0x198] sm:$0xff] %v11491_v0 }
  0x42   :  { %153 = vst.msk [vmem:[#allocation2 + $0x2] sm:$0xff] %vm152_vm1, %v127_v3  ;;  %154 = vst.msk [vmem:[#allocation2 + $0xa] sm:$0xff] %vm152_vm1, %v128_v4  ;;  %v188_v3 = vld [vmem:[%s14741_s0 + $0x118] sm:$0xff]  ;;  %v189_v4 = vld [vmem:[%s14741_s0 + $0x120] sm:$0xff] }
  0x43   :  { %155 = vst.msk [vmem:[#allocation2 + $0x12] sm:$0xff] %vm152_vm1, %v129_v5  ;;  %156 = vst.msk [vmem:[#allocation2 + $0x1a] sm:$0xff] %vm152_vm1, %v130_v6  ;;  %v190_v6 = vld [vmem:[%s14741_s0 + $0x128] sm:$0xff] }
  0x44   :  { %157 = vst.msk [vmem:[#allocation2 + $0x22] sm:$0xff] %vm152_vm1, %v131_v7  ;;  %158 = vst.msk [vmem:[#allocation2 + $0x2a] sm:$0xff] %vm152_vm1, %v132_v8  ;;  %v191_v7 = vld [vmem:[%s14741_s0 + $0x130] sm:$0xff]  ;;  %v192_v8 = vld [vmem:[%s14741_s0 + $0x138] sm:$0xff] }
  0x45   :  { %159 = vst.msk [vmem:[#allocation2 + $0x32] sm:$0xff] %vm152_vm1, %v133_v9  ;;  %160 = vst.msk [vmem:[#allocation2 + $0x3a] sm:$0xff] %vm152_vm1, %v134_v10  ;;  %v193_v9 = vld [vmem:[%s14741_s0 + $0x140] sm:$0xff] }
  0x46   :  { %161 = vst.msk [vmem:[#allocation2 + $0x42] sm:$0xff] %vm152_vm1, %v135_v11  ;;  %162 = vst.msk [vmem:[#allocation2 + $0x4a] sm:$0xff] %vm152_vm1, %v136_v12 }
  0x47   :  { %163 = vst.msk [vmem:[#allocation2 + $0x52] sm:$0xff] %vm152_vm1, %v137_v13  ;;  %164 = vst.msk [vmem:[#allocation2 + $0x5a] sm:$0xff] %vm152_vm1, %v138_v14  ;;  %v194_v13 = vld [vmem:[%s14741_s0 + $0x148] sm:$0xff]  ;;  %v195_v14 = vld [vmem:[%s14741_s0 + $0x150] sm:$0xff] }
  0x48   :  { %165 = vst.msk [vmem:[#allocation2 + $0x62] sm:$0xff] %vm152_vm1, %v139_v15  ;;  %166 = vst.msk [vmem:[#allocation2 + $0x6a] sm:$0xff] %vm152_vm1, %v140_v16  ;;  %v196_v15 = vld [vmem:[%s14741_s0 + $0x158] sm:$0xff]  ;;  %v197_v16 = vld [vmem:[%s14741_s0 + $0x160] sm:$0xff] }
  0x49   :  { %167 = vst.msk [vmem:[#allocation2 + $0x72] sm:$0xff] %vm152_vm1, %v141_v17  ;;  %v274_v23 = vld [vmem:[#allocation2 + $0x1] ss:$2 sm:$0xff]  ;;  %v241_v24 = vld [vmem:[#allocation2] ss:$2 sm:$0xff]  ;;  %168 = vst.msk [vmem:[#allocation2 + $0x7a] sm:$0xff] %vm152_vm1, %v142_v20 }
  0x4a   :  { %169 = vst.msk [vmem:[#allocation2 + $0x82] sm:$0xff] %vm152_vm1, %v143_v21  ;;  %170 = vst.msk [vmem:[#allocation2 + $0x8a] sm:$0xff] %vm152_vm1, %v144_v22  ;;  %v276_v26 = vld [vmem:[#allocation2 + $0x11] ss:$2 sm:$0xff]  ;;  %v243_v27 = vld [vmem:[#allocation2 + $0x10] ss:$2 sm:$0xff] }
  0x4b   :  { %171 = vst.msk [vmem:[#allocation2 + $0x92] sm:$0xff] %vm152_vm1, %v145_v25  ;;  %v299_v29 = vpack.c.bf16 %v276_v26, %v274_v23  ;;  %v266_v30 = vpack.c.bf16 %v243_v27, %v241_v24  ;;  %172 = vst.msk [vmem:[#allocation2 + $0x9a] sm:$0xff] %vm152_vm1, %v146_v28  ;;  %v278_v35 = vld [vmem:[#allocation2 + $0x21] ss:$2 sm:$0xff]  ;;  %v245_v38 = vld [vmem:[#allocation2 + $0x20] ss:$2 sm:$0xff] }
  0x4c   :  { %173 = vst.msk [vmem:[#allocation2 + $0xa2] sm:$0xff] %vm152_vm1, %v147_v31  ;;  %174 = vst.msk [vmem:[#allocation2 + $0xaa] sm:$0xff] %vm152_vm1, %v148_v32  ;;  %v280_v37 = vld [vmem:[#allocation2 + $0x31] ss:$2 sm:$0xff]  ;;  %v247_v39 = vld [vmem:[#allocation2 + $0x30] ss:$2 sm:$0xff] }
  0x4d   :  { %175 = vst.msk [vmem:[#allocation2 + $0xb2] sm:$0xff] %vm152_vm1, %v149_v33  ;;  %10107 = vmatmul.mubr.msk.bf16.vlgmr.msra.gmra.mrb[0].mxu0 %vm312_vm2, %v299_v29  ;;  %10137 = vmatmul.mubr.msk.bf16.vlgmr.msra.gmra.mrb[0].mxu1 %vm312_vm2, %v266_v30  ;;  %176 = vst.msk [vmem:[#allocation2 + $0xba] sm:$0xff] %vm152_vm1, %v150_v34  ;;  %v300_v40 = vpack.c.bf16 %v280_v37, %v278_v35  ;;  %v267_v41 = vpack.c.bf16 %v247_v39, %v245_v38  ;;  %v282_v42 = vld [vmem:[#allocation2 + $0x41] ss:$2 sm:$0xff]  ;;  %v249_v44 = vld [vmem:[#allocation2 + $0x40] ss:$2 sm:$0xff] }
  0x4e   :  { %10165 = vmatpush3.bf16.msra.mxu0 %v11728_v18  ;;  %10195 = vmatpush3.bf16.msra.mxu1 %v11183_v19  ;;  %177 = vst.msk [vmem:[#allocation2 + $0xc2] sm:$0xff] %vm152_vm1, %v151_v36  ;;  %v284_v43 = vld [vmem:[#allocation2 + $0x51] ss:$2 sm:$0xff]  ;;  %v251_v45 = vld [vmem:[#allocation2 + $0x50] ss:$2 sm:$0xff]  ;;  %203 = vst.msk [vmem:[#allocation2 + $0xd2] sm:$0xff] %vm152_vm1, %v178_v50 }
  0x4f   :  { %10110 = vmatprep.mubr.msk.bf16.mxu0 %vm11492_vm0, %v11491_v0  ;;  %10140 = vmatprep.mubr.msk.bf16.mxu1 %vm11492_vm0, %v11491_v0  ;;  %v301_v46 = vpack.c.bf16 %v284_v43, %v282_v42  ;;  %v268_v47 = vpack.c.bf16 %v251_v45, %v249_v44  ;;  %v286_v48 = vld [vmem:[#allocation2 + $0x61] ss:$2 sm:$0xff]  ;;  %v253_v49 = vld [vmem:[#allocation2 + $0x60] ss:$2 sm:$0xff]  ;;  %204 = vst.msk [vmem:[#allocation2 + $0xda] sm:$0xff] %vm152_vm1, %v179_v53  ;;  %205 = vst.msk [vmem:[#allocation2 + $0xe2] sm:$0xff] %vm152_vm1, %v180_v54 }
  0x50   :  { %10224 = vmatprep.subr.bf16.mxu0 %v11491_v0  ;;  %10254 = vmatprep.subr.bf16.mxu1 %v11491_v0  ;;  %v288_v51 = vld [vmem:[#allocation2 + $0x71] ss:$2 sm:$0xff]  ;;  %v255_v52 = vld [vmem:[#allocation2 + $0x70] ss:$2 sm:$0xff]  ;;  %206 = vst.msk [vmem:[#allocation2 + $0xea] sm:$0xff] %vm152_vm1, %v181_v55  ;;  %207 = vst.msk [vmem:[#allocation2 + $0xf2] sm:$0xff] %vm152_vm1, %v182_v56 }
  0x51   :  { %v302_v57 = vpack.c.bf16 %v288_v51, %v286_v48  ;;  %v269_v58 = vpack.c.bf16 %v255_v52, %v253_v49  ;;  %208 = vst.msk [vmem:[#allocation2 + $0xfa] sm:$0xff] %vm152_vm1, %v183_v59  ;;  %209 = vst.msk [vmem:[#allocation2 + $0x102] sm:$0xff] %vm152_vm1, %v184_v60  ;;  %v290_v5 = vld [vmem:[#allocation2 + $0x81] ss:$2 sm:$0xff]  ;;  %v257_v11 = vld [vmem:[#allocation2 + $0x80] ss:$2 sm:$0xff] }
  0x52   :  { %210 = vst.msk [vmem:[#allocation2 + $0x10a] sm:$0xff] %vm152_vm1, %v185_v61  ;;  %211 = vst.msk [vmem:[#allocation2 + $0x112] sm:$0xff] %vm152_vm1, %v186_v62  ;;  %v292_v10 = vld [vmem:[#allocation2 + $0x91] ss:$2 sm:$0xff]  ;;  %v259_v12 = vld [vmem:[#allocation2 + $0x90] ss:$2 sm:$0xff] }
  0x53   :  { %212 = vst.msk [vmem:[#allocation2 + $0x11a] sm:$0xff] %vm152_vm1, %v187_v63  ;;  %213 = vst.msk [vmem:[#allocation2 + $0x122] sm:$0xff] %vm152_vm1, %v188_v3  ;;  %v303_v17 = vpack.c.bf16 %v292_v10, %v290_v5  ;;  %v270_v19 = vpack.c.bf16 %v259_v12, %v257_v11  ;;  %v198_v20 = vld [vmem:[%s14741_s0 + $0x168] sm:$0xff]  ;;  %v199_v21 = vld [vmem:[%s14741_s0 + $0x170] sm:$0xff] }
  0x54   :  { %214 = vst.msk [vmem:[#allocation2 + $0x12a] sm:$0xff] %vm152_vm1, %v189_v4  ;;  %215 = vst.msk [vmem:[#allocation2 + $0x132] sm:$0xff] %vm152_vm1, %v190_v6  ;;  %v200_v22 = vld [vmem:[%s14741_s0 + $0x178] sm:$0xff]  ;;  %v201_v23 = vld [vmem:[%s14741_s0 + $0x180] sm:$0xff] }
  0x55   :  { %10111 = vmatmul.mubr.msk.bf16.gmra.mrb[4].mxu0 %vm312_vm2, %v300_v40  ;;  %10141 = vmatmul.mubr.msk.bf16.gmra.mrb[4].mxu1 %vm312_vm2, %v267_v41  ;;  %216 = vst.msk [vmem:[#allocation2 + $0x13a] sm:$0xff] %vm152_vm1, %v191_v7  ;;  %217 = vst.msk [vmem:[#allocation2 + $0x142] sm:$0xff] %vm152_vm1, %v192_v8  ;;  %v202_v24 = vld [vmem:[%s14741_s0 + $0x188] sm:$0xff]  ;;  %v296_v27 = vld [vmem:[#allocation2 + $0xb1] ss:$2 sm:$0xff] }
  0x56   :  { %10114 = vmatprep.mubr.msk.bf16.mxu0 %vm11492_vm0, %v11491_v0  ;;  %10144 = vmatprep.mubr.msk.bf16.mxu1 %vm11492_vm0, %v11491_v0  ;;  %218 = vst.msk [vmem:[#allocation2 + $0x14a] sm:$0xff] %vm152_vm1, %v193_v9  ;;  %219 = vst.msk [vmem:[#allocation2 + $0x152] sm:$0xff] %vm152_vm1, %v194_v13  ;;  %v294_v25 = vld [vmem:[#allocation2 + $0xa1] ss:$2 sm:$0xff]  ;;  %v261_v26 = vld [vmem:[#allocation2 + $0xa0] ss:$2 sm:$0xff] }
  0x57   :  { %220 = vst.msk [vmem:[#allocation2 + $0x15a] sm:$0xff] %vm152_vm1, %v195_v14  ;;  %221 = vst.msk [vmem:[#allocation2 + $0x162] sm:$0xff] %vm152_vm1, %v196_v15  ;;  %v263_v28 = vld [vmem:[#allocation2 + $0xb0] ss:$2 sm:$0xff]  ;;  %v304_v29 = vpack.c.bf16 %v296_v27, %v294_v25  ;;  %v699_v37 = vld [vmem:[#allocation2 + $0x3] ss:$2 sm:$0xff] }
  0x58   :  { %222 = vst.msk [vmem:[#allocation2 + $0x16a] sm:$0xff] %vm152_vm1, %v197_v16  ;;  %223 = vst.msk [vmem:[#allocation2 + $0x172] sm:$0xff] %vm152_vm1, %v198_v20  ;;  %v271_v30 = vpack.c.bf16 %v263_v28, %v261_v26  ;;  %v298_v31 = vld [vmem:[#allocation2 + $0xc1] ss:$2 sm:$0xf] }
  0x59   :  { %224 = vst.msk [vmem:[#allocation2 + $0x17a] sm:$0xff] %vm152_vm1, %v199_v21  ;;  %225 = vst.msk [vmem:[#allocation2 + $0x182] sm:$0xff] %vm152_vm1, %v200_v22  ;;  %v265_v32 = vld [vmem:[#allocation2 + $0xc0] ss:$2 sm:$0xf]  ;;  %v305_v33 = vpack.c.bf16 %v298_v31, %v298_v31 }
  0x5a   :  { %226 = vst.msk [vmem:[#allocation2 + $0x18a] sm:$0xff] %vm152_vm1, %v201_v23  ;;  %227 = vst.msk [vmem:[#allocation2 + $0x192] sm:$0xff] %vm152_vm1, %v202_v24  ;;  %v272_v34 = vpack.c.bf16 %v265_v32, %v265_v32  ;;  %v538_v35 = vld [vmem:[#allocation2 + $0x2] ss:$2 sm:$0xff]  ;;  %v540_v36 = vld [vmem:[#allocation2 + $0x12] ss:$2 sm:$0xff] }
  0x5b   :  { %v701_v38 = vld [vmem:[#allocation2 + $0x13] ss:$2 sm:$0xff]  ;;  %v563_v39 = vpack.c.bf16 %v540_v36, %v538_v35  ;;  %v542_v42 = vld [vmem:[#allocation2 + $0x22] ss:$2 sm:$0xff]  ;;  %v544_v43 = vld [vmem:[#allocation2 + $0x32] ss:$2 sm:$0xff] }
  0x5c   :  { %v724_v40 = vpack.c.bf16 %v701_v38, %v699_v37  ;;  %v11924_v41 = vld [vmem:[%s14743_s2 + $0x20] sm:$0xff]   ;;  %v1129_v16 = vld [vmem:[#allocation2 + $0xd1] ss:$2 sm:$0xff] }
  0x5d   :  { %10115 = vmatmul.mubr.msk.bf16.gmra.mrb[8].mxu0 %vm312_vm2, %v301_v46  ;;  %10145 = vmatmul.mubr.msk.bf16.gmra.mrb[8].mxu1 %vm312_vm2, %v268_v47  ;;  %v703_v44 = vld [vmem:[#allocation2 + $0x23] ss:$2 sm:$0xff]  ;;  %v705_v45 = vld [vmem:[#allocation2 + $0x33] ss:$2 sm:$0xff]  ;;  %v564_v46 = vpack.c.bf16 %v544_v43, %v542_v42  ;;  %v546_v48 = vld [vmem:[#allocation2 + $0x42] ss:$2 sm:$0xff] }
  0x5e   :  { %10118 = vmatprep.mubr.msk.bf16.mxu0 %vm11492_vm0, %v11491_v0  ;;  %10148 = vmatprep.mubr.msk.bf16.mxu1 %vm11492_vm0, %v11491_v0  ;;  %v725_v47 = vpack.c.bf16 %v705_v45, %v703_v44  ;;  %v548_v49 = vld [vmem:[#allocation2 + $0x52] ss:$2 sm:$0xff]  ;;  %v709_v50 = vld [vmem:[#allocation2 + $0x53] ss:$2 sm:$0xff]  ;;  %v550_v53 = vld [vmem:[#allocation2 + $0x62] ss:$2 sm:$0xff] }
  0x5f   :  { %v565_v51 = vpack.c.bf16 %v548_v49, %v546_v48  ;;  %v552_v54 = vld [vmem:[#allocation2 + $0x72] ss:$2 sm:$0xff]  ;;  %v711_v55 = vld [vmem:[#allocation2 + $0x63] ss:$2 sm:$0xff]  ;;  %v713_v56 = vld [vmem:[#allocation2 + $0x73] ss:$2 sm:$0xff] }
  0x60   :  { %v554_v59 = vld [vmem:[#allocation2 + $0x82] ss:$2 sm:$0xff]  ;;  %v556_v60 = vld [vmem:[#allocation2 + $0x92] ss:$2 sm:$0xff]  ;;  %v715_v61 = vld [vmem:[#allocation2 + $0x83] ss:$2 sm:$0xff] }
  0x61   :  { %v717_v62 = vld [vmem:[#allocation2 + $0x93] ss:$2 sm:$0xff]  ;;  %v567_v63 = vpack.c.bf16 %v556_v60, %v554_v59  ;;  %v558_v4 = vld [vmem:[#allocation2 + $0xa2] ss:$2 sm:$0xff]  ;;  %v560_v5 = vld [vmem:[#allocation2 + $0xb2] ss:$2 sm:$0xff] }
  0x62   :  { %v728_v3 = vpack.c.bf16 %v717_v62, %v715_v61  ;;  %v719_v6 = vld [vmem:[#allocation2 + $0xa3] ss:$2 sm:$0xff]  ;;  %v721_v7 = vld [vmem:[#allocation2 + $0xb3] ss:$2 sm:$0xff]  ;;  %v568_v8 = vpack.c.bf16 %v560_v5, %v558_v4  ;;  %v860_v14 = vld [vmem:[#allocation2 + $0x4] ss:$2 sm:$0xff] }
  0x63   :  { %v729_v9 = vpack.c.bf16 %v721_v7, %v719_v6  ;;  %v562_v10 = vld [vmem:[#allocation2 + $0xc2] ss:$2 sm:$0xf]  ;;  %v723_v11 = vld [vmem:[#allocation2 + $0xc3] ss:$2 sm:$0xf] }
  0x64   :  { %v569_v12 = vpack.c.bf16 %v562_v10, %v562_v10  ;;  %v730_v13 = vpack.c.bf16 %v723_v11, %v723_v11  ;;  %v862_v15 = vld [vmem:[#allocation2 + $0x14] ss:$2 sm:$0xff]  ;;  %v864_v21 = vld [vmem:[#allocation2 + $0x24] ss:$2 sm:$0xff]  ;;  %v1133_v23 = vld [vmem:[#allocation2 + $0xf1] ss:$2 sm:$0xff] }
  0x65   :  { %10119 = vmatmul.mubr.msk.bf16.gmra.mrb[12].mxu0 %vm312_vm2, %v302_v57  ;;  %10149 = vmatmul.mubr.msk.bf16.gmra.mrb[12].mxu1 %vm312_vm2, %v269_v58  ;;  %v566_v57 = vpack.c.bf16 %v552_v54, %v550_v53  ;;  %v727_v58 = vpack.c.bf16 %v713_v56, %v711_v55  ;;  %v866_v22 = vld [vmem:[#allocation2 + $0x34] ss:$2 sm:$0xff]  ;;  %v1135_v24 = vld [vmem:[#allocation2 + $0x101] ss:$2 sm:$0xff]  ;;  %v868_v27 = vld [vmem:[#allocation2 + $0x44] ss:$2 sm:$0xff] }
  0x66   :  { %10122 = vmatprep.mubr.msk.bf16.mxu0 %vm11492_vm0, %v11491_v0  ;;  %10152 = vmatprep.mubr.msk.bf16.mxu1 %vm11492_vm0, %v11491_v0  ;;  %v886_v25 = vpack.c.bf16 %v866_v22, %v864_v21  ;;  %v1155_v26 = vpack.c.bf16 %v1135_v24, %v1133_v23  ;;  %v870_v28 = vld [vmem:[#allocation2 + $0x54] ss:$2 sm:$0xff]  ;;  %v872_v31 = vld [vmem:[#allocation2 + $0x64] ss:$2 sm:$0xff] }
  0x67   :  { %v874_v32 = vld [vmem:[#allocation2 + $0x74] ss:$2 sm:$0xff]  ;;  %v876_v37 = vld [vmem:[#allocation2 + $0x84] ss:$2 sm:$0xff]  ;;  %2084 = vst.msk [vmem:[#allocation2 + $0x66] sm:$0xf] %vm1086_vm3, %v11491_v0 }
  0x68   :  { %v888_v35 = vpack.c.bf16 %v874_v32, %v872_v31  ;;  %v878_v38 = vld [vmem:[#allocation2 + $0x94] ss:$2 sm:$0xff]  ;;  %v880_v44 = vld [vmem:[#allocation2 + $0xa4] ss:$2 sm:$0xff] }
  0x69   :  { %v889_v42 = vpack.c.bf16 %v878_v38, %v876_v37  ;;  %v882_v45 = vld [vmem:[#allocation2 + $0xb4] ss:$2 sm:$0xff] }
  0x6a   :  { %v890_v48 = vpack.c.bf16 %v882_v45, %v880_v44  ;;  %v1096_v53 = vld [vmem:[#allocation2 + $0xd0] ss:$2 sm:$0xff]  ;;  %v1098_v54 = vld [vmem:[#allocation2 + $0xe0] ss:$2 sm:$0xff] }
  0x6b   :  { %v1380_v55 = vld [vmem:[#allocation2 + $0xd2] ss:$2 sm:$0xff]  ;;  %v1382_v56 = vld [vmem:[#allocation2 + $0xe2] ss:$2 sm:$0xff] }
  0x6c   :  { %v1100_v59 = vld [vmem:[#allocation2 + $0xf0] ss:$2 sm:$0xff]  ;;  %v1102_v61 = vld [vmem:[#allocation2 + $0x100] ss:$2 sm:$0xff] }
  0x6d   :  { %10123 = vmatmul.mubr.msk.bf16.gmra.mrb[16].mxu0 %vm312_vm2, %v303_v17  ;;  %10153 = vmatmul.mubr.msk.bf16.gmra.mrb[16].mxu1 %vm312_vm2, %v270_v19  ;;  %v1131_v17 = vld [vmem:[#allocation2 + $0xe1] ss:$2 sm:$0xff]  ;;  %v885_v19 = vpack.c.bf16 %v862_v15, %v860_v14  ;;  %v11390_v60 = vld [vmem:[%s14743_s2 + $0x18] sm:$0xff]   ;;  %v1390_v7 = vld [vmem:[#allocation2 + $0x122] ss:$2 sm:$0xff] }
  0x6e   :  { %10126 = vmatprep.mubr.msk.bf16.mxu0 %vm11492_vm0, %v11491_v0  ;;  %10156 = vmatprep.mubr.msk.bf16.mxu1 %vm11492_vm0, %v11491_v0  ;;  %v1154_v20 = vpack.c.bf16 %v1131_v17, %v1129_v16  ;;  %v1384_v62 = vld [vmem:[#allocation2 + $0xf2] ss:$2 sm:$0xff] }
  0x6f   :  { %v1104_v5 = vld [vmem:[#allocation2 + $0x110] ss:$2 sm:$0xff]  ;;  %v1110_v11 = vld [vmem:[#allocation2 + $0x140] ss:$2 sm:$0xff] }
  0x70   :  { %v1388_v6 = vld [vmem:[#allocation2 + $0x112] ss:$2 sm:$0xff] }
  0x71   :  { %v1108_v10 = vld [vmem:[#allocation2 + $0x130] ss:$2 sm:$0xff]  ;;  %v1114_v17 = vld [vmem:[#allocation2 + $0x160] ss:$2 sm:$0xff] }
  0x72   :  { %v1124_v14 = vpack.c.bf16 %v1110_v11, %v1108_v10  ;;  %v1112_v16 = vld [vmem:[#allocation2 + $0x150] ss:$2 sm:$0xff]  ;;  %v1118_v24 = vld [vmem:[#allocation2 + $0x180] ss:$2 sm:$0xff]  ;;  %v1543_v11 = vld [vmem:[#allocation2 + $0x113] ss:$2 sm:$0xff] }
  0x73   :  { %v1125_v21 = vpack.c.bf16 %v1114_v17, %v1112_v16  ;;  %v1116_v23 = vld [vmem:[#allocation2 + $0x170] ss:$2 sm:$0xff] }
  0x74   :  { %v1690_v44 = vld [vmem:[#allocation2 + $0xd4] ss:$2 sm:$0xff]  ;;  %v1692_v45 = vld [vmem:[#allocation2 + $0xe4] ss:$2 sm:$0xff] }
  0x75   :  { %10127 = vmatmul.mubr.msk.bf16.gmra.mrb[20].mxu0 %vm312_vm2, %v304_v29  ;;  %10157 = vmatmul.mubr.msk.bf16.gmra.mrb[20].mxu1 %vm312_vm2, %v271_v30  ;;  %v1137_v29 = vld [vmem:[#allocation2 + $0x111] ss:$2 sm:$0xff]  ;;  %v1139_v30 = vld [vmem:[#allocation2 + $0x121] ss:$2 sm:$0xff] }
  0x76   :  { %10130 = vmatprep.mubr.msk.bf16.mxu0 %vm11492_vm0, %v11491_v0  ;;  %10160 = vmatprep.mubr.msk.bf16.mxu1 %vm11492_vm0, %v11491_v0 }
  0x7d   :  { %10131 = vmatmul.mubr.msk.bf16.gmra.mrb[24].mxu0 %vm312_vm2, %v305_v33  ;;  %10161 = vmatmul.mubr.msk.bf16.gmra.mrb[24].mxu1 %vm312_vm2, %v272_v34  ;;  %v1141_v33 = vld [vmem:[#allocation2 + $0x131] ss:$2 sm:$0xff]  ;;  %v1143_v34 = vld [vmem:[#allocation2 + $0x141] ss:$2 sm:$0xff] }
  0x7e   :  { %10166 = vmatprep.mubr.msk.bf16.mxu0 %vm11492_vm0, %v11491_v0  ;;  %10196 = vmatprep.mubr.msk.bf16.mxu1 %vm11492_vm0, %v11491_v0  ;;  %v1157_v36 = vpack.c.bf16 %v1143_v34, %v1141_v33 }
  0x85   :  { %10167 = vmatmul.mubr.msk.bf16.vlgmr.msra.gmra.mrb[28].mxu0 %vm312_vm2, %v563_v39  ;;  %10197 = vmatmul.mubr.msk.bf16.vlgmr.msra.gmra.mrb[28].mxu1 %vm312_vm2, %v724_v40  ;;  %v1145_v39 = vld [vmem:[#allocation2 + $0x151] ss:$2 sm:$0xff]  ;;  %v1147_v40 = vld [vmem:[#allocation2 + $0x161] ss:$2 sm:$0xff] }
  0x86   :  { %10225 = vmatpush3.bf16.msra.mxu0 %v11924_v41  ;;  %10255 = vmatpush3.bf16.msra.mxu1 %v11657_v1  ;;  %v707_v1 = vld [vmem:[#allocation2 + $0x43] ss:$2 sm:$0xff]  ;;  %v1158_v43 = vpack.c.bf16 %v1147_v40, %v1145_v39 }
  0x87   :  { %10170 = vmatprep.mubr.msk.bf16.mxu0 %vm11492_vm0, %v11491_v0  ;;  %10200 = vmatprep.mubr.msk.bf16.mxu1 %vm11492_vm0, %v11491_v0  ;;  %v726_v52 = vpack.c.bf16 %v709_v50, %v707_v1  ;;  %v884_v1 = vld [vmem:[#allocation2 + $0xc4] ss:$2 sm:$0xf]  ;;  %v1153_v50 = vld [vmem:[#allocation2 + $0x191] ss:$2 sm:$0xf] }
  0x88   :  { %10284 = vmatprep.subr.bf16.mxu0 %v11491_v0  ;;  %10314 = vmatprep.subr.bf16.mxu1 %v11491_v0 }
  0x8d   :  { %10171 = vmatmul.mubr.msk.bf16.gmra.mrb[32].mxu0 %vm312_vm2, %v564_v46  ;;  %10201 = vmatmul.mubr.msk.bf16.gmra.mrb[32].mxu1 %vm312_vm2, %v725_v47  ;;  %v1149_v46 = vld [vmem:[#allocation2 + $0x171] ss:$2 sm:$0xff]  ;;  %v1151_v47 = vld [vmem:[#allocation2 + $0x181] ss:$2 sm:$0xff] }
  0x8e   :  { %10174 = vmatprep.mubr.msk.bf16.mxu0 %vm11492_vm0, %v11491_v0  ;;  %10204 = vmatprep.mubr.msk.bf16.mxu1 %vm11492_vm0, %v11491_v0  ;;  %v1159_v49 = vpack.c.bf16 %v1151_v47, %v1149_v46 }
  0x95   :  { %10175 = vmatmul.mubr.msk.bf16.gmra.mrb[36].mxu0 %vm312_vm2, %v565_v51  ;;  %10205 = vmatmul.mubr.msk.bf16.gmra.mrb[36].mxu1 %vm312_vm2, %v726_v52  ;;  %v891_v51 = vpack.c.bf16 %v884_v1, %v884_v1  ;;  %v1160_v52 = vpack.c.bf16 %v1153_v50, %v1153_v50  ;;  %v1715_v50 = vpack.c.bf16 %v1692_v45, %v1690_v44  ;;  %v1551_v45 = vld [vmem:[#allocation2 + $0x153] ss:$2 sm:$0xff] }
  0x96   :  { %10178 = vmatprep.mubr.msk.bf16.mxu0 %vm11492_vm0, %v11491_v0  ;;  %10208 = vmatprep.mubr.msk.bf16.mxu1 %vm11492_vm0, %v11491_v0 }
  0x9d   :  { %10179 = vmatmul.mubr.msk.bf16.gmra.mrb[40].mxu0 %vm312_vm2, %v566_v57  ;;  %10209 = vmatmul.mubr.msk.bf16.gmra.mrb[40].mxu1 %vm312_vm2, %v727_v58  ;;  %v1121_v57 = vpack.c.bf16 %v1098_v54, %v1096_v53  ;;  %v1405_v58 = vpack.c.bf16 %v1382_v56, %v1380_v55 }
  0x9e   :  { %10182 = vmatprep.mubr.msk.bf16.mxu0 %vm11492_vm0, %v11491_v0  ;;  %10212 = vmatprep.mubr.msk.bf16.mxu1 %vm11492_vm0, %v11491_v0 }
  0xa5   :  { %10183 = vmatmul.mubr.msk.bf16.gmra.mrb[44].mxu0 %vm312_vm2, %v567_v63  ;;  %10213 = vmatmul.mubr.msk.bf16.gmra.mrb[44].mxu1 %vm312_vm2, %v728_v3  ;;  %v1386_v63 = vld [vmem:[#allocation2 + $0x102] ss:$2 sm:$0xff]  ;;  %v1122_v3 = vpack.c.bf16 %v1102_v61, %v1100_v59 }
  0xa6   :  { %10186 = vmatprep.mubr.msk.bf16.mxu0 %vm11492_vm0, %v11491_v0  ;;  %10216 = vmatprep.mubr.msk.bf16.mxu1 %vm11492_vm0, %v11491_v0  ;;  %v1406_v4 = vpack.c.bf16 %v1386_v63, %v1384_v62  ;;  %v1694_v59 = vld [vmem:[#allocation2 + $0xf4] ss:$2 sm:$0xff] }
  0xad   :  { %10187 = vmatmul.mubr.msk.bf16.gmra.mrb[48].mxu0 %vm312_vm2, %v568_v8  ;;  %10217 = vmatmul.mubr.msk.bf16.gmra.mrb[48].mxu1 %vm312_vm2, %v729_v9  ;;  %v1407_v9 = vpack.c.bf16 %v1390_v7, %v1388_v6 }
  0xae   :  { %10190 = vmatprep.mubr.msk.bf16.mxu0 %vm11492_vm0, %v11491_v0  ;;  %10220 = vmatprep.mubr.msk.bf16.mxu1 %vm11492_vm0, %v11491_v0 }
  0xb5   :  { %10191 = vmatmul.mubr.msk.bf16.gmra.mrb[52].mxu0 %vm312_vm2, %v569_v12  ;;  %10221 = vmatmul.mubr.msk.bf16.gmra.mrb[52].mxu1 %vm312_vm2, %v730_v13  ;;  %v1392_v12 = vld [vmem:[#allocation2 + $0x132] ss:$2 sm:$0xff]  ;;  %v1394_v13 = vld [vmem:[#allocation2 + $0x142] ss:$2 sm:$0xff] }
  0xb6   :  { %10226 = vmatprep.mubr.msk.bf16.mxu0 %vm11492_vm0, %v11491_v0  ;;  %10256 = vmatprep.mubr.msk.bf16.mxu1 %vm11492_vm0, %v11491_v0  ;;  %v1408_v15 = vpack.c.bf16 %v1394_v13, %v1392_v12  ;;  %v1545_v12 = vld [vmem:[#allocation2 + $0x123] ss:$2 sm:$0xff]  ;;  %v1698_v13 = vld [vmem:[#allocation2 + $0x114] ss:$2 sm:$0xff] }
  0xbd   :  { %10227 = vmatmul.mubr.msk.bf16.vlgmr.msra.gmra.mrb[56].mxu0 %vm312_vm2, %v885_v19  ;;  %10257 = vmatmul.mubr.msk.bf16.vlgmr.msra.gmra.mrb[56].mxu1 %vm312_vm2, %v1154_v20  ;;  %v1396_v19 = vld [vmem:[#allocation2 + $0x152] ss:$2 sm:$0xff]  ;;  %v1398_v20 = vld [vmem:[#allocation2 + $0x162] ss:$2 sm:$0xff] }
  0xbe   :  { %10285 = vmatpush3.bf16.msra.mxu0 %v11662_v2  ;;  %10315 = vmatpush3.bf16.msra.mxu1 %v11728_v18  ;;  %v887_v2 = vpack.c.bf16 %v870_v28, %v868_v27  ;;  %v1156_v18 = vpack.c.bf16 %v1139_v30, %v1137_v29  ;;  %v1409_v22 = vpack.c.bf16 %v1398_v20, %v1396_v19  ;;  %v1120_v29 = vld [vmem:[#allocation2 + $0x190] ss:$2 sm:$0xf] }
  0xbf   :  { %10230 = vmatprep.mubr.msk.bf16.mxu0 %vm11492_vm0, %v11491_v0  ;;  %10260 = vmatprep.mubr.msk.bf16.mxu1 %vm11492_vm0, %v11491_v0  ;;  %v1126_v27 = vpack.c.bf16 %v1118_v24, %v1116_v23  ;;  %v1404_v30 = vld [vmem:[#allocation2 + $0x192] ss:$2 sm:$0xf]  ;;  %v1127_v33 = vpack.c.bf16 %v1120_v29, %v1120_v29  ;;  %v1549_v29 = vld [vmem:[#allocation2 + $0x143] ss:$2 sm:$0xff] }
  0xc0   :  { %10344 = vmatprep.subr.bf16.mxu0 %v11491_v0  ;;  %10374 = vmatprep.subr.bf16.mxu1 %v11491_v0  ;;  %v1411_v34 = vpack.c.bf16 %v1404_v30, %v1404_v30  ;;  %v1702_v30 = vld [vmem:[#allocation2 + $0x134] ss:$2 sm:$0xff] }
  0xc5   :  { %10231 = vmatmul.mubr.msk.bf16.gmra.mrb[60].mxu0 %vm312_vm2, %v886_v25  ;;  %10261 = vmatmul.mubr.msk.bf16.gmra.mrb[60].mxu1 %vm312_vm2, %v1155_v26  ;;  %v1400_v25 = vld [vmem:[#allocation2 + $0x172] ss:$2 sm:$0xff]  ;;  %v1402_v26 = vld [vmem:[#allocation2 + $0x182] ss:$2 sm:$0xff] }
  0xc6   :  { %10234 = vmatprep.mubr.msk.bf16.mxu0 %vm11492_vm0, %v11491_v0  ;;  %10264 = vmatprep.mubr.msk.bf16.mxu1 %vm11492_vm0, %v11491_v0  ;;  %v1410_v28 = vpack.c.bf16 %v1402_v26, %v1400_v25 }
  0xcd   :  { %10235 = vmatmul.mubr.msk.bf16.gmra.mrb[64].mxu0 %vm312_vm2, %v887_v2  ;;  %10265 = vmatmul.mubr.msk.bf16.gmra.mrb[64].mxu1 %vm312_vm2, %v1156_v18 }
  0xce   :  { %10238 = vmatprep.mubr.msk.bf16.mxu0 %vm11492_vm0, %v11491_v0  ;;  %10268 = vmatprep.mubr.msk.bf16.mxu1 %vm11492_vm0, %v11491_v0 }
  0xd5   :  { %10239 = vmatmul.mubr.msk.bf16.gmra.mrb[68].mxu0 %vm312_vm2, %v888_v35  ;;  %10269 = vmatmul.mubr.msk.bf16.gmra.mrb[68].mxu1 %vm312_vm2, %v1157_v36 }
  0xd6   :  { %10242 = vmatprep.mubr.msk.bf16.mxu0 %vm11492_vm0, %v11491_v0  ;;  %10272 = vmatprep.mubr.msk.bf16.mxu1 %vm11492_vm0, %v11491_v0 }
  0xdd   :  { %10243 = vmatmul.mubr.msk.bf16.gmra.mrb[72].mxu0 %vm312_vm2, %v889_v42  ;;  %10273 = vmatmul.mubr.msk.bf16.gmra.mrb[72].mxu1 %vm312_vm2, %v1158_v43  ;;  %v1535_v42 = vld [vmem:[#allocation2 + $0xd3] ss:$2 sm:$0xff]  ;;  %v1537_v43 = vld [vmem:[#allocation2 + $0xe3] ss:$2 sm:$0xff] }
  0xde   :  { %10246 = vmatprep.mubr.msk.bf16.mxu0 %vm11492_vm0, %v11491_v0  ;;  %10276 = vmatprep.mubr.msk.bf16.mxu1 %vm11492_vm0, %v11491_v0  ;;  %v1560_v1 = vpack.c.bf16 %v1537_v43, %v1535_v42 }
  0xe5   :  { %10247 = vmatmul.mubr.msk.bf16.gmra.mrb[76].mxu0 %vm312_vm2, %v890_v48  ;;  %10277 = vmatmul.mubr.msk.bf16.gmra.mrb[76].mxu1 %vm312_vm2, %v1159_v49 }
  0xe6   :  { %10250 = vmatprep.mubr.msk.bf16.mxu0 %vm11492_vm0, %v11491_v0  ;;  %10280 = vmatprep.mubr.msk.bf16.mxu1 %vm11492_vm0, %v11491_v0 }
  0xed   :  { %10251 = vmatmul.mubr.msk.bf16.gmra.mrb[80].mxu0 %vm312_vm2, %v891_v51  ;;  %10281 = vmatmul.mubr.msk.bf16.gmra.mrb[80].mxu1 %vm312_vm2, %v1160_v52 }
  0xee   :  { %10286 = vmatprep.mubr.msk.bf16.mxu0 %vm11492_vm0, %v11491_v0  ;;  %10316 = vmatprep.mubr.msk.bf16.mxu1 %vm11492_vm0, %v11491_v0 }
  0xf5   :  { %10287 = vmatmul.mubr.msk.bf16.vlgmr.msra.gmra.mrb[84].mxu0 %vm312_vm2, %v1121_v57  ;;  %10317 = vmatmul.mubr.msk.bf16.vlgmr.msra.gmra.mrb[84].mxu1 %vm312_vm2, %v1405_v58  ;;  %v1539_v57 = vld [vmem:[#allocation2 + $0xf3] ss:$2 sm:$0xff]  ;;  %v1541_v58 = vld [vmem:[#allocation2 + $0x103] ss:$2 sm:$0xff] }
  0xf6   :  { %10345 = vmatpush3.bf16.msra.mxu0 %v11390_v60  ;;  %10375 = vmatpush3.bf16.msra.mxu1 %v11924_v41  ;;  %v1106_v41 = vld [vmem:[#allocation2 + $0x120] ss:$2 sm:$0xff] }
  0xf7   :  { %10290 = vmatprep.mubr.msk.bf16.mxu0 %vm11492_vm0, %v11491_v0  ;;  %10320 = vmatprep.mubr.msk.bf16.mxu1 %vm11492_vm0, %v11491_v0  ;;  %v1123_v8 = vpack.c.bf16 %v1106_v41, %v1104_v5  ;;  %v1696_v60 = vld [vmem:[#allocation2 + $0x104] ss:$2 sm:$0xff]  ;;  %v1561_v5 = vpack.c.bf16 %v1541_v58, %v1539_v57 }
  0xf8   :  { %v1716_v41 = vpack.c.bf16 %v1696_v60, %v1694_v59 }
  0xfd   :  { %10291 = vmatmul.mubr.msk.bf16.gmra.mrb[88].mxu0 %vm312_vm2, %v1122_v3  ;;  %10321 = vmatmul.mubr.msk.bf16.gmra.mrb[88].mxu1 %vm312_vm2, %v1406_v4 }
  0xfe   :  { %10294 = vmatprep.mubr.msk.bf16.mxu0 %vm11492_vm0, %v11491_v0  ;;  %10324 = vmatprep.mubr.msk.bf16.mxu1 %vm11492_vm0, %v11491_v0 }
 0x105   :  { %10295 = vmatmul.mubr.msk.bf16.gmra.mrb[92].mxu0 %vm312_vm2, %v1123_v8  ;;  %10325 = vmatmul.mubr.msk.bf16.gmra.mrb[92].mxu1 %vm312_vm2, %v1407_v9 }
 0x106   :  { %10298 = vmatprep.mubr.msk.bf16.mxu0 %vm11492_vm0, %v11491_v0  ;;  %10328 = vmatprep.mubr.msk.bf16.mxu1 %vm11492_vm0, %v11491_v0 }
 0x10d   :  { %10299 = vmatmul.mubr.msk.bf16.gmra.mrb[96].mxu0 %vm312_vm2, %v1124_v14  ;;  %10329 = vmatmul.mubr.msk.bf16.gmra.mrb[96].mxu1 %vm312_vm2, %v1408_v15  ;;  %v1700_v14 = vld [vmem:[#allocation2 + $0x124] ss:$2 sm:$0xff] }
 0x10e   :  { %10302 = vmatprep.mubr.msk.bf16.mxu0 %vm11492_vm0, %v11491_v0  ;;  %10332 = vmatprep.mubr.msk.bf16.mxu1 %vm11492_vm0, %v11491_v0 }
 0x115   :  { %10303 = vmatmul.mubr.msk.bf16.gmra.mrb[100].mxu0 %vm312_vm2, %v1125_v21  ;;  %10333 = vmatmul.mubr.msk.bf16.gmra.mrb[100].mxu1 %vm312_vm2, %v1409_v22  ;;  %v1562_v21 = vpack.c.bf16 %v1545_v12, %v1543_v11  ;;  %v1717_v22 = vpack.c.bf16 %v1700_v14, %v1698_v13 }
 0x116   :  { %10306 = vmatprep.mubr.msk.bf16.mxu0 %vm11492_vm0, %v11491_v0  ;;  %10336 = vmatprep.mubr.msk.bf16.mxu1 %vm11492_vm0, %v11491_v0 }
 0x11d   :  { %10307 = vmatmul.mubr.msk.bf16.gmra.mrb[104].mxu0 %vm312_vm2, %v1126_v27  ;;  %10337 = vmatmul.mubr.msk.bf16.gmra.mrb[104].mxu1 %vm312_vm2, %v1410_v28  ;;  %v1547_v28 = vld [vmem:[#allocation2 + $0x133] ss:$2 sm:$0xff] }
 0x11e   :  { %10310 = vmatprep.mubr.msk.bf16.mxu0 %vm11492_vm0, %v11491_v0  ;;  %10340 = vmatprep.mubr.msk.bf16.mxu1 %vm11492_vm0, %v11491_v0  ;;  %2124 = vst.msk [vmem:[#allocation2 + $0x136] sm:$0xf] %vm1086_vm3, %v11491_v0 }
 0x120   :  { %v368_v2 = vpop.f32.mrb[0].mxu0  ;;  %v483_v18 = vpop.f32.mrb[0].mxu1 }
 0x121   :  { %v10108_v31 = vpop.f32.mrb[1].mxu0  ;;  %v10138_v32 = vpop.f32.mrb[1].mxu1  ;;  %v12058_v35 = vadd.f32 %v483_v18, %v368_v2  ;;  %v1704_v2 = vld [vmem:[#allocation2 + $0x144] ss:$2 sm:$0xff] }
 0x122   :  { %v371_v36 = vpop.f32.mrb[2].mxu0  ;;  %v486_v37 = vpop.f32.mrb[2].mxu1 }
 0x123   :  { %v10109_v38 = vpop.f32.mrb[3].mxu0  ;;  %v10139_v39 = vpop.f32.mrb[3].mxu1  ;;  %v12060_v40 = vadd.f32 %v486_v37, %v371_v36  ;;  %v1563_v36 = vpack.c.bf16 %v1549_v29, %v1547_v28  ;;  %v1718_v37 = vpack.c.bf16 %v1704_v2, %v1702_v30 }
 0x125   :  { %10311 = vmatmul.mubr.msk.bf16.gmra.mrb[108].mxu0 %vm312_vm2, %v1127_v33  ;;  %10341 = vmatmul.mubr.msk.bf16.gmra.mrb[108].mxu1 %vm312_vm2, %v1411_v34 }
 0x126   :  { %10346 = vmatprep.mubr.msk.bf16.mxu0 %vm11492_vm0, %v11491_v0  ;;  %10376 = vmatprep.mubr.msk.bf16.mxu1 %vm11492_vm0, %v11491_v0 }
 0x128   :  { %v376_v46 = vpop.f32.mrb[4].mxu0  ;;  %v491_v47 = vpop.f32.mrb[4].mxu1 }
 0x129   :  { %v10112_v48 = vpop.f32.mrb[5].mxu0  ;;  %v10142_v49 = vpop.f32.mrb[5].mxu1  ;;  %v12068_v51 = vadd.f32 %v491_v47, %v376_v46  ;;  %v1553_v46 = vld [vmem:[#allocation2 + $0x163] ss:$2 sm:$0xff]  ;;  %v1706_v47 = vld [vmem:[#allocation2 + $0x154] ss:$2 sm:$0xff] }
 0x12a   :  { %v379_v52 = vpop.f32.mrb[6].mxu0  ;;  %v494_v53 = vpop.f32.mrb[6].mxu1  ;;  %v1708_v48 = vld [vmem:[#allocation2 + $0x164] ss:$2 sm:$0xff] }
 0x12b   :  { %v10113_v54 = vpop.f32.mrb[7].mxu0  ;;  %v10143_v55 = vpop.f32.mrb[7].mxu1  ;;  %v12070_v56 = vadd.f32 %v494_v53, %v379_v52 }
 0x12c   :  { %v1564_v54 = vpack.c.bf16 %v1553_v46, %v1551_v45  ;;  %v1719_v55 = vpack.c.bf16 %v1708_v48, %v1706_v47 }
 0x12d   :  { %10347 = vmatmul.mubr.msk.bf16.vlgmr.msra.gmra.mrb[112].mxu0 %vm312_vm2, %v1560_v1  ;;  %10377 = vmatmul.mubr.msk.bf16.vlgmr.msra.gmra.mrb[112].mxu1 %vm312_vm2, %v1715_v50 }
 0x12e   :  { %10350 = vmatprep.mubr.msk.bf16.mxu0 %vm11492_vm0, %v11491_v0  ;;  %10380 = vmatprep.mubr.msk.bf16.mxu1 %vm11492_vm0, %v11491_v0 }
 0x130   :  { %v384_v61 = vpop.f32.mrb[8].mxu0  ;;  %v499_v62 = vpop.f32.mrb[8].mxu1 }
 0x131   :  { %v12078_v63 = vadd.f32 %v499_v62, %v384_v61  ;;  %v10116_v3 = vpop.f32.mrb[9].mxu0  ;;  %v10146_v4 = vpop.f32.mrb[9].mxu1  ;;  %v1555_v62 = vld [vmem:[#allocation2 + $0x173] ss:$2 sm:$0xff] }
 0x132   :  { %v387_v6 = vpop.f32.mrb[10].mxu0  ;;  %v502_v7 = vpop.f32.mrb[10].mxu1  ;;  %v1557_v3 = vld [vmem:[#allocation2 + $0x183] ss:$2 sm:$0xff]  ;;  %v1710_v4 = vld [vmem:[#allocation2 + $0x174] ss:$2 sm:$0xff] }
 0x133   :  { %v12080_v8 = vadd.f32 %v502_v7, %v387_v6  ;;  %v10117_v9 = vpop.f32.mrb[11].mxu0  ;;  %v10147_v10 = vpop.f32.mrb[11].mxu1  ;;  %v1565_v11 = vpack.c.bf16 %v1557_v3, %v1555_v62 }
 0x135   :  { %10351 = vmatmul.mubr.msk.bf16.gmra.mrb[116].mxu0 %vm312_vm2, %v1561_v5  ;;  %10381 = vmatmul.mubr.msk.bf16.gmra.mrb[116].mxu1 %vm312_vm2, %v1716_v41  ;;  %v1712_v5 = vld [vmem:[#allocation2 + $0x184] ss:$2 sm:$0xff] }
 0x136   :  { %10354 = vmatprep.mubr.msk.bf16.mxu0 %vm11492_vm0, %v11491_v0  ;;  %10384 = vmatprep.mubr.msk.bf16.mxu1 %vm11492_vm0, %v11491_v0  ;;  %v1720_v12 = vpack.c.bf16 %v1712_v5, %v1710_v4 }
 0x138   :  { %v392_v15 = vpop.f32.mrb[12].mxu0  ;;  %v507_v16 = vpop.f32.mrb[12].mxu1 }
 0x139   :  { %v12088_v17 = vadd.f32 %v507_v16, %v392_v15  ;;  %v10120_v19 = vpop.f32.mrb[13].mxu0  ;;  %v10150_v20 = vpop.f32.mrb[13].mxu1 }
 0x13a   :  { %v395_v23 = vpop.f32.mrb[14].mxu0  ;;  %v510_v24 = vpop.f32.mrb[14].mxu1  ;;  %v1559_v19 = vld [vmem:[#allocation2 + $0x193] ss:$2 sm:$0xf] }
 0x13b   :  { %v12090_v25 = vadd.f32 %v510_v24, %v395_v23  ;;  %v10121_v26 = vpop.f32.mrb[15].mxu0  ;;  %v10151_v27 = vpop.f32.mrb[15].mxu1  ;;  %v1714_v20 = vld [vmem:[#allocation2 + $0x194] ss:$2 sm:$0xf] }
 0x13c   :  { %v1566_v27 = vpack.c.bf16 %v1559_v19, %v1559_v19  ;;  %v1721_v28 = vpack.c.bf16 %v1714_v20, %v1714_v20 }
 0x13d   :  { %10355 = vmatmul.mubr.msk.bf16.gmra.mrb[120].mxu0 %vm312_vm2, %v1562_v21  ;;  %10385 = vmatmul.mubr.msk.bf16.gmra.mrb[120].mxu1 %vm312_vm2, %v1717_v22 }
 0x13e   :  { %10358 = vmatprep.mubr.msk.bf16.mxu0 %vm11492_vm0, %v11491_v0  ;;  %10388 = vmatprep.mubr.msk.bf16.mxu1 %vm11492_vm0, %v11491_v0 }
 0x140   :  { %v400_v18 = vpop.f32.mrb[16].mxu0  ;;  %v515_v31 = vpop.f32.mrb[16].mxu1 }
 0x141   :  { %v12098_v32 = vadd.f32 %v515_v31, %v400_v18  ;;  %v10124_v33 = vpop.f32.mrb[17].mxu0  ;;  %v10154_v34 = vpop.f32.mrb[17].mxu1 }
 0x142   :  { %v403_v38 = vpop.f32.mrb[18].mxu0  ;;  %v518_v39 = vpop.f32.mrb[18].mxu1 }
 0x143   :  { %v12100_v42 = vadd.f32 %v518_v39, %v403_v38  ;;  %v10125_v43 = vpop.f32.mrb[19].mxu0  ;;  %v10155_v44 = vpop.f32.mrb[19].mxu1 }
 0x145   :  { %10359 = vmatmul.mubr.msk.bf16.gmra.mrb[124].mxu0 %vm312_vm2, %v1563_v36  ;;  %10389 = vmatmul.mubr.msk.bf16.gmra.mrb[124].mxu1 %vm312_vm2, %v1718_v37 }
 0x146   :  { %10362 = vmatprep.mubr.msk.bf16.mxu0 %vm11492_vm0, %v11491_v0  ;;  %10392 = vmatprep.mubr.msk.bf16.mxu1 %vm11492_vm0, %v11491_v0 }
 0x148   :  { %v408_v49 = vpop.f32.mrb[20].mxu0  ;;  %v523_v1 = vpop.f32.mrb[20].mxu1 }
 0x149   :  { %v12112_v50 = vadd.f32 %v523_v1, %v408_v49  ;;  %v10128_v52 = vpop.f32.mrb[21].mxu0  ;;  %v10158_v53 = vpop.f32.mrb[21].mxu1 }
 0x14a   :  { %v411_v57 = vpop.f32.mrb[22].mxu0  ;;  %v526_v58 = vpop.f32.mrb[22].mxu1 }
 0x14b   :  { %v12114_v59 = vadd.f32 %v526_v58, %v411_v57  ;;  %v10129_v60 = vpop.f32.mrb[23].mxu0  ;;  %v10159_v61 = vpop.f32.mrb[23].mxu1 }
 0x14d   :  { %10363 = vmatmul.mubr.msk.bf16.gmra.mrb[128].mxu0 %vm312_vm2, %v1564_v54  ;;  %10393 = vmatmul.mubr.msk.bf16.gmra.mrb[128].mxu1 %vm312_vm2, %v1719_v55 }
 0x14e   :  { %10366 = vmatprep.mubr.msk.bf16.mxu0 %vm11492_vm0, %v11491_v0  ;;  %10396 = vmatprep.mubr.msk.bf16.mxu1 %vm11492_vm0, %v11491_v0 }
 0x150   :  { %v416_v41 = vpop.f32.mrb[24].mxu0  ;;  %v531_v6 = vpop.f32.mrb[24].mxu1 }
 0x151   :  { %v12122_v7 = vadd.f32 %v531_v6, %v416_v41  ;;  %v10132_v9 = vpop.f32.mrb[25].mxu0  ;;  %v10162_v10 = vpop.f32.mrb[25].mxu1 }
 0x152   :  { %v419_v13 = vpop.f32.mrb[26].mxu0  ;;  %v534_v14 = vpop.f32.mrb[26].mxu1 }
 0x153   :  { %v10133_v15 = vpop.f32.mrb[27].mxu0  ;;  %v10163_v16 = vpop.f32.mrb[27].mxu1 }
 0x155   :  { %10367 = vmatmul.mubr.msk.bf16.gmra.mrb[132].mxu0 %vm312_vm2, %v1565_v11  ;;  %10397 = vmatmul.mubr.msk.bf16.gmra.mrb[132].mxu1 %vm312_vm2, %v1720_v12 }
 0x156   :  { %10370 = vmatprep.mubr.msk.bf16.mxu0 %vm11492_vm0, %v11491_v0  ;;  %10400 = vmatprep.mubr.msk.bf16.mxu1 %vm11492_vm0, %v11491_v0 }
 0x158   :  { %v631_v21 = vpop.f32.mrb[28].mxu0  ;;  %v792_v22 = vpop.f32.mrb[28].mxu1 }
 0x159   :  { %v685_v23 = vadd.f32 %v631_v21, %v12058_v35  ;;  %v10168_v24 = vpop.f32.mrb[29].mxu0  ;;  %v10198_v26 = vpop.f32.mrb[29].mxu1 }
 0x15a   :  { %v634_v29 = vpop.f32.mrb[30].mxu0  ;;  %v795_v30 = vpop.f32.mrb[30].mxu1 }
 0x15b   :  { %v12131_v2 = vadd.f32 %v792_v22, %v685_v23  ;;  %v686_v18 = vadd.f32 %v634_v29, %v12060_v40  ;;  %v10169_v31 = vpop.f32.mrb[31].mxu0  ;;  %v10199_v33 = vpop.f32.mrb[31].mxu1 }
 0x15d   :  { %v12134_v34 = vadd.f32 %v795_v30, %v686_v18  ;;  %10371 = vmatmul.mubr.msk.bf16.gmra.mrb[136].mxu0 %vm312_vm2, %v1566_v27  ;;  %10401 = vmatmul.mubr.msk.bf16.gmra.mrb[136].mxu1 %vm312_vm2, %v1721_v28 }
 0x160   :  { %v639_v36 = vpop.f32.mrb[32].mxu0  ;;  %v800_v35 = vpop.f32.mrb[32].mxu1 }
 0x161   :  { %v687_v37 = vadd.f32 %v639_v36, %v12068_v51  ;;  %v10172_v38 = vpop.f32.mrb[33].mxu0  ;;  %v10202_v39 = vpop.f32.mrb[33].mxu1 }
 0x162   :  { %v642_v43 = vpop.f32.mrb[34].mxu0  ;;  %v803_v44 = vpop.f32.mrb[34].mxu1 }
 0x163   :  { %v12139_v45 = vadd.f32 %v800_v35, %v687_v37  ;;  %v688_v40 = vadd.f32 %v642_v43, %v12070_v56  ;;  %v10173_v46 = vpop.f32.mrb[35].mxu0  ;;  %v10203_v47 = vpop.f32.mrb[35].mxu1 }
 0x165   :  { %v12142_v48 = vadd.f32 %v803_v44, %v688_v40 }
 0x168   :  { %v647_v49 = vpop.f32.mrb[36].mxu0  ;;  %v808_v1 = vpop.f32.mrb[36].mxu1 }
 0x169   :  { %v689_v52 = vadd.f32 %v647_v49, %v12078_v63  ;;  %v10176_v53 = vpop.f32.mrb[37].mxu0  ;;  %v10206_v54 = vpop.f32.mrb[37].mxu1 }
 0x16a   :  { %v650_v55 = vpop.f32.mrb[38].mxu0  ;;  %v811_v51 = vpop.f32.mrb[38].mxu1 }
 0x16b   :  { %v12145_v57 = vadd.f32 %v808_v1, %v689_v52  ;;  %v690_v58 = vadd.f32 %v650_v55, %v12080_v8  ;;  %v10177_v60 = vpop.f32.mrb[39].mxu0  ;;  %v10207_v61 = vpop.f32.mrb[39].mxu1 }
 0x16d   :  { %v12148_v62 = vadd.f32 %v811_v51, %v690_v58 }
 0x170   :  { %v655_v56 = vpop.f32.mrb[40].mxu0  ;;  %v816_v3 = vpop.f32.mrb[40].mxu1 }
 0x171   :  { %v691_v4 = vadd.f32 %v655_v56, %v12088_v17  ;;  %v10180_v5 = vpop.f32.mrb[41].mxu0  ;;  %v10210_v41 = vpop.f32.mrb[41].mxu1 }
 0x172   :  { %v658_v6 = vpop.f32.mrb[42].mxu0  ;;  %v819_v63 = vpop.f32.mrb[42].mxu1 }
 0x173   :  { %v12151_v9 = vadd.f32 %v816_v3, %v691_v4  ;;  %v692_v10 = vadd.f32 %v658_v6, %v12090_v25  ;;  %v10181_v11 = vpop.f32.mrb[43].mxu0  ;;  %v10211_v12 = vpop.f32.mrb[43].mxu1 }
 0x175   :  { %v12154_v13 = vadd.f32 %v819_v63, %v692_v10 }
 0x178   :  { %v663_v8 = vpop.f32.mrb[44].mxu0  ;;  %v824_v14 = vpop.f32.mrb[44].mxu1 }
 0x179   :  { %v693_v15 = vadd.f32 %v663_v8, %v12098_v32  ;;  %v10184_v16 = vpop.f32.mrb[45].mxu0  ;;  %v10214_v19 = vpop.f32.mrb[45].mxu1 }
 0x17a   :  { %v666_v20 = vpop.f32.mrb[46].mxu0  ;;  %v827_v17 = vpop.f32.mrb[46].mxu1 }
 0x17b   :  { %v12157_v21 = vadd.f32 %v824_v14, %v693_v15  ;;  %v694_v22 = vadd.f32 %v666_v20, %v12100_v42  ;;  %v10185_v23 = vpop.f32.mrb[47].mxu0  ;;  %v10215_v24 = vpop.f32.mrb[47].mxu1 }
 0x17d   :  { %v12160_v26 = vadd.f32 %v827_v17, %v694_v22 }
 0x180   :  { %v671_v25 = vpop.f32.mrb[48].mxu0  ;;  %v832_v27 = vpop.f32.mrb[48].mxu1 }
 0x181   :  { %v695_v28 = vadd.f32 %v671_v25, %v12112_v50  ;;  %v10188_v29 = vpop.f32.mrb[49].mxu0  ;;  %v10218_v30 = vpop.f32.mrb[49].mxu1 }
 0x182   :  { %v674_v18 = vpop.f32.mrb[50].mxu0  ;;  %v835_v32 = vpop.f32.mrb[50].mxu1 }
 0x183   :  { %v12163_v31 = vadd.f32 %v832_v27, %v695_v28  ;;  %v696_v33 = vadd.f32 %v674_v18, %v12114_v59  ;;  %v10189_v36 = vpop.f32.mrb[51].mxu0  ;;  %v10219_v35 = vpop.f32.mrb[51].mxu1 }
 0x185   :  { %v12166_v37 = vadd.f32 %v835_v32, %v696_v33 }
 0x188   :  { %v679_v42 = vpop.f32.mrb[52].mxu0  ;;  %v840_v38 = vpop.f32.mrb[52].mxu1 }
 0x189   :  { %v697_v39 = vadd.f32 %v679_v42, %v12122_v7  ;;  %v10192_v43 = vpop.f32.mrb[53].mxu0  ;;  %v10222_v44 = vpop.f32.mrb[53].mxu1 }
 0x18a   :  { %v682_v40 = vpop.f32.mrb[54].mxu0  ;;  %v843_v50 = vpop.f32.mrb[54].mxu1 }
 0x18b   :  { %v12169_v46 = vadd.f32 %v840_v38, %v697_v39  ;;  %v10193_v47 = vpop.f32.mrb[55].mxu0  ;;  %v10223_v49 = vpop.f32.mrb[55].mxu1 }
 0x190   :  { %v953_v1 = vpop.f32.mrb[56].mxu0  ;;  %v12171_v52 = vpop.f32.mrb[56].mxu1 }
 0x191   :  { %v12174_v59 = vadd.f32 %v953_v1, %v12131_v2  ;;  %v10228_v53 = vpop.f32.mrb[57].mxu0  ;;  %v10258_v54 = vpop.f32.mrb[57].mxu1 }
 0x192   :  { %v956_v55 = vpop.f32.mrb[58].mxu0  ;;  %v12176_v51 = vpop.f32.mrb[58].mxu1 }
 0x193   :  { %v12179_v7 = vadd.f32 %v956_v55, %v12134_v34  ;;  %v10229_v58 = vpop.f32.mrb[59].mxu0  ;;  %v10259_v60 = vpop.f32.mrb[59].mxu1 }
 0x198   :  { %v961_v61 = vpop.f32.mrb[60].mxu0  ;;  %v12181_v56 = vpop.f32.mrb[60].mxu1 }
 0x199   :  { %v12184_v3 = vadd.f32 %v961_v61, %v12139_v45  ;;  %v10232_v4 = vpop.f32.mrb[61].mxu0  ;;  %v10262_v5 = vpop.f32.mrb[61].mxu1 }
 0x19a   :  { %v964_v2 = vpop.f32.mrb[62].mxu0  ;;  %v12186_v41 = vpop.f32.mrb[62].mxu1 }
 0x19b   :  { %v12189_v6 = vadd.f32 %v964_v2, %v12142_v48  ;;  %v10233_v63 = vpop.f32.mrb[63].mxu0  ;;  %v10263_v10 = vpop.f32.mrb[63].mxu1 }
 0x1a0   :  { %v969_v34 = vpop.f32.mrb[64].mxu0  ;;  %v12191_v11 = vpop.f32.mrb[64].mxu1 }
 0x1a1   :  { %v12194_v12 = vadd.f32 %v969_v34, %v12145_v57  ;;  %v10236_v8 = vpop.f32.mrb[65].mxu0  ;;  %v10266_v14 = vpop.f32.mrb[65].mxu1 }
 0x1a2   :  { %v972_v45 = vpop.f32.mrb[66].mxu0  ;;  %v12196_v15 = vpop.f32.mrb[66].mxu1 }
 0x1a3   :  { %v12199_v16 = vadd.f32 %v972_v45, %v12148_v62  ;;  %v10237_v19 = vpop.f32.mrb[67].mxu0  ;;  %v10267_v20 = vpop.f32.mrb[67].mxu1 }
 0x1a8   :  { %v977_v48 = vpop.f32.mrb[68].mxu0  ;;  %v12201_v17 = vpop.f32.mrb[68].mxu1 }
 0x1a9   :  { %v12204_v22 = vadd.f32 %v977_v48, %v12151_v9  ;;  %v10240_v23 = vpop.f32.mrb[69].mxu0  ;;  %v10270_v24 = vpop.f32.mrb[69].mxu1 }
 0x1aa   :  { %v980_v57 = vpop.f32.mrb[70].mxu0  ;;  %v12206_v25 = vpop.f32.mrb[70].mxu1 }
 0x1ab   :  { %v12209_v27 = vadd.f32 %v980_v57, %v12154_v13  ;;  %v10241_v28 = vpop.f32.mrb[71].mxu0  ;;  %v10271_v29 = vpop.f32.mrb[71].mxu1 }
 0x1b0   :  { %v985_v62 = vpop.f32.mrb[72].mxu0  ;;  %v12211_v30 = vpop.f32.mrb[72].mxu1 }
 0x1b1   :  { %v12214_v18 = vadd.f32 %v985_v62, %v12157_v21  ;;  %v10244_v32 = vpop.f32.mrb[73].mxu0  ;;  %v10274_v33 = vpop.f32.mrb[73].mxu1 }
 0x1b2   :  { %v988_v9 = vpop.f32.mrb[74].mxu0  ;;  %v12216_v36 = vpop.f32.mrb[74].mxu1 }
 0x1b3   :  { %v12219_v35 = vadd.f32 %v988_v9, %v12160_v26  ;;  %v10245_v42 = vpop.f32.mrb[75].mxu0  ;;  %v10275_v38 = vpop.f32.mrb[75].mxu1 }
 0x1b8   :  { %v993_v13 = vpop.f32.mrb[76].mxu0  ;;  %v12221_v39 = vpop.f32.mrb[76].mxu1 }
 0x1b9   :  { %v12224_v43 = vadd.f32 %v993_v13, %v12163_v31  ;;  %v10248_v44 = vpop.f32.mrb[77].mxu0  ;;  %v10278_v40 = vpop.f32.mrb[77].mxu1 }
 0x1ba   :  { %v996_v21 = vpop.f32.mrb[78].mxu0  ;;  %v12226_v50 = vpop.f32.mrb[78].mxu1 }
 0x1bb   :  { %v12229_v47 = vadd.f32 %v996_v21, %v12166_v37  ;;  %v10249_v49 = vpop.f32.mrb[79].mxu0  ;;  %v10279_v1 = vpop.f32.mrb[79].mxu1 }
 0x1c0   :  { %v1001_v26 = vpop.f32.mrb[80].mxu0  ;;  %v12231_v53 = vpop.f32.mrb[80].mxu1 }
 0x1c1   :  { %v12234_v54 = vadd.f32 %v1001_v26, %v12169_v46  ;;  %v10252_v55 = vpop.f32.mrb[81].mxu0  ;;  %v10282_v58 = vpop.f32.mrb[81].mxu1 }
 0x1c2   :  { %v1004_v31 = vpop.f32.mrb[82].mxu0  ;;  %v1267_v60 = vpop.f32.mrb[82].mxu1 }
 0x1c3   :  { %v10253_v61 = vpop.f32.mrb[83].mxu0  ;;  %v10283_v4 = vpop.f32.mrb[83].mxu1 }
 0x1c8   :  { %v1325_v5 = vpop.f32.mrb[84].mxu0  ;;  %v1467_v2 = vpop.f32.mrb[84].mxu1 }
 0x1c9   :  { %v1326_v63 = vadd.f32 %v1325_v5, %v12171_v52  ;;  %v10288_v37 = vpop.f32.mrb[85].mxu0  ;;  %v10318_v10 = vpop.f32.mrb[85].mxu1 }
 0x1ca   :  { %v1328_v34 = vpop.f32.mrb[86].mxu0  ;;  %v1470_v8 = vpop.f32.mrb[86].mxu1 }
 0x1cb   :  { %v12237_v14 = vadd.f32 %v1467_v2, %v1326_v63  ;;  %v1329_v45 = vadd.f32 %v1328_v34, %v12176_v51  ;;  %v10289_v46 = vpop.f32.mrb[87].mxu0  ;;  %v10319_v19 = vpop.f32.mrb[87].mxu1 }
 0x1cd   :  { %v12240_v20 = vadd.f32 %v1470_v8, %v1329_v45 }
 0x1d0   :  { %v1333_v48 = vpop.f32.mrb[88].mxu0  ;;  %v1475_v23 = vpop.f32.mrb[88].mxu1 }
 0x1d1   :  { %v1334_v24 = vadd.f32 %v1333_v48, %v12181_v56  ;;  %v10292_v57 = vpop.f32.mrb[89].mxu0  ;;  %v10322_v28 = vpop.f32.mrb[89].mxu1 }
 0x1d2   :  { %v1336_v29 = vpop.f32.mrb[90].mxu0  ;;  %v1478_v52 = vpop.f32.mrb[90].mxu1 }
 0x1d3   :  { %v12243_v62 = vadd.f32 %v1475_v23, %v1334_v24  ;;  %v1337_v32 = vadd.f32 %v1336_v29, %v12186_v41  ;;  %v10293_v33 = vpop.f32.mrb[91].mxu0  ;;  %v10323_v9 = vpop.f32.mrb[91].mxu1 }
 0x1d5   :  { %v12246_v42 = vadd.f32 %v1478_v52, %v1337_v32 }
 0x1d8   :  { %v1341_v51 = vpop.f32.mrb[92].mxu0  ;;  %v1483_v38 = vpop.f32.mrb[92].mxu1 }
 0x1d9   :  { %v1342_v13 = vadd.f32 %v1341_v51, %v12191_v11  ;;  %v10296_v44 = vpop.f32.mrb[93].mxu0  ;;  %v10326_v40 = vpop.f32.mrb[93].mxu1 }
 0x1da   :  { %v1344_v21 = vpop.f32.mrb[94].mxu0  ;;  %v1486_v56 = vpop.f32.mrb[94].mxu1 }
 0x1db   :  { %v12249_v49 = vadd.f32 %v1483_v38, %v1342_v13  ;;  %v1345_v1 = vadd.f32 %v1344_v21, %v12196_v15  ;;  %v10297_v26 = vpop.f32.mrb[95].mxu0  ;;  %v10327_v55 = vpop.f32.mrb[95].mxu1 }
 0x1dd   :  { %v12252_v58 = vadd.f32 %v1486_v56, %v1345_v1 }
 0x1e0   :  { %v1349_v41 = vpop.f32.mrb[96].mxu0  ;;  %v1491_v31 = vpop.f32.mrb[96].mxu1 }
 0x1e1   :  { %v1350_v60 = vadd.f32 %v1349_v41, %v12201_v17  ;;  %v10300_v61 = vpop.f32.mrb[97].mxu0  ;;  %v10330_v4 = vpop.f32.mrb[97].mxu1 }
 0x1e2   :  { %v1352_v5 = vpop.f32.mrb[98].mxu0  ;;  %v1494_v11 = vpop.f32.mrb[98].mxu1  ;;  %v12275_v4 = vld [vmem:[#allocation4] ss:$0 sm:$0xff] }
 0x1e3   :  { %v12255_v2 = vadd.f32 %v1491_v31, %v1350_v60  ;;  %v1353_v63 = vadd.f32 %v1352_v5, %v12206_v25  ;;  %v10301_v37 = vpop.f32.mrb[99].mxu0  ;;  %v10331_v10 = vpop.f32.mrb[99].mxu1 }
 0x1e5   :  { %v12258_v34 = vadd.f32 %v1494_v11, %v1353_v63 }
 0x1e8   :  { %v1357_v15 = vpop.f32.mrb[100].mxu0  ;;  %v1499_v8 = vpop.f32.mrb[100].mxu1 }
 0x1e9   :  { %v1358_v45 = vadd.f32 %v1357_v15, %v12211_v30  ;;  %v10304_v46 = vpop.f32.mrb[101].mxu0  ;;  %v10334_v19 = vpop.f32.mrb[101].mxu1 }
 0x1ea   :  { %v1360_v48 = vpop.f32.mrb[102].mxu0  ;;  %v1502_v17 = vpop.f32.mrb[102].mxu1 }
 0x1eb   :  { %v12261_v23 = vadd.f32 %v1499_v8, %v1358_v45  ;;  %v1361_v24 = vadd.f32 %v1360_v48, %v12216_v36  ;;  %v10305_v57 = vpop.f32.mrb[103].mxu0  ;;  %v10335_v28 = vpop.f32.mrb[103].mxu1  ;;  %v1024_v8 = vadd.f32 %v12275_v4, %v12174_v59  ;;  %v1026_v45 = vadd.f32 %v12275_v4, %v12184_v3 }
 0x1ec   :  { %v1028_v3 = vadd.f32 %v12275_v4, %v12194_v12  ;;  %v1029_v12 = vadd.f32 %v12275_v4, %v12199_v16 }
 0x1ed   :  { %v12264_v29 = vadd.f32 %v1502_v17, %v1361_v24  ;;  %v1027_v24 = vadd.f32 %v12275_v4, %v12189_v6  ;;  %v1037_v57 = vmul.f32 0.1, %v1024_v8  ;;  %v1039_v28 = vmul.f32 0.1, %v1026_v45 }
 0x1ef   :  { %v1040_v59 = vmul.f32 0.1, %v1027_v24  ;;  %v12294_v6 = vmax.f32 %v1026_v45, %v1039_v28 }
 0x1f0   :  { %v1365_v25 = vpop.f32.mrb[104].mxu0  ;;  %v1507_v52 = vpop.f32.mrb[104].mxu1 }
 0x1f1   :  { %v1366_v32 = vadd.f32 %v1365_v25, %v12221_v39  ;;  %v10308_v33 = vpop.f32.mrb[105].mxu0  ;;  %v10338_v9 = vpop.f32.mrb[105].mxu1 }
 0x1f2   :  { %v1368_v51 = vpop.f32.mrb[106].mxu0  ;;  %v1510_v30 = vpop.f32.mrb[106].mxu1 }
 0x1f3   :  { %v12267_v38 = vadd.f32 %v1507_v52, %v1366_v32  ;;  %v1369_v13 = vadd.f32 %v1368_v51, %v12226_v50  ;;  %v10309_v44 = vpop.f32.mrb[107].mxu0  ;;  %v10339_v40 = vpop.f32.mrb[107].mxu1  ;;  %v1025_v50 = vadd.f32 %v12275_v4, %v12179_v7 }
 0x1f5   :  { %v12270_v21 = vadd.f32 %v1510_v30, %v1369_v13  ;;  %v1038_v7 = vmul.f32 0.1, %v1025_v50  ;;  %v12292_v13 = vmax.f32 %v1024_v8, %v1037_v57 }
 0x1f7   :  { %v12287_v25 = vmax.f32 %v1025_v50, %v1038_v7 }
 0x1f8   :  { %v1373_v36 = vpop.f32.mrb[108].mxu0  ;;  %v1515_v56 = vpop.f32.mrb[108].mxu1 }
 0x1f9   :  { %v1374_v1 = vadd.f32 %v1373_v36, %v12231_v53  ;;  %v10312_v26 = vpop.f32.mrb[109].mxu0  ;;  %v10342_v55 = vpop.f32.mrb[109].mxu1 }
 0x1fa   :  { %v1376_v41 = vpop.f32.mrb[110].mxu0  ;;  %v1518_v39 = vpop.f32.mrb[110].mxu1  ;;  %v1041_v26 = vmul.f32 0.1, %v1028_v3 }
 0x1fb   :  { %v12273_v31 = vadd.f32 %v1515_v56, %v1374_v1  ;;  %v10313_v60 = vpop.f32.mrb[111].mxu0  ;;  %v10343_v61 = vpop.f32.mrb[111].mxu1  ;;  %v1064_v1 = vsel %vm312_vm2, %v12287_v25, 0.0  ;;  %v1030_v39 = vadd.f32 %v12275_v4, %v12204_v22 }
 0x1fc   :  { %v1066_v61 = vsel %vm312_vm2, %v12294_v6, 0.0 }
 0x200   :  { %v1622_v5 = vpop.f32.mrb[112].mxu0  ;;  %v1777_v11 = vpop.f32.mrb[112].mxu1 }
 0x201   :  { %v1676_v63 = vadd.f32 %v1622_v5, %v12237_v14  ;;  %v10348_v37 = vpop.f32.mrb[113].mxu0  ;;  %v10378_v10 = vpop.f32.mrb[113].mxu1  ;;  %v1042_v5 = vmul.f32 0.1, %v1029_v12 }
 0x202   :  { %v1625_v53 = vpop.f32.mrb[114].mxu0  ;;  %v1780_v15 = vpop.f32.mrb[114].mxu1  ;;  %v12314_v10 = vmax.f32 %v1028_v3, %v1041_v26 }
 0x203   :  { %v1831_v46 = vadd.f32 %v1777_v11, %v1676_v63  ;;  %v1677_v19 = vadd.f32 %v1625_v53, %v12240_v20  ;;  %v10349_v48 = vpop.f32.mrb[115].mxu0  ;;  %v10379_v17 = vpop.f32.mrb[115].mxu1 }
 0x204   :  { %v1070_v3 = vsel %vm312_vm2, %v12314_v10, 0.0 }
 0x205   :  { %v1832_v14 = vadd.f32 %v1780_v15, %v1677_v19  ;;  %v1844_v60 = vadd.f32 %v12275_v4, %v1831_v46  ;;  %v1043_v46 = vmul.f32 0.1, %v1030_v39  ;;  %v1031_v19 = vadd.f32 %v12275_v4, %v12209_v27 }
 0x207   :  { %v1845_v55 = vadd.f32 %v12275_v4, %v1832_v14  ;;  %v1857_v48 = vmul.f32 0.1, %v1844_v60 }
 0x208   :  { %v1630_v52 = vpop.f32.mrb[116].mxu0  ;;  %v1785_v32 = vpop.f32.mrb[116].mxu1 }
 0x209   :  { %v1678_v33 = vadd.f32 %v1630_v52, %v12243_v62  ;;  %v10352_v20 = vpop.f32.mrb[117].mxu0  ;;  %v10382_v9 = vpop.f32.mrb[117].mxu1  ;;  %v12301_v62 = vmax.f32 %v1027_v24, %v1040_v59  ;;  %v1858_v22 = vmul.f32 0.1, %v1845_v55  ;;  %v12321_v59 = vmax.f32 %v1029_v12, %v1042_v5 }
 0x20a   :  { %v1633_v51 = vpop.f32.mrb[118].mxu0  ;;  %v1788_v30 = vpop.f32.mrb[118].mxu1 }
 0x20b   :  { %v1833_v44 = vadd.f32 %v1785_v32, %v1678_v33  ;;  %v1679_v40 = vadd.f32 %v1633_v51, %v12246_v42  ;;  %v10353_v36 = vpop.f32.mrb[119].mxu0  ;;  %v10383_v56 = vpop.f32.mrb[119].mxu1  ;;  %v1063_v42 = vsel %vm312_vm2, %v12292_v13, 0.0  ;;  %v1068_v37 = vsel %vm312_vm2, %v12301_v62, 0.0 }
 0x20c   :  { %v1065_v16 = vadd.f32 %v1064_v1, %v1063_v42  ;;  %v12327_v27 = vmax.f32 %v1845_v55, %v1858_v22  ;;  %v12330_v51 = vmax.f32 %v1030_v39, %v1043_v46  ;;  %v1033_v1 = vadd.f32 %v12275_v4, %v12219_v35 }
 0x20d   :  { %v1834_v41 = vadd.f32 %v1788_v30, %v1679_v40  ;;  %v1846_v50 = vadd.f32 %v12275_v4, %v1833_v44  ;;  %v1044_v30 = vmul.f32 0.1, %v1031_v19  ;;  %v1034_v35 = vadd.f32 %v12275_v4, %v12224_v43 }
 0x20e   :  { %v1067_v45 = vadd.f32 %v1066_v61, %v1065_v16  ;;  %v1884_v55 = vsel %vm312_vm2, %v12327_v27, 0.0 }
 0x20f   :  { %v1859_v24 = vmul.f32 0.1, %v1846_v50  ;;  %v1847_v14 = vadd.f32 %v12275_v4, %v1834_v41  ;;  %v12346_v16 = vmax.f32 %v1031_v19, %v1044_v30  ;;  %v1046_v19 = vmul.f32 0.1, %v1033_v1 }
 0x210   :  { %v1638_v11 = vpop.f32.mrb[120].mxu0  ;;  %v1793_v63 = vpop.f32.mrb[120].mxu1  ;;  %v1069_v9 = vadd.f32 %v1068_v37, %v1067_v45 }
 0x211   :  { %v1680_v53 = vadd.f32 %v1638_v11, %v12249_v49  ;;  %v10356_v15 = vpop.f32.mrb[121].mxu0  ;;  %v10386_v8 = vpop.f32.mrb[121].mxu1  ;;  %v1032_v49 = vadd.f32 %v12275_v4, %v12214_v18  ;;  %v12334_v44 = vmax.f32 %v1846_v50, %v1859_v24  ;;  %v1860_v40 = vmul.f32 0.1, %v1847_v14 }
 0x212   :  { %v1641_v17 = vpop.f32.mrb[122].mxu0  ;;  %v1796_v7 = vpop.f32.mrb[122].mxu1  ;;  %v1071_v36 = vadd.f32 %v1070_v3, %v1069_v9  ;;  %v1072_v18 = vsel %vm312_vm2, %v12321_v59, 0.0  ;;  %v1074_v50 = vsel %vm312_vm2, %v12330_v51, 0.0 }
 0x213   :  { %v1835_v57 = vadd.f32 %v1793_v63, %v1680_v53  ;;  %v1681_v28 = vadd.f32 %v1641_v17, %v12252_v58  ;;  %v10357_v52 = vpop.f32.mrb[123].mxu0  ;;  %v10387_v32 = vpop.f32.mrb[123].mxu1  ;;  %v12332_v58 = vmax.f32 %v1844_v60, %v1857_v48  ;;  %v1045_v56 = vmul.f32 0.1, %v1032_v49 }
 0x214   :  { %v1886_v37 = vsel %vm312_vm2, %v12334_v44, 0.0  ;;  %v12354_v22 = vmax.f32 %v1847_v14, %v1860_v40  ;;  %v1073_v45 = vadd.f32 %v1072_v18, %v1071_v36  ;;  %v1035_v14 = vadd.f32 %v12275_v4, %v12229_v47  ;;  %v11185_v47 = vld [vmem:[%s14744_s3 + $0x8] sm:$0xff]  }
 0x215   :  { %v1848_v33 = vadd.f32 %v12275_v4, %v1835_v57  ;;  %v1836_v20 = vadd.f32 %v1796_v7, %v1681_v28  ;;  %v1883_v5 = vsel %vm312_vm2, %v12332_v58, 0.0  ;;  %v12357_v46 = vmax.f32 %v1032_v49, %v1045_v56  ;;  %10404 = vmatprep.subr.bf16.mxu0 %v11185_v47  ;;  %10454 = vmatprep.subr.bf16.mxu1 %v11185_v47 }
 0x216   :  { %v1885_v43 = vadd.f32 %v1884_v55, %v1883_v5  ;;  %v1075_v57 = vadd.f32 %v1074_v50, %v1073_v45  ;;  %v1047_v28 = vmul.f32 0.1, %v1034_v35  ;;  %v1888_v32 = vsel %vm312_vm2, %v12354_v22, 0.0  ;;  %10405 = vmatpush3.bf16.msra.mxu0 %v11185_v47  ;;  %10455 = vmatpush3.bf16.msra.mxu1 %v11185_v47 }
 0x217   :  { %v1861_v41 = vmul.f32 0.1, %v1848_v33  ;;  %v1849_v39 = vadd.f32 %v12275_v4, %v1836_v20  ;;  %v1036_v20 = vadd.f32 %v12275_v4, %v12234_v54  ;;  %v12376_v40 = vmax.f32 %v1033_v1, %v1046_v19 }
 0x218   :  { %v1646_v12 = vpop.f32.mrb[124].mxu0  ;;  %v1801_v26 = vpop.f32.mrb[124].mxu1  ;;  %v1887_v52 = vadd.f32 %v1886_v37, %v1885_v43  ;;  %v1048_v54 = vmul.f32 0.1, %v1035_v14 }
 0x219   :  { %v1682_v60 = vadd.f32 %v1646_v12, %v12255_v2  ;;  %v10360_v42 = vpop.f32.mrb[125].mxu0  ;;  %v10390_v61 = vpop.f32.mrb[125].mxu1  ;;  %v12359_v48 = vmax.f32 %v1848_v33, %v1861_v41  ;;  %v1862_v17 = vmul.f32 0.1, %v1849_v39  ;;  %v1078_v33 = vsel %vm312_vm2, %v12357_v46, 0.0 }
 0x21a   :  { %v1649_v11 = vpop.f32.mrb[126].mxu0  ;;  %v1804_v63 = vpop.f32.mrb[126].mxu1  ;;  %v12383_v41 = vmax.f32 %v1034_v35, %v1047_v28  ;;  %v1049_v37 = vmul.f32 0.1, %v1036_v20 }
 0x21b   :  { %v1837_v2 = vadd.f32 %v1801_v26, %v1682_v60  ;;  %v1683_v53 = vadd.f32 %v1649_v11, %v12258_v34  ;;  %v10361_v15 = vpop.f32.mrb[127].mxu0  ;;  %v10391_v8 = vpop.f32.mrb[127].mxu1  ;;  %v1076_v34 = vsel %vm312_vm2, %v12346_v16, 0.0  ;;  %v1890_v36 = vsel %vm312_vm2, %v12359_v48, 0.0 }
 0x21c   :  { %v12380_v18 = vmax.f32 %v1849_v39, %v1862_v17  ;;  %v1077_v55 = vadd.f32 %v1076_v34, %v1075_v57  ;;  %v1889_v60 = vadd.f32 %v1888_v32, %v1887_v52  ;;  %v1082_v45 = vsel %vm312_vm2, %v12383_v41, 0.0 }
 0x21d   :  { %v1850_v7 = vadd.f32 %v12275_v4, %v1837_v2  ;;  %v1838_v24 = vadd.f32 %v1804_v63, %v1683_v53  ;;  %v1080_v2 = vsel %vm312_vm2, %v12376_v40, 0.0  ;;  %v12402_v57 = vmax.f32 %v1036_v20, %v1049_v37 }
 0x21e   :  { %v1891_v35 = vadd.f32 %v1890_v36, %v1889_v60  ;;  %v1892_v53 = vsel %vm312_vm2, %v12380_v18, 0.0 }
 0x21f   :  { %v1863_v49 = vmul.f32 0.1, %v1850_v7  ;;  %v1851_v3 = vadd.f32 %v12275_v4, %v1838_v24  ;;  %v1087_v60 = vsel %vm1086_vm3, %v12402_v57, 0.0 }
 0x220   :  { %v1654_v9 = vpop.f32.mrb[128].mxu0  ;;  %v1809_v30 = vpop.f32.mrb[128].mxu1  ;;  %v1893_v28 = vadd.f32 %v1892_v53, %v1891_v35 }
 0x221   :  { %v1684_v56 = vadd.f32 %v1654_v9, %v12261_v23  ;;  %v10364_v12 = vpop.f32.mrb[129].mxu0  ;;  %v10394_v26 = vpop.f32.mrb[129].mxu1  ;;  %v12385_v1 = vmax.f32 %v1850_v7, %v1863_v49  ;;  %v1864_v50 = vmul.f32 0.1, %v1851_v3  ;;  %v1079_v23 = vadd.f32 %v1078_v33, %v1077_v55 }
 0x222   :  { %v1657_v42 = vpop.f32.mrb[130].mxu0  ;;  %v1812_v61 = vpop.f32.mrb[130].mxu1 }
 0x223   :  { %v1839_v5 = vadd.f32 %v1809_v30, %v1684_v56  ;;  %v1685_v39 = vadd.f32 %v1657_v42, %v12264_v29  ;;  %v10365_v11 = vpop.f32.mrb[131].mxu0  ;;  %v10395_v63 = vpop.f32.mrb[131].mxu1  ;;  %v12395_v29 = vmax.f32 %v1035_v14, %v1048_v54  ;;  %v1894_v19 = vsel %vm312_vm2, %v12385_v1, 0.0 }
 0x224   :  { %v12399_v43 = vmax.f32 %v1851_v3, %v1864_v50  ;;  %v1081_v24 = vadd.f32 %v1080_v2, %v1079_v23  ;;  %v1895_v47 = vadd.f32 %v1894_v19, %v1893_v28 }
 0x225   :  { %v1852_v15 = vadd.f32 %v12275_v4, %v1839_v5  ;;  %v1840_v8 = vadd.f32 %v1812_v61, %v1685_v39  ;;  %v1084_v56 = vsel %vm312_vm2, %v12395_v29, 0.0 }
 0x226   :  { %v1083_v30 = vadd.f32 %v1082_v45, %v1081_v24  ;;  %v1896_v20 = vsel %vm312_vm2, %v12399_v43, 0.0 }
 0x227   :  { %v1865_v17 = vmul.f32 0.1, %v1852_v15  ;;  %v1853_v7 = vadd.f32 %v12275_v4, %v1840_v8  ;;  %v1897_v39 = vadd.f32 %v1896_v20, %v1895_v47 }
 0x228   :  { %v1662_v52 = vpop.f32.mrb[132].mxu0  ;;  %v1817_v34 = vpop.f32.mrb[132].mxu1 }
 0x229   :  { %v12404_v32 = vmax.f32 %v1852_v15, %v1865_v17  ;;  %v1866_v49 = vmul.f32 0.1, %v1853_v7  ;;  %v1686_v14 = vadd.f32 %v1662_v52, %v12267_v38  ;;  %v10368_v33 = vpop.f32.mrb[133].mxu0  ;;  %v10398_v9 = vpop.f32.mrb[133].mxu1  ;;  %v12415_v38 = vld [vmem:[%s14744_s3] sm:$0xff]  }
 0x22a   :  { %v1665_v3 = vpop.f32.mrb[134].mxu0  ;;  %v1820_v36 = vpop.f32.mrb[134].mxu1  ;;  %10414 = vmatprep.subr.bf16.mxu0 %v12415_v38  ;;  %10464 = vmatprep.subr.bf16.mxu1 %v12415_v38 }
 0x22b   :  { %v1841_v12 = vadd.f32 %v1817_v34, %v1686_v14  ;;  %v1687_v26 = vadd.f32 %v1665_v3, %v12270_v21  ;;  %v10369_v55 = vpop.f32.mrb[135].mxu0  ;;  %v10399_v54 = vpop.f32.mrb[135].mxu1  ;;  %v1898_v42 = vsel %vm312_vm2, %v12404_v32, 0.0  ;;  %v12421_v61 = vmax.f32 %v1853_v7, %v1866_v49 }
 0x22c   :  { %v1085_v21 = vadd.f32 %v1084_v56, %v1083_v30  ;;  %v1899_v37 = vadd.f32 %v1898_v42, %v1897_v39 }
 0x22d   :  { %v1854_v50 = vadd.f32 %v12275_v4, %v1841_v12  ;;  %v1842_v5 = vadd.f32 %v1820_v36, %v1687_v26  ;;  %v1900_v53 = vsel %vm312_vm2, %v12421_v61, 0.0 }
 0x22e   :  { %v1088_v23 = vadd.f32 %v1087_v60, %v1085_v21  ;;  %v1901_v9 = vadd.f32 %v1900_v53, %v1899_v37 }
 0x22f   :  { %v1867_v11 = vmul.f32 0.1, %v1854_v50  ;;  %v1855_v63 = vadd.f32 %v12275_v4, %v1842_v5 }
 0x230   :  { %v1670_v35 = vpop.f32.mrb[136].mxu0  ;;  %v1825_v2 = vpop.f32.mrb[136].mxu1  ;;  %v1089_v33 = vrot.slane %v1088_v23, 4 }
 0x231   :  { %v12429_v15 = vmax.f32 %v1854_v50, %v1867_v11  ;;  %v1868_v8 = vmul.f32 0.1, %v1855_v63  ;;  %v1688_v45 = vadd.f32 %v1670_v35, %v12273_v31  ;;  %v10372_v19 = vpop.f32.mrb[137].mxu0  ;;  %v10402_v17 = vpop.f32.mrb[137].mxu1 }
 0x232   :  { %v1673_v7 = vpop.f32.mrb[138].mxu0  ;;  %v1828_v24 = vpop.f32.mrb[138].mxu1  ;;  %v1090_v36 = vadd.f32 %v1089_v33, %v1088_v23 }
 0x233   :  { %v1902_v28 = vsel %vm312_vm2, %v12429_v15, 0.0  ;;  %v12434_v52 = vmax.f32 %v1855_v63, %v1868_v8  ;;  %v1843_v34 = vadd.f32 %v1825_v2, %v1688_v45  ;;  %v10373_v49 = vpop.f32.mrb[139].mxu0  ;;  %v10403_v14 = vpop.f32.mrb[139].mxu1 }
 0x234   :  { %v1903_v47 = vadd.f32 %v1902_v28, %v1901_v9  ;;  %v1091_v26 = vrot.slane %v1090_v36, 2 }
 0x235   :  { %v1856_v30 = vadd.f32 %v12275_v4, %v1843_v34  ;;  %v1904_v31 = vsel %vm312_vm2, %v12434_v52, 0.0 }
 0x236   :  { %v1905_v20 = vadd.f32 %v1904_v31, %v1903_v47  ;;  %v1092_v60 = vadd.f32 %v1091_v26, %v1090_v36 }
 0x237   :  { %v1869_v3 = vmul.f32 0.1, %v1856_v30 }
 0x238   :  { %v1093_v5 = vrot.slane %v1092_v60, 1 }
 0x239   :  { %v12439_v56 = vmax.f32 %v1856_v30, %v1869_v3 }
 0x23a   :  { %v1094_v39 = vadd.f32 %v1093_v5, %v1092_v60 }
 0x23b   :  { %v1906_v12 = vsel %vm1086_vm3, %v12439_v56, 0.0 }
 0x23c   :  { %v1907_v55 = vadd.f32 %v1906_v12, %v1905_v20 }
 0x23e   :  { %v1908_v54 = vrot.slane %v1907_v55, 4 }
 0x240   :  { %v1909_v42 = vadd.f32 %v1908_v54, %v1907_v55 }
 0x242   :  { %v1910_v50 = vrot.slane %v1909_v42, 2 }
 0x244   :  { %v1911_v4 = vadd.f32 %v1910_v50, %v1909_v42 }
 0x246   :  { %v1912_v21 = vrot.slane %v1911_v4, 1 }
 0x248   :  { %v1913_v11 = vadd.f32 %v1912_v21, %v1911_v4 }
 0x24a   :  { %v1914_v63 = vadd.f32 %v1913_v11, %v1094_v39 }
 0x24c   :  { %v12443_v37 = vmul.f32 0.005, %v1914_v63 }
 0x24e   :  { %v1916_v23 = vsub.f32 %v12292_v13, %v12443_v37  ;;  %v1917_v35 = vsub.f32 %v12287_v25, %v12443_v37  ;;  %v1918_v2 = vsub.f32 %v12294_v6, %v12443_v37  ;;  %v1919_v53 = vsub.f32 %v12301_v62, %v12443_v37 }
 0x24f   :  { %v1920_v19 = vsub.f32 %v12314_v10, %v12443_v37  ;;  %v1921_v7 = vsub.f32 %v12321_v59, %v12443_v37  ;;  %v1922_v14 = vsub.f32 %v12330_v51, %v12443_v37  ;;  %v1923_v30 = vsub.f32 %v12346_v16, %v12443_v37 }
 0x250   :  { %v1929_v8 = vmul.f32 %v1916_v23, %v1916_v23  ;;  %v1930_v45 = vmul.f32 %v1917_v35, %v1917_v35  ;;  %v1931_v17 = vmul.f32 %v1918_v2, %v1918_v2  ;;  %v1932_v24 = vmul.f32 %v1919_v53, %v1919_v53 }
 0x251   :  { %v1933_v33 = vmul.f32 %v1920_v19, %v1920_v19  ;;  %v1934_v31 = vmul.f32 %v1921_v7, %v1921_v7  ;;  %v1973_v36 = vsub.f32 %v12332_v58, %v12443_v37  ;;  %v1974_v20 = vsub.f32 %v12327_v27, %v12443_v37 }
 0x252   :  { %v1942_v28 = vsel %vm312_vm2, %v1929_v8, 0.0  ;;  %v1943_v34 = vsel %vm312_vm2, %v1930_v45, 0.0  ;;  %v1945_v9 = vsel %vm312_vm2, %v1931_v17, 0.0  ;;  %v1947_v3 = vsel %vm312_vm2, %v1932_v24, 0.0 }
 0x253   :  { %v1944_v49 = vadd.f32 %v1943_v34, %v1942_v28  ;;  %v1924_v26 = vsub.f32 %v12357_v46, %v12443_v37  ;;  %v1935_v55 = vmul.f32 %v1922_v14, %v1922_v14  ;;  %v1949_v54 = vsel %vm312_vm2, %v1933_v33, 0.0 }
 0x254   :  { %v1975_v60 = vsub.f32 %v12334_v44, %v12443_v37  ;;  %v1925_v42 = vsub.f32 %v12376_v40, %v12443_v37  ;;  %v1936_v50 = vmul.f32 %v1923_v30, %v1923_v30  ;;  %v1951_v4 = vsel %vm312_vm2, %v1934_v31, 0.0 }
 0x255   :  { %v1946_v47 = vadd.f32 %v1945_v9, %v1944_v49  ;;  %v1976_v21 = vsub.f32 %v12354_v22, %v12443_v37  ;;  %v1986_v39 = vmul.f32 %v1973_v36, %v1973_v36  ;;  %v1987_v11 = vmul.f32 %v1974_v20, %v1974_v20 }
 0x256   :  { %v1926_v63 = vsub.f32 %v12383_v41, %v12443_v37  ;;  %v1937_v35 = vmul.f32 %v1924_v26, %v1924_v26  ;;  %v1953_v2 = vsel %vm312_vm2, %v1935_v55, 0.0  ;;  %v1977_v53 = vsub.f32 %v12359_v48, %v12443_v37 }
 0x257   :  { %v1948_v12 = vadd.f32 %v1947_v3, %v1946_v47  ;;  %v1988_v8 = vmul.f32 %v1975_v60, %v1975_v60  ;;  %v1927_v45 = vsub.f32 %v12395_v29, %v12443_v37  ;;  %v1938_v19 = vmul.f32 %v1925_v42, %v1925_v42 }
 0x258   :  { %v1999_v7 = vsel %vm312_vm2, %v1986_v39, 0.0  ;;  %v1955_v24 = vsel %vm312_vm2, %v1936_v50, 0.0  ;;  %v1978_v28 = vsub.f32 %v12380_v18, %v12443_v37  ;;  %v1989_v34 = vmul.f32 %v1976_v21, %v1976_v21 }
 0x259   :  { %v1950_v5 = vadd.f32 %v1949_v54, %v1948_v12  ;;  %v2000_v49 = vsel %vm312_vm2, %v1987_v11, 0.0  ;;  %v1928_v14 = vsub.f32 %v12402_v57, %v12443_v37  ;;  %v1939_v33 = vmul.f32 %v1926_v63, %v1926_v63 }
 0x25a   :  { %v2001_v30 = vadd.f32 %v2000_v49, %v1999_v7  ;;  %v1957_v47 = vsel %vm312_vm2, %v1937_v35, 0.0  ;;  %v1979_v31 = vsub.f32 %v12385_v1, %v12443_v37  ;;  %v1990_v3 = vmul.f32 %v1977_v53, %v1977_v53 }
 0x25b   :  { %v1952_v23 = vadd.f32 %v1951_v4, %v1950_v5  ;;  %v2002_v36 = vsel %vm312_vm2, %v1988_v8, 0.0  ;;  %v1940_v20 = vmul.f32 %v1927_v45, %v1927_v45  ;;  %v1959_v55 = vsel %vm312_vm2, %v1938_v19, 0.0 }
 0x25c   :  { %v2003_v26 = vadd.f32 %v2002_v36, %v2001_v30  ;;  %v1980_v54 = vsub.f32 %v12399_v43, %v12443_v37  ;;  %v1991_v60 = vmul.f32 %v1978_v28, %v1978_v28  ;;  %v2004_v42 = vsel %vm312_vm2, %v1989_v34, 0.0 }
 0x25d   :  { %v1954_v17 = vadd.f32 %v1953_v2, %v1952_v23  ;;  %v1941_v50 = vmul.f32 %v1928_v14, %v1928_v14  ;;  %v1961_v21 = vsel %vm312_vm2, %v1939_v33, 0.0  ;;  %v1981_v39 = vsub.f32 %v12404_v32, %v12443_v37 }
 0x25e   :  { %v2005_v4 = vadd.f32 %v2004_v42, %v2003_v26  ;;  %v1992_v11 = vmul.f32 %v1979_v31, %v1979_v31  ;;  %v2006_v63 = vsel %vm312_vm2, %v1990_v3, 0.0  ;;  %v1963_v2 = vsel %vm312_vm2, %v1940_v20, 0.0 }
 0x25f   :  { %v1956_v9 = vadd.f32 %v1955_v24, %v1954_v17  ;;  %v1982_v53 = vsub.f32 %v12421_v61, %v12443_v37  ;;  %v1993_v8 = vmul.f32 %v1980_v54, %v1980_v54  ;;  %v2008_v45 = vsel %vm312_vm2, %v1991_v60, 0.0 }
 0x260   :  { %v2007_v35 = vadd.f32 %v2006_v63, %v2005_v4  ;;  %v1965_v7 = vsel %vm1086_vm3, %v1941_v50, 0.0  ;;  %v1983_v24 = vsub.f32 %v12429_v15, %v12443_v37  ;;  %v1994_v28 = vmul.f32 %v1981_v39, %v1981_v39 }
 0x261   :  { %v1958_v12 = vadd.f32 %v1957_v47, %v1956_v9  ;;  %v2010_v34 = vsel %vm312_vm2, %v1992_v11, 0.0  ;;  %v1984_v33 = vsub.f32 %v12434_v52, %v12443_v37  ;;  %v1995_v9 = vmul.f32 %v1982_v53, %v1982_v53 }
 0x262   :  { %v2009_v17 = vadd.f32 %v2008_v45, %v2007_v35  ;;  %v2012_v30 = vsel %vm312_vm2, %v1993_v8, 0.0  ;;  %v1985_v3 = vsub.f32 %v12439_v56, %v12443_v37  ;;  %v1996_v36 = vmul.f32 %v1983_v24, %v1983_v24 }
 0x263   :  { %v1960_v5 = vadd.f32 %v1959_v55, %v1958_v12  ;;  %v2014_v20 = vsel %vm312_vm2, %v1994_v28, 0.0  ;;  %v1997_v26 = vmul.f32 %v1984_v33, %v1984_v33  ;;  %v2016_v55 = vsel %vm312_vm2, %v1995_v9, 0.0  ;;  %v239_v33 = vld [vmem:[#allocation4 + $0x1] sm:$0x1] }
 0x264   :  { %v2011_v14 = vadd.f32 %v2010_v34, %v2009_v17  ;;  %v1998_v42 = vmul.f32 %v1985_v3, %v1985_v3  ;;  %v2018_v50 = vsel %vm312_vm2, %v1996_v36, 0.0 }
 0x265   :  { %v1962_v23 = vadd.f32 %v1961_v21, %v1960_v5  ;;  %v2020_v4 = vsel %vm312_vm2, %v1997_v26, 0.0 }
 0x266   :  { %v2013_v31 = vadd.f32 %v2012_v30, %v2011_v14  ;;  %v2022_v11 = vsel %vm1086_vm3, %v1998_v42, 0.0 }
 0x267   :  { %v1964_v19 = vadd.f32 %v1963_v2, %v1962_v23 }
 0x268   :  { %v2015_v12 = vadd.f32 %v2014_v20, %v2013_v31  ;;  %v240_v31 = vld [vmem:[#allocation4 + $0x2] sm:$0x1] }
 0x269   :  { %v1966_v49 = vadd.f32 %v1965_v7, %v1964_v19 }
 0x26a   :  { %v2017_v60 = vadd.f32 %v2016_v55, %v2015_v12 }
 0x26b   :  { %v1967_v47 = vrot.slane %v1966_v49, 4 }
 0x26c   :  { %v2019_v5 = vadd.f32 %v2018_v50, %v2017_v60 }
 0x26d   :  { %v1968_v54 = vadd.f32 %v1967_v47, %v1966_v49  ;;  %v2037_v49 = vlaneseq }
 0x26e   :  { %v2021_v39 = vadd.f32 %v2020_v4, %v2019_v5 }
 0x26f   :  { %v1969_v21 = vrot.slane %v1968_v54, 2  ;;  %v12524_v14 = vshrl.u32 %v2037_v49, 7 }
 0x270   :  { %v2023_v63 = vadd.f32 %v2022_v11, %v2021_v39 }
 0x271   :  { %v1970_v23 = vadd.f32 %v1969_v21, %v1968_v54  ;;  %v12527_v9 = vsub.s32 0, %v12524_v14 }
 0x272   :  { %v2024_v35 = vrot.slane %v2023_v63, 4 }
 0x273   :  { %v1971_v53 = vrot.slane %v1970_v23, 1 }
 0x274   :  { %v2025_v2 = vadd.f32 %v2024_v35, %v2023_v63 }
 0x275   :  { %v1972_v19 = vadd.f32 %v1971_v53, %v1970_v23 }
 0x276   :  { %v2026_v8 = vrot.slane %v2025_v2, 2 }
 0x278   :  { %v2027_v45 = vadd.f32 %v2026_v8, %v2025_v2 }
 0x27a   :  { %v2028_v17 = vrot.slane %v2027_v45, 1 }
 0x27c   :  { %v2029_v7 = vadd.f32 %v2028_v17, %v2027_v45 }
 0x27e   :  { %v2030_v24 = vadd.f32 %v2029_v7, %v1972_v19 }
 0x280   :  { %v2031_v28 = vmul.f32 0.005, %v2030_v24 }
 0x282   :  { %v2032_v34 = vadd.f32 1e-05, %v2031_v28 }
 0x284   :  { %11354 = vrsqrt.f32 %v2032_v34 }
 0x28e   :  { %v11355_v30 = vpop.eup %11354 }
 0x28f   :  { %v2034_v47 = vmul.f32 %v11355_v30, %v239_v33 }
 0x291   :  { %v2035_v3 = vmul.f32 %v2034_v47, %v12443_v37  ;;  %v12531_v36 = vrot.slane %v2034_v47, %v12527_v9 }
 0x293   :  { %v2036_v20 = vsub.f32 %v240_v31, %v2035_v3  ;;  %v2097_v12 = vmul.f32 %v12531_v36, %v12439_v56  ;;  %v2041_v26 = vmul.f32 %v12531_v36, %v12292_v13  ;;  %v2042_v55 = vmul.f32 %v12531_v36, %v12287_v25 }
 0x294   :  { %v2043_v54 = vmul.f32 %v12531_v36, %v12294_v6  ;;  %v2044_v60 = vmul.f32 %v12531_v36, %v12301_v62  ;;  %v2085_v37 = vmul.f32 %v12531_v36, %v12332_v58  ;;  %v2086_v42 = vmul.f32 %v12531_v36, %v12327_v27 }
 0x295   :  { %v12548_v56 = vrot.slane %v2036_v20, %v12527_v9  ;;  %v2087_v13 = vmul.f32 %v12531_v36, %v12334_v44  ;;  %v2088_v25 = vmul.f32 %v12531_v36, %v12354_v22  ;;  %v2045_v6 = vmul.f32 %v12531_v36, %v12314_v10 }
 0x296   :  { %v2046_v62 = vmul.f32 %v12531_v36, %v12321_v59  ;;  %v2047_v58 = vmul.f32 %v12531_v36, %v12330_v51  ;;  %v2048_v27 = vmul.f32 %v12531_v36, %v12346_v16  ;;  %v2089_v50 = vmul.f32 %v12531_v36, %v12359_v48 }
 0x297   :  { %v2110_v44 = vadd.f32 %v2097_v12, %v12548_v56  ;;  %v2058_v5 = vadd.f32 %v12548_v56, %v2041_v26  ;;  %v2059_v22 = vadd.f32 %v12548_v56, %v2042_v55  ;;  %v2060_v10 = vadd.f32 %v12548_v56, %v2043_v54  ;;  %v11187_v54 = vld [vmem:[%s14744_s3 + $0x10] sm:$0xff]  }
 0x298   :  { %v2061_v4 = vadd.f32 %v12548_v56, %v2044_v60  ;;  %v2098_v59 = vadd.f32 %v2085_v37, %v12548_v56  ;;  %v2099_v51 = vadd.f32 %v2086_v42, %v12548_v56  ;;  %v2100_v21 = vadd.f32 %v2087_v13, %v12548_v56 }
 0x299   :  { %2123 = vst.msk [vmem:[#allocation2 + $0x132] sm:$0xf] %vm1086_vm3, %v2110_v44  ;;  %v2101_v16 = vadd.f32 %v2088_v25, %v12548_v56  ;;  %v2062_v48 = vadd.f32 %v12548_v56, %v2045_v6  ;;  %v2063_v39 = vadd.f32 %v12548_v56, %v2046_v62  ;;  %v2064_v11 = vadd.f32 %v12548_v56, %v2047_v58 }
 0x29a   :  { %2071 = vst.msk [vmem:[#allocation2 + $0x2] sm:$0xff] %vm312_vm2, %v2058_v5  ;;  %2072 = vst.msk [vmem:[#allocation2 + $0xa] sm:$0xff] %vm312_vm2, %v2059_v22  ;;  %v2065_v63 = vadd.f32 %v12548_v56, %v2048_v27  ;;  %v2090_v23 = vmul.f32 %v12531_v36, %v12380_v18  ;;  %v2091_v35 = vmul.f32 %v12531_v36, %v12385_v1 }
 0x29b   :  { %2073 = vst.msk [vmem:[#allocation2 + $0x12] sm:$0xff] %vm312_vm2, %v2060_v10  ;;  %2074 = vst.msk [vmem:[#allocation2 + $0x1a] sm:$0xff] %vm312_vm2, %v2061_v4  ;;  %v2092_v2 = vmul.f32 %v12531_v36, %v12399_v43  ;;  %v2102_v53 = vadd.f32 %v2089_v50, %v12548_v56  ;;  %v2049_v8 = vmul.f32 %v12531_v36, %v12357_v46 }
 0x29c   :  { %2111 = vst.msk [vmem:[#allocation2 + $0xd2] sm:$0xff] %vm312_vm2, %v2098_v59  ;;  %2112 = vst.msk [vmem:[#allocation2 + $0xda] sm:$0xff] %vm312_vm2, %v2099_v51  ;;  %v2050_v18 = vmul.f32 %v12531_v36, %v12376_v40  ;;  %v2051_v1 = vmul.f32 %v12531_v36, %v12383_v41  ;;  %v2103_v43 = vadd.f32 %v2090_v23, %v12548_v56 }
 0x29d   :  { %2113 = vst.msk [vmem:[#allocation2 + $0xe2] sm:$0xff] %vm312_vm2, %v2100_v21  ;;  %2114 = vst.msk [vmem:[#allocation2 + $0xea] sm:$0xff] %vm312_vm2, %v2101_v16  ;;  %v2104_v45 = vadd.f32 %v2091_v35, %v12548_v56  ;;  %v2105_v19 = vadd.f32 %v2092_v2, %v12548_v56  ;;  %v2052_v17 = vmul.f32 %v12531_v36, %v12395_v29 }
 0x29e   :  { %2075 = vst.msk [vmem:[#allocation2 + $0x22] sm:$0xff] %vm312_vm2, %v2062_v48  ;;  %2076 = vst.msk [vmem:[#allocation2 + $0x2a] sm:$0xff] %vm312_vm2, %v2063_v39  ;;  %v2066_v46 = vadd.f32 %v12548_v56, %v2049_v8  ;;  %v2067_v40 = vadd.f32 %v12548_v56, %v2050_v18  ;;  %v2068_v7 = vadd.f32 %v12548_v56, %v2051_v1 }
 0x29f   :  { %2077 = vst.msk [vmem:[#allocation2 + $0x32] sm:$0xff] %vm312_vm2, %v2064_v11  ;;  %2078 = vst.msk [vmem:[#allocation2 + $0x3a] sm:$0xff] %vm312_vm2, %v2065_v63  ;;  %v2093_v41 = vmul.f32 %v12531_v36, %v12404_v32  ;;  %v2069_v24 = vadd.f32 %v12548_v56, %v2052_v17  ;;  %v2094_v29 = vmul.f32 %v12531_v36, %v12421_v61 }
 0x2a0   :  { %2115 = vst.msk [vmem:[#allocation2 + $0xf2] sm:$0xff] %vm312_vm2, %v2102_v53  ;;  %2116 = vst.msk [vmem:[#allocation2 + $0xfa] sm:$0xff] %vm312_vm2, %v2103_v43  ;;  %v2095_v28 = vmul.f32 %v12531_v36, %v12429_v15  ;;  %v2096_v34 = vmul.f32 %v12531_v36, %v12434_v52  ;;  %v2053_v33 = vmul.f32 %v12531_v36, %v12402_v57  ;;  %v11188_v53 = vld [vmem:[%s14744_s3 + $0x18] sm:$0xff]  }
 0x2a1   :  { %2117 = vst.msk [vmem:[#allocation2 + $0x102] sm:$0xff] %vm312_vm2, %v2104_v45  ;;  %2118 = vst.msk [vmem:[#allocation2 + $0x10a] sm:$0xff] %vm312_vm2, %v2105_v19  ;;  %v2106_v32 = vadd.f32 %v2093_v41, %v12548_v56  ;;  %v2149_v30 = vld [vmem:[#allocation2 + $0x1] ss:$2 sm:$0xff]  ;;  %v2107_v61 = vadd.f32 %v2094_v29, %v12548_v56  ;;  %v2138_v58 = vld [vmem:[#allocation2] ss:$2 sm:$0xff] }
 0x2a2   :  { %2079 = vst.msk [vmem:[#allocation2 + $0x42] sm:$0xff] %vm312_vm2, %v2066_v46  ;;  %2080 = vst.msk [vmem:[#allocation2 + $0x4a] sm:$0xff] %vm312_vm2, %v2067_v40  ;;  %v2108_v15 = vadd.f32 %v2095_v28, %v12548_v56  ;;  %v2109_v52 = vadd.f32 %v2096_v34, %v12548_v56  ;;  %v2150_v47 = vld [vmem:[#allocation2 + $0x11] ss:$2 sm:$0xff]  ;;  %v2070_v3 = vadd.f32 %v12548_v56, %v2053_v33  ;;  %v2139_v44 = vld [vmem:[#allocation2 + $0x10] ss:$2 sm:$0xff] }
 0x2a3   :  { %2081 = vst.msk [vmem:[#allocation2 + $0x52] sm:$0xff] %vm312_vm2, %v2068_v7  ;;  %2082 = vst.msk [vmem:[#allocation2 + $0x5a] sm:$0xff] %vm312_vm2, %v2069_v24  ;;  %v2681_v31 = vld [vmem:[#allocation2 + $0xd1] ss:$2 sm:$0xff]  ;;  %v2156_v20 = vpack.c.bf16 %v2150_v47, %v2149_v30  ;;  %v2670_v10 = vld [vmem:[#allocation2 + $0xd0] ss:$2 sm:$0xff]  ;;  %v2145_v59 = vpack.c.bf16 %v2139_v44, %v2138_v58 }
 0x2a4   :  { %2119 = vst.msk [vmem:[#allocation2 + $0x112] sm:$0xff] %vm312_vm2, %v2106_v32  ;;  %v2682_v12 = vld [vmem:[#allocation2 + $0xe1] ss:$2 sm:$0xff]  ;;  %2120 = vst.msk [vmem:[#allocation2 + $0x11a] sm:$0xff] %vm312_vm2, %v2107_v61  ;;  %v2671_v4 = vld [vmem:[#allocation2 + $0xe0] ss:$2 sm:$0xff] }
 0x2a5   :  { %v2151_v26 = vld [vmem:[#allocation2 + $0x21] ss:$2 sm:$0xff]  ;;  %2121 = vst.msk [vmem:[#allocation2 + $0x122] sm:$0xff] %vm312_vm2, %v2108_v15  ;;  %2122 = vst.msk [vmem:[#allocation2 + $0x12a] sm:$0xff] %vm312_vm2, %v2109_v52  ;;  %v2688_v57 = vpack.c.bf16 %v2682_v12, %v2681_v31  ;;  %10406 = vmatprep.mubr.msk.bf16.mxu0 %vm312_vm2, %v2156_v20  ;;  %v2140_v21 = vld [vmem:[#allocation2 + $0x20] ss:$2 sm:$0xff] }
 0x2a6   :  { %v2152_v36 = vld [vmem:[#allocation2 + $0x31] ss:$2 sm:$0xff]  ;;  %2083 = vst.msk [vmem:[#allocation2 + $0x62] sm:$0xf] %vm1086_vm3, %v2070_v3  ;;  %v2141_v16 = vld [vmem:[#allocation2 + $0x30] ss:$2 sm:$0xff] }
 0x2a7   :  { %v2157_v55 = vpack.c.bf16 %v2152_v36, %v2151_v26  ;;  %10456 = vmatprep.mubr.msk.bf16.mxu1 %vm312_vm2, %v2688_v57  ;;  %v2683_v60 = vld [vmem:[#allocation2 + $0xf1] ss:$2 sm:$0xff]  ;;  %v2672_v11 = vld [vmem:[#allocation2 + $0xf0] ss:$2 sm:$0xff]  ;;  %v2146_v23 = vpack.c.bf16 %v2141_v16, %v2140_v21  ;;  %v11189_v31 = vld [vmem:[%s14744_s3 + $0x20] sm:$0xff]  }
 0x2a8   :  { %v2684_v37 = vld [vmem:[#allocation2 + $0x101] ss:$2 sm:$0xff]  ;;  %v2673_v63 = vld [vmem:[#allocation2 + $0x100] ss:$2 sm:$0xff] }
 0x2a9   :  { %10407 = vmatmul.mubr.msk.bf16.vlgmr.msra.gmra.mrb[140].mxu0 %vm312_vm2, %v2157_v55  ;;  %v2689_v42 = vpack.c.bf16 %v2684_v37, %v2683_v60  ;;  %v2153_v56 = vld [vmem:[#allocation2 + $0x41] ss:$2 sm:$0xff]  ;;  %v2142_v48 = vld [vmem:[#allocation2 + $0x40] ss:$2 sm:$0xff]  ;;  %v2678_v18 = vpack.c.bf16 %v2673_v63, %v2672_v11 }
 0x2aa   :  { %10415 = vmatpush3.bf16.msra.mxu0 %v12415_v38  ;;  %v2154_v13 = vld [vmem:[#allocation2 + $0x51] ss:$2 sm:$0xff]  ;;  %v2143_v39 = vld [vmem:[#allocation2 + $0x50] ss:$2 sm:$0xff] }
 0x2ab   :  { %10457 = vmatmul.mubr.msk.bf16.vlgmr.msra.gmra.mrb[140].mxu1 %vm312_vm2, %v2689_v42  ;;  %v2158_v25 = vpack.c.bf16 %v2154_v13, %v2153_v56  ;;  %10424 = vmatprep.subr.bf16.mxu0 %v11187_v54  ;;  %v2685_v6 = vld [vmem:[#allocation2 + $0x111] ss:$2 sm:$0xff]  ;;  %v2674_v35 = vld [vmem:[#allocation2 + $0x110] ss:$2 sm:$0xff]  ;;  %v2147_v8 = vpack.c.bf16 %v2143_v39, %v2142_v48 }
 0x2ac   :  { %10465 = vmatpush3.bf16.msra.mxu1 %v12415_v38  ;;  %v2686_v62 = vld [vmem:[#allocation2 + $0x121] ss:$2 sm:$0xff]  ;;  %v2687_v5 = vld [vmem:[#allocation2 + $0x131] ss:$2 sm:$0x3]  ;;  %v2677_v38 = vpack.c.bf16 %v2671_v4, %v2670_v10 }
 0x2ad   :  { %10410 = vmatprep.mubr.msk.bf16.mxu0 %vm312_vm2, %v2158_v25  ;;  %v2690_v27 = vpack.c.bf16 %v2686_v62, %v2685_v6  ;;  %v2155_v50 = vld [vmem:[#allocation2 + $0x61] ss:$2 sm:$0x3]  ;;  %10474 = vmatprep.subr.bf16.mxu1 %v11187_v54  ;;  %v2691_v51 = vpack.c.bf16 %v2687_v5, %v2687_v5  ;;  %v2675_v2 = vld [vmem:[#allocation2 + $0x120] ss:$2 sm:$0xff] }
 0x2ae   :  { %v2159_v22 = vpack.c.bf16 %v2155_v50, %v2155_v50  ;;  %v2679_v1 = vpack.c.bf16 %v2675_v2, %v2674_v35  ;;  %v2144_v43 = vld [vmem:[#allocation2 + $0x60] ss:$2 sm:$0x3]  ;;  %v2676_v17 = vld [vmem:[#allocation2 + $0x130] ss:$2 sm:$0x3] }
 0x2af   :  { %10460 = vmatprep.mubr.msk.bf16.mxu1 %vm312_vm2, %v2690_v27  ;;  %v2324_v45 = vld [vmem:[#allocation2 + $0x2] ss:$2 sm:$0xff]  ;;  %v2325_v19 = vld [vmem:[#allocation2 + $0x12] ss:$2 sm:$0xff]  ;;  %v2148_v46 = vpack.c.bf16 %v2144_v43, %v2144_v43  ;;  %v2680_v24 = vpack.c.bf16 %v2676_v17, %v2676_v17  ;;  %v2424_v57 = vld [vmem:[#allocation2 + $0x3] ss:$2 sm:$0xff] }
 0x2b0   :  { %v2844_v40 = vld [vmem:[#allocation2 + $0xd2] ss:$2 sm:$0xff]  ;;  %v2845_v7 = vld [vmem:[#allocation2 + $0xe2] ss:$2 sm:$0xff]  ;;  %v2331_v41 = vpack.c.bf16 %v2325_v19, %v2324_v45  ;;  %v2425_v36 = vld [vmem:[#allocation2 + $0x13] ss:$2 sm:$0xff] }
 0x2b1   :  { %10411 = vmatmul.mubr.msk.bf16.gmra.mrb[144].mxu0 %vm312_vm2, %v2159_v22  ;;  %v2851_v29 = vpack.c.bf16 %v2845_v7, %v2844_v40  ;;  %v2326_v28 = vld [vmem:[#allocation2 + $0x22] ss:$2 sm:$0xff]  ;;  %v2327_v34 = vld [vmem:[#allocation2 + $0x32] ss:$2 sm:$0xff]  ;;  %v2938_v60 = vld [vmem:[#allocation2 + $0xd3] ss:$2 sm:$0xff]  ;;  %v2431_v42 = vpack.c.bf16 %v2425_v36, %v2424_v57 }
 0x2b2   :  { %10416 = vmatprep.mubr.msk.bf16.mxu0 %vm312_vm2, %v2145_v59  ;;  %v2328_v32 = vld [vmem:[#allocation2 + $0x42] ss:$2 sm:$0xff]  ;;  %v2329_v33 = vld [vmem:[#allocation2 + $0x52] ss:$2 sm:$0xff]  ;;  %v2332_v15 = vpack.c.bf16 %v2327_v34, %v2326_v28  ;;  %v2939_v37 = vld [vmem:[#allocation2 + $0xe3] ss:$2 sm:$0xff] }
 0x2b3   :  { %10461 = vmatmul.mubr.msk.bf16.gmra.mrb[144].mxu1 %vm312_vm2, %v2691_v51  ;;  %v2846_v30 = vld [vmem:[#allocation2 + $0xf2] ss:$2 sm:$0xff]  ;;  %v2847_v61 = vld [vmem:[#allocation2 + $0x102] ss:$2 sm:$0xff]  ;;  %v2333_v3 = vpack.c.bf16 %v2329_v33, %v2328_v32  ;;  %v2945_v13 = vpack.c.bf16 %v2939_v37, %v2938_v60  ;;  %v2426_v25 = vld [vmem:[#allocation2 + $0x23] ss:$2 sm:$0xff] }
 0x2b4   :  { %10466 = vmatprep.mubr.msk.bf16.mxu1 %vm312_vm2, %v2677_v38  ;;  %v2848_v52 = vld [vmem:[#allocation2 + $0x112] ss:$2 sm:$0xff]  ;;  %v2849_v47 = vld [vmem:[#allocation2 + $0x122] ss:$2 sm:$0xff]  ;;  %v2852_v20 = vpack.c.bf16 %v2847_v61, %v2846_v30  ;;  %v2427_v6 = vld [vmem:[#allocation2 + $0x33] ss:$2 sm:$0xff] }
 0x2b5   :  { %v2853_v12 = vpack.c.bf16 %v2849_v47, %v2848_v52  ;;  %v2330_v26 = vld [vmem:[#allocation2 + $0x62] ss:$2 sm:$0x3]  ;;  %v2850_v55 = vld [vmem:[#allocation2 + $0x132] ss:$2 sm:$0x3]  ;;  %v2432_v44 = vpack.c.bf16 %v2427_v6, %v2426_v25 }
 0x2b6   :  { %v2854_v56 = vpack.c.bf16 %v2850_v55, %v2850_v55  ;;  %v2428_v62 = vld [vmem:[#allocation2 + $0x43] ss:$2 sm:$0xff]  ;;  %v2429_v58 = vld [vmem:[#allocation2 + $0x53] ss:$2 sm:$0xff]  ;;  %v2524_v38 = vld [vmem:[#allocation2 + $0x4] ss:$2 sm:$0xff] }
 0x2b7   :  { %v2940_v27 = vld [vmem:[#allocation2 + $0xf3] ss:$2 sm:$0xff]  ;;  %v2941_v50 = vld [vmem:[#allocation2 + $0x103] ss:$2 sm:$0xff]  ;;  %v2433_v10 = vpack.c.bf16 %v2429_v58, %v2428_v62  ;;  %v2525_v21 = vld [vmem:[#allocation2 + $0x14] ss:$2 sm:$0xff] }
 0x2b8   :  { %v2942_v5 = vld [vmem:[#allocation2 + $0x113] ss:$2 sm:$0xff]  ;;  %v2943_v22 = vld [vmem:[#allocation2 + $0x123] ss:$2 sm:$0xff]  ;;  %v2946_v4 = vpack.c.bf16 %v2941_v50, %v2940_v27  ;;  %v3032_v39 = vld [vmem:[#allocation2 + $0xd4] ss:$2 sm:$0xff]  ;;  %v2531_v63 = vpack.c.bf16 %v2525_v21, %v2524_v38 }
 0x2b9   :  { %10417 = vmatmul.mubr.msk.bf16.vlgmr.msra.gmra.mrb[140].mxu0 %vm312_vm2, %v2146_v23  ;;  %v2947_v59 = vpack.c.bf16 %v2943_v22, %v2942_v5  ;;  %v2430_v51 = vld [vmem:[#allocation2 + $0x63] ss:$2 sm:$0x3]  ;;  %v2944_v16 = vld [vmem:[#allocation2 + $0x133] ss:$2 sm:$0x3] }
 0x2ba   :  { %10425 = vmatpush3.bf16.msra.mxu0 %v11187_v54  ;;  %10420 = vmatprep.mubr.msk.bf16.mxu0 %vm312_vm2, %v2147_v8  ;;  %v2434_v48 = vpack.c.bf16 %v2430_v51, %v2430_v51  ;;  %v3033_v11 = vld [vmem:[#allocation2 + $0xe4] ss:$2 sm:$0xff]  ;;  %v2948_v23 = vpack.c.bf16 %v2944_v16, %v2944_v16  ;;  %v3036_v19 = vld [vmem:[#allocation2 + $0x114] ss:$2 sm:$0xff] }
 0x2bb   :  { %10467 = vmatmul.mubr.msk.bf16.vlgmr.msra.gmra.mrb[140].mxu1 %vm312_vm2, %v2678_v18  ;;  %10434 = vmatprep.subr.bf16.mxu0 %v11188_v53  ;;  %v3039_v35 = vpack.c.bf16 %v3033_v11, %v3032_v39  ;;  %v2526_v2 = vld [vmem:[#allocation2 + $0x24] ss:$2 sm:$0xff]  ;;  %v2529_v18 = vld [vmem:[#allocation2 + $0x54] ss:$2 sm:$0xff] }
 0x2bc   :  { %10475 = vmatpush3.bf16.msra.mxu1 %v11187_v54  ;;  %10470 = vmatprep.mubr.msk.bf16.mxu1 %vm312_vm2, %v2679_v1  ;;  %v2334_v54 = vpack.c.bf16 %v2330_v26, %v2330_v26  ;;  %v2528_v8 = vld [vmem:[#allocation2 + $0x44] ss:$2 sm:$0xff]  ;;  %v3034_v1 = vld [vmem:[#allocation2 + $0xf4] ss:$2 sm:$0xff] }
 0x2bd   :  { %10484 = vmatprep.subr.bf16.mxu1 %v11188_v53  ;;  %v3035_v43 = vld [vmem:[#allocation2 + $0x104] ss:$2 sm:$0xff]  ;;  %v11191_v5 = vld [vmem:[%s14745_s4 + $0x18] sm:$0xff]  }
 0x2be   :  { %v3037_v17 = vld [vmem:[#allocation2 + $0x124] ss:$2 sm:$0xff]  ;;  %v3040_v40 = vpack.c.bf16 %v3035_v43, %v3034_v1  ;;  %3293 = vst.msk [vmem:[#allocation2 + $0x104] sm:$0xf] %vm3270_vm4, %v11491_v0 }
 0x2bf   :  { %v3041_v7 = vpack.c.bf16 %v3037_v17, %v3036_v19 }
 0x2c1   :  { %10421 = vmatmul.mubr.msk.bf16.gmra.mrb[148].mxu0 %vm312_vm2, %v2148_v46  ;;  %v2533_v46 = vpack.c.bf16 %v2529_v18, %v2528_v8 }
 0x2c2   :  { %10426 = vmatprep.mubr.msk.bf16.mxu0 %vm312_vm2, %v2331_v41  ;;  %v2530_v41 = vld [vmem:[#allocation2 + $0x64] ss:$2 sm:$0x3] }
 0x2c3   :  { %10471 = vmatmul.mubr.msk.bf16.gmra.mrb[148].mxu1 %vm312_vm2, %v2680_v24  ;;  %v3038_v24 = vld [vmem:[#allocation2 + $0x134] ss:$2 sm:$0x3] }
 0x2c4   :  { %10476 = vmatprep.mubr.msk.bf16.mxu1 %vm312_vm2, %v2851_v29  ;;  %v2534_v29 = vpack.c.bf16 %v2530_v41, %v2530_v41  ;;  %v3042_v28 = vpack.c.bf16 %v3038_v24, %v3038_v24 }
 0x2c9   :  { %10427 = vmatmul.mubr.msk.bf16.vlgmr.msra.gmra.mrb[140].mxu0 %vm312_vm2, %v2332_v15 }
 0x2ca   :  { %10435 = vmatpush3.bf16.msra.mxu0 %v11188_v53  ;;  %10430 = vmatprep.mubr.msk.bf16.mxu0 %vm312_vm2, %v2333_v3 }
 0x2cb   :  { %10477 = vmatmul.mubr.msk.bf16.vlgmr.msra.gmra.mrb[140].mxu1 %vm312_vm2, %v2852_v20  ;;  %10444 = vmatprep.subr.bf16.mxu0 %v11189_v31 }
 0x2cc   :  { %10485 = vmatpush3.bf16.msra.mxu1 %v11188_v53  ;;  %10480 = vmatprep.mubr.msk.bf16.mxu1 %vm312_vm2, %v2853_v12  ;;  %v2527_v53 = vld [vmem:[#allocation2 + $0x34] ss:$2 sm:$0xff] }
 0x2cd   :  { %10494 = vmatprep.subr.bf16.mxu1 %v11189_v31  ;;  %v2532_v45 = vpack.c.bf16 %v2527_v53, %v2526_v2  ;;  %3271 = vst.msk [vmem:[#allocation2 + $0x34] sm:$0xf] %vm3270_vm4, %v11491_v0 }
 0x2d1   :  { %10431 = vmatmul.mubr.msk.bf16.gmra.mrb[152].mxu0 %vm312_vm2, %v2334_v54 }
 0x2d2   :  { %10436 = vmatprep.mubr.msk.bf16.mxu0 %vm312_vm2, %v2431_v42 }
 0x2d3   :  { %10481 = vmatmul.mubr.msk.bf16.gmra.mrb[152].mxu1 %vm312_vm2, %v2854_v56 }
 0x2d4   :  { %10486 = vmatprep.mubr.msk.bf16.mxu1 %vm312_vm2, %v2945_v13 }
 0x2d9   :  { %10437 = vmatmul.mubr.msk.bf16.vlgmr.msra.gmra.mrb[140].mxu0 %vm312_vm2, %v2432_v44  ;;  %v11190_v44 = vld [vmem:[%s14745_s4 + $0x10] sm:$0xff]  }
 0x2da   :  { %10445 = vmatpush3.bf16.msra.mxu0 %v11189_v31  ;;  %10440 = vmatprep.mubr.msk.bf16.mxu0 %vm312_vm2, %v2433_v10 }
 0x2db   :  { %10487 = vmatmul.mubr.msk.bf16.vlgmr.msra.gmra.mrb[140].mxu1 %vm312_vm2, %v2946_v4  ;;  %10504 = vmatprep.subr.bf16.mxu0 %v11190_v44 }
 0x2dc   :  { %10495 = vmatpush3.bf16.msra.mxu1 %v11189_v31  ;;  %10490 = vmatprep.mubr.msk.bf16.mxu1 %vm312_vm2, %v2947_v59 }
 0x2dd   :  { %10544 = vmatprep.subr.bf16.mxu1 %v11190_v44 }
 0x2e1   :  { %10441 = vmatmul.mubr.msk.bf16.gmra.mrb[156].mxu0 %vm312_vm2, %v2434_v48  ;;  %v12700_v48 = vld [vmem:[%s14745_s4] sm:$0xff]  }
 0x2e2   :  { %10446 = vmatprep.mubr.msk.bf16.mxu0 %vm312_vm2, %v2531_v63 }
 0x2e3   :  { %10491 = vmatmul.mubr.msk.bf16.gmra.mrb[156].mxu1 %vm312_vm2, %v2948_v23 }
 0x2e4   :  { %10496 = vmatprep.mubr.msk.bf16.mxu1 %vm312_vm2, %v3039_v35 }
 0x2e9   :  { %10447 = vmatmul.mubr.msk.bf16.vlgmr.msra.gmra.mrb[140].mxu0 %vm312_vm2, %v2532_v45 }
 0x2ea   :  { %10450 = vmatprep.mubr.msk.bf16.mxu0 %vm312_vm2, %v2533_v46  ;;  %10505 = vmatpush3.bf16.msra.mxu0 %v11190_v44  ;;  %v12710_v46 = vld [vmem:[#allocation4 + $0x3] ss:$0 sm:$0xff] }
 0x2eb   :  { %10497 = vmatmul.mubr.msk.bf16.vlgmr.msra.gmra.mrb[140].mxu1 %vm312_vm2, %v3040_v40  ;;  %10506 = vmatprep.subr.bf16.mxu0 %v11191_v5 }
 0x2ec   :  { %10500 = vmatprep.mubr.msk.bf16.mxu1 %vm312_vm2, %v3041_v7  ;;  %10545 = vmatpush3.bf16.msra.mxu1 %v11190_v44 }
 0x2ed   :  { %10546 = vmatprep.subr.bf16.mxu1 %v11191_v5 }
 0x2ee   :  { %10507 = vmatpush3.bf16.msra.mxu0 %v11191_v5 }
 0x2ef   :  { %10512 = vmatprep.subr.bf16.mxu0 %v12700_v48 }
 0x2f0   :  { %10547 = vmatpush3.bf16.msra.mxu1 %v11191_v5 }
 0x2f1   :  { %10451 = vmatmul.mubr.msk.bf16.gmra.mrb[160].mxu0 %vm312_vm2, %v2534_v29  ;;  %10552 = vmatprep.subr.bf16.mxu1 %v12700_v48 }
 0x2f3   :  { %10501 = vmatmul.mubr.msk.bf16.gmra.mrb[160].mxu1 %vm312_vm2, %v3042_v28 }
 0x384   :  { %v10412_v34 = vpop.f32.mrb[144].mxu0 }
 0x385   :  { %v2228_v32 = vpop.f32.mrb[145].mxu0 }
 0x386   :  { %v10462_v33 = vpop.f32.mrb[144].mxu1  ;;  %v10413_v30 = vpop.f32.mrb[146].mxu0 }
 0x387   :  { %v2754_v61 = vpop.f32.mrb[145].mxu1  ;;  %v2231_v15 = vpop.f32.mrb[147].mxu0 }
 0x388   :  { %v10463_v52 = vpop.f32.mrb[146].mxu1 }
 0x389   :  { %v2757_v47 = vpop.f32.mrb[147].mxu1 }
 0x394   :  { %v10422_v31 = vpop.f32.mrb[148].mxu0 }
 0x395   :  { %v2319_v3 = vadd.f32 %v10422_v31, %v10412_v34  ;;  %v2310_v20 = vpop.f32.mrb[149].mxu0 }
 0x396   :  { %v10472_v12 = vpop.f32.mrb[148].mxu1  ;;  %v2311_v26 = vadd.f32 %v2310_v20, %v2228_v32  ;;  %v10423_v57 = vpop.f32.mrb[150].mxu0 }
 0x397   :  { %v2839_v36 = vadd.f32 %v10472_v12, %v10462_v33  ;;  %v2830_v55 = vpop.f32.mrb[149].mxu1  ;;  %v2313_v54 = vpop.f32.mrb[151].mxu0 }
 0x398   :  { %v2831_v60 = vadd.f32 %v2830_v55, %v2754_v61  ;;  %v10473_v37 = vpop.f32.mrb[150].mxu1  ;;  %v2314_v42 = vadd.f32 %v2313_v54, %v2231_v15 }
 0x399   :  { %v2833_v56 = vpop.f32.mrb[151].mxu1 }
 0x39a   :  { %v2834_v13 = vadd.f32 %v2833_v56, %v2757_v47 }
 0x3a4   :  { %v10432_v25 = vpop.f32.mrb[152].mxu0 }
 0x3a5   :  { %v2423_v6 = vadd.f32 %v10432_v25, %v2319_v3  ;;  %v2403_v62 = vpop.f32.mrb[153].mxu0 }
 0x3a6   :  { %v10482_v58 = vpop.f32.mrb[152].mxu1  ;;  %v2421_v27 = vadd.f32 %v2403_v62, %v2311_v26  ;;  %v10433_v50 = vpop.f32.mrb[154].mxu0 }
 0x3a7   :  { %v2937_v22 = vadd.f32 %v10482_v58, %v2839_v36  ;;  %v2917_v10 = vpop.f32.mrb[153].mxu1  ;;  %v2406_v4 = vpop.f32.mrb[155].mxu0 }
 0x3a8   :  { %v2935_v59 = vadd.f32 %v2917_v10, %v2831_v60  ;;  %v10483_v51 = vpop.f32.mrb[154].mxu1  ;;  %v2422_v38 = vadd.f32 %v2406_v4, %v2314_v42 }
 0x3a9   :  { %v2920_v21 = vpop.f32.mrb[155].mxu1 }
 0x3aa   :  { %v2936_v16 = vadd.f32 %v2920_v21, %v2834_v13 }
 0x3b4   :  { %v10442_v39 = vpop.f32.mrb[156].mxu0 }
 0x3b5   :  { %v2523_v11 = vadd.f32 %v10442_v39, %v2423_v6  ;;  %v2503_v63 = vpop.f32.mrb[157].mxu0 }
 0x3b6   :  { %v10492_v23 = vpop.f32.mrb[156].mxu1  ;;  %v2521_v35 = vadd.f32 %v2503_v63, %v2421_v27  ;;  %v10443_v2 = vpop.f32.mrb[158].mxu0 }
 0x3b7   :  { %v3031_v53 = vadd.f32 %v10492_v23, %v2937_v22  ;;  %v3011_v8 = vpop.f32.mrb[157].mxu1  ;;  %v2506_v18 = vpop.f32.mrb[159].mxu0 }
 0x3b8   :  { %v3029_v1 = vadd.f32 %v3011_v8, %v2935_v59  ;;  %v10493_v43 = vpop.f32.mrb[158].mxu1  ;;  %v2522_v45 = vadd.f32 %v2506_v18, %v2422_v38 }
 0x3b9   :  { %v3014_v19 = vpop.f32.mrb[159].mxu1 }
 0x3ba   :  { %v12708_v17 = vadd.f32 %v3014_v19, %v2936_v16 }
 0x3bc   :  { %v10448_v40 = vpop.f32.mrb[140].mxu0 }
 0x3bd   :  { %v2630_v7 = vadd.f32 %v10448_v40, %v12710_v46  ;;  %v2587_v41 = vpop.f32.mrb[141].mxu0 }
 0x3be   :  { %v10498_v24 = vpop.f32.mrb[140].mxu1  ;;  %v2628_v29 = vadd.f32 %v12710_v46, %v2587_v41  ;;  %v10449_v28 = vpop.f32.mrb[142].mxu0 }
 0x3bf   :  { %v2637_v34 = vmul.f32 0.1, %v2630_v7  ;;  %v3128_v32 = vadd.f32 %v10498_v24, %v12710_v46  ;;  %v3089_v33 = vpop.f32.mrb[141].mxu1  ;;  %v2631_v30 = vadd.f32 %v10449_v28, %v12710_v46  ;;  %v2590_v61 = vpop.f32.mrb[143].mxu0 }
 0x3c0   :  { %v2635_v15 = vmul.f32 0.1, %v2628_v29  ;;  %v3126_v52 = vadd.f32 %v12710_v46, %v3089_v33  ;;  %v10499_v47 = vpop.f32.mrb[142].mxu1  ;;  %v2629_v31 = vadd.f32 %v12710_v46, %v2590_v61 }
 0x3c1   :  { %v12718_v3 = vmax.f32 %v2630_v7, %v2637_v34  ;;  %v3135_v20 = vmul.f32 0.1, %v3128_v32  ;;  %v2638_v12 = vmul.f32 0.1, %v2631_v30  ;;  %v3129_v26 = vadd.f32 %v10499_v47, %v12710_v46  ;;  %v3092_v57 = vpop.f32.mrb[143].mxu1 }
 0x3c2   :  { %v12721_v36 = vmax.f32 %v2628_v29, %v2635_v15  ;;  %v3133_v55 = vmul.f32 0.1, %v3126_v52  ;;  %v2636_v54 = vmul.f32 0.1, %v2629_v31  ;;  %v3127_v60 = vadd.f32 %v12710_v46, %v3092_v57 }
 0x3c3   :  { %v12724_v37 = vmax.f32 %v3128_v32, %v3135_v20  ;;  %v3136_v42 = vmul.f32 0.1, %v3129_v26  ;;  %v2653_v56 = vsel %vm2649_vm5, %v12718_v3, 0.0  ;;  %v12736_v50 = vmax.f32 %v2631_v30, %v2638_v12 }
 0x3c4   :  { %v12728_v13 = vmax.f32 %v3126_v52, %v3133_v55  ;;  %v12730_v25 = vmax.f32 %v2629_v31, %v2636_v54  ;;  %v3134_v6 = vmul.f32 0.1, %v3127_v60  ;;  %v10452_v62 = vpop.f32.mrb[160].mxu0  ;;  %v2650_v27 = vsel %vm2649_vm5, %v12721_v36, 0.0 }
 0x3c5   :  { %v3150_v58 = vsel %vm2649_vm5, %v12724_v37, 0.0  ;;  %v2623_v44 = vadd.f32 %v10452_v62, %v2523_v11  ;;  %v2603_v5 = vpop.f32.mrb[161].mxu0  ;;  %v12738_v22 = vmax.f32 %v3129_v26, %v3136_v42  ;;  %v2655_v32 = vsel %vm2649_vm5, %v12736_v50, 0.0 }
 0x3c6   :  { %v2651_v10 = vsel %vm2649_vm5, %v12730_v25, 0.0  ;;  %v12742_v4 = vmax.f32 %v3127_v60, %v3134_v6  ;;  %v10502_v59 = vpop.f32.mrb[160].mxu1  ;;  %v2621_v51 = vadd.f32 %v2603_v5, %v2521_v35  ;;  %v10453_v38 = vpop.f32.mrb[162].mxu0  ;;  %v3147_v21 = vsel %vm2649_vm5, %v12728_v13, 0.0 }
 0x3c7   :  { %v2652_v16 = vadd.f32 %v2651_v10, %v2650_v27  ;;  %v2634_v39 = vadd.f32 %v12710_v46, %v2623_v44  ;;  %v3125_v63 = vadd.f32 %v10502_v59, %v3031_v53  ;;  %v3105_v23 = vpop.f32.mrb[161].mxu1  ;;  %v2606_v11 = vpop.f32.mrb[163].mxu0  ;;  %v3152_v52 = vsel %vm2649_vm5, %v12738_v22, 0.0 }
 0x3c8   :  { %v3148_v2 = vsel %vm2649_vm5, %v12742_v4, 0.0  ;;  %v2632_v8 = vadd.f32 %v12710_v46, %v2621_v51  ;;  %v3123_v18 = vadd.f32 %v3105_v23, %v3029_v1  ;;  %v10503_v43 = vpop.f32.mrb[162].mxu1  ;;  %v2622_v19 = vadd.f32 %v2606_v11, %v2522_v45 }
 0x3c9   :  { %v2654_v40 = vadd.f32 %v2653_v56, %v2652_v16  ;;  %v3149_v35 = vadd.f32 %v3148_v2, %v3147_v21  ;;  %v2641_v7 = vmul.f32 0.1, %v2634_v39  ;;  %v3132_v41 = vadd.f32 %v12710_v46, %v3125_v63  ;;  %v3108_v24 = vpop.f32.mrb[163].mxu1 }
 0x3ca   :  { %v2639_v29 = vmul.f32 0.1, %v2632_v8  ;;  %v3130_v28 = vadd.f32 %v12710_v46, %v3123_v18  ;;  %v2633_v53 = vadd.f32 %v12710_v46, %v2622_v19  ;;  %v3124_v34 = vadd.f32 %v3108_v24, %v12708_v17 }
 0x3cb   :  { %v3151_v33 = vadd.f32 %v3150_v58, %v3149_v35  ;;  %v3139_v1 = vmul.f32 0.1, %v3132_v41  ;;  %v12761_v47 = vmax.f32 %v2634_v39, %v2641_v7  ;;  %v2656_v31 = vadd.f32 %v2655_v32, %v2654_v40 }
 0x3cc   :  { %v12756_v30 = vmax.f32 %v2632_v8, %v2639_v29  ;;  %v3137_v45 = vmul.f32 0.1, %v3130_v28  ;;  %v2640_v61 = vmul.f32 0.1, %v2633_v53  ;;  %v3131_v15 = vadd.f32 %v12710_v46, %v3124_v34 }
 0x3cd   :  { %v3153_v55 = vadd.f32 %v3152_v52, %v3151_v33  ;;  %v12769_v54 = vmax.f32 %v3132_v41, %v3139_v1  ;;  %v2662_v62 = vsel %vm2661_vm6, %v12761_v47, 0.0 }
 0x3ce   :  { %v2657_v17 = vsel %vm2649_vm5, %v12756_v30, 0.0  ;;  %v12765_v20 = vmax.f32 %v3130_v28, %v3137_v45  ;;  %v12767_v12 = vmax.f32 %v2633_v53, %v2640_v61  ;;  %v3138_v26 = vmul.f32 0.1, %v3131_v15 }
 0x3cf   :  { %v2658_v57 = vadd.f32 %v2657_v17, %v2656_v31  ;;  %v3158_v5 = vsel %vm2661_vm6, %v12769_v54, 0.0 }
 0x3d0   :  { %v3154_v46 = vsel %vm2649_vm5, %v12765_v20, 0.0  ;;  %v2659_v60 = vsel %vm2649_vm5, %v12767_v12, 0.0  ;;  %v12775_v42 = vmax.f32 %v3131_v15, %v3138_v26 }
 0x3d1   :  { %v3155_v56 = vadd.f32 %v3154_v46, %v3153_v55  ;;  %v2660_v6 = vadd.f32 %v2659_v60, %v2658_v57 }
 0x3d2   :  { %v3156_v58 = vsel %vm2649_vm5, %v12775_v42, 0.0 }
 0x3d3   :  { %v2663_v27 = vadd.f32 %v2662_v62, %v2660_v6  ;;  %v3157_v44 = vadd.f32 %v3156_v58, %v3155_v56 }
 0x3d5   :  { %v2664_v10 = vrot.slane %v2663_v27, 4  ;;  %v3159_v59 = vadd.f32 %v3158_v5, %v3157_v44 }
 0x3d7   :  { %v2665_v51 = vadd.f32 %v2664_v10, %v2663_v27  ;;  %v3160_v38 = vrot.slane %v3159_v59, 4 }
 0x3d9   :  { %v2666_v21 = vrot.slane %v2665_v51, 2  ;;  %v3161_v16 = vadd.f32 %v3160_v38, %v3159_v59 }
 0x3db   :  { %v2667_v39 = vadd.f32 %v2666_v21, %v2665_v51  ;;  %v3162_v63 = vrot.slane %v3161_v16, 2 }
 0x3dd   :  { %v2668_v23 = vrot.slane %v2667_v39, 1  ;;  %v3163_v11 = vadd.f32 %v3162_v63, %v3161_v16 }
 0x3df   :  { %v2669_v2 = vadd.f32 %v2668_v23, %v2667_v39  ;;  %v3164_v8 = vrot.slane %v3163_v11, 1 }
 0x3e1   :  { %v3165_v18 = vadd.f32 %v3164_v8, %v3163_v11 }
 0x3e3   :  { %v3166_v43 = vadd.f32 %v3165_v18, %v2669_v2 }
 0x3e5   :  { %v12783_v19 = vmul.f32 0.01, %v3166_v43 }
 0x3e7   :  { %v3168_v40 = vsub.f32 %v12721_v36, %v12783_v19  ;;  %v3169_v35 = vsub.f32 %v12730_v25, %v12783_v19  ;;  %v3170_v7 = vsub.f32 %v12718_v3, %v12783_v19  ;;  %v3171_v41 = vsub.f32 %v12736_v50, %v12783_v19 }
 0x3e8   :  { %v3172_v24 = vsub.f32 %v12756_v30, %v12783_v19  ;;  %v3201_v34 = vsub.f32 %v12728_v13, %v12783_v19  ;;  %v3202_v32 = vsub.f32 %v12742_v4, %v12783_v19  ;;  %v3173_v33 = vsub.f32 %v12767_v12, %v12783_v19 }
 0x3e9   :  { %v3175_v29 = vmul.f32 %v3168_v40, %v3168_v40  ;;  %v3176_v28 = vmul.f32 %v3169_v35, %v3169_v35  ;;  %v3177_v53 = vmul.f32 %v3170_v7, %v3170_v7  ;;  %v3178_v1 = vmul.f32 %v3171_v41, %v3171_v41 }
 0x3ea   :  { %v3174_v15 = vsub.f32 %v12761_v47, %v12783_v19  ;;  %v3179_v31 = vmul.f32 %v3172_v24, %v3172_v24  ;;  %v3203_v26 = vsub.f32 %v12724_v37, %v12783_v19  ;;  %v3204_v57 = vsub.f32 %v12738_v22, %v12783_v19 }
 0x3eb   :  { %v3182_v45 = vsel %vm2649_vm5, %v3175_v29, 0.0  ;;  %v3183_v61 = vsel %vm2649_vm5, %v3176_v28, 0.0  ;;  %v3185_v17 = vsel %vm2649_vm5, %v3177_v53, 0.0  ;;  %v3205_v46 = vsub.f32 %v12765_v20, %v12783_v19 }
 0x3ec   :  { %v3184_v52 = vadd.f32 %v3183_v61, %v3182_v45  ;;  %v3208_v60 = vmul.f32 %v3201_v34, %v3201_v34  ;;  %v3209_v56 = vmul.f32 %v3202_v32, %v3202_v32  ;;  %v3180_v6 = vmul.f32 %v3173_v33, %v3173_v33 }
 0x3ed   :  { %v3187_v62 = vsel %vm2649_vm5, %v3178_v1, 0.0  ;;  %v3206_v58 = vsub.f32 %v12775_v42, %v12783_v19  ;;  %v3210_v27 = vmul.f32 %v3203_v26, %v3203_v26  ;;  %v3211_v5 = vmul.f32 %v3204_v57, %v3204_v57 }
 0x3ee   :  { %v3186_v55 = vadd.f32 %v3185_v17, %v3184_v52  ;;  %v3215_v10 = vsel %vm2649_vm5, %v3208_v60, 0.0  ;;  %v3216_v59 = vsel %vm2649_vm5, %v3209_v56, 0.0  ;;  %v3181_v51 = vmul.f32 %v3174_v15, %v3174_v15 }
 0x3ef   :  { %v3189_v38 = vsel %vm2649_vm5, %v3179_v31, 0.0  ;;  %v3217_v21 = vadd.f32 %v3216_v59, %v3215_v10  ;;  %v3207_v39 = vsub.f32 %v12769_v54, %v12783_v19  ;;  %v3212_v63 = vmul.f32 %v3205_v46, %v3205_v46 }
 0x3f0   :  { %v3188_v44 = vadd.f32 %v3187_v62, %v3186_v55  ;;  %v3218_v23 = vsel %vm2649_vm5, %v3210_v27, 0.0  ;;  %v3191_v11 = vsel %vm2649_vm5, %v3180_v6, 0.0  ;;  %v3213_v18 = vmul.f32 %v3206_v58, %v3206_v58  ;;  %v2136_v62 = vld [vmem:[#allocation4 + $0x4] sm:$0x1] }
 0x3f1   :  { %v3219_v2 = vadd.f32 %v3218_v23, %v3217_v21  ;;  %v3220_v43 = vsel %vm2649_vm5, %v3211_v5, 0.0  ;;  %v3193_v40 = vsel %vm2661_vm6, %v3181_v51, 0.0  ;;  %v3214_v41 = vmul.f32 %v3207_v39, %v3207_v39 }
 0x3f2   :  { %v3190_v16 = vadd.f32 %v3189_v38, %v3188_v44  ;;  %v3222_v24 = vsel %vm2649_vm5, %v3212_v63, 0.0  ;;  %v3224_v53 = vsel %vm2649_vm5, %v3213_v18, 0.0  ;;  %v2137_v44 = vld [vmem:[#allocation4 + $0x5] sm:$0x1] }
 0x3f3   :  { %v3221_v35 = vadd.f32 %v3220_v43, %v3219_v2  ;;  %v3226_v33 = vsel %vm2661_vm6, %v3214_v41, 0.0 }
 0x3f4   :  { %v3192_v8 = vadd.f32 %v3191_v11, %v3190_v16 }
 0x3f5   :  { %v3223_v29 = vadd.f32 %v3222_v24, %v3221_v35 }
 0x3f6   :  { %v3194_v7 = vadd.f32 %v3193_v40, %v3192_v8 }
 0x3f7   :  { %v3225_v34 = vadd.f32 %v3224_v53, %v3223_v29 }
 0x3f8   :  { %v3195_v28 = vrot.slane %v3194_v7, 4 }
 0x3f9   :  { %v3227_v1 = vadd.f32 %v3226_v33, %v3225_v34 }
 0x3fa   :  { %v3196_v32 = vadd.f32 %v3195_v28, %v3194_v7 }
 0x3fb   :  { %v3228_v61 = vrot.slane %v3227_v1, 4 }
 0x3fc   :  { %v3197_v45 = vrot.slane %v3196_v32, 2 }
 0x3fd   :  { %v3229_v52 = vadd.f32 %v3228_v61, %v3227_v1 }
 0x3fe   :  { %v3198_v15 = vadd.f32 %v3197_v45, %v3196_v32 }
 0x3ff   :  { %v3230_v17 = vrot.slane %v3229_v52, 2 }
 0x400   :  { %v3199_v31 = vrot.slane %v3198_v15, 1 }
 0x401   :  { %v3231_v26 = vadd.f32 %v3230_v17, %v3229_v52 }
 0x402   :  { %v3200_v57 = vadd.f32 %v3199_v31, %v3198_v15 }
 0x403   :  { %v3232_v55 = vrot.slane %v3231_v26, 1 }
 0x405   :  { %v3233_v46 = vadd.f32 %v3232_v55, %v3231_v26  ;;  %v11193_v26 = vld [vmem:[%s14745_s4 + $0x8] sm:$0xff]  }
 0x407   :  { %v3234_v60 = vadd.f32 %v3233_v46, %v3200_v57  ;;  %v11194_v46 = vld [vmem:[%s14745_s4 + $0x20] sm:$0xff]  }
 0x409   :  { %v3235_v56 = vmul.f32 0.01, %v3234_v60 }
 0x40b   :  { %v3236_v6 = vadd.f32 1e-05, %v3235_v56 }
 0x40d   :  { %11356 = vrsqrt.f32 %v3236_v6 }
 0x417   :  { %v11357_v58 = vpop.eup %11356 }
 0x418   :  { %v3238_v27 = vmul.f32 %v11357_v58, %v2136_v62 }
 0x41a   :  { %v3239_v5 = vmul.f32 %v3238_v27, %v12783_v19  ;;  %v3244_v10 = vrot.slane %v3238_v27, %v12527_v9 }
 0x41c   :  { %v3240_v59 = vsub.f32 %v2137_v44, %v3239_v5  ;;  %v3245_v51 = vmul.f32 %v3244_v10, %v12721_v36  ;;  %v3246_v38 = vmul.f32 %v3244_v10, %v12730_v25  ;;  %v3247_v21 = vmul.f32 %v3244_v10, %v12718_v3 }
 0x41d   :  { %v3248_v16 = vmul.f32 %v3244_v10, %v12736_v50  ;;  %v3249_v39 = vmul.f32 %v3244_v10, %v12756_v30  ;;  %v3250_v63 = vmul.f32 %v3244_v10, %v12767_v12  ;;  %v3272_v23 = vmul.f32 %v3244_v10, %v12728_v13 }
 0x41e   :  { %v3255_v11 = vrot.slane %v3240_v59, %v12527_v9  ;;  %v3273_v19 = vmul.f32 %v3244_v10, %v12742_v4  ;;  %v3274_v2 = vmul.f32 %v3244_v10, %v12724_v37  ;;  %v3275_v36 = vmul.f32 %v3244_v10, %v12738_v22 }
 0x41f   :  { %v3276_v25 = vmul.f32 %v3244_v10, %v12765_v20  ;;  %v3277_v3 = vmul.f32 %v3244_v10, %v12775_v42  ;;  %v3251_v50 = vmul.f32 %v3244_v10, %v12761_v47  ;;  %v3278_v30 = vmul.f32 %v3244_v10, %v12769_v54 }
 0x420   :  { %v3256_v8 = vadd.f32 %v3255_v11, %v3245_v51  ;;  %v3257_v12 = vadd.f32 %v3255_v11, %v3246_v38  ;;  %v3258_v18 = vadd.f32 %v3255_v11, %v3247_v21  ;;  %v3259_v13 = vadd.f32 %v3255_v11, %v3248_v16  ;;  %v11195_v16 = vld [vmem:[%s14745_s4 + $0x28] sm:$0xff]  }
 0x421   :  { %v3260_v43 = vadd.f32 %v3255_v11, %v3249_v39  ;;  %v3261_v40 = vadd.f32 %v3255_v11, %v3250_v63  ;;  %v3279_v35 = vadd.f32 %v3272_v23, %v3255_v11  ;;  %v3280_v4 = vadd.f32 %v3273_v19, %v3255_v11  ;;  %v11196_v23 = vld [vmem:[%s14745_s4 + $0x30] sm:$0xff]  }
 0x422   :  { %v3281_v7 = vadd.f32 %v3274_v2, %v3255_v11  ;;  %v3282_v37 = vadd.f32 %v3275_v36, %v3255_v11  ;;  %v3283_v41 = vadd.f32 %v3276_v25, %v3255_v11  ;;  %v3284_v22 = vadd.f32 %v3277_v3, %v3255_v11  ;;  %3263 = vst.msk [vmem:[#allocation2 + $0x2] sm:$0xff] %vm2649_vm5, %v3256_v8  ;;  %v11197_v8 = vld [vmem:[%s14745_s4 + $0x38] sm:$0xff]  }
 0x423   :  { %3264 = vst.msk [vmem:[#allocation2 + $0xa] sm:$0xff] %vm2649_vm5, %v3257_v12  ;;  %3265 = vst.msk [vmem:[#allocation2 + $0x12] sm:$0xff] %vm2649_vm5, %v3258_v18  ;;  %v3262_v47 = vadd.f32 %v3255_v11, %v3251_v50  ;;  %v3285_v20 = vadd.f32 %v3278_v30, %v3255_v11 }
 0x424   :  { %3266 = vst.msk [vmem:[#allocation2 + $0x1a] sm:$0xff] %vm2649_vm5, %v3259_v13  ;;  %3267 = vst.msk [vmem:[#allocation2 + $0x22] sm:$0xff] %vm2649_vm5, %v3260_v43  ;;  %v11198_v13 = vld [vmem:[%s14745_s4 + $0x40] sm:$0xff]  }
 0x425   :  { %3268 = vst.msk [vmem:[#allocation2 + $0x2a] sm:$0xff] %vm2649_vm5, %v3261_v40  ;;  %3286 = vst.msk [vmem:[#allocation2 + $0xd2] sm:$0xff] %vm2649_vm5, %v3279_v35 }
 0x426   :  { %3287 = vst.msk [vmem:[#allocation2 + $0xda] sm:$0xff] %vm2649_vm5, %v3280_v4  ;;  %3288 = vst.msk [vmem:[#allocation2 + $0xe2] sm:$0xff] %vm2649_vm5, %v3281_v7 }
 0x427   :  { %3289 = vst.msk [vmem:[#allocation2 + $0xea] sm:$0xff] %vm2649_vm5, %v3282_v37  ;;  %3290 = vst.msk [vmem:[#allocation2 + $0xf2] sm:$0xff] %vm2649_vm5, %v3283_v41 }
 0x428   :  { %3291 = vst.msk [vmem:[#allocation2 + $0xfa] sm:$0xff] %vm2649_vm5, %v3284_v22 }
 0x429   :  { %3269 = vst.msk [vmem:[#allocation2 + $0x32] sm:$0x3] %vm2661_vm6, %v3262_v47  ;;  %3292 = vst.msk [vmem:[#allocation2 + $0x102] sm:$0x3] %vm2661_vm6, %v3285_v20  ;;  %v11199_v47 = vld [vmem:[%s14745_s4 + $0x48] sm:$0xff]  }
 0x42a   :  { %v3323_v54 = vld [vmem:[#allocation2 + $0x1] ss:$2 sm:$0xff]  ;;  %v3317_v24 = vld [vmem:[#allocation2] ss:$2 sm:$0xff] }
 0x42b   :  { %v3324_v42 = vld [vmem:[#allocation2 + $0x11] ss:$2 sm:$0xff]  ;;  %v3318_v34 = vld [vmem:[#allocation2 + $0x10] ss:$2 sm:$0xff] }
 0x42c   :  { %v3327_v29 = vpack.c.bf16 %v3324_v42, %v3323_v54  ;;  %v3325_v53 = vld [vmem:[#allocation2 + $0x21] ss:$2 sm:$0xff]  ;;  %v3326_v33 = vld [vmem:[#allocation2 + $0x31] ss:$2 sm:$0x1]  ;;  %v3321_v57 = vpack.c.bf16 %v3318_v34, %v3317_v24 }
 0x42d   :  { %v3730_v28 = vld [vmem:[#allocation2 + $0xd1] ss:$2 sm:$0xff]  ;;  %v3328_v45 = vpack.c.bf16 %v3326_v33, %v3325_v53  ;;  %v3724_v31 = vld [vmem:[#allocation2 + $0xd0] ss:$2 sm:$0xff]  ;;  %v3319_v60 = vld [vmem:[#allocation2 + $0x20] ss:$2 sm:$0xff] }
 0x42e   :  { %v3731_v32 = vld [vmem:[#allocation2 + $0xe1] ss:$2 sm:$0xff]  ;;  %10508 = vmatprep.mubr.msk.bf16.mxu0 %vm2649_vm5, %v3327_v29  ;;  %v3725_v17 = vld [vmem:[#allocation2 + $0xe0] ss:$2 sm:$0xff] }
 0x42f   :  { %v3734_v1 = vpack.c.bf16 %v3731_v32, %v3730_v28  ;;  %v3732_v61 = vld [vmem:[#allocation2 + $0xf1] ss:$2 sm:$0xff]  ;;  %v3733_v15 = vld [vmem:[#allocation2 + $0x101] ss:$2 sm:$0x1]  ;;  %10509 = vmatmul.mubr.msk.bf16.vlgmr.msra.gmra.mrb[164].mxu0 %vm2649_vm5, %v3328_v45  ;;  %v3728_v55 = vpack.c.bf16 %v3725_v17, %v3724_v31  ;;  %v12937_v45 = vld [vmem:[%s14746_s5 + $0x8] sm:$0xff]  }
 0x430   :  { %v3735_v52 = vpack.c.bf16 %v3733_v15, %v3732_v61  ;;  %10513 = vmatpush3.bf16.msra.mxu0 %v12700_v48  ;;  %10516 = vmatprep.mubr.msk.bf16.mxu0 %vm2649_vm5, %v3321_v57  ;;  %v3320_v56 = vld [vmem:[#allocation2 + $0x30] ss:$2 sm:$0x1]  ;;  %v3727_v62 = vld [vmem:[#allocation2 + $0x100] ss:$2 sm:$0x1] }
 0x431   :  { %10548 = vmatprep.mubr.msk.bf16.mxu1 %vm2649_vm5, %v3734_v1  ;;  %10514 = vmatprep.subr.bf16.mxu0 %v11193_v26  ;;  %v3726_v6 = vld [vmem:[#allocation2 + $0xf0] ss:$2 sm:$0xff]  ;;  %v3541_v27 = vld [vmem:[#allocation2 + $0x13] ss:$2 sm:$0xff]  ;;  %v3912_v10 = vld [vmem:[#allocation2 + $0xe3] ss:$2 sm:$0xff]  ;;  %v3322_v51 = vpack.c.bf16 %v3320_v56, %v3319_v60 }
 0x432   :  { %10549 = vmatmul.mubr.msk.bf16.vlgmr.msra.gmra.mrb[164].mxu1 %vm2649_vm5, %v3735_v52  ;;  %v3463_v58 = vld [vmem:[#allocation2 + $0x2] ss:$2 sm:$0xff]  ;;  %v3846_v38 = vld [vmem:[#allocation2 + $0xd2] ss:$2 sm:$0xff]  ;;  %v3729_v21 = vpack.c.bf16 %v3727_v62, %v3726_v6  ;;  %v3540_v25 = vld [vmem:[#allocation2 + $0x3] ss:$2 sm:$0xff] }
 0x433   :  { %10553 = vmatpush3.bf16.msra.mxu1 %v12700_v48  ;;  %10556 = vmatprep.mubr.msk.bf16.mxu1 %vm2649_vm5, %v3728_v55  ;;  %v3464_v48 = vld [vmem:[#allocation2 + $0x12] ss:$2 sm:$0xff]  ;;  %v3847_v5 = vld [vmem:[#allocation2 + $0xe2] ss:$2 sm:$0xff]  ;;  %v3911_v50 = vld [vmem:[#allocation2 + $0xd3] ss:$2 sm:$0xff]  ;;  %v3544_v12 = vpack.c.bf16 %v3541_v27, %v3540_v25 }
 0x434   :  { %10554 = vmatprep.subr.bf16.mxu1 %v11193_v26  ;;  %10515 = vmatpush3.bf16.msra.mxu0 %v11193_v26  ;;  %v12872_v44 = vld [vmem:[#allocation2 + $0x14] ss:$2 sm:$0xff]  ;;  %v12874_v59 = vld [vmem:[#allocation2 + $0xe4] ss:$2 sm:$0xff]  ;;  %v3467_v39 = vpack.c.bf16 %v3464_v48, %v3463_v58  ;;  %v3850_v63 = vpack.c.bf16 %v3847_v5, %v3846_v38  ;;  %v3915_v18 = vpack.c.bf16 %v3912_v10, %v3911_v50  ;;  %v3542_v43 = vld [vmem:[#allocation2 + $0x23] ss:$2 sm:$0xff] }
 0x435   :  { %10520 = vmatprep.subr.bf16.mxu0 %v11194_v46  ;;  %4137 = vst.msk [vmem:[#allocation2 + $0x1b] sm:$0xf] %vm3270_vm4, %v11491_v0  ;;  %4150 = vst.msk [vmem:[#allocation2 + $0xeb] sm:$0xf] %vm3270_vm4, %v11491_v0  ;;  %v3465_v11 = vld [vmem:[#allocation2 + $0x22] ss:$2 sm:$0xff] }
 0x436   :  { %v3466_v19 = vld [vmem:[#allocation2 + $0x32] ss:$2 sm:$0x1]  ;;  %v3849_v36 = vld [vmem:[#allocation2 + $0x102] ss:$2 sm:$0x1] }
 0x437   :  { %10555 = vmatpush3.bf16.msra.mxu1 %v11193_v26  ;;  %v3848_v2 = vld [vmem:[#allocation2 + $0xf2] ss:$2 sm:$0xff]  ;;  %v3468_v3 = vpack.c.bf16 %v3466_v19, %v3465_v11  ;;  %v3543_v40 = vld [vmem:[#allocation2 + $0x33] ss:$2 sm:$0x1] }
 0x438   :  { %10560 = vmatprep.subr.bf16.mxu1 %v11194_v46  ;;  %v3851_v30 = vpack.c.bf16 %v3849_v36, %v3848_v2  ;;  %v3913_v35 = vld [vmem:[#allocation2 + $0xf3] ss:$2 sm:$0xff]  ;;  %v3914_v4 = vld [vmem:[#allocation2 + $0x103] ss:$2 sm:$0x1]  ;;  %v3545_v37 = vpack.c.bf16 %v3543_v40, %v3542_v43 }
 0x439   :  { %v3617_v7 = vld [vmem:[#allocation2 + $0x4] ss:$2 sm:$0xff]  ;;  %v3976_v41 = vld [vmem:[#allocation2 + $0xd4] ss:$2 sm:$0xff]  ;;  %v3916_v22 = vpack.c.bf16 %v3914_v4, %v3913_v35 }
 0x43a   :  { %v3621_v20 = vpack.c.bf16 %v12872_v44, %v3617_v7  ;;  %v3980_v54 = vpack.c.bf16 %v12874_v59, %v3976_v41  ;;  %v3619_v42 = vld [vmem:[#allocation2 + $0x24] ss:$2 sm:$0xff]  ;;  %v3620_v24 = vld [vmem:[#allocation2 + $0x34] ss:$2 sm:$0x1]  ;;  %v12932_v1 = vld [vmem:[%s14746_s5 + $0x18] sm:$0xff]  }
 0x43b   :  { %10517 = vmatmul.mubr.msk.bf16.vlgmr.msra.gmra.mrb[164].mxu0 %vm2649_vm5, %v3322_v51  ;;  %v3978_v29 = vld [vmem:[#allocation2 + $0xf4] ss:$2 sm:$0xff]  ;;  %v3979_v28 = vld [vmem:[#allocation2 + $0x104] ss:$2 sm:$0x1]  ;;  %v3622_v53 = vpack.c.bf16 %v3620_v24, %v3619_v42 }
 0x43c   :  { %10521 = vmatpush3.bf16.msra.mxu0 %v11194_v46  ;;  %10524 = vmatprep.mubr.msk.bf16.mxu0 %vm2649_vm5, %v3467_v39  ;;  %v3981_v34 = vpack.c.bf16 %v3979_v28, %v3978_v29  ;;  %v12920_v32 = vld [vmem:[%s14746_s5 + $0x10] sm:$0xff]   ;;  %v12925_v33 = vld [vmem:[%s14746_s5] sm:$0xff]   ;;  %v9297_v61 = vld [vmem:[#allocation4 + $0x6] ss:$0 sm:$0xff] }
 0x43d   :  { %10522 = vmatprep.subr.bf16.mxu0 %v11195_v16 }
 0x43e   :  { %10557 = vmatmul.mubr.msk.bf16.vlgmr.msra.gmra.mrb[164].mxu1 %vm2649_vm5, %v3729_v21 }
 0x43f   :  { %10561 = vmatpush3.bf16.msra.mxu1 %v11194_v46  ;;  %10564 = vmatprep.mubr.msk.bf16.mxu1 %vm2649_vm5, %v3850_v63 }
 0x440   :  { %10562 = vmatprep.subr.bf16.mxu1 %v11195_v16  ;;  %10523 = vmatpush3.bf16.msra.mxu0 %v11195_v16 }
 0x441   :  { %10528 = vmatprep.subr.bf16.mxu0 %v11196_v23 }
 0x443   :  { %10563 = vmatpush3.bf16.msra.mxu1 %v11195_v16 }
 0x444   :  { %10568 = vmatprep.subr.bf16.mxu1 %v11196_v23 }
 0x447   :  { %10525 = vmatmul.mubr.msk.bf16.vlgmr.msra.gmra.mrb[164].mxu0 %vm2649_vm5, %v3468_v3 }
 0x448   :  { %10529 = vmatpush3.bf16.msra.mxu0 %v11196_v23  ;;  %10532 = vmatprep.mubr.msk.bf16.mxu0 %vm2649_vm5, %v3544_v12 }
 0x449   :  { %10530 = vmatprep.subr.bf16.mxu0 %v11197_v8 }
 0x44a   :  { %10565 = vmatmul.mubr.msk.bf16.vlgmr.msra.gmra.mrb[164].mxu1 %vm2649_vm5, %v3851_v30 }
 0x44b   :  { %10569 = vmatpush3.bf16.msra.mxu1 %v11196_v23  ;;  %10572 = vmatprep.mubr.msk.bf16.mxu1 %vm2649_vm5, %v3915_v18 }
 0x44c   :  { %10570 = vmatprep.subr.bf16.mxu1 %v11197_v8  ;;  %10531 = vmatpush3.bf16.msra.mxu0 %v11197_v8 }
 0x44d   :  { %10536 = vmatprep.subr.bf16.mxu0 %v11198_v13 }
 0x44f   :  { %10571 = vmatpush3.bf16.msra.mxu1 %v11197_v8 }
 0x450   :  { %10576 = vmatprep.subr.bf16.mxu1 %v11198_v13 }
 0x453   :  { %10533 = vmatmul.mubr.msk.bf16.vlgmr.msra.gmra.mrb[164].mxu0 %vm2649_vm5, %v3545_v37 }
 0x454   :  { %10537 = vmatpush3.bf16.msra.mxu0 %v11198_v13  ;;  %10540 = vmatprep.mubr.msk.bf16.mxu0 %vm2649_vm5, %v3621_v20 }
 0x455   :  { %10538 = vmatprep.subr.bf16.mxu0 %v11199_v47 }
 0x456   :  { %10573 = vmatmul.mubr.msk.bf16.vlgmr.msra.gmra.mrb[164].mxu1 %vm2649_vm5, %v3916_v22 }
 0x457   :  { %10577 = vmatpush3.bf16.msra.mxu1 %v11198_v13  ;;  %10580 = vmatprep.mubr.msk.bf16.mxu1 %vm2649_vm5, %v3980_v54 }
 0x458   :  { %10578 = vmatprep.subr.bf16.mxu1 %v11199_v47  ;;  %10539 = vmatpush3.bf16.msra.mxu0 %v11199_v47 }
 0x459   :  { %10584 = vmatprep.subr.bf16.mxu0 %v11491_v0 }
 0x45b   :  { %10579 = vmatpush3.bf16.msra.mxu1 %v11199_v47 }
 0x45c   :  { %10592 = vmatprep.subr.bf16.mxu1 %v11491_v0 }
 0x45f   :  { %10541 = vmatmul.mubr.msk.bf16.vlgmr.msra.gmra.mrb[164].mxu0 %vm2649_vm5, %v3622_v53 }
 0x460   :  { %10588 = vmatprep.mubr.msk.bf16.mxu0 %vm11492_vm0, %v11491_v0  ;;  %10585 = vmatpush3.bf16.msra.mxu0 %v12920_v32 }
 0x461   :  { %10586 = vmatprep.subr.bf16.mxu0 %v11491_v0 }
 0x462   :  { %10581 = vmatmul.mubr.msk.bf16.vlgmr.msra.gmra.mrb[164].mxu1 %vm2649_vm5, %v3981_v34 }
 0x463   :  { %10596 = vmatprep.mubr.msk.bf16.mxu1 %vm11492_vm0, %v11491_v0  ;;  %10593 = vmatpush3.bf16.msra.mxu1 %v12925_v33 }
 0x464   :  { %10594 = vmatprep.subr.bf16.mxu1 %v11491_v0  ;;  %10587 = vmatpush3.bf16.msra.mxu0 %v12932_v1 }
 0x465   :  { %10600 = vmatprep.subr.bf16.mxu0 %v11491_v0 }
 0x467   :  { %10595 = vmatpush3.bf16.msra.mxu1 %v12937_v45 }
 0x468   :  { %10608 = vmatprep.subr.bf16.mxu1 %v11491_v0 }
 0x532   :  { %v10542_v15 = vpop.f32.mrb[164].mxu0 }
 0x533   :  { %v3700_v52 = vadd.f32 %v10542_v15, %v9297_v61  ;;  %v3675_v17 = vpop.f32.mrb[165].mxu0 }
 0x534   :  { %v3698_v57 = vadd.f32 %v9297_v61, %v3675_v17  ;;  %v10543_v46 = vpop.f32.mrb[166].mxu0 }
 0x535   :  { %v10582_v31 = vpop.f32.mrb[164].mxu1  ;;  %v3701_v56 = vadd.f32 %v10543_v46, %v9297_v61  ;;  %v3678_v62 = vpop.f32.mrb[167].mxu0  ;;  %v3704_v58 = vmul.f32 0.1, %v3700_v52 }
 0x536   :  { %v4043_v26 = vadd.f32 %v10582_v31, %v9297_v61  ;;  %v4022_v55 = vpop.f32.mrb[165].mxu1  ;;  %v3702_v48 = vmul.f32 0.1, %v3698_v57  ;;  %v3699_v44 = vadd.f32 %v9297_v61, %v3678_v62 }
 0x537   :  { %v4041_v60 = vadd.f32 %v9297_v61, %v4022_v55  ;;  %v10583_v6 = vpop.f32.mrb[166].mxu1  ;;  %v3705_v21 = vmul.f32 0.1, %v3701_v56  ;;  %v12949_v11 = vmax.f32 %v3700_v52, %v3704_v58 }
 0x538   :  { %v4044_v27 = vadd.f32 %v10583_v6, %v9297_v61  ;;  %v4025_v5 = vpop.f32.mrb[167].mxu1  ;;  %v4047_v10 = vmul.f32 0.1, %v4043_v26  ;;  %v12945_v38 = vmax.f32 %v3698_v57, %v3702_v48  ;;  %v3703_v16 = vmul.f32 0.1, %v3699_v44 }
 0x539   :  { %v4045_v59 = vmul.f32 0.1, %v4041_v60  ;;  %v4042_v51 = vadd.f32 %v9297_v61, %v4025_v5  ;;  %v12959_v3 = vmax.f32 %v3701_v56, %v3705_v21  ;;  %v3713_v13 = vsel %vm2649_vm5, %v12949_v11, 0.0 }
 0x53a   :  { %v4048_v63 = vmul.f32 0.1, %v4044_v27  ;;  %v12951_v19 = vmax.f32 %v3699_v44, %v3703_v16  ;;  %v12953_v2 = vmax.f32 %v4043_v26, %v4047_v10  ;;  %v3710_v25 = vsel %vm2649_vm5, %v12945_v38, 0.0 }
 0x53b   :  { %v12947_v39 = vmax.f32 %v4041_v60, %v4045_v59  ;;  %v4046_v23 = vmul.f32 0.1, %v4042_v51  ;;  %v3716_v4 = vsel %vm3715_vm7, %v12959_v3, 0.0 }
 0x53c   :  { %v3711_v50 = vsel %vm2649_vm5, %v12951_v19, 0.0  ;;  %v12965_v8 = vmax.f32 %v4044_v27, %v4048_v63  ;;  %v4056_v40 = vsel %vm2649_vm5, %v12953_v2, 0.0 }
 0x53d   :  { %v12955_v36 = vmax.f32 %v4042_v51, %v4046_v23  ;;  %v4053_v30 = vsel %vm2649_vm5, %v12947_v39, 0.0  ;;  %v3712_v12 = vadd.f32 %v3711_v50, %v3710_v25 }
 0x53e   :  { %v4058_v37 = vsel %vm3715_vm7, %v12965_v8, 0.0 }
 0x53f   :  { %v4054_v18 = vsel %vm2649_vm5, %v12955_v36, 0.0  ;;  %v3714_v35 = vadd.f32 %v3713_v13, %v3712_v12 }
 0x540   :  { %v4055_v43 = vadd.f32 %v4054_v18, %v4053_v30 }
 0x541   :  { %v3717_v41 = vadd.f32 %v3716_v4, %v3714_v35 }
 0x542   :  { %v4057_v7 = vadd.f32 %v4056_v40, %v4055_v43 }
 0x543   :  { %v3718_v47 = vrot.slane %v3717_v41, 4 }
 0x544   :  { %v4059_v22 = vadd.f32 %v4058_v37, %v4057_v7 }
 0x545   :  { %v3719_v54 = vadd.f32 %v3718_v47, %v3717_v41 }
 0x546   :  { %v4060_v20 = vrot.slane %v4059_v22, 4 }
 0x547   :  { %v3720_v24 = vrot.slane %v3719_v54, 2 }
 0x548   :  { %v4061_v42 = vadd.f32 %v4060_v20, %v4059_v22 }
 0x549   :  { %v3721_v28 = vadd.f32 %v3720_v24, %v3719_v54 }
 0x54a   :  { %v4062_v29 = vrot.slane %v4061_v42, 2 }
 0x54b   :  { %v3722_v34 = vrot.slane %v3721_v28, 1 }
 0x54c   :  { %v4063_v53 = vadd.f32 %v4062_v29, %v4061_v42 }
 0x54d   :  { %v3723_v15 = vadd.f32 %v3722_v34, %v3721_v28 }
 0x54e   :  { %v4064_v61 = vrot.slane %v4063_v53, 1 }
 0x550   :  { %v4065_v52 = vadd.f32 %v4064_v61, %v4063_v53 }
 0x552   :  { %v4066_v31 = vadd.f32 %v4065_v52, %v3723_v15  ;;  %v3315_v52 = vld [vmem:[#allocation4 + $0x7] sm:$0x1] }
 0x554   :  { %v4067_v17 = vmul.f32 0.02, %v4066_v31 }
 0x556   :  { %v4068_v26 = vsub.f32 %v12945_v38, %v4067_v17  ;;  %v4069_v57 = vsub.f32 %v12951_v19, %v4067_v17  ;;  %v4070_v55 = vsub.f32 %v12949_v11, %v4067_v17  ;;  %v4071_v46 = vsub.f32 %v12959_v3, %v4067_v17 }
 0x557   :  { %v4089_v60 = vsub.f32 %v12947_v39, %v4067_v17  ;;  %v4090_v56 = vsub.f32 %v12955_v36, %v4067_v17  ;;  %v4091_v6 = vsub.f32 %v12953_v2, %v4067_v17  ;;  %v4092_v62 = vsub.f32 %v12965_v8, %v4067_v17 }
 0x558   :  { %v4072_v58 = vmul.f32 %v4068_v26, %v4068_v26  ;;  %v4073_v48 = vmul.f32 %v4069_v57, %v4069_v57  ;;  %v4074_v27 = vmul.f32 %v4070_v55, %v4070_v55  ;;  %v4075_v59 = vmul.f32 %v4071_v46, %v4071_v46  ;;  %v3316_v57 = vld [vmem:[#allocation4 + $0x8] sm:$0x1] }
 0x559   :  { %v4093_v44 = vmul.f32 %v4089_v60, %v4089_v60  ;;  %v4094_v5 = vmul.f32 %v4090_v56, %v4090_v56  ;;  %v4095_v10 = vmul.f32 %v4091_v6, %v4091_v6  ;;  %v4096_v63 = vmul.f32 %v4092_v62, %v4092_v62 }
 0x55a   :  { %v4076_v51 = vsel %vm2649_vm5, %v4072_v58, 0.0  ;;  %v4077_v21 = vsel %vm2649_vm5, %v4073_v48, 0.0  ;;  %v4079_v50 = vsel %vm2649_vm5, %v4074_v27, 0.0  ;;  %v4081_v13 = vsel %vm3715_vm7, %v4075_v59, 0.0 }
 0x55b   :  { %v4078_v16 = vadd.f32 %v4077_v21, %v4076_v51  ;;  %v4097_v23 = vsel %vm2649_vm5, %v4093_v44, 0.0  ;;  %v4098_v25 = vsel %vm2649_vm5, %v4094_v5, 0.0  ;;  %v4100_v18 = vsel %vm2649_vm5, %v4095_v10, 0.0 }
 0x55c   :  { %v4099_v30 = vadd.f32 %v4098_v25, %v4097_v23  ;;  %v4102_v35 = vsel %vm3715_vm7, %v4096_v63, 0.0  ;;  %v11205_v23 = vld [vmem:[%s14746_s5 + $0x30] sm:$0xff]  }
 0x55d   :  { %v4080_v12 = vadd.f32 %v4079_v50, %v4078_v16  ;;  %v11206_v50 = vld [vmem:[%s14746_s5 + $0x28] sm:$0xff]  }
 0x55e   :  { %v4101_v43 = vadd.f32 %v4100_v18, %v4099_v30  ;;  %v13026_v30 = vld [vmem:[%s14746_s5 + $0x38] sm:$0xff]  }
 0x55f   :  { %v4082_v40 = vadd.f32 %v4081_v13, %v4080_v12 }
 0x560   :  { %v4103_v4 = vadd.f32 %v4102_v35, %v4101_v43 }
 0x561   :  { %v4083_v7 = vrot.slane %v4082_v40, 4 }
 0x562   :  { %v4104_v37 = vrot.slane %v4103_v4, 4 }
 0x563   :  { %v4084_v41 = vadd.f32 %v4083_v7, %v4082_v40  ;;  %v11208_v40 = vld [vmem:[%s14746_s5 + $0x40] sm:$0xff]   ;;  %v11209_v7 = vld [vmem:[%s14746_s5 + $0x48] sm:$0xff]  }
 0x564   :  { %v4105_v22 = vadd.f32 %v4104_v37, %v4103_v4 }
 0x565   :  { %v4085_v47 = vrot.slane %v4084_v41, 2 }
 0x566   :  { %v4106_v20 = vrot.slane %v4105_v22, 2 }
 0x567   :  { %v4086_v54 = vadd.f32 %v4085_v47, %v4084_v41 }
 0x568   :  { %v4107_v42 = vadd.f32 %v4106_v20, %v4105_v22 }
 0x569   :  { %v4087_v24 = vrot.slane %v4086_v54, 1 }
 0x56a   :  { %v4108_v29 = vrot.slane %v4107_v42, 1 }
 0x56b   :  { %v4088_v28 = vadd.f32 %v4087_v24, %v4086_v54 }
 0x56c   :  { %v4109_v53 = vadd.f32 %v4108_v29, %v4107_v42 }
 0x56e   :  { %v4110_v34 = vadd.f32 %v4109_v53, %v4088_v28 }
 0x570   :  { %v4111_v61 = vmul.f32 0.02, %v4110_v34 }
 0x572   :  { %v4112_v15 = vadd.f32 1e-05, %v4111_v61 }
 0x574   :  { %11358 = vrsqrt.f32 %v4112_v15 }
 0x57e   :  { %v11359_v31 = vpop.eup %11358 }
 0x57f   :  { %v4114_v26 = vmul.f32 %v11359_v31, %v3315_v52  ;;  %v13086_v52 = vld [vmem:[%s14747_s6 + $0x20] sm:$0xff]  }
 0x580   :  { %v13091_v31 = vld [vmem:[%s14747_s6] sm:$0xff]  }
 0x581   :  { %v4115_v55 = vmul.f32 %v4114_v26, %v4067_v17  ;;  %v4120_v46 = vrot.slane %v4114_v26, %v12527_v9  ;;  %v13098_v26 = vld [vmem:[%s14747_s6 + $0x28] sm:$0xff]  }
 0x583   :  { %v4116_v60 = vsub.f32 %v3316_v57, %v4115_v55  ;;  %v4121_v56 = vmul.f32 %v4120_v46, %v12945_v38  ;;  %v4122_v6 = vmul.f32 %v4120_v46, %v12951_v19  ;;  %v4123_v62 = vmul.f32 %v4120_v46, %v12949_v11  ;;  %v13103_v57 = vld [vmem:[%s14747_s6 + $0x8] sm:$0xff]   ;;  %v13112_v55 = vld [vmem:[%s14747_s6 + $0x30] sm:$0xff]  }
 0x584   :  { %v4138_v48 = vmul.f32 %v4120_v46, %v12947_v39  ;;  %v4124_v27 = vmul.f32 %v4120_v46, %v12959_v3  ;;  %v4139_v44 = vmul.f32 %v4120_v46, %v12955_v36  ;;  %v4140_v5 = vmul.f32 %v4120_v46, %v12953_v2  ;;  %v11204_v36 = vld [vmem:[%s14746_s5 + $0x20] sm:$0xff]  }
 0x585   :  { %v4128_v58 = vrot.slane %v4116_v60, %v12527_v9  ;;  %v4141_v17 = vmul.f32 %v4120_v46, %v12965_v8  ;;  %v13117_v46 = vld [vmem:[%s14747_s6 + $0x10] sm:$0xff]   ;;  %v13126_v60 = vld [vmem:[%s14747_s6 + $0x38] sm:$0xff]  }
 0x587   :  { %v4129_v10 = vadd.f32 %v4128_v58, %v4121_v56  ;;  %v4130_v59 = vadd.f32 %v4128_v58, %v4122_v6  ;;  %v4131_v51 = vadd.f32 %v4128_v58, %v4123_v62  ;;  %v4142_v38 = vadd.f32 %v4138_v48, %v4128_v58  ;;  %v13131_v56 = vld [vmem:[%s14747_s6 + $0x18] sm:$0xff]  }
 0x588   :  { %v4143_v21 = vadd.f32 %v4139_v44, %v4128_v58  ;;  %v4144_v19 = vadd.f32 %v4140_v5, %v4128_v58  ;;  %v4132_v16 = vadd.f32 %v4128_v58, %v4124_v27  ;;  %v4145_v11 = vadd.f32 %v4141_v17, %v4128_v58 }
 0x589   :  { %4133 = vst.msk [vmem:[#allocation2 + $0x2] sm:$0xff] %vm2649_vm5, %v4129_v10  ;;  %4134 = vst.msk [vmem:[#allocation2 + $0xa] sm:$0xff] %vm2649_vm5, %v4130_v59 }
 0x58a   :  { %4135 = vst.msk [vmem:[#allocation2 + $0x12] sm:$0xff] %vm2649_vm5, %v4131_v51  ;;  %4146 = vst.msk [vmem:[#allocation2 + $0xd2] sm:$0xff] %vm2649_vm5, %v4142_v38 }
 0x58b   :  { %4147 = vst.msk [vmem:[#allocation2 + $0xda] sm:$0xff] %vm2649_vm5, %v4143_v21  ;;  %4148 = vst.msk [vmem:[#allocation2 + $0xe2] sm:$0xff] %vm2649_vm5, %v4144_v19 }
 0x58c   :  { %4136 = vst.msk [vmem:[#allocation2 + $0x1a] sm:$0x1] %vm3715_vm7, %v4132_v16  ;;  %4149 = vst.msk [vmem:[#allocation2 + $0xea] sm:$0x1] %vm3715_vm7, %v4145_v11 }
 0x590   :  { %v4177_v39 = vld [vmem:[#allocation2 + $0x1] ss:$2 sm:$0xff]  ;;  %v4174_v8 = vld [vmem:[#allocation2] ss:$2 sm:$0xff] }
 0x591   :  { %v4178_v2 = vld [vmem:[#allocation2 + $0x11] ss:$2 sm:$0x1f]  ;;  %v4175_v63 = vld [vmem:[#allocation2 + $0x10] ss:$2 sm:$0x1f] }
 0x592   :  { %v4179_v3 = vpack.c.bf16 %v4178_v2, %v4177_v39  ;;  %v4176_v25 = vpack.c.bf16 %v4175_v63, %v4174_v8  ;;  %v4292_v12 = vld [vmem:[#allocation2 + $0x2] ss:$2 sm:$0xff]  ;;  %v4353_v13 = vld [vmem:[#allocation2 + $0x3] ss:$2 sm:$0xff]  ;;  %v4590_v42 = vld [vmem:[#allocation2 + $0xd2] ss:$2 sm:$0xff] }
 0x593   :  { %v4293_v18 = vld [vmem:[#allocation2 + $0x12] ss:$2 sm:$0x1f]  ;;  %v4354_v43 = vld [vmem:[#allocation2 + $0x13] ss:$2 sm:$0x1f] }
 0x594   :  { %10589 = vmatmul.mubr.msk.bf16.vlgmr.msra.gmra.mrb[168].mxu0 %vm2649_vm5, %v4179_v3  ;;  %10597 = vmatmul.mubr.msk.bf16.vlgmr.msra.gmra.mrb[168].mxu1 %vm2649_vm5, %v4176_v25  ;;  %v4294_v35 = vpack.c.bf16 %v4293_v18, %v4292_v12  ;;  %v4355_v4 = vpack.c.bf16 %v4354_v43, %v4353_v13  ;;  %v4414_v37 = vld [vmem:[#allocation2 + $0x4] ss:$2 sm:$0xff]  ;;  %v4415_v41 = vld [vmem:[#allocation2 + $0x14] ss:$2 sm:$0x1f] }
 0x595   :  { %10601 = vmatpush3.bf16.msra.mxu0 %v11204_v36  ;;  %10609 = vmatpush3.bf16.msra.mxu1 %v11205_v23  ;;  %v4499_v22 = vld [vmem:[#allocation2 + $0xd1] ss:$2 sm:$0xff]  ;;  %v4500_v47 = vld [vmem:[#allocation2 + $0xe1] ss:$2 sm:$0x1f] }
 0x596   :  { %10602 = vmatprep.subr.bf16.mxu0 %v11491_v0  ;;  %10610 = vmatprep.subr.bf16.mxu1 %v11491_v0  ;;  %v4501_v20 = vpack.c.bf16 %v4500_v47, %v4499_v22  ;;  %v4497_v54 = vld [vmem:[#allocation2 + $0xe0] ss:$2 sm:$0x1f]  ;;  %v4640_v28 = vld [vmem:[#allocation2 + $0xe3] ss:$2 sm:$0x1f] }
 0x597   :  { %10604 = vmatprep.mubr.msk.bf16.mxu0 %vm11492_vm0, %v11491_v0  ;;  %10612 = vmatprep.mubr.msk.bf16.mxu1 %vm11492_vm0, %v11491_v0  ;;  %v4591_v24 = vld [vmem:[#allocation2 + $0xe2] ss:$2 sm:$0x1f]  ;;  %4802 = vst.msk [vmem:[#allocation2 + $0xf] sm:$0xf] %vm4801_vm8, %v11491_v0 }
 0x598   :  { %v4592_v29 = vpack.c.bf16 %v4591_v24, %v4590_v42  ;;  %v4688_v53 = vld [vmem:[#allocation2 + $0xd4] ss:$2 sm:$0xff]  ;;  %v4689_v34 = vld [vmem:[#allocation2 + $0xe4] ss:$2 sm:$0x1f] }
 0x599   :  { %10603 = vmatpush3.bf16.msra.mxu0 %v11206_v50  ;;  %10611 = vmatpush3.bf16.msra.mxu1 %v13026_v30  ;;  %v4690_v15 = vpack.c.bf16 %v4689_v34, %v4688_v53 }
 0x59a   :  { %10616 = vmatprep.subr.bf16.mxu0 %v11491_v0  ;;  %10624 = vmatprep.subr.bf16.mxu1 %v11491_v0 }
 0x59c   :  { %10605 = vmatmul.mubr.msk.bf16.vlgmr.msra.gmra.mrb[172].mxu0 %vm2649_vm5, %v4294_v35  ;;  %10613 = vmatmul.mubr.msk.bf16.vlgmr.msra.gmra.mrb[172].mxu1 %vm2649_vm5, %v4355_v4 }
 0x59d   :  { %10617 = vmatpush3.bf16.msra.mxu0 %v11208_v40  ;;  %10625 = vmatpush3.bf16.msra.mxu1 %v12920_v32  ;;  %v4416_v32 = vpack.c.bf16 %v4415_v41, %v4414_v37 }
 0x59e   :  { %10618 = vmatprep.subr.bf16.mxu0 %v11491_v0  ;;  %10626 = vmatprep.subr.bf16.mxu1 %v11491_v0 }
 0x59f   :  { %10620 = vmatprep.mubr.msk.bf16.mxu0 %vm11492_vm0, %v11491_v0  ;;  %10628 = vmatprep.mubr.msk.bf16.mxu1 %vm11492_vm0, %v11491_v0 }
 0x5a1   :  { %10619 = vmatpush3.bf16.msra.mxu0 %v11209_v7  ;;  %10627 = vmatpush3.bf16.msra.mxu1 %v12932_v1  ;;  %v4496_v1 = vld [vmem:[#allocation2 + $0xd0] ss:$2 sm:$0xff] }
 0x5a2   :  { %10632 = vmatprep.subr.bf16.mxu0 %v11491_v0  ;;  %10640 = vmatprep.subr.bf16.mxu1 %v11491_v0 }
 0x5a4   :  { %10621 = vmatmul.mubr.msk.bf16.vlgmr.msra.gmra.mrb[176].mxu0 %vm2649_vm5, %v4416_v32  ;;  %10629 = vmatmul.mubr.msk.bf16.vlgmr.msra.gmra.mrb[176].mxu1 %vm2649_vm5, %v4501_v20 }
 0x5a5   :  { %10633 = vmatpush3.bf16.msra.mxu0 %v12925_v33  ;;  %10641 = vmatpush3.bf16.msra.mxu1 %v11204_v36  ;;  %v4498_v33 = vpack.c.bf16 %v4497_v54, %v4496_v1 }
 0x5a6   :  { %10634 = vmatprep.subr.bf16.mxu0 %v11491_v0  ;;  %10642 = vmatprep.subr.bf16.mxu1 %v11491_v0 }
 0x5a7   :  { %10636 = vmatprep.mubr.msk.bf16.mxu0 %vm11492_vm0, %v11491_v0  ;;  %10644 = vmatprep.mubr.msk.bf16.mxu1 %vm11492_vm0, %v11491_v0 }
 0x5a9   :  { %10635 = vmatpush3.bf16.msra.mxu0 %v12937_v45  ;;  %10643 = vmatpush3.bf16.msra.mxu1 %v11206_v50  ;;  %v4639_v45 = vld [vmem:[#allocation2 + $0xd3] ss:$2 sm:$0xff] }
 0x5aa   :  { %10648 = vmatprep.subr.bf16.mxu0 %v11491_v0  ;;  %10656 = vmatprep.subr.bf16.mxu1 %v11491_v0  ;;  %v4641_v61 = vpack.c.bf16 %v4640_v28, %v4639_v45  ;;  %4809 = vst.msk [vmem:[#allocation2 + $0xdf] sm:$0xf] %vm4801_vm8, %v11491_v0 }
 0x5ac   :  { %10637 = vmatmul.mubr.msk.bf16.vlgmr.msra.gmra.mrb[180].mxu0 %vm2649_vm5, %v4498_v33  ;;  %10645 = vmatmul.mubr.msk.bf16.vlgmr.msra.gmra.mrb[180].mxu1 %vm2649_vm5, %v4592_v29 }
 0x5ad   :  { %10649 = vmatpush3.bf16.msra.mxu0 %v11205_v23  ;;  %10657 = vmatpush3.bf16.msra.mxu1 %v11208_v40  ;;  %v9323_v23 = vld [vmem:[#allocation4 + $0x9] ss:$0 sm:$0xff] }
 0x5ae   :  { %10650 = vmatprep.subr.bf16.mxu0 %v11491_v0  ;;  %10658 = vmatprep.subr.bf16.mxu1 %v11491_v0 }
 0x5af   :  { %10652 = vmatprep.mubr.msk.bf16.mxu0 %vm11492_vm0, %v11491_v0  ;;  %10660 = vmatprep.mubr.msk.bf16.mxu1 %vm11492_vm0, %v11491_v0 }
 0x5b1   :  { %10651 = vmatpush3.bf16.msra.mxu0 %v13026_v30  ;;  %10659 = vmatpush3.bf16.msra.mxu1 %v11209_v7 }
 0x5b2   :  { %10664 = vmatprep.subr.bf16.mxu0 %v11491_v0  ;;  %10676 = vmatprep.subr.bf16.mxu1 %v11491_v0 }
 0x5b4   :  { %10653 = vmatmul.mubr.msk.bf16.vlgmr.msra.gmra.mrb[184].mxu0 %vm2649_vm5, %v4641_v61  ;;  %10661 = vmatmul.mubr.msk.bf16.vlgmr.msra.gmra.mrb[184].mxu1 %vm2649_vm5, %v4690_v15 }
 0x5b5   :  { %10672 = vmatprep.mubr.msk.bf16.mxu0 %vm11492_vm0, %v11491_v0  ;;  %10684 = vmatprep.mubr.msk.bf16.mxu1 %vm11492_vm0, %v11491_v0 }
 0x5b6   :  { %10665 = vmatpush3.bf16.msra.mxu0 %v13086_v52  ;;  %10677 = vmatpush3.bf16.msra.mxu1 %v13091_v31 }
 0x5b7   :  { %10666 = vmatprep.subr.bf16.mxu0 %v11491_v0  ;;  %10678 = vmatprep.subr.bf16.mxu1 %v11491_v0 }
 0x5ba   :  { %10667 = vmatpush3.bf16.msra.mxu0 %v13098_v26  ;;  %10679 = vmatpush3.bf16.msra.mxu1 %v13103_v57 }
 0x5bb   :  { %10668 = vmatprep.subr.bf16.mxu0 %v11491_v0  ;;  %10680 = vmatprep.subr.bf16.mxu1 %v11491_v0 }
 0x5be   :  { %10669 = vmatpush3.bf16.msra.mxu0 %v13112_v55  ;;  %10681 = vmatpush3.bf16.msra.mxu1 %v13117_v46 }
 0x5bf   :  { %10670 = vmatprep.subr.bf16.mxu0 %v11491_v0  ;;  %10682 = vmatprep.subr.bf16.mxu1 %v11491_v0 }
 0x5c2   :  { %10671 = vmatpush3.bf16.msra.mxu0 %v13126_v60  ;;  %10683 = vmatpush3.bf16.msra.mxu1 %v13131_v56 }
 0x5c3   :  { %10688 = vmatprep.subr.bf16.mxu0 %v11491_v0  ;;  %10700 = vmatprep.subr.bf16.mxu1 %v11491_v0 }
 0x667   :  { %v4229_v6 = vpop.f32.mrb[168].mxu0  ;;  %v4285_v62 = vpop.f32.mrb[168].mxu1 }
 0x668   :  { %v10590_v58 = vpop.f32.mrb[169].mxu0  ;;  %v4286_v48 = vadd.f32 %v4285_v62, %v4229_v6  ;;  %v10598_v27 = vpop.f32.mrb[169].mxu1 }
 0x669   :  { %v4232_v44 = vpop.f32.mrb[170].mxu0  ;;  %v4288_v5 = vpop.f32.mrb[170].mxu1 }
 0x66a   :  { %v10591_v17 = vpop.f32.mrb[171].mxu0  ;;  %v4289_v10 = vadd.f32 %v4288_v5, %v4232_v44  ;;  %v10599_v59 = vpop.f32.mrb[171].mxu1 }
 0x66f   :  { %v4344_v51 = vpop.f32.mrb[172].mxu0  ;;  %v4405_v21 = vpop.f32.mrb[172].mxu1 }
 0x670   :  { %v4351_v38 = vadd.f32 %v4344_v51, %v4286_v48  ;;  %v10606_v19 = vpop.f32.mrb[173].mxu0  ;;  %v10614_v16 = vpop.f32.mrb[173].mxu1 }
 0x671   :  { %v4347_v11 = vpop.f32.mrb[174].mxu0  ;;  %v4408_v36 = vpop.f32.mrb[174].mxu1 }
 0x672   :  { %v4412_v39 = vadd.f32 %v4405_v21, %v4351_v38  ;;  %v4352_v2 = vadd.f32 %v4347_v11, %v4289_v10  ;;  %v10607_v3 = vpop.f32.mrb[175].mxu0  ;;  %v10615_v8 = vpop.f32.mrb[175].mxu1 }
 0x674   :  { %v4413_v63 = vadd.f32 %v4408_v36, %v4352_v2 }
 0x677   :  { %v4466_v25 = vpop.f32.mrb[176].mxu0  ;;  %v4539_v30 = vpop.f32.mrb[176].mxu1 }
 0x678   :  { %v4473_v50 = vadd.f32 %v4466_v25, %v4412_v39  ;;  %v10622_v12 = vpop.f32.mrb[177].mxu0  ;;  %v10630_v18 = vpop.f32.mrb[177].mxu1 }
 0x679   :  { %v4469_v13 = vpop.f32.mrb[178].mxu0  ;;  %v4542_v35 = vpop.f32.mrb[178].mxu1 }
 0x67a   :  { %v4479_v43 = vadd.f32 %v9323_v23, %v4473_v50  ;;  %v4474_v40 = vadd.f32 %v4469_v13, %v4413_v63  ;;  %v10623_v4 = vpop.f32.mrb[179].mxu0  ;;  %v10631_v7 = vpop.f32.mrb[179].mxu1 }
 0x67c   :  { %v4481_v37 = vmul.f32 0.1, %v4479_v43  ;;  %v4480_v41 = vadd.f32 %v9323_v23, %v4474_v40 }
 0x67e   :  { %v13143_v22 = vmax.f32 %v4479_v43, %v4481_v37  ;;  %v4482_v47 = vmul.f32 0.1, %v4480_v41 }
 0x67f   :  { %v4583_v32 = vpop.f32.mrb[180].mxu0  ;;  %v4630_v54 = vpop.f32.mrb[180].mxu1 }
 0x680   :  { %v13145_v20 = vmax.f32 %v4480_v41, %v4482_v47  ;;  %v4584_v1 = vadd.f32 %v4583_v32, %v4539_v30  ;;  %v10638_v42 = vpop.f32.mrb[181].mxu0  ;;  %v10646_v24 = vpop.f32.mrb[181].mxu1  ;;  %v4486_v29 = vsel %vm4485_vm9, %v13143_v22, 0.0 }
 0x681   :  { %v4586_v33 = vpop.f32.mrb[182].mxu0  ;;  %v4633_v34 = vpop.f32.mrb[182].mxu1 }
 0x682   :  { %v4488_v45 = vsel %vm4487_vm10, %v13145_v20, 0.0  ;;  %v4637_v28 = vadd.f32 %v4630_v54, %v4584_v1  ;;  %v4587_v53 = vadd.f32 %v4586_v33, %v4542_v35  ;;  %v10639_v61 = vpop.f32.mrb[183].mxu0  ;;  %v10647_v6 = vpop.f32.mrb[183].mxu1 }
 0x683   :  { %v4489_v15 = vadd.f32 %v4488_v45, %v4486_v29 }
 0x684   :  { %v4638_v62 = vadd.f32 %v4633_v34, %v4587_v53 }
 0x685   :  { %v4490_v11 = vrot.slane %v4489_v15, 4 }
 0x687   :  { %v4679_v58 = vpop.f32.mrb[184].mxu0  ;;  %v4728_v27 = vpop.f32.mrb[184].mxu1  ;;  %v4491_v8 = vadd.f32 %v4490_v11, %v4489_v15 }
 0x688   :  { %v4686_v48 = vadd.f32 %v4679_v58, %v4637_v28  ;;  %v10654_v44 = vpop.f32.mrb[185].mxu0  ;;  %v10662_v5 = vpop.f32.mrb[185].mxu1 }
 0x689   :  { %v4682_v17 = vpop.f32.mrb[186].mxu0  ;;  %v4731_v51 = vpop.f32.mrb[186].mxu1  ;;  %v4492_v30 = vrot.slane %v4491_v8, 2 }
 0x68a   :  { %v4735_v10 = vadd.f32 %v4728_v27, %v4686_v48  ;;  %v4687_v59 = vadd.f32 %v4682_v17, %v4638_v62  ;;  %v10655_v38 = vpop.f32.mrb[187].mxu0  ;;  %v10663_v21 = vpop.f32.mrb[187].mxu1 }
 0x68b   :  { %v4493_v13 = vadd.f32 %v4492_v30, %v4491_v8  ;;  %v4173_v8 = vld [vmem:[#allocation4 + $0xb] sm:$0x1] }
 0x68c   :  { %v4737_v19 = vadd.f32 %v9323_v23, %v4735_v10  ;;  %v4736_v16 = vadd.f32 %v4731_v51, %v4687_v59 }
 0x68d   :  { %v4494_v35 = vrot.slane %v4493_v13, 1 }
 0x68e   :  { %v4739_v39 = vmul.f32 0.1, %v4737_v19  ;;  %v4738_v2 = vadd.f32 %v9323_v23, %v4736_v16 }
 0x68f   :  { %v4495_v37 = vadd.f32 %v4494_v35, %v4493_v13 }
 0x690   :  { %v4741_v36 = vmax.f32 %v4737_v19, %v4739_v39  ;;  %v4740_v3 = vmul.f32 0.1, %v4738_v2  ;;  %v4172_v39 = vld [vmem:[#allocation4 + $0xa] sm:$0x1] }
 0x692   :  { %v4742_v63 = vmax.f32 %v4738_v2, %v4740_v3  ;;  %v4743_v25 = vsel %vm4485_vm9, %v4741_v36, 0.0 }
 0x694   :  { %v4744_v50 = vsel %vm4487_vm10, %v4742_v63, 0.0 }
 0x695   :  { %v4745_v12 = vadd.f32 %v4744_v50, %v4743_v25 }
 0x697   :  { %v4746_v18 = vrot.slane %v4745_v12, 4 }
 0x699   :  { %v4747_v43 = vadd.f32 %v4746_v18, %v4745_v12 }
 0x69b   :  { %v4748_v40 = vrot.slane %v4747_v43, 2 }
 0x69d   :  { %v4749_v4 = vadd.f32 %v4748_v40, %v4747_v43 }
 0x69f   :  { %v4750_v7 = vrot.slane %v4749_v4, 1 }
 0x6a1   :  { %v4751_v41 = vadd.f32 %v4750_v7, %v4749_v4 }
 0x6a3   :  { %v4752_v23 = vadd.f32 %v4751_v41, %v4495_v37 }
 0x6a5   :  { %v4753_v47 = vmul.f32 0.03846154, %v4752_v23 }
 0x6a7   :  { %v4754_v32 = vsub.f32 %v13143_v22, %v4753_v47  ;;  %v4755_v1 = vsub.f32 %v13145_v20, %v4753_v47  ;;  %v4767_v54 = vsub.f32 %v4741_v36, %v4753_v47  ;;  %v4768_v42 = vsub.f32 %v4742_v63, %v4753_v47 }
 0x6a9   :  { %v4756_v24 = vmul.f32 %v4754_v32, %v4754_v32  ;;  %v4757_v33 = vmul.f32 %v4755_v1, %v4755_v1  ;;  %v4769_v29 = vmul.f32 %v4767_v54, %v4767_v54  ;;  %v4770_v45 = vmul.f32 %v4768_v42, %v4768_v42  ;;  %v13180_v1 = vld [vmem:[%s14747_s6 + $0x48] sm:$0xff]  }
 0x6aa   :  { %v13185_v54 = vld [vmem:[%s14747_s6 + $0x68] sm:$0xff]  }
 0x6ab   :  { %v4758_v28 = vsel %vm4485_vm9, %v4756_v24, 0.0  ;;  %v4759_v53 = vsel %vm4487_vm10, %v4757_v33, 0.0  ;;  %v4771_v34 = vsel %vm4485_vm9, %v4769_v29, 0.0  ;;  %v4772_v61 = vsel %vm4487_vm10, %v4770_v45, 0.0 }
 0x6ac   :  { %v4760_v15 = vadd.f32 %v4759_v53, %v4758_v28  ;;  %v4773_v6 = vadd.f32 %v4772_v61, %v4771_v34  ;;  %v11222_v53 = vld [vmem:[%s14747_s6 + $0x50] sm:$0xff]   ;;  %v11224_v61 = vld [vmem:[%s14747_s6 + $0x58] sm:$0xff]  }
 0x6ad   :  { %v13217_v34 = vld [vmem:[%s14747_s6 + $0x70] sm:$0xff]  }
 0x6ae   :  { %v4761_v62 = vrot.slane %v4760_v15, 4  ;;  %v4774_v58 = vrot.slane %v4773_v6, 4 }
 0x6b0   :  { %v4762_v48 = vadd.f32 %v4761_v62, %v4760_v15  ;;  %v4775_v27 = vadd.f32 %v4774_v58, %v4773_v6  ;;  %v13228_v15 = vld [vmem:[%s14747_s6 + $0x78] sm:$0xff]   ;;  %v11226_v6 = vld [vmem:[%s14747_s6 + $0x80] sm:$0xff]  }
 0x6b2   :  { %v4763_v44 = vrot.slane %v4762_v48, 2  ;;  %v4776_v5 = vrot.slane %v4775_v27, 2 }
 0x6b4   :  { %v4764_v17 = vadd.f32 %v4763_v44, %v4762_v48  ;;  %v4777_v10 = vadd.f32 %v4776_v5, %v4775_v27  ;;  %v11227_v48 = vld [vmem:[%s14747_s6 + $0x88] sm:$0xff]   ;;  %v11229_v27 = vld [vmem:[%s14747_s6 + $0x98] sm:$0xff]  }
 0x6b6   :  { %v4765_v59 = vrot.slane %v4764_v17, 1  ;;  %v4778_v51 = vrot.slane %v4777_v10, 1 }
 0x6b8   :  { %v4766_v38 = vadd.f32 %v4765_v59, %v4764_v17  ;;  %v4779_v21 = vadd.f32 %v4778_v51, %v4777_v10 }
 0x6ba   :  { %v4780_v19 = vadd.f32 %v4779_v21, %v4766_v38 }
 0x6bc   :  { %v4781_v16 = vmul.f32 0.03846154, %v4780_v19  ;;  %v13320_v19 = vld [vmem:[%s14748_s7 + $0x20] sm:$0xff]  }
 0x6be   :  { %v4782_v11 = vadd.f32 1e-05, %v4781_v16  ;;  %v13325_v16 = vld [vmem:[%s14748_s7] sm:$0xff]  }
 0x6c0   :  { %11360 = vrsqrt.f32 %v4782_v11  ;;  %v13332_v11 = vld [vmem:[%s14748_s7 + $0x28] sm:$0xff]  }
 0x6ca   :  { %v11361_v2 = vpop.eup %11360 }
 0x6cb   :  { %v4784_v3 = vmul.f32 %v11361_v2, %v4172_v39  ;;  %v13337_v39 = vld [vmem:[%s14748_s7 + $0x8] sm:$0xff]   ;;  %v13346_v2 = vld [vmem:[%s14748_s7 + $0x30] sm:$0xff]  }
 0x6cd   :  { %v4785_v25 = vmul.f32 %v4784_v3, %v4753_v47  ;;  %v4790_v50 = vrot.slane %v4784_v3, %v12527_v9  ;;  %v13351_v3 = vld [vmem:[%s14748_s7 + $0x10] sm:$0xff]  }
 0x6cf   :  { %v4786_v30 = vsub.f32 %v4173_v8, %v4785_v25  ;;  %v4791_v12 = vmul.f32 %v4790_v50, %v13143_v22  ;;  %v4792_v18 = vmul.f32 %v4790_v50, %v13145_v20  ;;  %v4803_v13 = vmul.f32 %v4790_v50, %v4741_v36  ;;  %v13170_v22 = vld [vmem:[%s14747_s6 + $0x40] sm:$0xff]  }
 0x6d0   :  { %v4804_v43 = vmul.f32 %v4790_v50, %v4742_v63  ;;  %v13175_v20 = vld [vmem:[%s14747_s6 + $0x60] sm:$0xff]  }
 0x6d1   :  { %v4796_v40 = vrot.slane %v4786_v30, %v12527_v9 }
 0x6d3   :  { %v4797_v35 = vadd.f32 %v4796_v40, %v4791_v12  ;;  %v4798_v4 = vadd.f32 %v4796_v40, %v4792_v18  ;;  %v4805_v7 = vadd.f32 %v4803_v13, %v4796_v40  ;;  %v4806_v37 = vadd.f32 %v4804_v43, %v4796_v40  ;;  %v13360_v43 = vld [vmem:[%s14748_s7 + $0x38] sm:$0xff]  }
 0x6d4   :  { %v13365_v40 = vld [vmem:[%s14748_s7 + $0x18] sm:$0xff]  }
 0x6d5   :  { %4799 = vst.msk [vmem:[#allocation2 + $0x2] sm:$0xff] %vm4485_vm9, %v4797_v35  ;;  %4807 = vst.msk [vmem:[#allocation2 + $0xd2] sm:$0xff] %vm4485_vm9, %v4805_v7 }
 0x6d6   :  { %4800 = vst.msk [vmem:[#allocation2 + $0xa] sm:$0x1f] %vm4487_vm10, %v4798_v4  ;;  %4808 = vst.msk [vmem:[#allocation2 + $0xda] sm:$0x1f] %vm4487_vm10, %v4806_v37 }
 0x6dd   :  { %v4855_v36 = vld [vmem:[#allocation2 + $0x1] ss:$2 sm:$0x7f]  ;;  %v4853_v63 = vld [vmem:[#allocation2] ss:$2 sm:$0x7f] }
 0x6de   :  { %v4856_v41 = vpack.c.bf16 %v4855_v36, %v4855_v36  ;;  %v4854_v23 = vpack.c.bf16 %v4853_v63, %v4853_v63  ;;  %v4991_v47 = vld [vmem:[#allocation2 + $0x2] ss:$2 sm:$0x7f]  ;;  %v5061_v32 = vld [vmem:[#allocation2 + $0x3] ss:$2 sm:$0x7f] }
 0x6df   :  { %v5131_v42 = vld [vmem:[#allocation2 + $0x4] ss:$2 sm:$0x7f]  ;;  %v5218_v24 = vld [vmem:[#allocation2 + $0xd1] ss:$2 sm:$0x7f]  ;;  %v4992_v62 = vpack.c.bf16 %v4991_v47, %v4991_v47  ;;  %v5062_v58 = vpack.c.bf16 %v5061_v32, %v5061_v32 }
 0x6e0   :  { %10673 = vmatmul.mubr.msk.bf16.vlgmr.msra.gmra.mrb[188].mxu0 %vm4485_vm9, %v4856_v41  ;;  %10685 = vmatmul.mubr.msk.bf16.vlgmr.msra.gmra.mrb[188].mxu1 %vm4485_vm9, %v4854_v23  ;;  %5492 = vst.msk [vmem:[#allocation2 + $0x9] sm:$0xf] %vm4801_vm8, %v11491_v0  ;;  %v13191_v33 = vld [vmem:[#allocation2 + $0xd0] ss:$2 sm:$0x7f]  ;;  %v5219_v44 = vpack.c.bf16 %v5218_v24, %v5218_v24 }
 0x6e1   :  { %v13193_v29 = vld [vmem:[#allocation2 + $0xd2] ss:$2 sm:$0x7f]  ;;  %10689 = vmatpush3.bf16.msra.mxu0 %v13170_v22  ;;  %10701 = vmatpush3.bf16.msra.mxu1 %v13175_v20  ;;  %v13197_v45 = vld [vmem:[#allocation2 + $0xd3] ss:$2 sm:$0x7f] }
 0x6e2   :  { %v13199_v28 = vld [vmem:[#allocation2 + $0xd4] ss:$2 sm:$0x7f]  ;;  %10690 = vmatprep.subr.bf16.mxu0 %v11491_v0  ;;  %10702 = vmatprep.subr.bf16.mxu1 %v11491_v0 }
 0x6e3   :  { %5496 = vst.msk [vmem:[#allocation2 + $0xd9] sm:$0xf] %vm4801_vm8, %v11491_v0  ;;  %10696 = vmatprep.mubr.msk.bf16.mxu0 %vm11492_vm0, %v11491_v0  ;;  %10708 = vmatprep.mubr.msk.bf16.mxu1 %vm11492_vm0, %v11491_v0 }
 0x6e5   :  { %10691 = vmatpush3.bf16.msra.mxu0 %v13180_v1  ;;  %10703 = vmatpush3.bf16.msra.mxu1 %v13185_v54 }
 0x6e6   :  { %10692 = vmatprep.subr.bf16.mxu0 %v11491_v0  ;;  %10704 = vmatprep.subr.bf16.mxu1 %v11491_v0 }
 0x6e9   :  { %10693 = vmatpush3.bf16.msra.mxu0 %v11222_v53  ;;  %10705 = vmatpush3.bf16.msra.mxu1 %v13217_v34 }
 0x6ea   :  { %10694 = vmatprep.subr.bf16.mxu0 %v11491_v0  ;;  %10706 = vmatprep.subr.bf16.mxu1 %v11491_v0 }
 0x6ed   :  { %10695 = vmatpush3.bf16.msra.mxu0 %v11224_v61  ;;  %10707 = vmatpush3.bf16.msra.mxu1 %v13228_v15 }
 0x6ee   :  { %10712 = vmatprep.subr.bf16.mxu0 %v11491_v0  ;;  %10724 = vmatprep.subr.bf16.mxu1 %v11491_v0 }
 0x6f0   :  { %10697 = vmatmul.mubr.msk.bf16.vlgmr.msra.gmra.mrb[192].mxu0 %vm4485_vm9, %v4992_v62  ;;  %10709 = vmatmul.mubr.msk.bf16.vlgmr.msra.gmra.mrb[192].mxu1 %vm4485_vm9, %v5062_v58 }
 0x6f1   :  { %10713 = vmatpush3.bf16.msra.mxu0 %v11226_v6  ;;  %10725 = vmatpush3.bf16.msra.mxu1 %v13086_v52  ;;  %v11228_v52 = vld [vmem:[%s14747_s6 + $0x90] sm:$0xff]  }
 0x6f2   :  { %10714 = vmatprep.subr.bf16.mxu0 %v11491_v0  ;;  %10726 = vmatprep.subr.bf16.mxu1 %v11491_v0 }
 0x6f3   :  { %10720 = vmatprep.mubr.msk.bf16.mxu0 %vm11492_vm0, %v11491_v0  ;;  %10732 = vmatprep.mubr.msk.bf16.mxu1 %vm11492_vm0, %v11491_v0 }
 0x6f5   :  { %10715 = vmatpush3.bf16.msra.mxu0 %v11227_v48  ;;  %10727 = vmatpush3.bf16.msra.mxu1 %v13098_v26  ;;  %v5132_v26 = vpack.c.bf16 %v5131_v42, %v5131_v42 }
 0x6f6   :  { %10716 = vmatprep.subr.bf16.mxu0 %v11491_v0  ;;  %10728 = vmatprep.subr.bf16.mxu1 %v11491_v0 }
 0x6f9   :  { %10717 = vmatpush3.bf16.msra.mxu0 %v11228_v52  ;;  %10729 = vmatpush3.bf16.msra.mxu1 %v13112_v55  ;;  %v5353_v55 = vpack.c.bf16 %v13197_v45, %v13197_v45 }
 0x6fa   :  { %10718 = vmatprep.subr.bf16.mxu0 %v11491_v0  ;;  %10730 = vmatprep.subr.bf16.mxu1 %v11491_v0 }
 0x6fd   :  { %10719 = vmatpush3.bf16.msra.mxu0 %v11229_v27  ;;  %10731 = vmatpush3.bf16.msra.mxu1 %v13126_v60 }
 0x6fe   :  { %10736 = vmatprep.subr.bf16.mxu0 %v11491_v0  ;;  %10748 = vmatprep.subr.bf16.mxu1 %v11491_v0 }
 0x700   :  { %10721 = vmatmul.mubr.msk.bf16.vlgmr.msra.gmra.mrb[196].mxu0 %vm4485_vm9, %v5132_v26  ;;  %10733 = vmatmul.mubr.msk.bf16.vlgmr.msra.gmra.mrb[196].mxu1 %vm4485_vm9, %v5219_v44 }
 0x701   :  { %10737 = vmatpush3.bf16.msra.mxu0 %v13091_v31  ;;  %10749 = vmatpush3.bf16.msra.mxu1 %v13170_v22  ;;  %v5217_v31 = vpack.c.bf16 %v13191_v33, %v13191_v33 }
 0x702   :  { %10738 = vmatprep.subr.bf16.mxu0 %v11491_v0  ;;  %10750 = vmatprep.subr.bf16.mxu1 %v11491_v0 }
 0x703   :  { %10744 = vmatprep.mubr.msk.bf16.mxu0 %vm11492_vm0, %v11491_v0  ;;  %10756 = vmatprep.mubr.msk.bf16.mxu1 %vm11492_vm0, %v11491_v0 }
 0x705   :  { %10739 = vmatpush3.bf16.msra.mxu0 %v13103_v57  ;;  %10751 = vmatpush3.bf16.msra.mxu1 %v13180_v1  ;;  %v5307_v57 = vpack.c.bf16 %v13193_v29, %v13193_v29  ;;  %v9354_v1 = vld [vmem:[#allocation4 + $0xc] ss:$0 sm:$0xff] }
 0x706   :  { %10740 = vmatprep.subr.bf16.mxu0 %v11491_v0  ;;  %10752 = vmatprep.subr.bf16.mxu1 %v11491_v0 }
 0x709   :  { %10741 = vmatpush3.bf16.msra.mxu0 %v13117_v46  ;;  %10753 = vmatpush3.bf16.msra.mxu1 %v11222_v53  ;;  %v5399_v46 = vpack.c.bf16 %v13199_v28, %v13199_v28 }
 0x70a   :  { %10742 = vmatprep.subr.bf16.mxu0 %v11491_v0  ;;  %10754 = vmatprep.subr.bf16.mxu1 %v11491_v0 }
 0x70d   :  { %10743 = vmatpush3.bf16.msra.mxu0 %v13131_v56  ;;  %10755 = vmatpush3.bf16.msra.mxu1 %v11224_v61 }
 0x70e   :  { %10760 = vmatprep.subr.bf16.mxu0 %v11491_v0  ;;  %10772 = vmatprep.subr.bf16.mxu1 %v11491_v0 }
 0x710   :  { %10745 = vmatmul.mubr.msk.bf16.vlgmr.msra.gmra.mrb[200].mxu0 %vm4485_vm9, %v5217_v31  ;;  %10757 = vmatmul.mubr.msk.bf16.vlgmr.msra.gmra.mrb[200].mxu1 %vm4485_vm9, %v5307_v57 }
 0x711   :  { %10761 = vmatpush3.bf16.msra.mxu0 %v13175_v20  ;;  %10773 = vmatpush3.bf16.msra.mxu1 %v11226_v6 }
 0x712   :  { %10762 = vmatprep.subr.bf16.mxu0 %v11491_v0  ;;  %10774 = vmatprep.subr.bf16.mxu1 %v11491_v0 }
 0x713   :  { %10768 = vmatprep.mubr.msk.bf16.mxu0 %vm11492_vm0, %v11491_v0  ;;  %10780 = vmatprep.mubr.msk.bf16.mxu1 %vm11492_vm0, %v11491_v0 }
 0x715   :  { %10763 = vmatpush3.bf16.msra.mxu0 %v13185_v54  ;;  %10775 = vmatpush3.bf16.msra.mxu1 %v11227_v48 }
 0x716   :  { %10764 = vmatprep.subr.bf16.mxu0 %v11491_v0  ;;  %10776 = vmatprep.subr.bf16.mxu1 %v11491_v0 }
 0x719   :  { %10765 = vmatpush3.bf16.msra.mxu0 %v13217_v34  ;;  %10777 = vmatpush3.bf16.msra.mxu1 %v11228_v52 }
 0x71a   :  { %10766 = vmatprep.subr.bf16.mxu0 %v11491_v0  ;;  %10778 = vmatprep.subr.bf16.mxu1 %v11491_v0 }
 0x71d   :  { %10767 = vmatpush3.bf16.msra.mxu0 %v13228_v15  ;;  %10779 = vmatpush3.bf16.msra.mxu1 %v11229_v27 }
 0x71e   :  { %10784 = vmatprep.subr.bf16.mxu0 %v11491_v0  ;;  %10796 = vmatprep.subr.bf16.mxu1 %v11491_v0 }
 0x720   :  { %10769 = vmatmul.mubr.msk.bf16.vlgmr.msra.gmra.mrb[204].mxu0 %vm4485_vm9, %v5353_v55  ;;  %10781 = vmatmul.mubr.msk.bf16.vlgmr.msra.gmra.mrb[204].mxu1 %vm4485_vm9, %v5399_v46 }
 0x721   :  { %10792 = vmatprep.mubr.msk.bf16.mxu0 %vm11492_vm0, %v11491_v0  ;;  %10804 = vmatprep.mubr.msk.bf16.mxu1 %vm11492_vm0, %v11491_v0 }
 0x722   :  { %10785 = vmatpush3.bf16.msra.mxu0 %v13320_v19  ;;  %10797 = vmatpush3.bf16.msra.mxu1 %v13325_v16 }
 0x723   :  { %10786 = vmatprep.subr.bf16.mxu0 %v11491_v0  ;;  %10798 = vmatprep.subr.bf16.mxu1 %v11491_v0 }
 0x726   :  { %10787 = vmatpush3.bf16.msra.mxu0 %v13332_v11  ;;  %10799 = vmatpush3.bf16.msra.mxu1 %v13337_v39 }
 0x727   :  { %10788 = vmatprep.subr.bf16.mxu0 %v11491_v0  ;;  %10800 = vmatprep.subr.bf16.mxu1 %v11491_v0 }
 0x72a   :  { %10789 = vmatpush3.bf16.msra.mxu0 %v13346_v2  ;;  %10801 = vmatpush3.bf16.msra.mxu1 %v13351_v3 }
 0x72b   :  { %10790 = vmatprep.subr.bf16.mxu0 %v11491_v0  ;;  %10802 = vmatprep.subr.bf16.mxu1 %v11491_v0 }
 0x72e   :  { %10791 = vmatpush3.bf16.msra.mxu0 %v13360_v43  ;;  %10803 = vmatpush3.bf16.msra.mxu1 %v13365_v40 }
 0x72f   :  { %10808 = vmatprep.subr.bf16.mxu0 %v11491_v0  ;;  %10820 = vmatprep.subr.bf16.mxu1 %v11491_v0 }
 0x7b3   :  { %v4918_v60 = vpop.f32.mrb[188].mxu0  ;;  %v4985_v56 = vpop.f32.mrb[188].mxu1 }
 0x7b4   :  { %v4986_v5 = vadd.f32 %v4985_v56, %v4918_v60  ;;  %v10674_v17 = vpop.f32.mrb[189].mxu0  ;;  %v10686_v10 = vpop.f32.mrb[189].mxu1 }
 0x7b5   :  { %v4921_v59 = vpop.f32.mrb[190].mxu0  ;;  %v4988_v51 = vpop.f32.mrb[190].mxu1 }
 0x7b6   :  { %v10675_v38 = vpop.f32.mrb[191].mxu0  ;;  %v10687_v21 = vpop.f32.mrb[191].mxu1 }
 0x7c3   :  { %v5054_v8 = vpop.f32.mrb[192].mxu0  ;;  %v5124_v25 = vpop.f32.mrb[192].mxu1 }
 0x7c4   :  { %v5060_v50 = vadd.f32 %v5054_v8, %v4986_v5  ;;  %v10698_v30 = vpop.f32.mrb[193].mxu0  ;;  %v10710_v12 = vpop.f32.mrb[193].mxu1 }
 0x7c5   :  { %v5057_v18 = vpop.f32.mrb[194].mxu0  ;;  %v5127_v13 = vpop.f32.mrb[194].mxu1 }
 0x7c6   :  { %v5130_v35 = vadd.f32 %v5124_v25, %v5060_v50  ;;  %v10699_v4 = vpop.f32.mrb[195].mxu0  ;;  %v10711_v7 = vpop.f32.mrb[195].mxu1 }
 0x7d3   :  { %v5194_v37 = vpop.f32.mrb[196].mxu0  ;;  %v5257_v22 = vpop.f32.mrb[196].mxu1 }
 0x7d4   :  { %v5200_v20 = vadd.f32 %v5194_v37, %v5130_v35  ;;  %v10722_v36 = vpop.f32.mrb[197].mxu0  ;;  %v10734_v63 = vpop.f32.mrb[197].mxu1 }
 0x7d5   :  { %v5197_v41 = vpop.f32.mrb[198].mxu0  ;;  %v5260_v23 = vpop.f32.mrb[198].mxu1 }
 0x7d6   :  { %v10723_v47 = vpop.f32.mrb[199].mxu0  ;;  %v10735_v32 = vpop.f32.mrb[199].mxu1  ;;  %v5205_v53 = vadd.f32 %v9354_v1, %v5200_v20 }
 0x7d8   :  { %v5206_v6 = vmul.f32 0.1, %v5205_v53 }
 0x7da   :  { %v5207_v62 = vmax.f32 %v5205_v53, %v5206_v6  ;;  %v4851_v6 = vld [vmem:[#allocation4 + $0xd] sm:$0x1] }
 0x7dc   :  { %v5209_v58 = vsel %vm5208_vm11, %v5207_v62, 0.0 }
 0x7dd   :  { %v5210_v31 = vrot.slane %v5209_v58, 4 }
 0x7df   :  { %v5211_v17 = vadd.f32 %v5210_v31, %v5209_v58 }
 0x7e1   :  { %v5212_v51 = vrot.slane %v5211_v17, 2 }
 0x7e3   :  { %v5300_v54 = vpop.f32.mrb[200].mxu0  ;;  %v5345_v42 = vpop.f32.mrb[200].mxu1  ;;  %v5213_v8 = vadd.f32 %v5212_v51, %v5211_v17 }
 0x7e4   :  { %v5301_v24 = vadd.f32 %v5300_v54, %v5257_v22  ;;  %v10746_v33 = vpop.f32.mrb[201].mxu0  ;;  %v10758_v29 = vpop.f32.mrb[201].mxu1 }
 0x7e5   :  { %v5303_v45 = vpop.f32.mrb[202].mxu0  ;;  %v5348_v28 = vpop.f32.mrb[202].mxu1  ;;  %v5214_v30 = vrot.slane %v5213_v8, 1 }
 0x7e6   :  { %v5351_v34 = vadd.f32 %v5345_v42, %v5301_v24  ;;  %v10747_v61 = vpop.f32.mrb[203].mxu0  ;;  %v10759_v15 = vpop.f32.mrb[203].mxu1 }
 0x7e7   :  { %v5215_v13 = vadd.f32 %v5214_v30, %v5213_v8  ;;  %v13399_v8 = vld [vmem:[%s14748_s7 + $0x68] sm:$0xff]  }
 0x7f3   :  { %v5391_v48 = vpop.f32.mrb[204].mxu0  ;;  %v5437_v52 = vpop.f32.mrb[204].mxu1 }
 0x7f4   :  { %v5397_v27 = vadd.f32 %v5391_v48, %v5351_v34  ;;  %v10770_v26 = vpop.f32.mrb[205].mxu0  ;;  %v10782_v44 = vpop.f32.mrb[205].mxu1 }
 0x7f5   :  { %v5394_v57 = vpop.f32.mrb[206].mxu0  ;;  %v5440_v55 = vpop.f32.mrb[206].mxu1 }
 0x7f6   :  { %v5443_v46 = vadd.f32 %v5437_v52, %v5397_v27  ;;  %v10771_v60 = vpop.f32.mrb[207].mxu0  ;;  %v10783_v56 = vpop.f32.mrb[207].mxu1  ;;  %v4852_v52 = vld [vmem:[#allocation4 + $0xe] sm:$0x1] }
 0x7f7   :  { %v13384_v56 = vld [vmem:[%s14748_s7 + $0x40] sm:$0xff]  }
 0x7f8   :  { %v5444_v5 = vadd.f32 %v9354_v1, %v5443_v46 }
 0x7fa   :  { %v5445_v10 = vmul.f32 0.1, %v5444_v5 }
 0x7fc   :  { %v5446_v59 = vmax.f32 %v5444_v5, %v5445_v10  ;;  %v13389_v5 = vld [vmem:[%s14748_s7 + $0x60] sm:$0xff]  }
 0x7fe   :  { %v5447_v38 = vsel %vm5208_vm11, %v5446_v59, 0.0 }
 0x7ff   :  { %v5448_v21 = vrot.slane %v5447_v38, 4 }
 0x801   :  { %v5449_v25 = vadd.f32 %v5448_v21, %v5447_v38  ;;  %v13394_v21 = vld [vmem:[%s14748_s7 + $0x48] sm:$0xff]  }
 0x803   :  { %v5450_v50 = vrot.slane %v5449_v25, 2 }
 0x805   :  { %v5451_v12 = vadd.f32 %v5450_v50, %v5449_v25 }
 0x807   :  { %v5452_v18 = vrot.slane %v5451_v12, 1 }
 0x809   :  { %v5453_v35 = vadd.f32 %v5452_v18, %v5451_v12 }
 0x80b   :  { %v5454_v4 = vadd.f32 %v5453_v35, %v5215_v13  ;;  %v11242_v35 = vld [vmem:[%s14748_s7 + $0x50] sm:$0xff]  }
 0x80d   :  { %v5455_v7 = vmul.f32 0.071428575, %v5454_v4  ;;  %v13429_v4 = vld [vmem:[%s14748_s7 + $0x70] sm:$0xff]  }
 0x80f   :  { %v5456_v37 = vsub.f32 %v5207_v62, %v5455_v7  ;;  %v5465_v22 = vsub.f32 %v5446_v59, %v5455_v7 }
 0x811   :  { %v5457_v20 = vmul.f32 %v5456_v37, %v5456_v37  ;;  %v5466_v36 = vmul.f32 %v5465_v22, %v5465_v22  ;;  %v13440_v37 = vld [vmem:[%s14748_s7 + $0x78] sm:$0xff]   ;;  %v11246_v22 = vld [vmem:[%s14748_s7 + $0x80] sm:$0xff]  }
 0x813   :  { %v5458_v63 = vsel %vm5208_vm11, %v5457_v20, 0.0  ;;  %v5467_v41 = vsel %vm5208_vm11, %v5466_v36, 0.0 }
 0x814   :  { %v5459_v23 = vrot.slane %v5458_v63, 4  ;;  %v5468_v47 = vrot.slane %v5467_v41, 4 }
 0x816   :  { %v5460_v32 = vadd.f32 %v5459_v23, %v5458_v63  ;;  %v5469_v1 = vadd.f32 %v5468_v47, %v5467_v41  ;;  %v11247_v63 = vld [vmem:[%s14748_s7 + $0x88] sm:$0xff]   ;;  %v11249_v41 = vld [vmem:[%s14748_s7 + $0x98] sm:$0xff]  }
 0x817   :  { %v13546_v47 = vld [vmem:[%s14749_s8 + $0x48] sm:$0xff]  }
 0x818   :  { %v5461_v54 = vrot.slane %v5460_v32, 2  ;;  %v5470_v42 = vrot.slane %v5469_v1, 2 }
 0x81a   :  { %v5462_v24 = vadd.f32 %v5461_v54, %v5460_v32  ;;  %v5471_v33 = vadd.f32 %v5470_v42, %v5469_v1  ;;  %v13551_v32 = vld [vmem:[%s14749_s8 + $0x8] sm:$0xff]  }
 0x81c   :  { %v5463_v29 = vrot.slane %v5462_v24, 1  ;;  %v5472_v45 = vrot.slane %v5471_v33, 1 }
 0x81e   :  { %v5464_v28 = vadd.f32 %v5463_v29, %v5462_v24  ;;  %v5473_v53 = vadd.f32 %v5472_v45, %v5471_v33 }
 0x820   :  { %v5474_v34 = vadd.f32 %v5473_v53, %v5464_v28 }
 0x822   :  { %v5475_v61 = vmul.f32 0.071428575, %v5474_v34  ;;  %v13560_v34 = vld [vmem:[%s14749_s8 + $0x50] sm:$0xff]  }
 0x824   :  { %v5476_v15 = vadd.f32 1e-05, %v5475_v61  ;;  %v13565_v61 = vld [vmem:[%s14749_s8 + $0x10] sm:$0xff]  }
 0x826   :  { %11362 = vrsqrt.f32 %v5476_v15  ;;  %v13574_v15 = vld [vmem:[%s14749_s8 + $0x58] sm:$0xff]  }
 0x830   :  { %v11363_v58 = vpop.eup %11362 }
 0x831   :  { %v5478_v48 = vmul.f32 %v11363_v58, %v4851_v6  ;;  %v13579_v6 = vld [vmem:[%s14749_s8 + $0x18] sm:$0xff]   ;;  %v13586_v58 = vld [vmem:[%s14749_s8 + $0x60] sm:$0xff]  }
 0x833   :  { %v5479_v27 = vmul.f32 %v5478_v48, %v5455_v7  ;;  %v5484_v26 = vrot.slane %v5478_v48, %v12527_v9  ;;  %v11244_v7 = vld [vmem:[%s14748_s7 + $0x58] sm:$0xff]   ;;  %v13591_v48 = vld [vmem:[%s14749_s8 + $0x20] sm:$0xff]  }
 0x835   :  { %v5480_v44 = vsub.f32 %v4852_v52, %v5479_v27  ;;  %v5485_v31 = vmul.f32 %v5484_v26, %v5207_v62  ;;  %v5493_v57 = vmul.f32 %v5484_v26, %v5446_v59  ;;  %v13600_v52 = vld [vmem:[%s14749_s8 + $0x68] sm:$0xff]  }
 0x836   :  { %v13605_v27 = vld [vmem:[%s14749_s8 + $0x28] sm:$0xff]  }
 0x837   :  { %v5489_v55 = vrot.slane %v5480_v44, %v12527_v9 }
 0x839   :  { %v5490_v46 = vadd.f32 %v5489_v55, %v5485_v31  ;;  %v5494_v60 = vadd.f32 %v5493_v57, %v5489_v55 }
 0x83b   :  { %5491 = vst.msk [vmem:[#allocation2 + $0x2] sm:$0x7f] %vm5208_vm11, %v5490_v46  ;;  %5495 = vst.msk [vmem:[#allocation2 + $0xd2] sm:$0x7f] %vm5208_vm11, %v5494_v60  ;;  %v13614_v46 = vld [vmem:[%s14749_s8 + $0x70] sm:$0xff]  }
 0x83c   :  { %v13619_v60 = vld [vmem:[%s14749_s8 + $0x30] sm:$0xff]  }
 0x842   :  { %v5542_v62 = vld [vmem:[#allocation2 + $0x1] ss:$2 sm:$0xf]  ;;  %v5540_v17 = vld [vmem:[#allocation2] ss:$2 sm:$0xf] }
 0x843   :  { %v5543_v10 = vpack.c.bf16 %v5542_v62, %v5542_v62  ;;  %v5541_v59 = vpack.c.bf16 %v5540_v17, %v5540_v17  ;;  %v5678_v51 = vld [vmem:[#allocation2 + $0x2] ss:$2 sm:$0xf]  ;;  %v5748_v38 = vld [vmem:[#allocation2 + $0x3] ss:$2 sm:$0xf] }
 0x844   :  { %v5818_v25 = vld [vmem:[#allocation2 + $0x4] ss:$2 sm:$0xf]  ;;  %v5905_v50 = vld [vmem:[#allocation2 + $0xd1] ss:$2 sm:$0xf]  ;;  %v5679_v20 = vpack.c.bf16 %v5678_v51, %v5678_v51  ;;  %v5749_v36 = vpack.c.bf16 %v5748_v38, %v5748_v38 }
 0x845   :  { %10793 = vmatmul.mubr.msk.bf16.vlgmr.msra.gmra.mrb[208].mxu0 %vm4485_vm9, %v5543_v10  ;;  %10805 = vmatmul.mubr.msk.bf16.vlgmr.msra.gmra.mrb[208].mxu1 %vm4485_vm9, %v5541_v59  ;;  %6179 = vst [vmem:[#allocation2 + $0x6] sm:$0xf] %v11491_v0  ;;  %v13404_v30 = vld [vmem:[#allocation2 + $0xd0] ss:$2 sm:$0xf]  ;;  %v5906_v23 = vpack.c.bf16 %v5905_v50, %v5905_v50  ;;  %v13628_v59 = vld [vmem:[%s14749_s8 + $0x78] sm:$0xff]  }
 0x846   :  { %v13406_v12 = vld [vmem:[#allocation2 + $0xd2] ss:$2 sm:$0xf]  ;;  %10809 = vmatpush3.bf16.msra.mxu0 %v13384_v56  ;;  %10821 = vmatpush3.bf16.msra.mxu1 %v13389_v5  ;;  %v13410_v18 = vld [vmem:[#allocation2 + $0xd3] ss:$2 sm:$0xf] }
 0x847   :  { %v13412_v13 = vld [vmem:[#allocation2 + $0xd4] ss:$2 sm:$0xf]  ;;  %10810 = vmatprep.subr.bf16.mxu0 %v11491_v0  ;;  %10822 = vmatprep.subr.bf16.mxu1 %v11491_v0 }
 0x848   :  { %6183 = vst [vmem:[#allocation2 + $0xd6] sm:$0xf] %v11491_v0  ;;  %10816 = vmatprep.mubr.msk.bf16.mxu0 %vm11492_vm0, %v11491_v0  ;;  %10828 = vmatprep.mubr.msk.bf16.mxu1 %vm11492_vm0, %v11491_v0  ;;  %v13633_v51 = vld [vmem:[%s14749_s8 + $0x38] sm:$0xff]  }
 0x84a   :  { %10811 = vmatpush3.bf16.msra.mxu0 %v13394_v21  ;;  %10823 = vmatpush3.bf16.msra.mxu1 %v13399_v8 }
 0x84b   :  { %10812 = vmatprep.subr.bf16.mxu0 %v11491_v0  ;;  %10824 = vmatprep.subr.bf16.mxu1 %v11491_v0 }
 0x84e   :  { %10813 = vmatpush3.bf16.msra.mxu0 %v11242_v35  ;;  %10825 = vmatpush3.bf16.msra.mxu1 %v13429_v4 }
 0x84f   :  { %10814 = vmatprep.subr.bf16.mxu0 %v11491_v0  ;;  %10826 = vmatprep.subr.bf16.mxu1 %v11491_v0 }
 0x852   :  { %10815 = vmatpush3.bf16.msra.mxu0 %v11244_v7  ;;  %10827 = vmatpush3.bf16.msra.mxu1 %v13440_v37 }
 0x853   :  { %10832 = vmatprep.subr.bf16.mxu0 %v11491_v0  ;;  %10844 = vmatprep.subr.bf16.mxu1 %v11491_v0 }
 0x855   :  { %10817 = vmatmul.mubr.msk.bf16.vlgmr.msra.gmra.mrb[212].mxu0 %vm4485_vm9, %v5679_v20  ;;  %10829 = vmatmul.mubr.msk.bf16.vlgmr.msra.gmra.mrb[212].mxu1 %vm4485_vm9, %v5749_v36 }
 0x856   :  { %10833 = vmatpush3.bf16.msra.mxu0 %v11246_v22  ;;  %10845 = vmatpush3.bf16.msra.mxu1 %v13320_v19  ;;  %v11248_v19 = vld [vmem:[%s14748_s7 + $0x90] sm:$0xff]  }
 0x857   :  { %10834 = vmatprep.subr.bf16.mxu0 %v11491_v0  ;;  %10846 = vmatprep.subr.bf16.mxu1 %v11491_v0 }
 0x858   :  { %10840 = vmatprep.mubr.msk.bf16.mxu0 %vm11492_vm0, %v11491_v0  ;;  %10852 = vmatprep.mubr.msk.bf16.mxu1 %vm11492_vm0, %v11491_v0 }
 0x85a   :  { %10835 = vmatpush3.bf16.msra.mxu0 %v11247_v63  ;;  %10847 = vmatpush3.bf16.msra.mxu1 %v13332_v11  ;;  %v5819_v11 = vpack.c.bf16 %v5818_v25, %v5818_v25 }
 0x85b   :  { %10836 = vmatprep.subr.bf16.mxu0 %v11491_v0  ;;  %10848 = vmatprep.subr.bf16.mxu1 %v11491_v0 }
 0x85e   :  { %10837 = vmatpush3.bf16.msra.mxu0 %v11248_v19  ;;  %10849 = vmatpush3.bf16.msra.mxu1 %v13346_v2  ;;  %v6040_v2 = vpack.c.bf16 %v13410_v18, %v13410_v18 }
 0x85f   :  { %10838 = vmatprep.subr.bf16.mxu0 %v11491_v0  ;;  %10850 = vmatprep.subr.bf16.mxu1 %v11491_v0 }
 0x862   :  { %10839 = vmatpush3.bf16.msra.mxu0 %v11249_v41  ;;  %10851 = vmatpush3.bf16.msra.mxu1 %v13360_v43  ;;  %v13532_v43 = vld [vmem:[%s14749_s8 + $0x40] sm:$0xff]  }
 0x863   :  { %10856 = vmatprep.subr.bf16.mxu0 %v11491_v0  ;;  %10868 = vmatprep.subr.bf16.mxu1 %v11491_v0 }
 0x865   :  { %10841 = vmatmul.mubr.msk.bf16.vlgmr.msra.gmra.mrb[216].mxu0 %vm4485_vm9, %v5819_v11  ;;  %10853 = vmatmul.mubr.msk.bf16.vlgmr.msra.gmra.mrb[216].mxu1 %vm4485_vm9, %v5906_v23 }
 0x866   :  { %10857 = vmatpush3.bf16.msra.mxu0 %v13325_v16  ;;  %10869 = vmatpush3.bf16.msra.mxu1 %v13384_v56  ;;  %v5904_v16 = vpack.c.bf16 %v13404_v30, %v13404_v30 }
 0x867   :  { %10858 = vmatprep.subr.bf16.mxu0 %v11491_v0  ;;  %10870 = vmatprep.subr.bf16.mxu1 %v11491_v0 }
 0x868   :  { %10864 = vmatprep.mubr.msk.bf16.mxu0 %vm11492_vm0, %v11491_v0  ;;  %10876 = vmatprep.mubr.msk.bf16.mxu1 %vm11492_vm0, %v11491_v0 }
 0x86a   :  { %10859 = vmatpush3.bf16.msra.mxu0 %v13337_v39  ;;  %10871 = vmatpush3.bf16.msra.mxu1 %v13394_v21  ;;  %v5994_v39 = vpack.c.bf16 %v13406_v12, %v13406_v12 }
 0x86b   :  { %10860 = vmatprep.subr.bf16.mxu0 %v11491_v0  ;;  %10872 = vmatprep.subr.bf16.mxu1 %v11491_v0 }
 0x86e   :  { %10861 = vmatpush3.bf16.msra.mxu0 %v13351_v3  ;;  %10873 = vmatpush3.bf16.msra.mxu1 %v11242_v35  ;;  %v6086_v3 = vpack.c.bf16 %v13412_v13, %v13412_v13  ;;  %v9385_v35 = vld [vmem:[#allocation4 + $0xf] ss:$0 sm:$0xff] }
 0x86f   :  { %10862 = vmatprep.subr.bf16.mxu0 %v11491_v0  ;;  %10874 = vmatprep.subr.bf16.mxu1 %v11491_v0 }
 0x872   :  { %10863 = vmatpush3.bf16.msra.mxu0 %v13365_v40  ;;  %10875 = vmatpush3.bf16.msra.mxu1 %v11244_v7  ;;  %v13537_v40 = vld [vmem:[%s14749_s8] sm:$0xff]  }
 0x873   :  { %10880 = vmatprep.subr.bf16.mxu0 %v11491_v0  ;;  %10892 = vmatprep.subr.bf16.mxu1 %v11491_v0 }
 0x875   :  { %10865 = vmatmul.mubr.msk.bf16.vlgmr.msra.gmra.mrb[220].mxu0 %vm4485_vm9, %v5904_v16  ;;  %10877 = vmatmul.mubr.msk.bf16.vlgmr.msra.gmra.mrb[220].mxu1 %vm4485_vm9, %v5994_v39 }
 0x876   :  { %10881 = vmatpush3.bf16.msra.mxu0 %v13389_v5  ;;  %10893 = vmatpush3.bf16.msra.mxu1 %v11246_v22 }
 0x877   :  { %10882 = vmatprep.subr.bf16.mxu0 %v11491_v0  ;;  %10894 = vmatprep.subr.bf16.mxu1 %v11491_v0 }
 0x878   :  { %10888 = vmatprep.mubr.msk.bf16.mxu0 %vm11492_vm0, %v11491_v0  ;;  %10900 = vmatprep.mubr.msk.bf16.mxu1 %vm11492_vm0, %v11491_v0 }
 0x87a   :  { %10883 = vmatpush3.bf16.msra.mxu0 %v13399_v8  ;;  %10895 = vmatpush3.bf16.msra.mxu1 %v11247_v63 }
 0x87b   :  { %10884 = vmatprep.subr.bf16.mxu0 %v11491_v0  ;;  %10896 = vmatprep.subr.bf16.mxu1 %v11491_v0 }
 0x87e   :  { %10885 = vmatpush3.bf16.msra.mxu0 %v13429_v4  ;;  %10897 = vmatpush3.bf16.msra.mxu1 %v11248_v19 }
 0x87f   :  { %10886 = vmatprep.subr.bf16.mxu0 %v11491_v0  ;;  %10898 = vmatprep.subr.bf16.mxu1 %v11491_v0 }
 0x882   :  { %10887 = vmatpush3.bf16.msra.mxu0 %v13440_v37  ;;  %10899 = vmatpush3.bf16.msra.mxu1 %v11249_v41 }
 0x883   :  { %10904 = vmatprep.subr.bf16.mxu0 %v11491_v0  ;;  %10924 = vmatprep.subr.bf16.mxu1 %v11491_v0 }
 0x885   :  { %10889 = vmatmul.mubr.msk.bf16.vlgmr.msra.gmra.mrb[224].mxu0 %vm4485_vm9, %v6040_v2  ;;  %10901 = vmatmul.mubr.msk.bf16.vlgmr.msra.gmra.mrb[224].mxu1 %vm4485_vm9, %v6086_v3 }
 0x886   :  { %10920 = vmatprep.mubr.msk.bf16.mxu0 %vm11492_vm0, %v11491_v0  ;;  %10940 = vmatprep.mubr.msk.bf16.mxu1 %vm11492_vm0, %v11491_v0 }
 0x887   :  { %10905 = vmatpush3.bf16.msra.mxu0 %v13532_v43  ;;  %10925 = vmatpush3.bf16.msra.mxu1 %v13537_v40 }
 0x888   :  { %10906 = vmatprep.subr.bf16.mxu0 %v11491_v0  ;;  %10926 = vmatprep.subr.bf16.mxu1 %v11491_v0 }
 0x88b   :  { %10907 = vmatpush3.bf16.msra.mxu0 %v13546_v47  ;;  %10927 = vmatpush3.bf16.msra.mxu1 %v13551_v32 }
 0x88c   :  { %10908 = vmatprep.subr.bf16.mxu0 %v11491_v0  ;;  %10928 = vmatprep.subr.bf16.mxu1 %v11491_v0 }
 0x88f   :  { %10909 = vmatpush3.bf16.msra.mxu0 %v13560_v34  ;;  %10929 = vmatpush3.bf16.msra.mxu1 %v13565_v61 }
 0x890   :  { %10910 = vmatprep.subr.bf16.mxu0 %v11491_v0  ;;  %10930 = vmatprep.subr.bf16.mxu1 %v11491_v0 }
 0x893   :  { %10911 = vmatpush3.bf16.msra.mxu0 %v13574_v15  ;;  %10931 = vmatpush3.bf16.msra.mxu1 %v13579_v6 }
 0x894   :  { %10912 = vmatprep.subr.bf16.mxu0 %v11491_v0  ;;  %10932 = vmatprep.subr.bf16.mxu1 %v11491_v0 }
 0x897   :  { %10913 = vmatpush3.bf16.msra.mxu0 %v13586_v58  ;;  %10933 = vmatpush3.bf16.msra.mxu1 %v13591_v48 }
 0x898   :  { %10914 = vmatprep.subr.bf16.mxu0 %v11491_v0  ;;  %10934 = vmatprep.subr.bf16.mxu1 %v11491_v0 }
 0x89b   :  { %10915 = vmatpush3.bf16.msra.mxu0 %v13600_v52  ;;  %10935 = vmatpush3.bf16.msra.mxu1 %v13605_v27 }
 0x89c   :  { %10916 = vmatprep.subr.bf16.mxu0 %v11491_v0  ;;  %10936 = vmatprep.subr.bf16.mxu1 %v11491_v0 }
 0x89f   :  { %10917 = vmatpush3.bf16.msra.mxu0 %v13614_v46  ;;  %10937 = vmatpush3.bf16.msra.mxu1 %v13619_v60 }
 0x8a0   :  { %10918 = vmatprep.subr.bf16.mxu0 %v11491_v0  ;;  %10938 = vmatprep.subr.bf16.mxu1 %v11491_v0 }
 0x8a3   :  { %10919 = vmatpush3.bf16.msra.mxu0 %v13628_v59  ;;  %10939 = vmatpush3.bf16.msra.mxu1 %v13633_v51 }
 0x8a4   :  { %10944 = vmatprep.subr.bf16.mxu0 %v11491_v0  ;;  %10964 = vmatprep.subr.bf16.mxu1 %v11491_v0 }
 0x918   :  { %v5605_v1 = vpop.f32.mrb[208].mxu0  ;;  %v5672_v54 = vpop.f32.mrb[208].mxu1 }
 0x919   :  { %v5673_v42 = vadd.f32 %v5672_v54, %v5605_v1  ;;  %v10794_v24 = vpop.f32.mrb[209].mxu0  ;;  %v10806_v33 = vpop.f32.mrb[209].mxu1 }
 0x91a   :  { %v5608_v29 = vpop.f32.mrb[210].mxu0  ;;  %v5675_v45 = vpop.f32.mrb[210].mxu1 }
 0x91b   :  { %v10795_v28 = vpop.f32.mrb[211].mxu0  ;;  %v10807_v53 = vpop.f32.mrb[211].mxu1 }
 0x928   :  { %v5741_v26 = vpop.f32.mrb[212].mxu0  ;;  %v5811_v44 = vpop.f32.mrb[212].mxu1 }
 0x929   :  { %v5747_v31 = vadd.f32 %v5741_v26, %v5673_v42  ;;  %v10818_v57 = vpop.f32.mrb[213].mxu0  ;;  %v10830_v55 = vpop.f32.mrb[213].mxu1 }
 0x92a   :  { %v5744_v56 = vpop.f32.mrb[214].mxu0  ;;  %v5814_v5 = vpop.f32.mrb[214].mxu1 }
 0x92b   :  { %v5817_v62 = vadd.f32 %v5811_v44, %v5747_v31  ;;  %v10819_v17 = vpop.f32.mrb[215].mxu0  ;;  %v10831_v10 = vpop.f32.mrb[215].mxu1 }
 0x938   :  { %v5881_v38 = vpop.f32.mrb[216].mxu0  ;;  %v5944_v21 = vpop.f32.mrb[216].mxu1 }
 0x939   :  { %v5887_v8 = vadd.f32 %v5881_v38, %v5817_v62  ;;  %v10842_v25 = vpop.f32.mrb[217].mxu0  ;;  %v10854_v50 = vpop.f32.mrb[217].mxu1 }
 0x93a   :  { %v5884_v30 = vpop.f32.mrb[218].mxu0  ;;  %v5947_v12 = vpop.f32.mrb[218].mxu1 }
 0x93b   :  { %v10843_v18 = vpop.f32.mrb[219].mxu0  ;;  %v10855_v13 = vpop.f32.mrb[219].mxu1  ;;  %v5892_v19 = vadd.f32 %v9385_v35, %v5887_v8 }
 0x93d   :  { %v5893_v16 = vmul.f32 0.1, %v5892_v19 }
 0x93f   :  { %v5894_v39 = vmax.f32 %v5892_v19, %v5893_v16 }
 0x941   :  { %v5896_v2 = vsel %vm5895_vm12, %v5894_v39, 0.0 }
 0x942   :  { %v5897_v33 = vrot.slane %v5896_v2, 4 }
 0x944   :  { %v5898_v31 = vadd.f32 %v5897_v33, %v5896_v2 }
 0x946   :  { %v5899_v56 = vrot.slane %v5898_v31, 2 }
 0x948   :  { %v5987_v4 = vpop.f32.mrb[220].mxu0  ;;  %v6032_v7 = vpop.f32.mrb[220].mxu1  ;;  %v5900_v17 = vadd.f32 %v5899_v56, %v5898_v31 }
 0x949   :  { %v5988_v37 = vadd.f32 %v5987_v4, %v5944_v21  ;;  %v10866_v22 = vpop.f32.mrb[221].mxu0  ;;  %v10878_v20 = vpop.f32.mrb[221].mxu1 }
 0x94a   :  { %v5990_v36 = vpop.f32.mrb[222].mxu0  ;;  %v6035_v63 = vpop.f32.mrb[222].mxu1  ;;  %v5901_v21 = vrot.slane %v5900_v17, 1 }
 0x94b   :  { %v6038_v41 = vadd.f32 %v6032_v7, %v5988_v37  ;;  %v10867_v11 = vpop.f32.mrb[223].mxu0  ;;  %v10879_v23 = vpop.f32.mrb[223].mxu1 }
 0x94c   :  { %v5902_v50 = vadd.f32 %v5901_v21, %v5900_v17 }
 0x958   :  { %v6078_v3 = vpop.f32.mrb[224].mxu0  ;;  %v6124_v1 = vpop.f32.mrb[224].mxu1 }
 0x959   :  { %v6084_v54 = vadd.f32 %v6078_v3, %v6038_v41  ;;  %v10890_v42 = vpop.f32.mrb[225].mxu0  ;;  %v10902_v24 = vpop.f32.mrb[225].mxu1 }
 0x95a   :  { %v6081_v29 = vpop.f32.mrb[226].mxu0  ;;  %v6127_v45 = vpop.f32.mrb[226].mxu1 }
 0x95b   :  { %v6130_v28 = vadd.f32 %v6124_v1, %v6084_v54  ;;  %v10891_v53 = vpop.f32.mrb[227].mxu0  ;;  %v10903_v26 = vpop.f32.mrb[227].mxu1  ;;  %v5538_v29 = vld [vmem:[#allocation4 + $0x10] sm:$0x1] }
 0x95c   :  { %v5539_v53 = vld [vmem:[#allocation4 + $0x11] sm:$0x1] }
 0x95d   :  { %v6131_v44 = vadd.f32 %v9385_v35, %v6130_v28 }
 0x95f   :  { %v6132_v57 = vmul.f32 0.1, %v6131_v44 }
 0x961   :  { %v6133_v55 = vmax.f32 %v6131_v44, %v6132_v57 }
 0x963   :  { %v6134_v5 = vsel %vm5895_vm12, %v6133_v55, 0.0 }
 0x964   :  { %v6135_v62 = vrot.slane %v6134_v5, 4 }
 0x966   :  { %v6136_v10 = vadd.f32 %v6135_v62, %v6134_v5 }
 0x968   :  { %v6137_v38 = vrot.slane %v6136_v10, 2 }
 0x96a   :  { %v6138_v8 = vadd.f32 %v6137_v38, %v6136_v10  ;;  %v13650_v10 = vld [vmem:[%s14749_s8 + $0x80] sm:$0xff]  }
 0x96b   :  { %v13655_v38 = vld [vmem:[%s14749_s8 + $0xc0] sm:$0xff]  }
 0x96c   :  { %v6139_v25 = vrot.slane %v6138_v8, 1 }
 0x96e   :  { %v6140_v30 = vadd.f32 %v6139_v25, %v6138_v8 }
 0x970   :  { %v6141_v12 = vadd.f32 %v6140_v30, %v5902_v50 }
 0x972   :  { %v6142_v18 = vmul.f32 0.125, %v6141_v12  ;;  %v13662_v12 = vld [vmem:[%s14749_s8 + $0x88] sm:$0xff]  }
 0x974   :  { %v6143_v13 = vsub.f32 %v5894_v39, %v6142_v18  ;;  %v6152_v4 = vsub.f32 %v6133_v55, %v6142_v18 }
 0x976   :  { %v6144_v35 = vmul.f32 %v6143_v13, %v6143_v13  ;;  %v6153_v7 = vmul.f32 %v6152_v4, %v6152_v4 }
 0x978   :  { %v6145_v37 = vsel %vm5895_vm12, %v6144_v35, 0.0  ;;  %v6154_v22 = vsel %vm5895_vm12, %v6153_v7, 0.0  ;;  %v13690_v7 = vld [vmem:[%s14749_s8 + $0x90] sm:$0xff]  }
 0x979   :  { %v6146_v20 = vrot.slane %v6145_v37, 4  ;;  %v6155_v36 = vrot.slane %v6154_v22, 4 }
 0x97b   :  { %v6147_v63 = vadd.f32 %v6146_v20, %v6145_v37  ;;  %v6156_v19 = vadd.f32 %v6155_v36, %v6154_v22  ;;  %v13695_v37 = vld [vmem:[%s14749_s8 + $0xd0] sm:$0xff]   ;;  %v13704_v22 = vld [vmem:[%s14749_s8 + $0x98] sm:$0xff]   ;;  %v13718_v36 = vld [vmem:[%s14749_s8 + $0xa0] sm:$0xff]  }
 0x97c   :  { %v13709_v20 = vld [vmem:[%s14749_s8 + $0xd8] sm:$0xff]  }
 0x97d   :  { %v6148_v41 = vrot.slane %v6147_v63, 2  ;;  %v6157_v11 = vrot.slane %v6156_v19, 2 }
 0x97f   :  { %v6149_v23 = vadd.f32 %v6148_v41, %v6147_v63  ;;  %v6158_v16 = vadd.f32 %v6157_v11, %v6156_v19  ;;  %v13723_v63 = vld [vmem:[%s14749_s8 + $0xe0] sm:$0xff]   ;;  %v13732_v19 = vld [vmem:[%s14749_s8 + $0xa8] sm:$0xff]   ;;  %v13746_v11 = vld [vmem:[%s14749_s8 + $0xb0] sm:$0xff]  }
 0x980   :  { %v13737_v41 = vld [vmem:[%s14749_s8 + $0xe8] sm:$0xff]  }
 0x981   :  { %v6150_v2 = vrot.slane %v6149_v23, 1  ;;  %v6159_v3 = vrot.slane %v6158_v16, 1 }
 0x983   :  { %v6151_v1 = vadd.f32 %v6150_v2, %v6149_v23  ;;  %v6160_v54 = vadd.f32 %v6159_v3, %v6158_v16  ;;  %v13751_v23 = vld [vmem:[%s14749_s8 + $0xf0] sm:$0xff]   ;;  %v13760_v16 = vld [vmem:[%s14749_s8 + $0xb8] sm:$0xff]   ;;  %v13774_v3 = vld [vmem:[%s14749_s8 + $0x100] sm:$0xff]  }
 0x984   :  { %v13765_v2 = vld [vmem:[%s14749_s8 + $0xf8] sm:$0xff]  }
 0x985   :  { %v6161_v42 = vadd.f32 %v6160_v54, %v6151_v1 }
 0x987   :  { %v6162_v24 = vmul.f32 0.125, %v6161_v42  ;;  %v13783_v42 = vld [vmem:[%s14749_s8 + $0x108] sm:$0xff]  }
 0x989   :  { %v6163_v33 = vadd.f32 1e-05, %v6162_v24  ;;  %v13805_v24 = vld [vmem:[%s14749_s8 + $0x118] sm:$0xff]  }
 0x98b   :  { %11364 = vrsqrt.f32 %v6163_v33 }
 0x995   :  { %v11365_v45 = vpop.eup %11364 }
 0x996   :  { %v6165_v28 = vmul.f32 %v11365_v45, %v5538_v29 }
 0x998   :  { %v6166_v26 = vmul.f32 %v6165_v28, %v6142_v18  ;;  %v6171_v44 = vrot.slane %v6165_v28, %v12527_v9  ;;  %v13667_v18 = vld [vmem:[%s14749_s8 + $0xc8] sm:$0xff]  }
 0x99a   :  { %v6167_v31 = vsub.f32 %v5539_v53, %v6166_v26  ;;  %v6172_v57 = vmul.f32 %v6171_v44, %v5894_v39  ;;  %v6180_v56 = vmul.f32 %v6171_v44, %v6133_v55 }
 0x99c   :  { %v6176_v5 = vrot.slane %v6167_v31, %v12527_v9 }
 0x99e   :  { %v6177_v62 = vadd.f32 %v6176_v5, %v6172_v57  ;;  %v6181_v17 = vadd.f32 %v6180_v56, %v6176_v5 }
 0x9a0   :  { %6178 = vst [vmem:[#allocation2 + $0x2] sm:$0xf] %v6177_v62  ;;  %6182 = vst [vmem:[#allocation2 + $0xd2] sm:$0xf] %v6181_v17 }
 0x9a7   :  { %v6269_v21 = vld [vmem:[#allocation2 + $0x1] ss:$2 sm:$0x3]  ;;  %v6267_v8 = vld [vmem:[#allocation2] ss:$2 sm:$0x3] }
 0x9a8   :  { %v6270_v39 = vpack.c.bf16 %v6269_v21, %v6269_v21  ;;  %v6268_v55 = vpack.c.bf16 %v6267_v8, %v6267_v8  ;;  %v6447_v25 = vld [vmem:[#allocation2 + $0x2] ss:$2 sm:$0x3]  ;;  %v6538_v50 = vld [vmem:[#allocation2 + $0x3] ss:$2 sm:$0x3] }
 0x9a9   :  { %v13657_v30 = vld [vmem:[#allocation2 + $0x4] ss:$2 sm:$0x3]  ;;  %v13670_v13 = vld [vmem:[#allocation2 + $0xd2] ss:$2 sm:$0x3]  ;;  %v6448_v1 = vpack.c.bf16 %v6447_v25, %v6447_v25  ;;  %v6539_v54 = vpack.c.bf16 %v6538_v50, %v6538_v50 }
 0x9aa   :  { %10921 = vmatmul.mubr.bf16.vlgmr.msra.gmra.mrb[228].mxu0 %v6270_v39  ;;  %10941 = vmatmul.mubr.bf16.vlgmr.msra.gmra.mrb[228].mxu1 %v6268_v55  ;;  %6996 = vst [vmem:[#allocation2 + $0x4] sm:$0xf] %v11491_v0  ;;  %v13674_v4 = vld [vmem:[#allocation2 + $0xd3] ss:$2 sm:$0x3]  ;;  %v6630_v33 = vpack.c.bf16 %v13657_v30, %v13657_v30  ;;  %v7023_v21 = vld [vmem:[%s14751_s10] sm:$0xff] }
 0x9ab   :  { %10945 = vmatpush3.bf16.msra.mxu0 %v13650_v10  ;;  %10965 = vmatpush3.bf16.msra.mxu1 %v13655_v38  ;;  %v13676_v35 = vld [vmem:[#allocation2 + $0xd4] ss:$2 sm:$0x3]  ;;  %v7027_v8 = vld [vmem:[%s14751_s10 + $0x20] sm:$0xff]  ;;  %v7024_v39 = vld [vmem:[%s14751_s10 + $0x8] sm:$0xff] }
 0x9ac   :  { %10946 = vmatprep.subr.bf16.mxu0 %v11491_v0  ;;  %10966 = vmatprep.subr.bf16.mxu1 %v11491_v0  ;;  %7000 = vst [vmem:[#allocation2 + $0xd4] sm:$0xf] %v11491_v0  ;;  %v9434_v55 = vcombine.high %v7023_v21, %v7027_v8  ;;  %v7028_v25 = vld [vmem:[%s14751_s10 + $0x28] sm:$0xff]  ;;  %v9433_v50 = vcombine.low %v7023_v21, %v7027_v8 }
 0x9ad   :  { %10960 = vmatprep.mubr.msk.bf16.mxu0 %vm11492_vm0, %v11491_v0  ;;  %10980 = vmatprep.mubr.msk.bf16.mxu1 %vm11492_vm0, %v11491_v0  ;;  %v9435_v30 = vcombine.low %v7024_v39, %v7028_v25 }
 0x9af   :  { %10947 = vmatpush3.bf16.msra.mxu0 %v13662_v12  ;;  %10967 = vmatpush3.bf16.msra.mxu1 %v13667_v18 }
 0x9b0   :  { %10948 = vmatprep.subr.bf16.mxu0 %v11491_v0  ;;  %10968 = vmatprep.subr.bf16.mxu1 %v11491_v0 }
 0x9b3   :  { %10949 = vmatpush3.bf16.msra.mxu0 %v13690_v7  ;;  %10969 = vmatpush3.bf16.msra.mxu1 %v13695_v37 }
 0x9b4   :  { %10950 = vmatprep.subr.bf16.mxu0 %v11491_v0  ;;  %10970 = vmatprep.subr.bf16.mxu1 %v11491_v0 }
 0x9b7   :  { %10951 = vmatpush3.bf16.msra.mxu0 %v13704_v22  ;;  %10971 = vmatpush3.bf16.msra.mxu1 %v13709_v20 }
 0x9b8   :  { %10952 = vmatprep.subr.bf16.mxu0 %v11491_v0  ;;  %10972 = vmatprep.subr.bf16.mxu1 %v11491_v0 }
 0x9bb   :  { %10953 = vmatpush3.bf16.msra.mxu0 %v13718_v36  ;;  %10973 = vmatpush3.bf16.msra.mxu1 %v13723_v63 }
 0x9bc   :  { %10954 = vmatprep.subr.bf16.mxu0 %v11491_v0  ;;  %10974 = vmatprep.subr.bf16.mxu1 %v11491_v0 }
 0x9bf   :  { %10955 = vmatpush3.bf16.msra.mxu0 %v13732_v19  ;;  %10975 = vmatpush3.bf16.msra.mxu1 %v13737_v41 }
 0x9c0   :  { %10956 = vmatprep.subr.bf16.mxu0 %v11491_v0  ;;  %10976 = vmatprep.subr.bf16.mxu1 %v11491_v0 }
 0x9c3   :  { %10957 = vmatpush3.bf16.msra.mxu0 %v13746_v11  ;;  %10977 = vmatpush3.bf16.msra.mxu1 %v13751_v23 }
 0x9c4   :  { %10958 = vmatprep.subr.bf16.mxu0 %v11491_v0  ;;  %10978 = vmatprep.subr.bf16.mxu1 %v11491_v0 }
 0x9c7   :  { %10959 = vmatpush3.bf16.msra.mxu0 %v13760_v16  ;;  %10979 = vmatpush3.bf16.msra.mxu1 %v13765_v2 }
 0x9c8   :  { %10984 = vmatprep.subr.bf16.mxu0 %v11491_v0  ;;  %11004 = vmatprep.subr.bf16.mxu1 %v11491_v0 }
 0x9ca   :  { %10961 = vmatmul.mubr.bf16.vlgmr.msra.gmra.mrb[232].mxu0 %v6448_v1  ;;  %10981 = vmatmul.mubr.bf16.vlgmr.msra.gmra.mrb[232].mxu1 %v6539_v54  ;;  %v7051_v1 = vld [vmem:[%s14751_s10 + $0xe0] sm:$0xff]  ;;  %v7048_v54 = vld [vmem:[%s14751_s10 + $0xc8] sm:$0xff] }
 0x9cb   :  { %10985 = vmatpush3.bf16.msra.mxu0 %v13774_v3  ;;  %11005 = vmatpush3.bf16.msra.mxu1 %v13532_v43  ;;  %v13796_v43 = vld [vmem:[%s14749_s8 + $0x110] sm:$0xff]  }
 0x9cc   :  { %10986 = vmatprep.subr.bf16.mxu0 %v11491_v0  ;;  %11006 = vmatprep.subr.bf16.mxu1 %v11491_v0 }
 0x9cd   :  { %11000 = vmatprep.mubr.msk.bf16.mxu0 %vm11492_vm0, %v11491_v0  ;;  %11020 = vmatprep.mubr.msk.bf16.mxu1 %vm11492_vm0, %v11491_v0 }
 0x9cf   :  { %10987 = vmatpush3.bf16.msra.mxu0 %v13783_v42  ;;  %11007 = vmatpush3.bf16.msra.mxu1 %v13546_v47  ;;  %v13814_v47 = vld [vmem:[%s14749_s8 + $0x120] sm:$0xff]  }
 0x9d0   :  { %10988 = vmatprep.subr.bf16.mxu0 %v11491_v0  ;;  %11008 = vmatprep.subr.bf16.mxu1 %v11491_v0 }
 0x9d3   :  { %10989 = vmatpush3.bf16.msra.mxu0 %v13796_v43  ;;  %11009 = vmatpush3.bf16.msra.mxu1 %v13560_v34  ;;  %v13823_v34 = vld [vmem:[%s14749_s8 + $0x128] sm:$0xff]  }
 0x9d4   :  { %10990 = vmatprep.subr.bf16.mxu0 %v11491_v0  ;;  %11010 = vmatprep.subr.bf16.mxu1 %v11491_v0 }
 0x9d7   :  { %10991 = vmatpush3.bf16.msra.mxu0 %v13805_v24  ;;  %11011 = vmatpush3.bf16.msra.mxu1 %v13574_v15  ;;  %v13832_v15 = vld [vmem:[%s14749_s8 + $0x130] sm:$0xff]  }
 0x9d8   :  { %10992 = vmatprep.subr.bf16.mxu0 %v11491_v0  ;;  %11012 = vmatprep.subr.bf16.mxu1 %v11491_v0 }
 0x9db   :  { %10993 = vmatpush3.bf16.msra.mxu0 %v13814_v47  ;;  %11013 = vmatpush3.bf16.msra.mxu1 %v13586_v58  ;;  %v13841_v58 = vld [vmem:[%s14749_s8 + $0x138] sm:$0xff]  }
 0x9dc   :  { %10994 = vmatprep.subr.bf16.mxu0 %v11491_v0  ;;  %11014 = vmatprep.subr.bf16.mxu1 %v11491_v0 }
 0x9df   :  { %10995 = vmatpush3.bf16.msra.mxu0 %v13823_v34  ;;  %11015 = vmatpush3.bf16.msra.mxu1 %v13600_v52  ;;  %v6737_v52 = vld [vmem:[#allocation2 + $0xd1] ss:$2 sm:$0x3] }
 0x9e0   :  { %10996 = vmatprep.subr.bf16.mxu0 %v11491_v0  ;;  %11016 = vmatprep.subr.bf16.mxu1 %v11491_v0  ;;  %v6738_v29 = vpack.c.bf16 %v6737_v52, %v6737_v52  ;;  %v7056_v52 = vld [vmem:[%s14751_s10 + $0x108] sm:$0xff] }
 0x9e3   :  { %10997 = vmatpush3.bf16.msra.mxu0 %v13832_v15  ;;  %11017 = vmatpush3.bf16.msra.mxu1 %v13614_v46 }
 0x9e4   :  { %10998 = vmatprep.subr.bf16.mxu0 %v11491_v0  ;;  %11018 = vmatprep.subr.bf16.mxu1 %v11491_v0 }
 0x9e7   :  { %10999 = vmatpush3.bf16.msra.mxu0 %v13841_v58  ;;  %11019 = vmatpush3.bf16.msra.mxu1 %v13628_v59 }
 0x9e8   :  { %11024 = vmatprep.subr.bf16.mxu0 %v11491_v0  ;;  %11044 = vmatprep.subr.bf16.mxu1 %v11491_v0 }
 0x9ea   :  { %11001 = vmatmul.mubr.bf16.vlgmr.msra.gmra.mrb[236].mxu0 %v6630_v33  ;;  %11021 = vmatmul.mubr.bf16.vlgmr.msra.gmra.mrb[236].mxu1 %v6738_v29  ;;  %v7060_v29 = vld [vmem:[%s14751_s10 + $0x128] sm:$0xff] }
 0x9eb   :  { %11025 = vmatpush3.bf16.msra.mxu0 %v13537_v40  ;;  %11045 = vmatpush3.bf16.msra.mxu1 %v13650_v10  ;;  %v6735_v40 = vld [vmem:[#allocation2 + $0xd0] ss:$2 sm:$0x3] }
 0x9ec   :  { %11026 = vmatprep.subr.bf16.mxu0 %v11491_v0  ;;  %11046 = vmatprep.subr.bf16.mxu1 %v11491_v0 }
 0x9ed   :  { %11040 = vmatprep.mubr.msk.bf16.mxu0 %vm11492_vm0, %v11491_v0  ;;  %11060 = vmatprep.mubr.msk.bf16.mxu1 %vm11492_vm0, %v11491_v0 }
 0x9ef   :  { %11027 = vmatpush3.bf16.msra.mxu0 %v13551_v32  ;;  %11047 = vmatpush3.bf16.msra.mxu1 %v13662_v12  ;;  %v6736_v32 = vpack.c.bf16 %v6735_v40, %v6735_v40  ;;  %v9436_v12 = vcombine.high %v7024_v39, %v7028_v25  ;;  %v7084_v39 = vld [vmem:[%s14751_s10 + $0x1e8] sm:$0xff] }
 0x9f0   :  { %11028 = vmatprep.subr.bf16.mxu0 %v11491_v0  ;;  %11048 = vmatprep.subr.bf16.mxu1 %v11491_v0 }
 0x9f3   :  { %11029 = vmatpush3.bf16.msra.mxu0 %v13565_v61  ;;  %11049 = vmatpush3.bf16.msra.mxu1 %v13690_v7  ;;  %v6820_v61 = vpack.c.bf16 %v13670_v13, %v13670_v13  ;;  %v7035_v13 = vld [vmem:[%s14751_s10 + $0x60] sm:$0xff]  ;;  %v7036_v7 = vld [vmem:[%s14751_s10 + $0x68] sm:$0xff] }
 0x9f4   :  { %11030 = vmatprep.subr.bf16.mxu0 %v11491_v0  ;;  %11050 = vmatprep.subr.bf16.mxu1 %v11491_v0 }
 0x9f7   :  { %11031 = vmatpush3.bf16.msra.mxu0 %v13579_v6  ;;  %11051 = vmatpush3.bf16.msra.mxu1 %v13704_v22  ;;  %v6863_v6 = vpack.c.bf16 %v13674_v4, %v13674_v4  ;;  %v7032_v4 = vld [vmem:[%s14751_s10 + $0x48] sm:$0xff] }
 0x9f8   :  { %11032 = vmatprep.subr.bf16.mxu0 %v11491_v0  ;;  %11052 = vmatprep.subr.bf16.mxu1 %v11491_v0  ;;  %v9443_v22 = vcombine.low %v7032_v4, %v7036_v7 }
 0x9fb   :  { %11033 = vmatpush3.bf16.msra.mxu0 %v13591_v48  ;;  %11053 = vmatpush3.bf16.msra.mxu1 %v13718_v36  ;;  %v6906_v48 = vpack.c.bf16 %v13676_v35, %v13676_v35  ;;  %v7039_v36 = vld [vmem:[%s14751_s10 + $0x80] sm:$0xff] }
 0x9fc   :  { %11034 = vmatprep.subr.bf16.mxu0 %v11491_v0  ;;  %11054 = vmatprep.subr.bf16.mxu1 %v11491_v0 }
 0x9ff   :  { %11035 = vmatpush3.bf16.msra.mxu0 %v13605_v27  ;;  %11055 = vmatpush3.bf16.msra.mxu1 %v13732_v19  ;;  %v7040_v19 = vld [vmem:[%s14751_s10 + $0x88] sm:$0xff] }
 0xa00   :  { %11036 = vmatprep.subr.bf16.mxu0 %v11491_v0  ;;  %11056 = vmatprep.subr.bf16.mxu1 %v11491_v0 }
 0xa03   :  { %11037 = vmatpush3.bf16.msra.mxu0 %v13619_v60  ;;  %11057 = vmatpush3.bf16.msra.mxu1 %v13746_v11  ;;  %v7044_v11 = vld [vmem:[%s14751_s10 + $0xa8] sm:$0xff] }
 0xa04   :  { %11038 = vmatprep.subr.bf16.mxu0 %v11491_v0  ;;  %11058 = vmatprep.subr.bf16.mxu1 %v11491_v0 }
 0xa07   :  { %11039 = vmatpush3.bf16.msra.mxu0 %v13633_v51  ;;  %11059 = vmatpush3.bf16.msra.mxu1 %v13760_v16  ;;  %v9451_v16 = vcombine.low %v7040_v19, %v7044_v11 }
 0xa08   :  { %11064 = vmatprep.subr.bf16.mxu0 %v11491_v0  ;;  %11084 = vmatprep.subr.bf16.mxu1 %v11491_v0 }
 0xa0a   :  { %11041 = vmatmul.mubr.bf16.vlgmr.msra.gmra.mrb[240].mxu0 %v6736_v32  ;;  %11061 = vmatmul.mubr.bf16.vlgmr.msra.gmra.mrb[240].mxu1 %v6820_v61  ;;  %v9467_v32 = vcombine.low %v7056_v52, %v7060_v29  ;;  %v9468_v61 = vcombine.high %v7056_v52, %v7060_v29  ;;  %v7112_v29 = vld [vmem:[%s14751_s10 + $0x2c8] sm:$0xff] }
 0xa0b   :  { %11065 = vmatpush3.bf16.msra.mxu0 %v13655_v38  ;;  %11085 = vmatpush3.bf16.msra.mxu1 %v13774_v3  ;;  %v7047_v3 = vld [vmem:[%s14751_s10 + $0xc0] sm:$0xff] }
 0xa0c   :  { %11066 = vmatprep.subr.bf16.mxu0 %v11491_v0  ;;  %11086 = vmatprep.subr.bf16.mxu1 %v11491_v0 }
 0xa0d   :  { %11080 = vmatprep.mubr.msk.bf16.mxu0 %vm11492_vm0, %v11491_v0  ;;  %11100 = vmatprep.mubr.msk.bf16.mxu1 %vm11492_vm0, %v11491_v0 }
 0xa0f   :  { %11067 = vmatpush3.bf16.msra.mxu0 %v13667_v18  ;;  %11087 = vmatpush3.bf16.msra.mxu1 %v13783_v42  ;;  %v7031_v18 = vld [vmem:[%s14751_s10 + $0x40] sm:$0xff]  ;;  %v9458_v42 = vcombine.high %v7047_v3, %v7051_v1 }
 0xa10   :  { %11068 = vmatprep.subr.bf16.mxu0 %v11491_v0  ;;  %11088 = vmatprep.subr.bf16.mxu1 %v11491_v0  ;;  %v9442_v35 = vcombine.high %v7031_v18, %v7035_v13 }
 0xa13   :  { %11069 = vmatpush3.bf16.msra.mxu0 %v13695_v37  ;;  %11089 = vmatpush3.bf16.msra.mxu1 %v13796_v43  ;;  %v9441_v37 = vcombine.low %v7031_v18, %v7035_v13  ;;  %v7052_v43 = vld [vmem:[%s14751_s10 + $0xe8] sm:$0xff] }
 0xa14   :  { %11070 = vmatprep.subr.bf16.mxu0 %v11491_v0  ;;  %11090 = vmatprep.subr.bf16.mxu1 %v11491_v0 }
 0xa17   :  { %11071 = vmatpush3.bf16.msra.mxu0 %v13709_v20  ;;  %11091 = vmatpush3.bf16.msra.mxu1 %v13805_v24  ;;  %v9444_v20 = vcombine.high %v7032_v4, %v7036_v7  ;;  %v9457_v24 = vcombine.low %v7047_v3, %v7051_v1  ;;  %v7100_v1 = vld [vmem:[%s14751_s10 + $0x268] sm:$0xff] }
 0xa18   :  { %11072 = vmatprep.subr.bf16.mxu0 %v11491_v0  ;;  %11092 = vmatprep.subr.bf16.mxu1 %v11491_v0 }
 0xa1b   :  { %11073 = vmatpush3.bf16.msra.mxu0 %v13723_v63  ;;  %11093 = vmatpush3.bf16.msra.mxu1 %v13814_v47  ;;  %v7043_v63 = vld [vmem:[%s14751_s10 + $0xa0] sm:$0xff]  ;;  %v9459_v47 = vcombine.low %v7048_v54, %v7052_v43 }
 0xa1c   :  { %11074 = vmatprep.subr.bf16.mxu0 %v11491_v0  ;;  %11094 = vmatprep.subr.bf16.mxu1 %v11491_v0 }
 0xa1f   :  { %11075 = vmatpush3.bf16.msra.mxu0 %v13737_v41  ;;  %11095 = vmatpush3.bf16.msra.mxu1 %v13823_v34  ;;  %v9450_v41 = vcombine.high %v7039_v36, %v7043_v63  ;;  %v9460_v34 = vcombine.high %v7048_v54, %v7052_v43  ;;  %v7103_v54 = vld [vmem:[%s14751_s10 + $0x280] sm:$0xff] }
 0xa20   :  { %11076 = vmatprep.subr.bf16.mxu0 %v11491_v0  ;;  %11096 = vmatprep.subr.bf16.mxu1 %v11491_v0 }
 0xa23   :  { %11077 = vmatpush3.bf16.msra.mxu0 %v13751_v23  ;;  %11097 = vmatpush3.bf16.msra.mxu1 %v13832_v15  ;;  %v9449_v23 = vcombine.low %v7039_v36, %v7043_v63  ;;  %v7055_v15 = vld [vmem:[%s14751_s10 + $0x100] sm:$0xff]  ;;  %v7092_v36 = vld [vmem:[%s14751_s10 + $0x228] sm:$0xff] }
 0xa24   :  { %11078 = vmatprep.subr.bf16.mxu0 %v11491_v0  ;;  %11098 = vmatprep.subr.bf16.mxu1 %v11491_v0 }
 0xa27   :  { %11079 = vmatpush3.bf16.msra.mxu0 %v13765_v2  ;;  %11099 = vmatpush3.bf16.msra.mxu1 %v13841_v58  ;;  %v9452_v2 = vcombine.high %v7040_v19, %v7044_v11  ;;  %v7059_v58 = vld [vmem:[%s14751_s10 + $0x120] sm:$0xff] }
 0xa28   :  { %7833 = vmatprep.subr.bf16.mxu0 %v9434_v55  ;;  %7874 = vmatprep.subr.bf16.mxu1 %v9436_v12  ;;  %v9466_v33 = vcombine.high %v7055_v15, %v7059_v58  ;;  %v9465_v40 = vcombine.low %v7055_v15, %v7059_v58  ;;  %v7095_v11 = vld [vmem:[%s14751_s10 + $0x240] sm:$0xff] }
 0xa29   :  { %v7111_v15 = vld [vmem:[%s14751_s10 + $0x2c0] sm:$0xff] }
 0xa2a   :  { %11081 = vmatmul.mubr.bf16.vlgmr.msra.gmra.mrb[244].mxu0 %v6863_v6  ;;  %11101 = vmatmul.mubr.bf16.vlgmr.msra.gmra.mrb[244].mxu1 %v6906_v48  ;;  %v7063_v6 = vld [vmem:[%s14751_s10 + $0x140] sm:$0xff] }
 0xa2b   :  { %7834 = vmatpush1.bf16.msra.mxu0 %v9433_v50  ;;  %7875 = vmatpush1.bf16.msra.mxu1 %v9435_v30  ;;  %v7067_v48 = vld [vmem:[%s14751_s10 + $0x160] sm:$0xff] }
 0xa2c   :  { %7835 = vmatprep.subr.bf16.mxu0 %v9442_v35  ;;  %7876 = vmatprep.subr.bf16.mxu1 %v9444_v20 }
 0xa2f   :  { %7836 = vmatpush1.bf16.msra.mxu0 %v9441_v37  ;;  %7877 = vmatpush1.bf16.msra.mxu1 %v9443_v22  ;;  %v7087_v37 = vld [vmem:[%s14751_s10 + $0x200] sm:$0xff]  ;;  %v7088_v22 = vld [vmem:[%s14751_s10 + $0x208] sm:$0xff] }
 0xa30   :  { %7837 = vmatprep.subr.bf16.mxu0 %v9450_v41  ;;  %7878 = vmatprep.subr.bf16.mxu1 %v9452_v2  ;;  %v9499_v19 = vcombine.low %v7088_v22, %v7092_v36  ;;  %v9500_v41 = vcombine.high %v7088_v22, %v7092_v36  ;;  %v14134_v36 = vld [vmem:[%s14751_s10 + $0x30] sm:$0xff] }
 0xa33   :  { %7838 = vmatpush1.bf16.msra.mxu0 %v9449_v23  ;;  %7879 = vmatpush1.bf16.msra.mxu1 %v9451_v16  ;;  %v7099_v23 = vld [vmem:[%s14751_s10 + $0x260] sm:$0xff]  ;;  %v7096_v16 = vld [vmem:[%s14751_s10 + $0x248] sm:$0xff] }
 0xa34   :  { %7839 = vmatprep.subr.bf16.mxu0 %v9458_v42  ;;  %7880 = vmatprep.subr.bf16.mxu1 %v9460_v34  ;;  %v9505_v2 = vcombine.low %v7095_v11, %v7099_v23  ;;  %v9506_v3 = vcombine.high %v7095_v11, %v7099_v23  ;;  %v7107_v42 = vld [vmem:[%s14751_s10 + $0x2a0] sm:$0xff]  ;;  %v9507_v43 = vcombine.low %v7096_v16, %v7100_v1  ;;  %v7108_v34 = vld [vmem:[%s14751_s10 + $0x2a8] sm:$0xff] }
 0xa35   :  { %v9514_v58 = vcombine.high %v7103_v54, %v7107_v42 }
 0xa37   :  { %7840 = vmatpush1.bf16.msra.mxu0 %v9457_v24  ;;  %7881 = vmatpush1.bf16.msra.mxu1 %v9459_v47  ;;  %v9508_v24 = vcombine.high %v7096_v16, %v7100_v1  ;;  %v7104_v47 = vld [vmem:[%s14751_s10 + $0x288] sm:$0xff] }
 0xa38   :  { %7841 = vmatprep.subr.bf16.mxu0 %v9466_v33  ;;  %7882 = vmatprep.subr.bf16.mxu1 %v9468_v61  ;;  %v9516_v52 = vcombine.high %v7104_v47, %v7108_v34  ;;  %v7115_v33 = vld [vmem:[%s14751_s10 + $0x2e0] sm:$0xff]  ;;  %v9515_v61 = vcombine.low %v7104_v47, %v7108_v34 }
 0xa3b   :  { %7842 = vmatpush1.bf16.msra.mxu0 %v9465_v40  ;;  %7883 = vmatpush1.bf16.msra.mxu1 %v9467_v32  ;;  %v7116_v40 = vld [vmem:[%s14751_s10 + $0x2e8] sm:$0xff]  ;;  %v9513_v32 = vcombine.low %v7103_v54, %v7107_v42 }
 0xa7d   :  { %v6353_v27 = vpop.f32.mrb[228].mxu0  ;;  %v6441_v46 = vpop.f32.mrb[228].mxu1 }
 0xa7e   :  { %v6442_v60 = vadd.f32 %v6441_v46, %v6353_v27  ;;  %v10922_v59 = vpop.f32.mrb[229].mxu0  ;;  %v10942_v51 = vpop.f32.mrb[229].mxu1  ;;  %v7064_v27 = vld [vmem:[%s14751_s10 + $0x148] sm:$0xff]  ;;  %v9474_v46 = vcombine.high %v7063_v6, %v7067_v48 }
 0xa7f   :  { %v6356_v45 = vpop.f32.mrb[230].mxu0  ;;  %v6444_v28 = vpop.f32.mrb[230].mxu1  ;;  %v9473_v59 = vcombine.low %v7063_v6, %v7067_v48  ;;  %v9522_v6 = vcombine.high %v7111_v15, %v7115_v33  ;;  %v9524_v48 = vcombine.high %v7112_v29, %v7116_v40 }
 0xa80   :  { %v10923_v0 = vpop.f32.mrb[231].mxu0  ;;  %v10943_v53 = vpop.f32.mrb[231].mxu1  ;;  %7843 = vmatprep.subr.bf16.mxu0 %v9474_v46  ;;  %v7071_v28 = vld [vmem:[%s14751_s10 + $0x180] sm:$0xff] }
 0xa81   :  { %7844 = vmatpush1.bf16.msra.mxu0 %v9473_v59  ;;  %v7075_v0 = vld [vmem:[%s14751_s10 + $0x1a0] sm:$0xff]  ;;  %v7072_v53 = vld [vmem:[%s14751_s10 + $0x188] sm:$0xff] }
 0xa82   :  { %v7123_v46 = vld [vmem:[%s14751_s10 + $0x320] sm:$0xff]  ;;  %v7124_v59 = vld [vmem:[%s14751_s10 + $0x328] sm:$0xff] }
 0xa9d   :  { %v6531_v26 = vpop.f32.mrb[232].mxu0  ;;  %v6622_v44 = vpop.f32.mrb[232].mxu1 }
 0xa9e   :  { %v6537_v31 = vadd.f32 %v6531_v26, %v6442_v60  ;;  %v10962_v57 = vpop.f32.mrb[233].mxu0  ;;  %v10982_v56 = vpop.f32.mrb[233].mxu1  ;;  %v7068_v60 = vld [vmem:[%s14751_s10 + $0x168] sm:$0xff]  ;;  %v9482_v26 = vcombine.high %v7071_v28, %v7075_v0 }
 0xa9f   :  { %v6534_v5 = vpop.f32.mrb[234].mxu0  ;;  %v6625_v62 = vpop.f32.mrb[234].mxu1  ;;  %v9475_v51 = vcombine.low %v7064_v27, %v7068_v60  ;;  %v9476_v45 = vcombine.high %v7064_v27, %v7068_v60  ;;  %v7119_v27 = vld [vmem:[%s14751_s10 + $0x300] sm:$0xff]  ;;  %v7120_v60 = vld [vmem:[%s14751_s10 + $0x308] sm:$0xff] }
 0xaa0   :  { %v13927_v17 = vadd.f32 %v6622_v44, %v6537_v31  ;;  %v10963_v10 = vpop.f32.mrb[235].mxu0  ;;  %v10983_v38 = vpop.f32.mrb[235].mxu1  ;;  %v7076_v44 = vld [vmem:[%s14751_s10 + $0x1a8] sm:$0xff]  ;;  %v9481_v31 = vcombine.low %v7071_v28, %v7075_v0  ;;  %7845 = vmatprep.subr.bf16.mxu0 %v9482_v26  ;;  %v7079_v5 = vld [vmem:[%s14751_s10 + $0x1c0] sm:$0xff]  ;;  %v9530_v28 = vcombine.high %v7119_v27, %v7123_v46  ;;  %v9532_v0 = vcombine.high %v7120_v60, %v7124_v59 }
 0xaa1   :  { %7884 = vmatprep.subr.bf16.mxu1 %v9476_v45  ;;  %v9483_v57 = vcombine.low %v7072_v53, %v7076_v44  ;;  %v9484_v56 = vcombine.high %v7072_v53, %v7076_v44  ;;  %v7083_v62 = vld [vmem:[%s14751_s10 + $0x1e0] sm:$0xff]  ;;  %v7080_v10 = vld [vmem:[%s14751_s10 + $0x1c8] sm:$0xff]  ;;  %v9523_v45 = vcombine.low %v7112_v29, %v7116_v40 }
 0xaa2   :  { %7885 = vmatpush1.bf16.msra.mxu1 %v9475_v51  ;;  %7846 = vmatpush1.bf16.msra.mxu0 %v9481_v31  ;;  %v9490_v8 = vcombine.high %v7079_v5, %v7083_v62  ;;  %v9489_v30 = vcombine.low %v7079_v5, %v7083_v62  ;;  %v9491_v12 = vcombine.low %v7080_v10, %v7084_v39  ;;  %v7127_v53 = vld [vmem:[%s14751_s10 + $0x340] sm:$0xff]  ;;  %v7128_v44 = vld [vmem:[%s14751_s10 + $0x348] sm:$0xff] }
 0xaa3   :  { %7886 = vmatprep.subr.bf16.mxu1 %v9484_v56  ;;  %v9492_v18 = vcombine.high %v7080_v10, %v7084_v39  ;;  %v9521_v51 = vcombine.low %v7111_v15, %v7115_v33  ;;  %v7131_v26 = vld [vmem:[%s14751_s10 + $0x360] sm:$0xff]  ;;  %v7132_v31 = vld [vmem:[%s14751_s10 + $0x368] sm:$0xff]  ;;  %v9531_v56 = vcombine.low %v7120_v60, %v7124_v59  ;;  %v9431_v33 = vld [vmem:[#allocation4 + $0x12] ss:$0 sm:$0xff] }
 0xaa4   :  { %7847 = vmatprep.subr.bf16.mxu0 %v9490_v8  ;;  %v9538_v5 = vcombine.high %v7127_v53, %v7131_v26  ;;  %v9540_v62 = vcombine.high %v7128_v44, %v7132_v31  ;;  %v7135_v10 = vld [vmem:[%s14751_s10 + $0x380] sm:$0xff]  ;;  %v7136_v8 = vld [vmem:[%s14751_s10 + $0x388] sm:$0xff] }
 0xaa5   :  { %v7140_v39 = vld [vmem:[%s14751_s10 + $0x3a8] sm:$0xff] }
 0xaa6   :  { %7887 = vmatpush1.bf16.msra.mxu1 %v9483_v57  ;;  %7848 = vmatpush1.bf16.msra.mxu0 %v9489_v30  ;;  %v9529_v57 = vcombine.low %v7119_v27, %v7123_v46 }
 0xaa7   :  { %7888 = vmatprep.subr.bf16.mxu1 %v9492_v18  ;;  %v7143_v18 = vld [vmem:[%s14751_s10 + $0x3c0] sm:$0xff] }
 0xaaa   :  { %7889 = vmatpush1.bf16.msra.mxu1 %v9491_v12  ;;  %v9548_v12 = vcombine.high %v7136_v8, %v7140_v39 }
 0xaab   :  { %7890 = vmatprep.subr.bf16.mxu1 %v9500_v41  ;;  %v14146_v41 = vld [vmem:[%s14751_s10 + $0x38] sm:$0xff] }
 0xaae   :  { %7891 = vmatpush1.bf16.msra.mxu1 %v9499_v19 }
 0xaaf   :  { %7892 = vmatprep.subr.bf16.mxu1 %v9508_v24 }
 0xab2   :  { %7893 = vmatpush1.bf16.msra.mxu1 %v9507_v43 }
 0xab3   :  { %7894 = vmatprep.subr.bf16.mxu1 %v9516_v52 }
 0xab6   :  { %7895 = vmatpush1.bf16.msra.mxu1 %v9515_v61 }
 0xab7   :  { %7896 = vmatprep.subr.bf16.mxu1 %v9524_v48 }
 0xaba   :  { %7897 = vmatpush1.bf16.msra.mxu1 %v9523_v45 }
 0xabb   :  { %7898 = vmatprep.subr.bf16.mxu1 %v9532_v0 }
 0xabd   :  { %v6713_v38 = vpop.f32.mrb[236].mxu0  ;;  %v14022_v21 = vpop.f32.mrb[236].mxu1 }
 0xabe   :  { %v14028_v55 = vadd.f32 %v6713_v38, %v13927_v17  ;;  %v11002_v25 = vpop.f32.mrb[237].mxu0  ;;  %v11022_v50 = vpop.f32.mrb[237].mxu1  ;;  %v7091_v17 = vld [vmem:[%s14751_s10 + $0x220] sm:$0xff]  ;;  %7899 = vmatpush1.bf16.msra.mxu1 %v9531_v56 }
 0xabf   :  { %v6716_v13 = vpop.f32.mrb[238].mxu0  ;;  %v6776_v4 = vpop.f32.mrb[238].mxu1  ;;  %v9498_v20 = vcombine.high %v7087_v37, %v7091_v17  ;;  %v9497_v63 = vcombine.low %v7087_v37, %v7091_v17  ;;  %v7139_v38 = vld [vmem:[%s14751_s10 + $0x3a0] sm:$0xff]  ;;  %v9537_v25 = vcombine.low %v7127_v53, %v7131_v26  ;;  %v9539_v50 = vcombine.low %v7128_v44, %v7132_v31  ;;  %7900 = vmatprep.subr.bf16.mxu1 %v9540_v62 }
 0xac0   :  { %v11003_v35 = vpop.f32.mrb[239].mxu0  ;;  %v11023_v7 = vpop.f32.mrb[239].mxu1  ;;  %v9546_v30 = vcombine.high %v7135_v10, %v7139_v38  ;;  %v7147_v13 = vld [vmem:[%s14751_s10 + $0x3e0] sm:$0xff]  ;;  %v7144_v4 = vld [vmem:[%s14751_s10 + $0x3c8] sm:$0xff]  ;;  %v9547_v37 = vcombine.low %v7136_v8, %v7140_v39  ;;  %v6724_v29 = vadd.f32 %v9431_v33, %v14028_v55 }
 0xac1   :  { %7849 = vmatprep.subr.bf16.mxu0 %v9498_v20  ;;  %v7148_v35 = vld [vmem:[%s14751_s10 + $0x3e8] sm:$0xff]  ;;  %v9545_v7 = vcombine.low %v7135_v10, %v7139_v38  ;;  %v9554_v17 = vcombine.high %v7143_v18, %v7147_v13  ;;  %v14129_v20 = vld [vmem:[%s14751_s10 + $0x10] sm:$0xff]  ;;  %v9553_v11 = vcombine.low %v7143_v18, %v7147_v13 }
 0xac2   :  { %7850 = vmatpush1.bf16.msra.mxu0 %v9497_v63  ;;  %7901 = vmatpush1.bf16.msra.mxu1 %v9539_v50  ;;  %v9556_v22 = vcombine.high %v7144_v4, %v7148_v35  ;;  %v14139_v63 = vld [vmem:[%s14751_s10 + $0x18] sm:$0xff]  ;;  %v9437_v19 = vcombine.low %v14129_v20, %v14134_v36  ;;  %v9438_v1 = vcombine.high %v14129_v20, %v14134_v36  ;;  %v6725_v40 = vmul.f32 0.1, %v6724_v29  ;;  %v7053_v20 = vld [vmem:[%s14751_s10 + $0xf0] sm:$0xff] }
 0xac3   :  { %7851 = vmatprep.subr.bf16.mxu0 %v9506_v3  ;;  %7902 = vmatprep.subr.bf16.mxu1 %v9548_v12  ;;  %v9439_v23 = vcombine.low %v14139_v63, %v14146_v41  ;;  %v9555_v3 = vcombine.low %v7144_v4, %v7148_v35  ;;  %v9440_v24 = vcombine.high %v14139_v63, %v14146_v41  ;;  %v7050_v36 = vld [vmem:[%s14751_s10 + $0xd8] sm:$0xff] }
 0xac4   :  { %v7054_v63 = vld [vmem:[%s14751_s10 + $0xf8] sm:$0xff] }
 0xac6   :  { %7852 = vmatpush1.bf16.msra.mxu0 %v9505_v2  ;;  %7903 = vmatpush1.bf16.msra.mxu1 %v9547_v37 }
 0xac7   :  { %7853 = vmatprep.subr.bf16.mxu0 %v9514_v58  ;;  %7904 = vmatprep.subr.bf16.mxu1 %v9556_v22 }
 0xaca   :  { %7854 = vmatpush1.bf16.msra.mxu0 %v9513_v32  ;;  %7905 = vmatpush1.bf16.msra.mxu1 %v9555_v3 }
 0xacb   :  { %7855 = vmatprep.subr.bf16.mxu0 %v9522_v6  ;;  %7956 = vmatprep.subr.bf16.mxu1 %v9440_v24 }
 0xace   :  { %7856 = vmatpush1.bf16.msra.mxu0 %v9521_v51 }
 0xacf   :  { %7857 = vmatprep.subr.bf16.mxu0 %v9530_v28 }
 0xad2   :  { %7858 = vmatpush1.bf16.msra.mxu0 %v9529_v57 }
 0xad3   :  { %7859 = vmatprep.subr.bf16.mxu0 %v9538_v5 }
 0xad6   :  { %7860 = vmatpush1.bf16.msra.mxu0 %v9537_v25 }
 0xad7   :  { %7861 = vmatprep.subr.bf16.mxu0 %v9546_v30 }
 0xada   :  { %7862 = vmatpush1.bf16.msra.mxu0 %v9545_v7 }
 0xadb   :  { %7863 = vmatprep.subr.bf16.mxu0 %v9554_v17 }
 0xadd   :  { %v6813_v16 = vpop.f32.mrb[240].mxu0  ;;  %v6855_v2 = vpop.f32.mrb[240].mxu1 }
 0xade   :  { %v6814_v54 = vadd.f32 %v6813_v16, %v14022_v21  ;;  %v11042_v42 = vpop.f32.mrb[241].mxu0  ;;  %v11062_v43 = vpop.f32.mrb[241].mxu1  ;;  %7864 = vmatpush1.bf16.msra.mxu0 %v9553_v11  ;;  %v6726_v21 = vmax.f32 %v6724_v29, %v6725_v40  ;;  %v6266_v40 = vld [vmem:[#allocation4 + $0x14] sm:$0x1] }
 0xadf   :  { %v6816_v47 = vpop.f32.mrb[242].mxu0  ;;  %v6858_v34 = vpop.f32.mrb[242].mxu1  ;;  %7915 = vmatprep.subr.bf16.mxu0 %v9438_v1 }
 0xae0   :  { %v6861_v15 = vadd.f32 %v6855_v2, %v6814_v54  ;;  %v11043_v58 = vpop.f32.mrb[243].mxu0  ;;  %v11063_v52 = vpop.f32.mrb[243].mxu1  ;;  %v6728_v32 = vsel %vm6727_vm13, %v6726_v21, 0.0 }
 0xae1   :  { %v6729_v60 = vrot.slane %v6728_v32, 4  ;;  %v6265_v52 = vld [vmem:[#allocation4 + $0x13] sm:$0x1] }
 0xae3   :  { %v6730_v26 = vadd.f32 %v6729_v60, %v6728_v32 }
 0xae5   :  { %v6731_v31 = vrot.slane %v6730_v26, 2 }
 0xae7   :  { %v6732_v5 = vadd.f32 %v6731_v31, %v6730_v26  ;;  %v7038_v31 = vld [vmem:[%s14751_s10 + $0x78] sm:$0xff] }
 0xae9   :  { %v6733_v38 = vrot.slane %v6732_v5, 1 }
 0xaeb   :  { %v6734_v25 = vadd.f32 %v6733_v38, %v6732_v5  ;;  %v7041_v5 = vld [vmem:[%s14751_s10 + $0x90] sm:$0xff] }
 0xaec   :  { %v7045_v38 = vld [vmem:[%s14751_s10 + $0xb0] sm:$0xff] }
 0xafd   :  { %v6898_v61 = vpop.f32.mrb[244].mxu0  ;;  %v6941_v6 = vpop.f32.mrb[244].mxu1 }
 0xafe   :  { %v6904_v48 = vadd.f32 %v6898_v61, %v6861_v15  ;;  %v11082_v27 = vpop.f32.mrb[245].mxu0  ;;  %v11102_v46 = vpop.f32.mrb[245].mxu1 }
 0xaff   :  { %v6901_v59 = vpop.f32.mrb[246].mxu0  ;;  %v6944_v51 = vpop.f32.mrb[246].mxu1 }
 0xb00   :  { %v6947_v45 = vadd.f32 %v6941_v6, %v6904_v48  ;;  %v11083_v28 = vpop.f32.mrb[247].mxu0  ;;  %v11103_v0 = vpop.f32.mrb[247].mxu1 }
 0xb02   :  { %v6948_v53 = vadd.f32 %v9431_v33, %v6947_v45 }
 0xb04   :  { %v6949_v44 = vmul.f32 0.1, %v6948_v53 }
 0xb06   :  { %v6950_v55 = vmax.f32 %v6948_v53, %v6949_v44  ;;  %v7037_v44 = vld [vmem:[%s14751_s10 + $0x70] sm:$0xff] }
 0xb08   :  { %v6951_v57 = vsel %vm6727_vm13, %v6950_v55, 0.0 }
 0xb09   :  { %v6952_v56 = vrot.slane %v6951_v57, 4 }
 0xb0b   :  { %v6953_v62 = vadd.f32 %v6952_v56, %v6951_v57 }
 0xb0d   :  { %v6954_v10 = vrot.slane %v6953_v62, 2 }
 0xb0f   :  { %v6955_v8 = vadd.f32 %v6954_v10, %v6953_v62 }
 0xb11   :  { %v6956_v39 = vrot.slane %v6955_v8, 1 }
 0xb13   :  { %v6957_v50 = vadd.f32 %v6956_v39, %v6955_v8  ;;  %v7042_v8 = vld [vmem:[%s14751_s10 + $0x98] sm:$0xff] }
 0xb14   :  { %v7046_v39 = vld [vmem:[%s14751_s10 + $0xb8] sm:$0xff] }
 0xb15   :  { %v6958_v30 = vadd.f32 %v6957_v50, %v6734_v25  ;;  %v9455_v41 = vcombine.low %v7042_v8, %v7046_v39 }
 0xb17   :  { %v6959_v12 = vmul.f32 0.25, %v6958_v30  ;;  %v9454_v30 = vcombine.high %v7041_v5, %v7045_v38 }
 0xb19   :  { %v6960_v18 = vsub.f32 %v6726_v21, %v6959_v12  ;;  %v6969_v13 = vsub.f32 %v6950_v55, %v6959_v12 }
 0xb1b   :  { %v6961_v4 = vmul.f32 %v6960_v18, %v6960_v18  ;;  %v6970_v35 = vmul.f32 %v6969_v13, %v6969_v13  ;;  %v7049_v18 = vld [vmem:[%s14751_s10 + $0xd0] sm:$0xff]  ;;  %v9464_v13 = vcombine.high %v7050_v36, %v7054_v63 }
 0xb1d   :  { %v6962_v7 = vsel %vm6727_vm13, %v6961_v4, 0.0  ;;  %v6971_v37 = vsel %vm6727_vm13, %v6970_v35, 0.0  ;;  %v7057_v4 = vld [vmem:[%s14751_s10 + $0x110] sm:$0xff] }
 0xb1e   :  { %v6963_v17 = vrot.slane %v6962_v7, 4  ;;  %v6972_v22 = vrot.slane %v6971_v37, 4  ;;  %v7061_v35 = vld [vmem:[%s14751_s10 + $0x130] sm:$0xff] }
 0xb20   :  { %v6964_v11 = vadd.f32 %v6963_v17, %v6962_v7  ;;  %v6973_v16 = vadd.f32 %v6972_v22, %v6971_v37  ;;  %v7058_v7 = vld [vmem:[%s14751_s10 + $0x118] sm:$0xff]  ;;  %v9461_v17 = vcombine.low %v7049_v18, %v7053_v20  ;;  %v9463_v22 = vcombine.low %v7050_v36, %v7054_v63 }
 0xb21   :  { %v7062_v37 = vld [vmem:[%s14751_s10 + $0x138] sm:$0xff] }
 0xb22   :  { %v6965_v2 = vrot.slane %v6964_v11, 2  ;;  %v6974_v3 = vrot.slane %v6973_v16, 2 }
 0xb24   :  { %v6966_v1 = vadd.f32 %v6965_v2, %v6964_v11  ;;  %v6975_v54 = vadd.f32 %v6974_v3, %v6973_v16  ;;  %v9470_v11 = vcombine.high %v7057_v4, %v7061_v35  ;;  %v9472_v16 = vcombine.high %v7058_v7, %v7062_v37  ;;  %v7065_v2 = vld [vmem:[%s14751_s10 + $0x150] sm:$0xff] }
 0xb25   :  { %v7069_v3 = vld [vmem:[%s14751_s10 + $0x170] sm:$0xff] }
 0xb26   :  { %v6967_v42 = vrot.slane %v6966_v1, 1  ;;  %v6976_v43 = vrot.slane %v6975_v54, 1 }
 0xb28   :  { %v6968_v24 = vadd.f32 %v6967_v42, %v6966_v1  ;;  %v6977_v47 = vadd.f32 %v6976_v43, %v6975_v54  ;;  %v7066_v1 = vld [vmem:[%s14751_s10 + $0x158] sm:$0xff]  ;;  %v9469_v42 = vcombine.low %v7057_v4, %v7061_v35  ;;  %v9471_v43 = vcombine.low %v7058_v7, %v7062_v37 }
 0xb29   :  { %v7070_v54 = vld [vmem:[%s14751_s10 + $0x178] sm:$0xff] }
 0xb2a   :  { %v6978_v34 = vadd.f32 %v6977_v47, %v6968_v24  ;;  %v9478_v24 = vcombine.high %v7065_v2, %v7069_v3  ;;  %v9480_v47 = vcombine.high %v7066_v1, %v7070_v54 }
 0xb2c   :  { %v6979_v15 = vmul.f32 0.25, %v6978_v34  ;;  %v7073_v34 = vld [vmem:[%s14751_s10 + $0x190] sm:$0xff] }
 0xb2e   :  { %v6980_v58 = vadd.f32 1e-05, %v6979_v15  ;;  %v7077_v15 = vld [vmem:[%s14751_s10 + $0x1b0] sm:$0xff] }
 0xb30   :  { %11366 = vrsqrt.f32 %v6980_v58  ;;  %v7074_v58 = vld [vmem:[%s14751_s10 + $0x198] sm:$0xff] }
 0xb3a   :  { %v11367_v33 = vpop.eup %11366 }
 0xb3b   :  { %v6982_v29 = vmul.f32 %v11367_v33, %v6265_v52  ;;  %v7078_v52 = vld [vmem:[%s14751_s10 + $0x1b8] sm:$0xff]  ;;  %v9477_v33 = vcombine.low %v7065_v2, %v7069_v3 }
 0xb3d   :  { %v6983_v32 = vmul.f32 %v6982_v29, %v6959_v12  ;;  %v6988_v61 = vrot.slane %v6982_v29, %v12527_v9  ;;  %v9456_v12 = vcombine.high %v7042_v8, %v7046_v39  ;;  %v9479_v29 = vcombine.low %v7066_v1, %v7070_v54 }
 0xb3f   :  { %v6984_v6 = vsub.f32 %v6266_v40, %v6983_v32  ;;  %v6989_v48 = vmul.f32 %v6988_v61, %v6726_v21  ;;  %v6997_v27 = vmul.f32 %v6988_v61, %v6950_v55  ;;  %v7033_v21 = vld [vmem:[%s14751_s10 + $0x50] sm:$0xff]  ;;  %v7034_v55 = vld [vmem:[%s14751_s10 + $0x58] sm:$0xff]  ;;  %v9486_v40 = vcombine.high %v7073_v34, %v7077_v15 }
 0xb40   :  { %v9446_v62 = vcombine.high %v7033_v21, %v7037_v44  ;;  %v9448_v10 = vcombine.high %v7034_v55, %v7038_v31  ;;  %v9445_v25 = vcombine.low %v7033_v21, %v7037_v44  ;;  %v9447_v50 = vcombine.low %v7034_v55, %v7038_v31  ;;  %v7081_v61 = vld [vmem:[%s14751_s10 + $0x1d0] sm:$0xff] }
 0xb41   :  { %v6993_v46 = vrot.slane %v6984_v6, %v12527_v9  ;;  %v9488_v32 = vcombine.high %v7074_v58, %v7078_v52  ;;  %v7085_v6 = vld [vmem:[%s14751_s10 + $0x1f0] sm:$0xff] }
 0xb42   :  { %v7097_v31 = vld [vmem:[%s14751_s10 + $0x250] sm:$0xff] }
 0xb43   :  { %v6994_v60 = vadd.f32 %v6993_v46, %v6989_v48  ;;  %v6998_v59 = vadd.f32 %v6997_v27, %v6993_v46  ;;  %v7082_v48 = vld [vmem:[%s14751_s10 + $0x1d8] sm:$0xff]  ;;  %v9485_v46 = vcombine.low %v7073_v34, %v7077_v15 }
 0xb44   :  { %v7086_v27 = vld [vmem:[%s14751_s10 + $0x1f8] sm:$0xff] }
 0xb45   :  { %6995 = vst [vmem:[#allocation2 + $0x2] sm:$0x3] %v6994_v60  ;;  %6999 = vst [vmem:[#allocation2 + $0xd2] sm:$0x3] %v6998_v59  ;;  %v9487_v60 = vcombine.low %v7074_v58, %v7078_v52  ;;  %v9494_v59 = vcombine.high %v7081_v61, %v7085_v6  ;;  %v9495_v21 = vcombine.low %v7082_v48, %v7086_v27 }
 0xb4c   :  { %v7001_v51 = vld [vmem:[#allocation2 + $0x2] sm:$0x1]  ;;  %v7003_v45 = vld [vmem:[#allocation2 + $0x3] sm:$0x1]  ;;  %v7005_v28 = vld [vmem:[#allocation2 + $0xd2] sm:$0x1] }
 0xb4d   :  { %7002 = vst [vmem:[#allocation3] sm:$0x1] %v7001_v51  ;;  %7004 = vst [vmem:[#allocation3 + $0x2] sm:$0x1] %v7003_v45  ;;  %v7007_v0 = vld [vmem:[#allocation2 + $0xd3] sm:$0x1]  ;;  %v9496_v51 = vcombine.high %v7082_v48, %v7086_v27 }
 0xb4e   :  { %7006 = vst [vmem:[#allocation3 + $0x1] sm:$0x1] %v7005_v28  ;;  %7008 = vst [vmem:[#allocation3 + $0x3] sm:$0x1] %v7007_v0  ;;  %v7089_v45 = vld [vmem:[%s14751_s10 + $0x210] sm:$0xff]  ;;  %v7090_v0 = vld [vmem:[%s14751_s10 + $0x218] sm:$0xff] }
 0xb4f   :  { %v7093_v28 = vld [vmem:[%s14751_s10 + $0x230] sm:$0xff] }
 0xb50   :  { %v9502_v44 = vcombine.high %v7089_v45, %v7093_v28 }
 0xb55   :  { %v9432_v53 = vld.sshfl [vmem:[#allocation3] sm:$0x33 pattern:$0x76325410] }
 0xb56   :  { %v7018_v26 = vcombine.high %v9432_v53, %v9432_v53  ;;  %v14174_v56 = vpack.c.bf16 %v9432_v53, %v9432_v53  ;;  %v7094_v53 = vld [vmem:[%s14751_s10 + $0x238] sm:$0xff] }
 0xb57   :  { %v9504_v55 = vcombine.high %v7090_v0, %v7094_v53 }
 0xb58   :  { %v7022_v57 = vpack.c.bf16 %v7018_v26, %v7018_v26  ;;  %v9493_v26 = vcombine.low %v7081_v61, %v7085_v6 }
 0xb5a   :  { %7865 = vmatprep.mubr.bf16.mxu0 %v7022_v57  ;;  %7906 = vmatprep.mubr.bf16.mxu1 %v7022_v57 }
 0xb5b   :  { %7866 = vmatmul.mubr.bf16.vlgmr.msra.gmra.mrb[248].mxu0 %v14174_v56  ;;  %7907 = vmatmul.mubr.bf16.vlgmr.msra.gmra.mrb[248].mxu1 %v14174_v56 }
 0xb5c   :  { %7916 = vmatpush1.bf16.msra.mxu0 %v9437_v19  ;;  %7957 = vmatpush1.bf16.msra.mxu1 %v9439_v23  ;;  %v9453_v19 = vcombine.low %v7041_v5, %v7045_v38  ;;  %v9462_v23 = vcombine.high %v7049_v18, %v7053_v20  ;;  %v7098_v5 = vld [vmem:[%s14751_s10 + $0x258] sm:$0xff]  ;;  %v9503_v38 = vcombine.low %v7090_v0, %v7094_v53 }
 0xb5d   :  { %7947 = vmatprep.mubr.bf16.mxu0 %v7022_v57  ;;  %7988 = vmatprep.mubr.bf16.mxu1 %v7022_v57  ;;  %v7101_v57 = vld [vmem:[%s14751_s10 + $0x270] sm:$0xff] }
 0xb5e   :  { %7917 = vmatprep.subr.bf16.mxu0 %v9446_v62  ;;  %7958 = vmatprep.subr.bf16.mxu1 %v9448_v10  ;;  %v7102_v62 = vld [vmem:[%s14751_s10 + $0x278] sm:$0xff]  ;;  %v9501_v10 = vcombine.low %v7089_v45, %v7093_v28  ;;  %v9510_v8 = vcombine.high %v7097_v31, %v7101_v57  ;;  %v9509_v18 = vcombine.low %v7097_v31, %v7101_v57 }
 0xb5f   :  { %v9512_v39 = vcombine.high %v7098_v5, %v7102_v62  ;;  %v9511_v20 = vcombine.low %v7098_v5, %v7102_v62  ;;  %v11292_v5 = vld [vmem:[%s14753_s12] sm:$0xff]  }
 0xb60   :  { %7918 = vmatpush1.bf16.msra.mxu0 %v9445_v25  ;;  %7959 = vmatpush1.bf16.msra.mxu1 %v9447_v50  ;;  %v7105_v25 = vld [vmem:[%s14751_s10 + $0x290] sm:$0xff]  ;;  %v11293_v62 = vld [vmem:[%s14753_s12 + $0x80] sm:$0xff]  }
 0xb61   :  { %7919 = vmatprep.subr.bf16.mxu0 %v9454_v30  ;;  %7960 = vmatprep.subr.bf16.mxu1 %v9456_v12  ;;  %v7109_v50 = vld [vmem:[%s14751_s10 + $0x2b0] sm:$0xff]  ;;  %v7106_v30 = vld [vmem:[%s14751_s10 + $0x298] sm:$0xff] }
 0xb62   :  { %v7110_v12 = vld [vmem:[%s14751_s10 + $0x2b8] sm:$0xff]  ;;  %v9518_v36 = vcombine.high %v7105_v25, %v7109_v50  ;;  %v9517_v4 = vcombine.low %v7105_v25, %v7109_v50  ;;  %v14369_v25 = vsub.s32 2, %v12524_v14 }
 0xb63   :  { %v9520_v63 = vcombine.high %v7106_v30, %v7110_v12  ;;  %v9519_v35 = vcombine.low %v7106_v30, %v7110_v12  ;;  %v11294_v12 = vld [vmem:[%s14753_s12 + $0x48] sm:$0xff]  }
 0xb64   :  { %7920 = vmatpush1.bf16.msra.mxu0 %v9453_v19  ;;  %7961 = vmatpush1.bf16.msra.mxu1 %v9455_v41  ;;  %v7113_v19 = vld [vmem:[%s14751_s10 + $0x2d0] sm:$0xff] }
 0xb65   :  { %7921 = vmatprep.subr.bf16.mxu0 %v9462_v23  ;;  %7962 = vmatprep.subr.bf16.mxu1 %v9464_v13  ;;  %v7117_v41 = vld [vmem:[%s14751_s10 + $0x2f0] sm:$0xff]  ;;  %v7114_v23 = vld [vmem:[%s14751_s10 + $0x2d8] sm:$0xff] }
 0xb66   :  { %v7118_v13 = vld [vmem:[%s14751_s10 + $0x2f8] sm:$0xff]  ;;  %v9526_v7 = vcombine.high %v7113_v19, %v7117_v41  ;;  %v9525_v2 = vcombine.low %v7113_v19, %v7117_v41  ;;  %v14388_v41 = vsub.s32 1, %v12524_v14 }
 0xb67   :  { %v9528_v37 = vcombine.high %v7114_v23, %v7118_v13  ;;  %v9527_v3 = vcombine.low %v7114_v23, %v7118_v13  ;;  %v14391_v23 = vsub.s32 3, %v12524_v14  ;;  %v11298_v13 = vld [vmem:[%s14753_s12 + $0x50] sm:$0xff]  }
 0xb68   :  { %7922 = vmatpush1.bf16.msra.mxu0 %v9461_v17  ;;  %7963 = vmatpush1.bf16.msra.mxu1 %v9463_v22  ;;  %v7121_v17 = vld [vmem:[%s14751_s10 + $0x310] sm:$0xff] }
 0xb69   :  { %7923 = vmatprep.subr.bf16.mxu0 %v9470_v11  ;;  %7964 = vmatprep.subr.bf16.mxu1 %v9472_v16  ;;  %v7125_v22 = vld [vmem:[%s14751_s10 + $0x330] sm:$0xff]  ;;  %v7122_v11 = vld [vmem:[%s14751_s10 + $0x318] sm:$0xff] }
 0xb6a   :  { %v7126_v16 = vld [vmem:[%s14751_s10 + $0x338] sm:$0xff]  ;;  %v9534_v1 = vcombine.high %v7121_v17, %v7125_v22  ;;  %v9533_v34 = vcombine.low %v7121_v17, %v7125_v22 }
 0xb6b   :  { %v9536_v54 = vcombine.high %v7122_v11, %v7126_v16  ;;  %v9535_v15 = vcombine.low %v7122_v11, %v7126_v16  ;;  %v11302_v16 = vld [vmem:[%s14753_s12 + $0x58] sm:$0xff]  }
 0xb6c   :  { %7924 = vmatpush1.bf16.msra.mxu0 %v9469_v42  ;;  %7965 = vmatpush1.bf16.msra.mxu1 %v9471_v43  ;;  %v7129_v42 = vld [vmem:[%s14751_s10 + $0x350] sm:$0xff] }
 0xb6d   :  { %7925 = vmatprep.subr.bf16.mxu0 %v9478_v24  ;;  %7966 = vmatprep.subr.bf16.mxu1 %v9480_v47  ;;  %v7133_v43 = vld [vmem:[%s14751_s10 + $0x370] sm:$0xff]  ;;  %v7130_v24 = vld [vmem:[%s14751_s10 + $0x358] sm:$0xff] }
 0xb6e   :  { %v7134_v47 = vld [vmem:[%s14751_s10 + $0x378] sm:$0xff]  ;;  %v9542_v58 = vcombine.high %v7129_v42, %v7133_v43  ;;  %v9541_v61 = vcombine.low %v7129_v42, %v7133_v43 }
 0xb6f   :  { %v9544_v52 = vcombine.high %v7130_v24, %v7134_v47  ;;  %v9543_v6 = vcombine.low %v7130_v24, %v7134_v47  ;;  %v11306_v47 = vld [vmem:[%s14753_s12 + $0x60] sm:$0xff]  }
 0xb70   :  { %7926 = vmatpush1.bf16.msra.mxu0 %v9477_v33  ;;  %7967 = vmatpush1.bf16.msra.mxu1 %v9479_v29  ;;  %v7137_v33 = vld [vmem:[%s14751_s10 + $0x390] sm:$0xff] }
 0xb71   :  { %7927 = vmatprep.subr.bf16.mxu0 %v9486_v40  ;;  %7968 = vmatprep.subr.bf16.mxu1 %v9488_v32  ;;  %v7141_v29 = vld [vmem:[%s14751_s10 + $0x3b0] sm:$0xff]  ;;  %v7138_v40 = vld [vmem:[%s14751_s10 + $0x398] sm:$0xff] }
 0xb72   :  { %v7142_v32 = vld [vmem:[%s14751_s10 + $0x3b8] sm:$0xff]  ;;  %v9550_v48 = vcombine.high %v7137_v33, %v7141_v29  ;;  %v9549_v45 = vcombine.low %v7137_v33, %v7141_v29  ;;  %v11311_v33 = vld [vmem:[%s14753_s12 + $0xe8] sm:$0xff]  }
 0xb73   :  { %v9552_v27 = vcombine.high %v7138_v40, %v7142_v32  ;;  %v9551_v28 = vcombine.low %v7138_v40, %v7142_v32 }
 0xb74   :  { %7928 = vmatpush1.bf16.msra.mxu0 %v9485_v46  ;;  %7969 = vmatpush1.bf16.msra.mxu1 %v9487_v60  ;;  %v7145_v46 = vld [vmem:[%s14751_s10 + $0x3d0] sm:$0xff] }
 0xb75   :  { %7929 = vmatprep.subr.bf16.mxu0 %v9494_v59  ;;  %7970 = vmatprep.subr.bf16.mxu1 %v9496_v51  ;;  %v7149_v60 = vld [vmem:[%s14751_s10 + $0x3f0] sm:$0xff]  ;;  %v7146_v59 = vld [vmem:[%s14751_s10 + $0x3d8] sm:$0xff] }
 0xb76   :  { %v7150_v51 = vld [vmem:[%s14751_s10 + $0x3f8] sm:$0xff]  ;;  %v9558_v0 = vcombine.high %v7145_v46, %v7149_v60 }
 0xb77   :  { %v9560_v53 = vcombine.high %v7146_v59, %v7150_v51 }
 0xb78   :  { %7930 = vmatpush1.bf16.msra.mxu0 %v9493_v26  ;;  %7971 = vmatpush1.bf16.msra.mxu1 %v9495_v21  ;;  %v9557_v26 = vcombine.low %v7145_v46, %v7149_v60  ;;  %v9559_v21 = vcombine.low %v7146_v59, %v7150_v51  ;;  %v11315_v46 = vld [vmem:[%s14753_s12 + $0xf0] sm:$0xff]  }
 0xb79   :  { %7931 = vmatprep.subr.bf16.mxu0 %v9502_v44  ;;  %7972 = vmatprep.subr.bf16.mxu1 %v9504_v55  ;;  %v11290_v44 = vld [vmem:[%s14753_s12 + $0x40] sm:$0xff]  }
 0xb7a   :  { %v11291_v55 = vld [vmem:[%s14753_s12 + $0xc0] sm:$0xff]  }
 0xb7c   :  { %7932 = vmatpush1.bf16.msra.mxu0 %v9501_v10  ;;  %7973 = vmatpush1.bf16.msra.mxu1 %v9503_v38 }
 0xb7d   :  { %7933 = vmatprep.subr.bf16.mxu0 %v9510_v8  ;;  %7974 = vmatprep.subr.bf16.mxu1 %v9512_v39  ;;  %v14366_v39 = vld [vmem:[#allocation7] ss:$4 sm:$0xff] }
 0xb7e   :  { %v7164_v19 = vrot.slane %v14366_v39, %v14369_v25  ;;  %v7160_v22 = vrot.slane %v14366_v39, %v14388_v41  ;;  %v7168_v11 = vrot.slane %v14366_v39, %v14391_v23 }
 0xb80   :  { %7934 = vmatpush1.bf16.msra.mxu0 %v9509_v18  ;;  %7975 = vmatpush1.bf16.msra.mxu1 %v9511_v20  ;;  %v11295_v18 = vld [vmem:[%s14753_s12 + $0xc8] sm:$0xff]  }
 0xb81   :  { %7935 = vmatprep.subr.bf16.mxu0 %v9518_v36  ;;  %7976 = vmatprep.subr.bf16.mxu1 %v9520_v63  ;;  %v11296_v20 = vld [vmem:[%s14753_s12 + $0x8] sm:$0xff]   ;;  %v7156_v63 = vrot.slane %v14366_v39, %v12527_v9 }
 0xb82   :  { %v11297_v36 = vld [vmem:[%s14753_s12 + $0x88] sm:$0xff]  }
 0xb84   :  { %7936 = vmatpush1.bf16.msra.mxu0 %v9517_v4  ;;  %7977 = vmatpush1.bf16.msra.mxu1 %v9519_v35  ;;  %v11299_v4 = vld [vmem:[%s14753_s12 + $0xd0] sm:$0xff]  }
 0xb85   :  { %7937 = vmatprep.subr.bf16.mxu0 %v9526_v7  ;;  %7978 = vmatprep.subr.bf16.mxu1 %v9528_v37  ;;  %v11300_v35 = vld [vmem:[%s14753_s12 + $0x10] sm:$0xff]  }
 0xb86   :  { %v11301_v7 = vld [vmem:[%s14753_s12 + $0x90] sm:$0xff]  }
 0xb88   :  { %7938 = vmatpush1.bf16.msra.mxu0 %v9525_v2  ;;  %7979 = vmatpush1.bf16.msra.mxu1 %v9527_v3  ;;  %v11303_v2 = vld [vmem:[%s14753_s12 + $0xd8] sm:$0xff]  }
 0xb89   :  { %7939 = vmatprep.subr.bf16.mxu0 %v9534_v1  ;;  %7980 = vmatprep.subr.bf16.mxu1 %v9536_v54  ;;  %v11304_v3 = vld [vmem:[%s14753_s12 + $0x18] sm:$0xff]  }
 0xb8a   :  { %v11305_v1 = vld [vmem:[%s14753_s12 + $0x98] sm:$0xff]  }
 0xb8c   :  { %7940 = vmatpush1.bf16.msra.mxu0 %v9533_v34  ;;  %7981 = vmatpush1.bf16.msra.mxu1 %v9535_v15  ;;  %v11307_v34 = vld [vmem:[%s14753_s12 + $0xe0] sm:$0xff]  }
 0xb8d   :  { %7941 = vmatprep.subr.bf16.mxu0 %v9542_v58  ;;  %7982 = vmatprep.subr.bf16.mxu1 %v9544_v52  ;;  %v11308_v15 = vld [vmem:[%s14753_s12 + $0x20] sm:$0xff]   ;;  %v11310_v52 = vld [vmem:[%s14753_s12 + $0x68] sm:$0xff]  }
 0xb8e   :  { %v11309_v58 = vld [vmem:[%s14753_s12 + $0xa0] sm:$0xff]  }
 0xb90   :  { %7942 = vmatpush1.bf16.msra.mxu0 %v9541_v61  ;;  %7983 = vmatpush1.bf16.msra.mxu1 %v9543_v6  ;;  %v11312_v6 = vld [vmem:[%s14753_s12 + $0x28] sm:$0xff]  }
 0xb91   :  { %7943 = vmatprep.subr.bf16.mxu0 %v9550_v48  ;;  %7984 = vmatprep.subr.bf16.mxu1 %v9552_v27  ;;  %v11313_v48 = vld [vmem:[%s14753_s12 + $0xa8] sm:$0xff]   ;;  %v11314_v27 = vld [vmem:[%s14753_s12 + $0x70] sm:$0xff]  }
 0xb94   :  { %7944 = vmatpush1.bf16.msra.mxu0 %v9549_v45  ;;  %7985 = vmatpush1.bf16.msra.mxu1 %v9551_v28  ;;  %v11316_v28 = vld [vmem:[%s14753_s12 + $0x30] sm:$0xff]  }
 0xb95   :  { %7945 = vmatprep.subr.bf16.mxu0 %v9558_v0  ;;  %7986 = vmatprep.subr.bf16.mxu1 %v9560_v53  ;;  %v11317_v0 = vld [vmem:[%s14753_s12 + $0xb0] sm:$0xff]   ;;  %v11318_v53 = vld [vmem:[%s14753_s12 + $0x78] sm:$0xff]  }
 0xb98   :  { %7946 = vmatpush1.bf16.msra.mxu0 %v9557_v26  ;;  %7987 = vmatpush1.bf16.msra.mxu1 %v9559_v21  ;;  %v11319_v26 = vld [vmem:[%s14753_s12 + $0xf8] sm:$0xff]  }
 0xb99   :  { %10016 = vmatprep.subr.bf16.mxu0 %v11290_v44  ;;  %10038 = vmatprep.subr.bf16.mxu1 %v11291_v55 }
 0xb9b   :  { %7948 = vmatmul.mubr.bf16.vlgmr.msra.gmra.mrb[252].mxu0 %v14174_v56  ;;  %7989 = vmatmul.mubr.bf16.vlgmr.msra.gmra.mrb[252].mxu1 %v14174_v56 }
 0xb9c   :  { %10017 = vmatpush3.bf16.msra.mxu0 %v11292_v5  ;;  %10039 = vmatpush3.bf16.msra.mxu1 %v11293_v62  ;;  %v11321_v5 = vld [vmem:[%s14753_s12 + $0xb8] sm:$0xff]   ;;  %v11322_v62 = vld [vmem:[%s14753_s12 + $0x140] sm:$0xff]  }
 0xb9d   :  { %10018 = vmatprep.subr.bf16.mxu0 %v11294_v12  ;;  %10040 = vmatprep.subr.bf16.mxu1 %v11295_v18 }
 0xba0   :  { %10019 = vmatpush3.bf16.msra.mxu0 %v11296_v20  ;;  %10041 = vmatpush3.bf16.msra.mxu1 %v11297_v36 }
 0xba1   :  { %10020 = vmatprep.subr.bf16.mxu0 %v11298_v13  ;;  %10042 = vmatprep.subr.bf16.mxu1 %v11299_v4 }
 0xba4   :  { %10021 = vmatpush3.bf16.msra.mxu0 %v11300_v35  ;;  %10043 = vmatpush3.bf16.msra.mxu1 %v11301_v7 }
 0xba5   :  { %10022 = vmatprep.subr.bf16.mxu0 %v11302_v16  ;;  %10044 = vmatprep.subr.bf16.mxu1 %v11303_v2 }
 0xba8   :  { %10023 = vmatpush3.bf16.msra.mxu0 %v11304_v3  ;;  %10045 = vmatpush3.bf16.msra.mxu1 %v11305_v1 }
 0xba9   :  { %10024 = vmatprep.subr.bf16.mxu0 %v11306_v47  ;;  %10046 = vmatprep.subr.bf16.mxu1 %v11307_v34  ;;  %v14504_v34 = vsub.s32 4, %v12524_v14 }
 0xbac   :  { %10025 = vmatpush3.bf16.msra.mxu0 %v11308_v15  ;;  %10047 = vmatpush3.bf16.msra.mxu1 %v11309_v58  ;;  %v14507_v15 = vsub.s32 6, %v12524_v14  ;;  %v14510_v58 = vsub.s32 5, %v12524_v14 }
 0xbad   :  { %10026 = vmatprep.subr.bf16.mxu0 %v11310_v52  ;;  %10048 = vmatprep.subr.bf16.mxu1 %v11311_v33  ;;  %v14513_v52 = vsub.s32 7, %v12524_v14 }
 0xbb0   :  { %10027 = vmatpush3.bf16.msra.mxu0 %v11312_v6  ;;  %10049 = vmatpush3.bf16.msra.mxu1 %v11313_v48  ;;  %v7172_v48 = vrot.slane %v14366_v39, %v14504_v34 }
 0xbb1   :  { %10028 = vmatprep.subr.bf16.mxu0 %v11314_v27  ;;  %10050 = vmatprep.subr.bf16.mxu1 %v11315_v46  ;;  %v7180_v27 = vrot.slane %v14366_v39, %v14507_v15  ;;  %v7176_v46 = vrot.slane %v14366_v39, %v14510_v58 }
 0xbb4   :  { %10029 = vmatpush3.bf16.msra.mxu0 %v11316_v28  ;;  %10051 = vmatpush3.bf16.msra.mxu1 %v11317_v0 }
 0xbb5   :  { %10030 = vmatprep.subr.bf16.mxu0 %v11318_v53  ;;  %10052 = vmatprep.subr.bf16.mxu1 %v11319_v26 }
 0xbb8   :  { %10053 = vmatpush3.bf16.msra.mxu1 %v11321_v5 }
 0xc2e   :  { %v7867_v31 = vpop.f32.mrb[248].mxu0  ;;  %v7908_v57 = vpop.f32.mrb[248].mxu1 }
 0xc2f   :  { %v7869_v10 = vpop.f32.mrb[249].mxu0  ;;  %v7910_v56 = vpop.f32.mrb[249].mxu1  ;;  %v7868_v37 = vadd.f32 %v7867_v31, %v7156_v63  ;;  %v7909_v17 = vadd.f32 %v7908_v57, %v7164_v19  ;;  %v11320_v57 = vld [vmem:[%s14753_s12 + $0x38] sm:$0xff]  }
 0xc30   :  { %v7871_v38 = vpop.f32.mrb[250].mxu0  ;;  %v7912_v8 = vpop.f32.mrb[250].mxu1  ;;  %v7870_v43 = vadd.f32 %v7869_v10, %v7160_v22  ;;  %v7911_v24 = vadd.f32 %v7910_v56, %v7168_v11  ;;  %v11323_v10 = vld [vmem:[%s14753_s12 + $0x1c0] sm:$0xff]   ;;  %10031 = vmatpush3.bf16.msra.mxu0 %v11320_v57 }
 0xc31   :  { %v7872_v50 = vpop.f32.mrb[251].mxu0  ;;  %v7913_v30 = vpop.f32.mrb[251].mxu1  ;;  %v7997_v54 = vmul.f32 0.1, %v7868_v37  ;;  %v7999_v42 = vmul.f32 0.1, %v7909_v17  ;;  %10060 = vmatprep.subr.bf16.mxu0 %v11322_v62  ;;  %10082 = vmatprep.subr.bf16.mxu1 %v11323_v10 }
 0xc32   :  { %v7998_v32 = vmul.f32 0.1, %v7870_v43  ;;  %v8000_v61 = vmul.f32 0.1, %v7911_v24 }
 0xc33   :  { %v14439_v29 = vmax.f32 %v7868_v37, %v7997_v54  ;;  %v14441_v40 = vmax.f32 %v7909_v17, %v7999_v42 }
 0xc34   :  { %v14459_v51 = vmax.f32 %v7870_v43, %v7998_v32  ;;  %v14461_v45 = vmax.f32 %v7911_v24, %v8000_v61 }
 0xc35   :  { %v8013_v60 = vsel %vm6727_vm13, %v14439_v29, 0.0  ;;  %v8027_v59 = vsel %vm6727_vm13, %v14441_v40, 0.0 }
 0xc36   :  { %v8014_v21 = vrot.slane %v8013_v60, 4  ;;  %v8028_v44 = vrot.slane %v8027_v59, 4  ;;  %v8020_v55 = vsel %vm6727_vm13, %v14459_v51, 0.0  ;;  %v8034_v31 = vsel %vm6727_vm13, %v14461_v45, 0.0 }
 0xc37   :  { %v8021_v8 = vrot.slane %v8020_v55, 4  ;;  %v8035_v50 = vrot.slane %v8034_v31, 4 }
 0xc38   :  { %v8015_v56 = vadd.f32 %v8014_v21, %v8013_v60  ;;  %v8029_v38 = vadd.f32 %v8028_v44, %v8027_v59  ;;  %v7184_v60 = vrot.slane %v14366_v39, %v14513_v52 }
 0xc39   :  { %v8022_v18 = vadd.f32 %v8021_v8, %v8020_v55  ;;  %v8036_v20 = vadd.f32 %v8035_v50, %v8034_v31 }
 0xc3a   :  { %v8016_v30 = vrot.slane %v8015_v56, 2  ;;  %v8030_v12 = vrot.slane %v8029_v38, 2 }
 0xc3b   :  { %v8023_v19 = vrot.slane %v8022_v18, 2  ;;  %v8037_v13 = vrot.slane %v8036_v20, 2 }
 0xc3c   :  { %v8017_v36 = vadd.f32 %v8016_v30, %v8015_v56  ;;  %v8031_v63 = vadd.f32 %v8030_v12, %v8029_v38 }
 0xc3d   :  { %v8024_v7 = vadd.f32 %v8023_v19, %v8022_v18  ;;  %v8038_v37 = vadd.f32 %v8037_v13, %v8036_v20 }
 0xc3e   :  { %v8018_v4 = vrot.slane %v8017_v36, 1  ;;  %v8032_v35 = vrot.slane %v8031_v63, 1 }
 0xc3f   :  { %v8025_v11 = vrot.slane %v8024_v7, 1  ;;  %v8039_v16 = vrot.slane %v8038_v37, 1 }
 0xc40   :  { %v8019_v17 = vadd.f32 %v8018_v4, %v8017_v36  ;;  %v8033_v22 = vadd.f32 %v8032_v35, %v8031_v63 }
 0xc41   :  { %v8026_v1 = vadd.f32 %v8025_v11, %v8024_v7  ;;  %v8040_v54 = vadd.f32 %v8039_v16, %v8038_v37 }
 0xc42   :  { %v14491_v2 = vmul.f32 0.5, %v8019_v17  ;;  %v14493_v3 = vmul.f32 0.5, %v8033_v22 }
 0xc43   :  { %v14499_v24 = vmul.f32 0.5, %v8026_v1  ;;  %v14501_v47 = vmul.f32 0.5, %v8040_v54 }
 0xc44   :  { %v8078_v42 = vsub.f32 %v14439_v29, %v14491_v2  ;;  %v8080_v43 = vsub.f32 %v14441_v40, %v14493_v3 }
 0xc45   :  { %v8079_v61 = vsub.f32 %v14459_v51, %v14499_v24  ;;  %v8081_v6 = vsub.f32 %v14461_v45, %v14501_v47 }
 0xc46   :  { %v8086_v33 = vmul.f32 %v8078_v42, %v8078_v42  ;;  %v8088_v32 = vmul.f32 %v8080_v43, %v8080_v43 }
 0xc47   :  { %v8087_v0 = vmul.f32 %v8079_v61, %v8079_v61  ;;  %v8089_v53 = vmul.f32 %v8081_v6, %v8081_v6 }
 0xc48   :  { %v8094_v59 = vsel %vm6727_vm13, %v8086_v33, 0.0  ;;  %v8108_v28 = vsel %vm6727_vm13, %v8088_v32, 0.0 }
 0xc49   :  { %v8095_v44 = vrot.slane %v8094_v59, 4  ;;  %v8109_v55 = vrot.slane %v8108_v28, 4  ;;  %v8101_v10 = vsel %vm6727_vm13, %v8087_v0, 0.0  ;;  %v8115_v56 = vsel %vm6727_vm13, %v8089_v53, 0.0 }
 0xc4a   :  { %v8102_v19 = vrot.slane %v8101_v10, 4  ;;  %v8116_v7 = vrot.slane %v8115_v56, 4 }
 0xc4b   :  { %v8096_v35 = vadd.f32 %v8095_v44, %v8094_v59  ;;  %v8110_v22 = vadd.f32 %v8109_v55, %v8108_v28 }
 0xc4c   :  { %v8103_v33 = vadd.f32 %v8102_v19, %v8101_v10 }
 0xc4d   :  { %v8097_v6 = vrot.slane %v8096_v35, 2  ;;  %v8111_v28 = vrot.slane %v8110_v22, 2 }
 0xc4f   :  { %v8098_v55 = vadd.f32 %v8097_v6, %v8096_v35 }
 0xc6e   :  { %v7949_v26 = vpop.f32.mrb[252].mxu0  ;;  %v7990_v21 = vpop.f32.mrb[252].mxu1 }
 0xc6f   :  { %v7950_v31 = vadd.f32 %v7949_v26, %v7172_v48  ;;  %v7991_v57 = vadd.f32 %v7990_v21, %v7180_v27  ;;  %v7951_v5 = vpop.f32.mrb[253].mxu0  ;;  %v7992_v62 = vpop.f32.mrb[253].mxu1  ;;  %v8117_v48 = vadd.f32 %v8116_v7, %v8115_v56  ;;  %v8104_v26 = vrot.slane %v8103_v33, 2 }
 0xc70   :  { %v7952_v38 = vadd.f32 %v7951_v5, %v7176_v46  ;;  %v7993_v39 = vadd.f32 %v7992_v62, %v7184_v60  ;;  %v7953_v8 = vpop.f32.mrb[254].mxu0  ;;  %v7994_v50 = vpop.f32.mrb[254].mxu1 }
 0xc71   :  { %v8001_v30 = vmul.f32 0.1, %v7950_v31  ;;  %v8003_v12 = vmul.f32 0.1, %v7991_v57  ;;  %v7954_v18 = vpop.f32.mrb[255].mxu0  ;;  %v7995_v20 = vpop.f32.mrb[255].mxu1  ;;  %v8105_v56 = vadd.f32 %v8104_v26, %v8103_v33 }
 0xc72   :  { %v8002_v36 = vmul.f32 0.1, %v7952_v38  ;;  %v8004_v63 = vmul.f32 0.1, %v7993_v39 }
 0xc73   :  { %v14531_v13 = vmax.f32 %v7950_v31, %v8001_v30  ;;  %v14533_v4 = vmax.f32 %v7991_v57, %v8003_v12  ;;  %v8118_v31 = vrot.slane %v8117_v48, 2  ;;  %v8099_v12 = vrot.slane %v8098_v55, 1 }
 0xc74   :  { %v14535_v37 = vmax.f32 %v7952_v38, %v8002_v36  ;;  %v14537_v17 = vmax.f32 %v7993_v39, %v8004_v63  ;;  %v8112_v38 = vadd.f32 %v8111_v28, %v8110_v22 }
 0xc75   :  { %v8041_v11 = vsel %vm6727_vm13, %v14531_v13, 0.0  ;;  %v8055_v16 = vsel %vm6727_vm13, %v14533_v4, 0.0  ;;  %v8119_v18 = vadd.f32 %v8118_v31, %v8117_v48 }
 0xc76   :  { %v8042_v1 = vrot.slane %v8041_v11, 4  ;;  %v8056_v54 = vrot.slane %v8055_v16, 4  ;;  %v8048_v42 = vsel %vm6727_vm13, %v14535_v37, 0.0  ;;  %v8062_v43 = vsel %vm6727_vm13, %v14537_v17, 0.0 }
 0xc77   :  { %v8049_v32 = vrot.slane %v8048_v42, 4  ;;  %v8063_v61 = vrot.slane %v8062_v43, 4  ;;  %v8113_v7 = vrot.slane %v8112_v38, 1 }
 0xc78   :  { %v8043_v27 = vadd.f32 %v8042_v1, %v8041_v11  ;;  %v8057_v46 = vadd.f32 %v8056_v54, %v8055_v16  ;;  %v8106_v16 = vrot.slane %v8105_v56, 1  ;;  %v8100_v54 = vadd.f32 %v8099_v12, %v8098_v55 }
 0xc79   :  { %v8050_v60 = vadd.f32 %v8049_v32, %v8048_v42  ;;  %v8064_v59 = vadd.f32 %v8063_v61, %v8062_v43  ;;  %v8120_v42 = vrot.slane %v8119_v18, 1  ;;  %v8114_v6 = vadd.f32 %v8113_v7, %v8112_v38 }
 0xc7a   :  { %v8044_v0 = vrot.slane %v8043_v27, 2  ;;  %v8058_v53 = vrot.slane %v8057_v46, 2  ;;  %v8150_v28 = vmul.f32 0.5, %v8100_v54 }
 0xc7b   :  { %v8051_v21 = vrot.slane %v8050_v60, 2  ;;  %v8065_v44 = vrot.slane %v8064_v59, 2 }
 0xc7c   :  { %v8045_v57 = vadd.f32 %v8044_v0, %v8043_v27  ;;  %v8059_v5 = vadd.f32 %v8058_v53, %v8057_v46  ;;  %v8107_v46 = vadd.f32 %v8106_v16, %v8105_v56  ;;  %v8121_v0 = vadd.f32 %v8120_v42, %v8119_v18 }
 0xc7d   :  { %v8052_v62 = vadd.f32 %v8051_v21, %v8050_v60  ;;  %v8066_v10 = vadd.f32 %v8065_v44, %v8064_v59 }
 0xc7e   :  { %v8046_v39 = vrot.slane %v8045_v57, 1  ;;  %v8060_v8 = vrot.slane %v8059_v5, 1 }
 0xc7f   :  { %v8053_v50 = vrot.slane %v8052_v62, 1  ;;  %v8067_v30 = vrot.slane %v8066_v10, 1 }
 0xc80   :  { %v8047_v20 = vadd.f32 %v8046_v39, %v8045_v57  ;;  %v8061_v36 = vadd.f32 %v8060_v8, %v8059_v5  ;;  %v8152_v57 = vmul.f32 0.5, %v8114_v6  ;;  %v8153_v8 = vmul.f32 0.5, %v8121_v0 }
 0xc81   :  { %v8054_v63 = vadd.f32 %v8053_v50, %v8052_v62  ;;  %v8068_v19 = vadd.f32 %v8067_v30, %v8066_v10  ;;  %v8151_v10 = vmul.f32 0.5, %v8107_v46  ;;  %v8160_v30 = vadd.f32 1e-05, %v8150_v28 }
 0xc82   :  { %v14547_v11 = vmul.f32 0.5, %v8047_v20  ;;  %v14549_v35 = vmul.f32 0.5, %v8061_v36  ;;  %v8162_v20 = vadd.f32 1e-05, %v8152_v57  ;;  %v8163_v54 = vadd.f32 1e-05, %v8153_v8 }
 0xc83   :  { %v14551_v1 = vmul.f32 0.5, %v8054_v63  ;;  %v14553_v22 = vmul.f32 0.5, %v8068_v19  ;;  %v8161_v19 = vadd.f32 1e-05, %v8151_v10  ;;  %11368 = vrsqrt.f32 %v8160_v30 }
 0xc84   :  { %v8082_v43 = vsub.f32 %v14531_v13, %v14547_v11  ;;  %v8084_v33 = vsub.f32 %v14533_v4, %v14549_v35  ;;  %11370 = vrsqrt.f32 %v8162_v20 }
 0xc85   :  { %v8083_v32 = vsub.f32 %v14535_v37, %v14551_v1  ;;  %v8085_v61 = vsub.f32 %v14537_v17, %v14553_v22  ;;  %11372 = vrsqrt.f32 %v8161_v19 }
 0xc86   :  { %v8090_v48 = vmul.f32 %v8082_v43, %v8082_v43  ;;  %v8092_v27 = vmul.f32 %v8084_v33, %v8084_v33  ;;  %11374 = vrsqrt.f32 %v8163_v54 }
 0xc87   :  { %v8091_v60 = vmul.f32 %v8083_v32, %v8083_v32  ;;  %v8093_v59 = vmul.f32 %v8085_v61, %v8085_v61 }
 0xc88   :  { %v8122_v53 = vsel %vm6727_vm13, %v8090_v48, 0.0  ;;  %v8136_v26 = vsel %vm6727_vm13, %v8092_v27, 0.0 }
 0xc89   :  { %v8123_v21 = vrot.slane %v8122_v53, 4  ;;  %v8137_v44 = vrot.slane %v8136_v26, 4  ;;  %v8129_v55 = vsel %vm6727_vm13, %v8091_v60, 0.0  ;;  %v8143_v31 = vsel %vm6727_vm13, %v8093_v59, 0.0 }
 0xc8a   :  { %v8130_v5 = vrot.slane %v8129_v55, 4  ;;  %v8144_v62 = vrot.slane %v8143_v31, 4 }
 0xc8b   :  { %v8124_v38 = vadd.f32 %v8123_v21, %v8122_v53  ;;  %v8138_v39 = vadd.f32 %v8137_v44, %v8136_v26 }
 0xc8c   :  { %v8131_v56 = vadd.f32 %v8130_v5, %v8129_v55  ;;  %v8145_v50 = vadd.f32 %v8144_v62, %v8143_v31  ;;  %v11493_v31 = vmov 1966171168  }
 0xc8d   :  { %v8125_v12 = vrot.slane %v8124_v38, 2  ;;  %v8139_v18 = vrot.slane %v8138_v39, 2  ;;  %v8189_v57 = vunpack.c.l.s4 %v11493_v31  ;;  %v11369_v5 = vpop.eup %11368 }
 0xc8e   :  { %v8132_v36 = vrot.slane %v8131_v56, 2  ;;  %v8146_v63 = vrot.slane %v8145_v50, 2  ;;  %v11371_v62 = vpop.eup %11370 }
 0xc8f   :  { %v8126_v7 = vadd.f32 %v8125_v12, %v8124_v38  ;;  %v8140_v16 = vadd.f32 %v8139_v18, %v8138_v39  ;;  %v11373_v10 = vpop.eup %11372  ;;  %v8190_v38 = vunpack.c.0.s8 %v8189_v57 }
 0xc90   :  { %v8133_v42 = vadd.f32 %v8132_v36, %v8131_v56  ;;  %v8147_v43 = vadd.f32 %v8146_v63, %v8145_v50  ;;  %v11375_v39 = vpop.eup %11374  ;;  %v8184_v8 = vcombine.low %v11369_v5, %v11373_v10 }
 0xc91   :  { %v8127_v33 = vrot.slane %v8126_v7, 1  ;;  %v8141_v32 = vrot.slane %v8140_v16, 1  ;;  %v8193_v56 = vsub.s32 %v8190_v38, %v12524_v14  ;;  %v8185_v50 = vcombine.low %v11371_v62, %v11375_v39 }
 0xc92   :  { %v8134_v61 = vrot.slane %v8133_v42, 1  ;;  %v8148_v6 = vrot.slane %v8147_v43, 1 }
 0xc93   :  { %v8128_v48 = vadd.f32 %v8127_v33, %v8126_v7  ;;  %v8142_v27 = vadd.f32 %v8141_v32, %v8140_v16  ;;  %v8194_v20 = vrot.slane %v8184_v8, %v8193_v56  ;;  %v8201_v36 = vrot.slane %v8185_v50, %v8193_v56 }
 0xc94   :  { %v8135_v46 = vadd.f32 %v8134_v61, %v8133_v42  ;;  %v8149_v60 = vadd.f32 %v8148_v6, %v8147_v43  ;;  %v8159_v61 = vld [vmem:[#allocation7 + $0x1] ss:$4 sm:$0xff] }
 0xc95   :  { %v8154_v59 = vmul.f32 0.5, %v8128_v48  ;;  %v8156_v28 = vmul.f32 0.5, %v8142_v27  ;;  %v8216_v54 = vcombine.low %v8194_v20, %v8201_v36  ;;  %v8236_v20 = vld [vmem:[#allocation7 + $0x2] ss:$4 sm:$0xff] }
 0xc96   :  { %v8155_v0 = vmul.f32 0.5, %v8135_v46  ;;  %v8157_v53 = vmul.f32 0.5, %v8149_v60 }
 0xc97   :  { %v8164_v26 = vadd.f32 1e-05, %v8154_v59  ;;  %v8166_v21 = vadd.f32 1e-05, %v8156_v28  ;;  %v8224_v33 = vrot.slane %v8216_v54, %v8193_v56 }
 0xc98   :  { %v8165_v44 = vadd.f32 1e-05, %v8155_v0  ;;  %v8167_v55 = vadd.f32 1e-05, %v8157_v53 }
 0xc99   :  { %11376 = vrsqrt.f32 %v8164_v26 }
 0xc9a   :  { %11378 = vrsqrt.f32 %v8166_v21 }
 0xc9b   :  { %11380 = vrsqrt.f32 %v8165_v44 }
 0xc9c   :  { %11382 = vrsqrt.f32 %v8167_v55 }
 0xca3   :  { %v11377_v30 = vpop.eup %11376 }
 0xca4   :  { %v11379_v12 = vpop.eup %11378 }
 0xca5   :  { %v11381_v18 = vpop.eup %11380 }
 0xca6   :  { %v11383_v63 = vpop.eup %11382  ;;  %v8186_v19 = vcombine.low %v11377_v30, %v11381_v18 }
 0xca7   :  { %v8187_v7 = vcombine.low %v11379_v12, %v11383_v63 }
 0xca8   :  { %v8208_v16 = vrot.slane %v8186_v19, %v8193_v56 }
 0xca9   :  { %v8215_v42 = vrot.slane %v8187_v7, %v8193_v56 }
 0xcab   :  { %v8217_v43 = vcombine.low %v8208_v16, %v8215_v42 }
 0xcad   :  { %v8231_v32 = vrot.slane %v8217_v43, %v8193_v56 }
 0xcaf   :  { %v8232_v6 = vcombine.low %v8224_v33, %v8231_v32 }
 0xcb1   :  { %v8234_v48 = vmul.f32 %v8232_v6, %v8159_v61 }
 0xcb3   :  { %v14569_v14 = vrot.slane %v8234_v48, %v14504_v34  ;;  %v8261_v27 = vrot.slane %v8234_v48, %v14510_v58  ;;  %v14573_v46 = vrot.slane %v8234_v48, %v14507_v15  ;;  %v8269_v60 = vrot.slane %v8234_v48, %v14513_v52 }
 0xcb4   :  { %v8241_v59 = vrot.slane %v8234_v48, %v12527_v9  ;;  %v8245_v28 = vrot.slane %v8234_v48, %v14388_v41  ;;  %v8249_v0 = vrot.slane %v8234_v48, %v14369_v25  ;;  %v8253_v53 = vrot.slane %v8234_v48, %v14391_v23 }
 0xcb5   :  { %v8282_v26 = vmul.f32 %v14569_v14, %v14547_v11  ;;  %v8283_v21 = vmul.f32 %v8261_v27, %v14551_v1  ;;  %v8284_v44 = vmul.f32 %v14573_v46, %v14549_v35  ;;  %v8285_v55 = vmul.f32 %v8269_v60, %v14553_v22 }
 0xcb6   :  { %v8278_v31 = vmul.f32 %v8241_v59, %v14491_v2  ;;  %v8279_v57 = vmul.f32 %v8245_v28, %v14499_v24  ;;  %v8280_v10 = vmul.f32 %v8249_v0, %v14493_v3  ;;  %v8281_v38 = vmul.f32 %v8253_v53, %v14501_v47 }
 0xcb7   :  { %v8296_v5 = vcombine.low %v8282_v26, %v8283_v21  ;;  %v8297_v62 = vcombine.low %v8284_v44, %v8285_v55  ;;  %v8345_v24 = vmul.f32 %v8241_v59, %v14439_v29  ;;  %v8346_v3 = vmul.f32 %v8245_v28, %v14459_v51  ;;  %v11330_v59 = vld [vmem:[%s14753_s12 + $0x150] sm:$0xff]   ;;  %v11334_v26 = vld [vmem:[%s14753_s12 + $0x158] sm:$0xff]  }
 0xcb8   :  { %v8294_v39 = vcombine.low %v8278_v31, %v8279_v57  ;;  %v8295_v50 = vcombine.low %v8280_v10, %v8281_v38  ;;  %v8347_v47 = vmul.f32 %v8249_v0, %v14441_v40  ;;  %v8348_v63 = vmul.f32 %v8253_v53, %v14461_v45  ;;  %v11331_v28 = vld [vmem:[%s14753_s12 + $0x1d0] sm:$0xff]   ;;  %v11335_v21 = vld [vmem:[%s14753_s12 + $0x1d8] sm:$0xff]   ;;  %v11338_v31 = vld [vmem:[%s14753_s12 + $0x160] sm:$0xff]  }
 0xcb9   :  { %v8318_v8 = vrot.slane %v8296_v5, %v8193_v56  ;;  %v8325_v11 = vrot.slane %v8297_v62, %v8193_v56  ;;  %v8350_v29 = vmul.f32 %v8261_v27, %v14535_v37  ;;  %v8352_v40 = vmul.f32 %v8269_v60, %v14537_v17  ;;  %v11324_v37 = vld [vmem:[%s14753_s12 + $0x100] sm:$0xff]   ;;  %v11327_v17 = vld [vmem:[%s14753_s12 + $0x1c8] sm:$0xff]   ;;  %v11332_v0 = vld [vmem:[%s14753_s12 + $0x110] sm:$0xff]  }
 0xcba   :  { %v8304_v1 = vrot.slane %v8294_v39, %v8193_v56  ;;  %v8311_v12 = vrot.slane %v8295_v50, %v8193_v56  ;;  %v11328_v27 = vld [vmem:[%s14753_s12 + $0x108] sm:$0xff]   ;;  %v11333_v53 = vld [vmem:[%s14753_s12 + $0x190] sm:$0xff]   ;;  %v11336_v44 = vld [vmem:[%s14753_s12 + $0x118] sm:$0xff]  }
 0xcbb   :  { %v8327_v30 = vcombine.low %v8318_v8, %v8325_v11  ;;  %v11329_v60 = vld [vmem:[%s14753_s12 + $0x188] sm:$0xff]   ;;  %v11337_v55 = vld [vmem:[%s14753_s12 + $0x198] sm:$0xff]   ;;  %v11339_v57 = vld [vmem:[%s14753_s12 + $0x1e0] sm:$0xff]  }
 0xcbc   :  { %v8326_v18 = vcombine.low %v8304_v1, %v8311_v12  ;;  %v11340_v5 = vld [vmem:[%s14753_s12 + $0x120] sm:$0xff]   ;;  %v11342_v10 = vld [vmem:[%s14753_s12 + $0x168] sm:$0xff]   ;;  %v11346_v11 = vld [vmem:[%s14753_s12 + $0x170] sm:$0xff]  }
 0xcbd   :  { %v8341_v35 = vrot.slane %v8327_v30, %v8193_v56  ;;  %v11341_v62 = vld [vmem:[%s14753_s12 + $0x1a0] sm:$0xff]   ;;  %v11343_v38 = vld [vmem:[%s14753_s12 + $0x1e8] sm:$0xff]   ;;  %v11347_v50 = vld [vmem:[%s14753_s12 + $0x1f0] sm:$0xff]  }
 0xcbe   :  { %v8334_v22 = vrot.slane %v8326_v18, %v8193_v56  ;;  %v11344_v39 = vld [vmem:[%s14753_s12 + $0x128] sm:$0xff]   ;;  %v11348_v1 = vld [vmem:[%s14753_s12 + $0x130] sm:$0xff]   ;;  %v11350_v12 = vld [vmem:[%s14753_s12 + $0x178] sm:$0xff]  }
 0xcbf   :  { %v11345_v8 = vld [vmem:[%s14753_s12 + $0x1a8] sm:$0xff]   ;;  %v11349_v30 = vld [vmem:[%s14753_s12 + $0x1b0] sm:$0xff]  }
 0xcc0   :  { %v8342_v2 = vcombine.low %v8334_v22, %v8341_v35  ;;  %v11351_v35 = vld [vmem:[%s14753_s12 + $0x1f8] sm:$0xff]  }
 0xcc2   :  { %v14590_v36 = vsub.f32 %v8236_v20, %v8342_v2  ;;  %v8349_v20 = vmul.f32 %v14569_v14, %v14531_v13  ;;  %v8351_v2 = vmul.f32 %v14573_v46, %v14533_v4 }
 0xcc4   :  { %v8357_v19 = vrot.slane %v14590_v36, %v12527_v9  ;;  %v8361_v7 = vrot.slane %v14590_v36, %v14388_v41  ;;  %v8365_v56 = vrot.slane %v14590_v36, %v14369_v25  ;;  %v8369_v16 = vrot.slane %v14590_v36, %v14391_v23 }
 0xcc5   :  { %v8377_v51 = vrot.slane %v14590_v36, %v14510_v58  ;;  %v8385_v45 = vrot.slane %v14590_v36, %v14513_v52  ;;  %v11325_v58 = vld [vmem:[%s14753_s12 + $0x180] sm:$0xff]   ;;  %v11326_v52 = vld [vmem:[%s14753_s12 + $0x148] sm:$0xff]   ;;  %v8373_v18 = vrot.slane %v14590_v36, %v14504_v34  ;;  %v8381_v22 = vrot.slane %v14590_v36, %v14507_v15  ;;  %v9561_v36 = vld [vmem:[#allocation7 + $0x3] ss:$0 sm:$0xff] }
 0xcc6   :  { %v8394_v9 = vadd.f32 %v8357_v19, %v8345_v24  ;;  %v8395_v54 = vadd.f32 %v8361_v7, %v8346_v3  ;;  %v8396_v42 = vadd.f32 %v8365_v56, %v8347_v47  ;;  %v8397_v41 = vadd.f32 %v8369_v16, %v8348_v63  ;;  %v11352_v24 = vld [vmem:[%s14753_s12 + $0x138] sm:$0xff]  }
 0xcc7   :  { %v8399_v43 = vadd.f32 %v8377_v51, %v8350_v29  ;;  %v8401_v33 = vadd.f32 %v8385_v45, %v8352_v40  ;;  %v11353_v3 = vld [vmem:[%s14753_s12 + $0x1b8] sm:$0xff]   ;;  %v8398_v34 = vadd.f32 %v8373_v18, %v8349_v20  ;;  %v8400_v15 = vadd.f32 %v8381_v22, %v8351_v2 }
 0xcc8   :  { %v8402_v25 = vpack.c.bf16 %v8394_v9, %v8394_v9  ;;  %v8403_v32 = vpack.c.bf16 %v8395_v54, %v8395_v54  ;;  %v8404_v61 = vpack.c.bf16 %v8396_v42, %v8396_v42  ;;  %v8405_v23 = vpack.c.bf16 %v8397_v41, %v8397_v41 }
 0xcc9   :  { %v8407_v6 = vpack.c.bf16 %v8399_v43, %v8399_v43  ;;  %v8409_v48 = vpack.c.bf16 %v8401_v33, %v8401_v33  ;;  %v8406_v13 = vpack.c.bf16 %v8398_v34, %v8398_v34  ;;  %v8408_v14 = vpack.c.bf16 %v8400_v15, %v8400_v15 }
 0xcca   :  { %8959 = vmatprep.mubr.bf16.mxu0 %v8403_v32  ;;  %8999 = vmatprep.mubr.bf16.mxu1 %v8405_v23 }
 0xccb   :  { %8960 = vmatmul.mubr.bf16.vlgmr.msra.gmra.mrb[0].mxu0 %v8402_v25  ;;  %9000 = vmatmul.mubr.bf16.vlgmr.msra.gmra.mrb[0].mxu1 %v8404_v61 }
 0xccc   :  { %10061 = vmatpush3.bf16.msra.mxu0 %v11324_v37  ;;  %10083 = vmatpush3.bf16.msra.mxu1 %v11325_v58 }
 0xccd   :  { %9039 = vmatprep.mubr.bf16.mxu0 %v8407_v6  ;;  %9079 = vmatprep.mubr.bf16.mxu1 %v8409_v48  ;;  %v11494_v6 = vmov 0  }
 0xcce   :  { %10062 = vmatprep.subr.bf16.mxu0 %v11326_v52  ;;  %10084 = vmatprep.subr.bf16.mxu1 %v11327_v17  ;;  %v9103_v17 = vld [vmem:[%s14742_s1] sm:$0x3]  ;;  %s11495_s1 = smov [#allocation9]  }
 0xccf   :  { %11178 = vset.pattern.permute.xlu1 %v11494_v6  ;;  %11179 = vset.pattern.permute.xlu0 %v11494_v6  ;;  %s9131_s17 = sshll.u32 %s11495_s1, 4  ;;  %s9132_s17 = int_to_ptr.vmem [resolvable:$true] %s9131_s17 }
 0xcd0   :  { %10063 = vmatpush3.bf16.msra.mxu0 %v11328_v27  ;;  %10085 = vmatpush3.bf16.msra.mxu1 %v11329_v60  ;;  %s11435_s3 = scalar_lea.vmem %s9132_s17, 32  ;;  %p11440_p3 = scmp.lt.s32.totalorder %s9132_s17, %s9132_s17 }
 0xcd1   :  { %10064 = vmatprep.subr.bf16.mxu0 %v11330_v59  ;;  %10086 = vmatprep.subr.bf16.mxu1 %v11331_v28  ;;  %p11436_p2 = scmp.ne.s32.totalorder %s9132_s17, %s11435_s3  ;;  %p11441_p4 = scmp.lt.s32.totalorder %s11435_s3, %s11435_s3 }
 0xcd2   :  { %9107 = vperm.xlu1 %11178, %v9103_v17  }
 0xcd3   :  { %p11442_p5 = por %p11441_p4, %p11440_p3 }
 0xcd4   :  { %10065 = vmatpush3.bf16.msra.mxu0 %v11332_v0  ;;  %10087 = vmatpush3.bf16.msra.mxu1 %v11333_v53  ;;  %v9105_v53 = vand.u32 127, %v2037_v49 }
 0xcd5   :  { %10066 = vmatprep.subr.bf16.mxu0 %v11334_v26  ;;  %10088 = vmatprep.subr.bf16.mxu1 %v11335_v21  ;;  %p11443_p6 = pnand %p11442_p5, %p11436_p2 }
 0xcd8   :  { %10067 = vmatpush3.bf16.msra.mxu0 %v11336_v44  ;;  %10089 = vmatpush3.bf16.msra.mxu1 %v11337_v55 }
 0xcd9   :  { %10068 = vmatprep.subr.bf16.mxu0 %v11338_v31  ;;  %10090 = vmatprep.subr.bf16.mxu1 %v11339_v57 }
 0xcdc   :  { %10069 = vmatpush3.bf16.msra.mxu0 %v11340_v5  ;;  %10091 = vmatpush3.bf16.msra.mxu1 %v11341_v62 }
 0xcdd   :  { %10070 = vmatprep.subr.bf16.mxu0 %v11342_v10  ;;  %10092 = vmatprep.subr.bf16.mxu1 %v11343_v38 }
 0xce0   :  { %10071 = vmatpush3.bf16.msra.mxu0 %v11344_v39  ;;  %10093 = vmatpush3.bf16.msra.mxu1 %v11345_v8 }
 0xce1   :  { %10072 = vmatprep.subr.bf16.mxu0 %v11346_v11  ;;  %10094 = vmatprep.subr.bf16.mxu1 %v11347_v50 }
 0xce4   :  { %10073 = vmatpush3.bf16.msra.mxu0 %v11348_v1  ;;  %10095 = vmatpush3.bf16.msra.mxu1 %v11349_v30 }
 0xce5   :  { %10074 = vmatprep.subr.bf16.mxu0 %v11350_v12  ;;  %10096 = vmatprep.subr.bf16.mxu1 %v11351_v35 }
 0xce8   :  { %10075 = vmatpush3.bf16.msra.mxu0 %v11352_v24  ;;  %10097 = vmatpush3.bf16.msra.mxu1 %v11353_v3 }
 0xceb   :  { %9040 = vmatmul.mubr.bf16.vlgmr.msra.gmra.mrb[4].mxu0 %v8406_v13  ;;  %9080 = vmatmul.mubr.bf16.vlgmr.msra.gmra.mrb[4].mxu1 %v8408_v14 }
 0xd51   :  { %v9108_v21 = vpop.permute.xlu1 %9107 }
 0xd52   :  { %vm9109_vm15 = vcmp.eq.s32.totalorder %v9105_v53, %v9108_v21 }
 0xd9e   :  { %v10032_v4 = vpop.f32.mrb[0].mxu0  ;;  %v10054_v46 = vpop.f32.mrb[0].mxu1 }
 0xd9f   :  { %v10033_v47 = vpop.f32.mrb[1].mxu0  ;;  %v10055_v63 = vpop.f32.mrb[1].mxu1 }
 0xda0   :  { %v10034_v19 = vadd.f32 %v10033_v47, %v10032_v4  ;;  %v10056_v7 = vadd.f32 %v10055_v63, %v10054_v46  ;;  %v10035_v56 = vpop.f32.mrb[2].mxu0  ;;  %v10057_v16 = vpop.f32.mrb[2].mxu1 }
 0xda1   :  { %v10036_v29 = vpop.f32.mrb[3].mxu0  ;;  %v10058_v51 = vpop.f32.mrb[3].mxu1 }
 0xda2   :  { %v8962_v40 = vadd.f32 %v10034_v19, %v9561_v36 }
 0xda4   :  { %v9002_v45 = vadd.f32 %v10056_v7, %v8962_v40 }
 0xdbe   :  { %v10076_v9 = vpop.f32.mrb[4].mxu0  ;;  %v10098_v54 = vpop.f32.mrb[4].mxu1 }
 0xdbf   :  { %v10077_v42 = vpop.f32.mrb[5].mxu0  ;;  %v10099_v41 = vpop.f32.mrb[5].mxu1 }
 0xdc0   :  { %v10078_v43 = vadd.f32 %v10077_v42, %v10076_v9  ;;  %v10100_v33 = vadd.f32 %v10099_v41, %v10098_v54  ;;  %v10079_v25 = vpop.f32.mrb[6].mxu0  ;;  %v10101_v32 = vpop.f32.mrb[6].mxu1 }
 0xdc1   :  { %v10080_v61 = vpop.f32.mrb[7].mxu0  ;;  %v10102_v23 = vpop.f32.mrb[7].mxu1 }
 0xdc2   :  { %v9042_v37 = vadd.f32 %v10078_v43, %v9002_v45 }
 0xdc4   :  { %v9082_v58 = vadd.f32 %v10100_v33, %v9042_v37 }
 0xdc6   :  { %v9088_v52 = vsel %vm9087_vm14, %v9082_v58, -inf }
 0xdc7   :  { %9089 = vmax.xlane.f32.xlu0 %v9088_v52 }
 0xe54   :  { %v9090_v48 = vpop.xlane.xlu0 %9089 }
 0xe55   :  { %v9091_v27 = vsub.f32 %v9082_v58, %v9090_v48 }
 0xe57   :  { %v9092_v60 = vmul.f32 1.442695, %v9091_v27 }
 0xe59   :  { %11384 = vpow2.f32 %v9092_v60 }
 0xe63   :  { %v11385_v59 = vpop.eup %11384 }
 0xe64   :  { %v9094_v28 = vsel %vm9087_vm14, %v11385_v59, 0.0 }
 0xe65   :  { %9095 = vadd.xlane.f32.xlu0 %v9094_v28 }
 0xef2   :  { %v9096_v0 = vpop.xlane.xlu0 %9095 }
 0xef3   :  { %11386 = vrcp.f32 %v9096_v0 }
 0xef4   :  { %11388 = vlog2.f32 %v9096_v0 }
 0xefd   :  { %v11387_v26 = vpop.eup %11386 }
 0xefe   :  { %v11389_v44 = vpop.eup %11388  ;;  %v9098_v55 = vmul.f32 %v11387_v26, %v11385_v59 }
 0xeff   :  { %v9101_v31 = vmul.f32 0.6931472, %v11389_v44 }
 0xf00   :  { %9099 = vst.msk [vmem:[#allocation9] sm:$0x3] %vm9087_vm14, %v9098_v55 }
 0xf01   :  { %v9102_v57 = vsub.f32 %v9091_v27, %v9101_v31 }
 0xf03   :  { %v9110_v5 = vsel %vm9109_vm15, %v9102_v57, 0.0 }
 0xf04   :  { %v9111_v62 = vsel %vm9087_vm14, %v9110_v5, 0.0 }
 0xf05   :  { %9112 = vadd.xlane.f32.xlu1 %v9111_v62 }
 0xf06   :  { %11446 = shalt.err (!%p11443_p6)
}
 0xf07   :  { %s11447_s20 = scalar_lea.hbm %s14754_s13, 32 }
 0xf08   :  { %p11448_p7 = scmp.ne.s32.totalorder %s14754_s13, %s11447_s20  ;;  %p11451_p8 = scmp.lt.u32.totalorder %s11447_s20, %s14754_s13 }
 0xf0a   :  { %p11453_p9 = pnand %p11451_p8, %p11448_p7 }
 0xf0c   :  { %11456 = shalt.err (!%p11453_p9)
}
 0xf0d   :  { %9134 = dma.vmem_to_hbm [thread:$0]  %s9132_s17, 32, %s14754_s13, [#allocation6]   ;;  %vm9123_vm0 = vcmask 0  }
 0xf0e   :  { %s11496_s8 = smov [#allocation10]  }
 0xf0f   :  { %s9141_s11 = sshll.u32 %s11496_s8, 4  ;;  %s9142_s11 = int_to_ptr.vmem [resolvable:$true] %s9141_s11 }
 0xf10   :  { %s11457_s22 = scalar_lea.vmem %s9142_s11, 16  ;;  %s11461_s23 = scalar_lea.vmem %s9142_s11, 32 }
 0xf11   :  { %p11458_p10 = scmp.ne.s32.totalorder %s9142_s11, %s11457_s22  ;;  %p11462_p11 = scmp.lt.s32.totalorder %s9142_s11, %s9142_s11 }
 0xf12   :  { %p11463_p12 = scmp.lt.s32.totalorder %s11461_s23, %s11457_s22 }
 0xf14   :  { %p11464_p13 = por %p11463_p12, %p11462_p11 }
 0xf16   :  { %p11465_p0 = pnand %p11464_p13, %p11458_p10 }
 0xf92   :  { %v9113_v49 = vpop.xlane.xlu1 %9112 }
 0xf93   :  { %v9114_v10 = vsel %vm6727_vm13, %v9113_v49, 0.0 }
 0xf94   :  { %v9115_v38 = vrot.slane %v9114_v10, 4 }
 0xf96   :  { %v9116_v39 = vadd.f32 %v9115_v38, %v9114_v10 }
 0xf98   :  { %v9117_v8 = vrot.slane %v9116_v39, 2 }
 0xf9a   :  { %v9118_v11 = vadd.f32 %v9117_v8, %v9116_v39 }
 0xf9c   :  { %v9119_v50 = vrot.slane %v9118_v11, 1 }
 0xf9e   :  { %v9120_v1 = vadd.f32 %v9119_v50, %v9118_v11 }
 0xfa0   :  { %v9121_v30 = vsub.f32 0.0, %v9120_v1 }
 0xfa2   :  { %v9122_v12 = vmul.f32 0.5, %v9121_v30 }
 0xfa4   :  { %9124 = vst.msk [vmem:[#allocation10] sm:$0x1] %vm9123_vm0, %v9122_v12 }
 0xfa5   :  { %11468 = shalt.err (!%p11465_p0)
}
 0xfa6   :  { %s11469_s6 = scalar_lea.hbm %s14755_s14, 16 }
 0xfa7   :  { %p11470_p1 = scmp.ne.s32.totalorder %s14755_s14, %s11469_s6  ;;  %p11473_p2 = scmp.lt.u32.totalorder %s11469_s6, %s14755_s14 }
 0xfa9   :  { %p11475_p3 = pnand %p11473_p2, %p11470_p1 }
 0xfab   :  { %11478 = shalt.err (!%p11475_p3)
}
 0xfac   :  { %9144 = dma.vmem_to_hbm [thread:$0]  %s9142_s11, 16, %s14755_s14, [#allocation11]  }
 0xfad   :  { %11483 = dma.done.wait [#allocation6], 32  }
 0xfae   :  { %11484 = vsyncadd [#allocation6], 4294967264 }
 0xfaf   :  { %11485 = dma.done.wait [#allocation11], 16  }
 0xfb0   :  { %11486 = vsyncadd [#allocation11], 4294967280 }
 0xfb1   :  { %9151 = vsyncpa [#allocation5], 1 }
 0xfb2   :  { %9152 = vsyncpa [#allocation8], 1 }
 0xfb3   :  { %9153 = vsyncpa [#allocation6], 1 }
 0xfb4   :  { %9154 = vsyncpa [#allocation11], 1 }

</bundles_post_ra>
